<compile_context>
chip_gen: v5e
topology: v5e:2x2
jax: 0.10.0
libtpu: 0.0.40
codegen_flags: <defaults>
</compile_context>

<pallas_src>
import numpy as np
import jax
import jax.numpy as jnp
from jax import lax
from jax.experimental import pallas as pl
from jax.experimental.pallas import tpu as pltpu

K = 9               # Conv1d kernel size (padding=4 -> 'same')
PAD = K // 2
NEG_SLOPE = 0.01    # nn.LeakyReLU() default negative_slope
_POOL_BLK = 256     # lane-block width for the fused MaxPool1d(2) selection GEMM


# ---------------------------------------------------------------------------
# In-kernel helpers (operate on VMEM-resident values)
# ---------------------------------------------------------------------------

def _pool_selection_matrix(width):
    """(width, width) f32 0/1 matrix: cols [0, w/2) pick even lanes, cols [w/2, w) pick
    odd lanes, so  y @ S == [y_even | y_odd]  exactly."""
    half = width // 2
    r = lax.broadcasted_iota(jnp.int32, (width, width), 0)
    c = lax.broadcasted_iota(jnp.int32, (width, width), 1)
    even_hit = jnp.where(r == 2 * c, 1.0, 0.0)             # active for cols <  half
    odd_hit = jnp.where(r == 2 * (c - half) + 1, 1.0, 0.0)  # active for cols >= half
    return (even_hit + odd_hit).astype(jnp.float32)


def _conv1d_lrelu(h, w2_ref, b_ref):
    """'same' Conv1d(k=9) + bias + LeakyReLU on one batch element.

    h:      (Cin, L) f32 value (L in lanes)
    w2_ref: (O, K*Cin) k-major weight ref  (w2[o, k*Cin + c] == w_torch[o, c, k])
    b_ref:  (O, 1)
    returns (O, L) f32.
    """
    cin, seq = h.shape
    zpad = jnp.zeros((cin, PAD), jnp.float32)
    xp = jnp.concatenate([zpad, h, zpad], axis=1)                           # (Cin, L+8)
    slab = jnp.concatenate([xp[:, k:k + seq] for k in range(K)], axis=0)    # (K*Cin, L)
    y = jnp.dot(w2_ref[...], slab, preferred_element_type=jnp.float32)      # (O, L)
    y = y + b_ref[...]                                                      # lane broadcast
    return jnp.where(y >= 0.0, y, NEG_SLOPE * y)                            # LeakyReLU


def _maxpool2(y, sel_cache):
    """MaxPool1d(kernel=2, stride=2) along lanes via an even/odd selection GEMM."""
    _, seq = y.shape
    w = _POOL_BLK if seq % _POOL_BLK == 0 else seq
    if w not in sel_cache:
        sel_cache[w] = _pool_selection_matrix(w)
    sel = sel_cache[w]
    half = w // 2
    pieces = []
    for blk in range(seq // w):
        z = jnp.dot(y[:, blk * w:(blk + 1) * w], sel,
                    preferred_element_type=jnp.float32)                     # [even | odd]
        pieces.append(jnp.maximum(z[:, :half], z[:, half:]))
    return pieces[0] if len(pieces) == 1 else jnp.concatenate(pieces, axis=1)


def _make_encoder_kernel(n_convs):
    """Kernel args: x_ref, w0, b0, ..., w_{n-1}, b_{n-1}, ml_w, ml_b, out_ref."""

    def kernel(x_ref, *refs):
        out_ref = refs[-1]
        ml_w_ref, ml_b_ref = refs[-3], refs[-2]
        conv_refs = refs[:-3]

        sel_cache = {}
        h = x_ref[0]                                    # (1, L) -- Cin=1 input slab
        for i in range(n_convs):
            h = _conv1d_lrelu(h, conv_refs[2 * i], conv_refs[2 * i + 1])
            if i >= 1:                                  # pool after every conv except the first
                h = _maxpool2(h, sel_cache)

        # Flatten + fused [mu | logvar] head:  out[n] = sum_{c,l} h[c,l] * W[c*L_last + l, n]
        out_c, l_last = h.shape
        n_out = ml_b_ref.shape[1]
        acc = jnp.zeros((1, n_out), jnp.float32)
        for c in range(out_c):
            acc = acc + jnp.dot(h[c:c + 1, :],
                                ml_w_ref[c * l_last:(c + 1) * l_last, :],
                                preferred_element_type=jnp.float32)
        out_ref[0] = acc + ml_b_ref[...]

    return kernel


# ---------------------------------------------------------------------------
# Wrapper: one fused pallas_call for the whole encoder
# ---------------------------------------------------------------------------

def encoder_forward(x, params):
    """x: (B, 1, L) f32 (PyTorch NCL).  Returns (mu, logvar), each (B, dim_latent)."""
    conv_w2, conv_b = params["conv_w2"], params["conv_b"]
    ml_w, ml_b = params["ml_w"], params["ml_b"]
    B, cin0, seq_len = x.shape
    assert cin0 == 1
    n_convs = len(conv_w2)
    n_out = ml_w.shape[1]

    weight_args, weight_specs = [], []
    for w2, b in zip(conv_w2, conv_b):
        weight_args += [w2, b.reshape(-1, 1)]
        weight_specs += [pl.BlockSpec(w2.shape, lambda bi: (0, 0)),
                         pl.BlockSpec((b.shape[0], 1), lambda bi: (0, 0))]
    weight_args += [ml_w, ml_b.reshape(1, n_out)]
    weight_specs += [pl.BlockSpec(ml_w.shape, lambda bi: (0, 0)),
                     pl.BlockSpec((1, n_out), lambda bi: (0, 0))]

    out = pl.pallas_call(
        _make_encoder_kernel(n_convs),
        out_shape=jax.ShapeDtypeStruct((B, 1, n_out), jnp.float32),
        grid=(B,),
        in_specs=[pl.BlockSpec((1, 1, seq_len), lambda bi: (bi, 0, 0))] + weight_specs,
        out_specs=pl.BlockSpec((1, 1, n_out), lambda bi: (bi, 0, 0)),
        compiler_params=pltpu.CompilerParams(
            dimension_semantics=("parallel",)),          # batch across 2 TCs on v7x
    )(x, *weight_args)

    out = out[:, 0, :]
    dl = n_out // 2
    return out[:, :dl], out[:, dl:]                      # (mu, logvar)


# ---------------------------------------------------------------------------
# Parameter init (mirrors weights_init: kaiming_normal_, zero bias)
# ---------------------------------------------------------------------------

def init_encoder(key, channels=16, dim_latent=128, n_steps=4, seq_len=3072):
    """NOTE: if real PyTorch weights are loaded, Conv1d (O, Cin, K) must be permuted to the
    k-major (O, K*Cin) layout and nn.Linear (out, in) transposed to (in, out) before the
    [mu | logvar] concatenation."""
    n_convs = 2 + n_steps
    keys = jax.random.split(key, n_convs + 2)

    def kaiming_conv(k, out_c, in_c):
        fan_in = in_c * K
        w = jax.random.normal(k, (out_c, in_c, K), jnp.float32) * np.sqrt(2.0 / fan_in)
        return jnp.transpose(w, (0, 2, 1)).reshape(out_c, K * in_c)   # k-major flatten

    conv_w2, conv_b = [], []
    in_c = 1
    for i in range(n_convs):
        conv_w2.append(kaiming_conv(keys[i], channels, in_c))
        conv_b.append(jnp.zeros((channels,), jnp.float32))
        in_c = channels

    feat = channels * seq_len // 2 ** (n_steps + 1)

    def kaiming_lin(k, in_f, out_f):
        return jax.random.normal(k, (in_f, out_f), jnp.float32) * np.sqrt(2.0 / in_f)

    mu_w = kaiming_lin(keys[-2], feat, dim_latent)
    lv_w = kaiming_lin(keys[-1], feat, dim_latent)
    ml_w = jnp.concatenate([mu_w, lv_w], axis=1)          # fused [mu | logvar] head
    ml_b = jnp.zeros((2 * dim_latent,), jnp.float32)
    return dict(conv_w2=conv_w2, conv_b=conv_b, ml_w=ml_w, ml_b=ml_b)


# ---------------------------------------------------------------------------
# Pure-JAX reference (matches EncoderCNN.forward) for a correctness check
# ---------------------------------------------------------------------------

def reference_forward(x, params):
    h = x
    n_convs = len(params["conv_w2"])
    for i in range(n_convs):
        w2, b = params["conv_w2"][i], params["conv_b"][i]
        bsz, cin, seq = h.shape
        hp = jnp.pad(h, ((0, 0), (0, 0), (PAD, PAD)))
        y = jnp.zeros((bsz, w2.shape[0], seq), jnp.float32)
        for k in range(K):
            y = y + jnp.einsum("oc,bcl->bol", w2[:, k * cin:(k + 1) * cin],
                               hp[:, :, k:k + seq],
                               precision=jax.lax.Precision.HIGHEST)
        y = y + b[None, :, None]
        y = jnp.where(y >= 0.0, y, NEG_SLOPE * y)
        if i >= 1:
            y = jnp.max(y.reshape(bsz, y.shape[1], y.shape[2] // 2, 2), axis=-1)
        h = y
    flat = h.reshape(h.shape[0], -1)
    out = jnp.dot(flat, params["ml_w"], precision=jax.lax.Precision.HIGHEST) + params["ml_b"]
    dl = params["ml_w"].shape[1] // 2
    return out[:, :dl], out[:, dl:]


# ---------------------------------------------------------------------------

if __name__ == "__main__":
    # Small config (channels=4, latent=32, n_steps=2); seq_len=3072 is fixed by the module's
    # hardcoded Linear in_features = channels * 3072 // 2**(n_steps+1).
    B, channels, dim_latent, n_steps = 2, 4, 32, 2
    seq_len = 3072

    key = jax.random.PRNGKey(0)
    k_param, k_x = jax.random.split(key)
    params = init_encoder(k_param, channels, dim_latent, n_steps, seq_len)
    x = jax.random.normal(k_x, (B, 1, seq_len), jnp.float32)     # PyTorch NCL layout

    mu, logvar = jax.jit(encoder_forward)(x, params)
    jax.block_until_ready((mu, logvar))

    assert mu.shape == (B, dim_latent) and logvar.shape == (B, dim_latent)
    assert bool(jnp.all(jnp.isfinite(mu))) and bool(jnp.all(jnp.isfinite(logvar)))

    # Correctness vs. pure-JAX/XLA reference (loose tol: MXU may run f32 dots as bf16 passes).
    mu_ref, lv_ref = jax.jit(reference_forward)(x, params)
    assert bool(jnp.allclose(mu, mu_ref, rtol=1e-1, atol=1e-1)), \
        float(jnp.max(jnp.abs(mu - mu_ref)))
    assert bool(jnp.allclose(logvar, lv_ref, rtol=1e-1, atol=1e-1)), \
        float(jnp.max(jnp.abs(logvar - lv_ref)))

    print("KERNEL_OK")
</pallas_src>

<mosaic_0001>
module attributes {stable_mosaic.version = 11 : i64} {
  func.func @kernel(%arg0: i32, %arg1: memref<1x1x3072xf32, #tpu.memory_space<vmem>>, %arg2: memref<4x9xf32, #tpu.memory_space<vmem>>, %arg3: memref<4x1xf32, #tpu.memory_space<vmem>>, %arg4: memref<4x36xf32, #tpu.memory_space<vmem>>, %arg5: memref<4x1xf32, #tpu.memory_space<vmem>>, %arg6: memref<4x36xf32, #tpu.memory_space<vmem>>, %arg7: memref<4x1xf32, #tpu.memory_space<vmem>>, %arg8: memref<4x36xf32, #tpu.memory_space<vmem>>, %arg9: memref<4x1xf32, #tpu.memory_space<vmem>>, %arg10: memref<1536x64xf32, #tpu.memory_space<vmem>>, %arg11: memref<1x64xf32, #tpu.memory_space<vmem>>, %arg12: memref<1x1x64xf32, #tpu.memory_space<vmem>>) attributes {dimension_semantics = [#tpu.dimension_semantics<parallel>], iteration_bounds = array<i64: 2>, scalar_prefetch = 0 : i64, scratch_operands = 0 : i64, tpu.core_type = #tpu.core_type<tc>, window_params = [{transform_indices = @transform_0, window_bounds = array<i64: 1, 1, 3072>}, {pipeline_mode = #tpu.pipeline_mode<synchronous>, transform_indices = @transform_1, window_bounds = array<i64: 4, 9>}, {pipeline_mode = #tpu.pipeline_mode<synchronous>, transform_indices = @transform_2, window_bounds = array<i64: 4, 1>}, {pipeline_mode = #tpu.pipeline_mode<synchronous>, transform_indices = @transform_3, window_bounds = array<i64: 4, 36>}, {pipeline_mode = #tpu.pipeline_mode<synchronous>, transform_indices = @transform_4, window_bounds = array<i64: 4, 1>}, {pipeline_mode = #tpu.pipeline_mode<synchronous>, transform_indices = @transform_5, window_bounds = array<i64: 4, 36>}, {pipeline_mode = #tpu.pipeline_mode<synchronous>, transform_indices = @transform_6, window_bounds = array<i64: 4, 1>}, {pipeline_mode = #tpu.pipeline_mode<synchronous>, transform_indices = @transform_7, window_bounds = array<i64: 4, 36>}, {pipeline_mode = #tpu.pipeline_mode<synchronous>, transform_indices = @transform_8, window_bounds = array<i64: 4, 1>}, {pipeline_mode = #tpu.pipeline_mode<synchronous>, transform_indices = @transform_9, window_bounds = array<i64: 1536, 64>}, {pipeline_mode = #tpu.pipeline_mode<synchronous>, transform_indices = @transform_10, window_bounds = array<i64: 1, 64>}, {transform_indices = @transform_11, window_bounds = array<i64: 1, 1, 64>}]} {
    %c0 = arith.constant 0 : index
    %c0_0 = arith.constant 0 : index
    %c0_1 = arith.constant 0 : index
    %0 = vector.load %arg1[%c0, %c0_0, %c0_1] : memref<1x1x3072xf32, #tpu.memory_space<vmem>>, vector<1x1x3072xf32>
    %1 = vector.shape_cast %0 : vector<1x1x3072xf32> to vector<1x3072xf32>
    %cst = arith.constant 0.000000e+00 : f32
    %2 = vector.broadcast %cst : f32 to vector<1x4xf32>
    %3 = tpu.concatenate %2, %1, %2 in 1 : vector<1x4xf32>, vector<1x3072xf32>, vector<1x4xf32> -> vector<1x3080xf32>
    %4 = vector.extract_strided_slice %3 {offsets = [0, 0], sizes = [1, 3072], strides = [1, 1]} : vector<1x3080xf32> to vector<1x3072xf32>
    %5 = vector.extract_strided_slice %3 {offsets = [0, 1], sizes = [1, 3072], strides = [1, 1]} : vector<1x3080xf32> to vector<1x3072xf32>
    %6 = vector.extract_strided_slice %3 {offsets = [0, 2], sizes = [1, 3072], strides = [1, 1]} : vector<1x3080xf32> to vector<1x3072xf32>
    %7 = vector.extract_strided_slice %3 {offsets = [0, 3], sizes = [1, 3072], strides = [1, 1]} : vector<1x3080xf32> to vector<1x3072xf32>
    %8 = vector.extract_strided_slice %3 {offsets = [0, 4], sizes = [1, 3072], strides = [1, 1]} : vector<1x3080xf32> to vector<1x3072xf32>
    %9 = vector.extract_strided_slice %3 {offsets = [0, 5], sizes = [1, 3072], strides = [1, 1]} : vector<1x3080xf32> to vector<1x3072xf32>
    %10 = vector.extract_strided_slice %3 {offsets = [0, 6], sizes = [1, 3072], strides = [1, 1]} : vector<1x3080xf32> to vector<1x3072xf32>
    %11 = vector.extract_strided_slice %3 {offsets = [0, 7], sizes = [1, 3072], strides = [1, 1]} : vector<1x3080xf32> to vector<1x3072xf32>
    %12 = vector.extract_strided_slice %3 {offsets = [0, 8], sizes = [1, 3072], strides = [1, 1]} : vector<1x3080xf32> to vector<1x3072xf32>
    %13 = tpu.concatenate %4, %5, %6, %7, %8, %9, %10, %11, %12 in 0 : vector<1x3072xf32>, vector<1x3072xf32>, vector<1x3072xf32>, vector<1x3072xf32>, vector<1x3072xf32>, vector<1x3072xf32>, vector<1x3072xf32>, vector<1x3072xf32>, vector<1x3072xf32> -> vector<9x3072xf32>
    %c0_2 = arith.constant 0 : index
    %c0_3 = arith.constant 0 : index
    %14 = vector.load %arg2[%c0_2, %c0_3] : memref<4x9xf32, #tpu.memory_space<vmem>>, vector<4x9xf32>
    %cst_4 = arith.constant dense<0.000000e+00> : vector<4x3072xf32>
    %15 = tpu.matmul %14, %13, %cst_4 {dimension_numbers = #tpu.dot_dimension_numbers<[1], [0], [0], [1], [0, 0, 1, 1], [], []>} : vector<4x9xf32>, vector<9x3072xf32>, vector<4x3072xf32> -> vector<4x3072xf32>
    %c0_5 = arith.constant 0 : index
    %c0_6 = arith.constant 0 : index
    %16 = vector.load %arg3[%c0_5, %c0_6] : memref<4x1xf32, #tpu.memory_space<vmem>>, vector<4x1xf32>
    %17 = vector.broadcast %16 : vector<4x1xf32> to vector<4x3072xf32>
    %18 = arith.addf %15, %17 : vector<4x3072xf32>
    %cst_7 = arith.constant 0.000000e+00 : f32
    %19 = vector.broadcast %cst_7 : f32 to vector<4x3072xf32>
    %20 = arith.cmpf oge, %18, %19 : vector<4x3072xf32>
    %cst_8 = arith.constant 0.00999999977 : f32
    %21 = vector.broadcast %cst_8 : f32 to vector<4x3072xf32>
    %22 = arith.mulf %21, %18 : vector<4x3072xf32>
    %23 = arith.select %20, %18, %22 : vector<4x3072xi1>, vector<4x3072xf32>
    %cst_9 = arith.constant 0.000000e+00 : f32
    %24 = vector.broadcast %cst_9 : f32 to vector<4x4xf32>
    %25 = tpu.concatenate %24, %23, %24 in 1 : vector<4x4xf32>, vector<4x3072xf32>, vector<4x4xf32> -> vector<4x3080xf32>
    %26 = vector.extract_strided_slice %25 {offsets = [0, 0], sizes = [4, 3072], strides = [1, 1]} : vector<4x3080xf32> to vector<4x3072xf32>
    %27 = vector.extract_strided_slice %25 {offsets = [0, 1], sizes = [4, 3072], strides = [1, 1]} : vector<4x3080xf32> to vector<4x3072xf32>
    %28 = vector.extract_strided_slice %25 {offsets = [0, 2], sizes = [4, 3072], strides = [1, 1]} : vector<4x3080xf32> to vector<4x3072xf32>
    %29 = vector.extract_strided_slice %25 {offsets = [0, 3], sizes = [4, 3072], strides = [1, 1]} : vector<4x3080xf32> to vector<4x3072xf32>
    %30 = vector.extract_strided_slice %25 {offsets = [0, 4], sizes = [4, 3072], strides = [1, 1]} : vector<4x3080xf32> to vector<4x3072xf32>
    %31 = vector.extract_strided_slice %25 {offsets = [0, 5], sizes = [4, 3072], strides = [1, 1]} : vector<4x3080xf32> to vector<4x3072xf32>
    %32 = vector.extract_strided_slice %25 {offsets = [0, 6], sizes = [4, 3072], strides = [1, 1]} : vector<4x3080xf32> to vector<4x3072xf32>
    %33 = vector.extract_strided_slice %25 {offsets = [0, 7], sizes = [4, 3072], strides = [1, 1]} : vector<4x3080xf32> to vector<4x3072xf32>
    %34 = vector.extract_strided_slice %25 {offsets = [0, 8], sizes = [4, 3072], strides = [1, 1]} : vector<4x3080xf32> to vector<4x3072xf32>
    %35 = tpu.concatenate %26, %27, %28, %29, %30, %31, %32, %33, %34 in 0 : vector<4x3072xf32>, vector<4x3072xf32>, vector<4x3072xf32>, vector<4x3072xf32>, vector<4x3072xf32>, vector<4x3072xf32>, vector<4x3072xf32>, vector<4x3072xf32>, vector<4x3072xf32> -> vector<36x3072xf32>
    %c0_10 = arith.constant 0 : index
    %c0_11 = arith.constant 0 : index
    %36 = vector.load %arg4[%c0_10, %c0_11] : memref<4x36xf32, #tpu.memory_space<vmem>>, vector<4x36xf32>
    %cst_12 = arith.constant dense<0.000000e+00> : vector<4x3072xf32>
    %37 = tpu.matmul %36, %35, %cst_12 {dimension_numbers = #tpu.dot_dimension_numbers<[1], [0], [0], [1], [0, 0, 1, 1], [], []>} : vector<4x36xf32>, vector<36x3072xf32>, vector<4x3072xf32> -> vector<4x3072xf32>
    %c0_13 = arith.constant 0 : index
    %c0_14 = arith.constant 0 : index
    %38 = vector.load %arg5[%c0_13, %c0_14] : memref<4x1xf32, #tpu.memory_space<vmem>>, vector<4x1xf32>
    %39 = vector.broadcast %38 : vector<4x1xf32> to vector<4x3072xf32>
    %40 = arith.addf %37, %39 : vector<4x3072xf32>
    %cst_15 = arith.constant 0.000000e+00 : f32
    %41 = vector.broadcast %cst_15 : f32 to vector<4x3072xf32>
    %42 = arith.cmpf oge, %40, %41 : vector<4x3072xf32>
    %cst_16 = arith.constant 0.00999999977 : f32
    %43 = vector.broadcast %cst_16 : f32 to vector<4x3072xf32>
    %44 = arith.mulf %43, %40 : vector<4x3072xf32>
    %45 = arith.select %42, %40, %44 : vector<4x3072xi1>, vector<4x3072xf32>
    %46 = tpu.iota {dimensions = array<i32: 0>} : vector<256x256xi32>
    %47 = tpu.iota {dimensions = array<i32: 1>} : vector<256x256xi32>
    %c2_i32 = arith.constant 2 : i32
    %48 = vector.broadcast %c2_i32 : i32 to vector<256x256xi32>
    %49 = arith.muli %48, %47 : vector<256x256xi32>
    %50 = arith.cmpi eq, %46, %49 : vector<256x256xi32>
    %cst_17 = arith.constant 1.000000e+00 : f32
    %cst_18 = arith.constant 0.000000e+00 : f32
    %51 = vector.broadcast %cst_17 : f32 to vector<256x256xf32>
    %52 = vector.broadcast %cst_18 : f32 to vector<256x256xf32>
    %53 = arith.select %50, %51, %52 : vector<256x256xi1>, vector<256x256xf32>
    %c128_i32 = arith.constant 128 : i32
    %54 = vector.broadcast %c128_i32 : i32 to vector<256x256xi32>
    %55 = arith.subi %47, %54 : vector<256x256xi32>
    %c2_i32_19 = arith.constant 2 : i32
    %56 = vector.broadcast %c2_i32_19 : i32 to vector<256x256xi32>
    %57 = arith.muli %56, %55 : vector<256x256xi32>
    %c1_i32 = arith.constant 1 : i32
    %58 = vector.broadcast %c1_i32 : i32 to vector<256x256xi32>
    %59 = arith.addi %57, %58 : vector<256x256xi32>
    %60 = arith.cmpi eq, %46, %59 : vector<256x256xi32>
    %cst_20 = arith.constant 1.000000e+00 : f32
    %cst_21 = arith.constant 0.000000e+00 : f32
    %61 = vector.broadcast %cst_20 : f32 to vector<256x256xf32>
    %62 = vector.broadcast %cst_21 : f32 to vector<256x256xf32>
    %63 = arith.select %60, %61, %62 : vector<256x256xi1>, vector<256x256xf32>
    %64 = arith.addf %53, %63 : vector<256x256xf32>
    %65 = vector.extract_strided_slice %45 {offsets = [0, 0], sizes = [4, 256], strides = [1, 1]} : vector<4x3072xf32> to vector<4x256xf32>
    %cst_22 = arith.constant dense<0.000000e+00> : vector<4x256xf32>
    %66 = tpu.matmul %65, %64, %cst_22 {dimension_numbers = #tpu.dot_dimension_numbers<[1], [0], [0], [1], [0, 0, 1, 1], [], []>} : vector<4x256xf32>, vector<256x256xf32>, vector<4x256xf32> -> vector<4x256xf32>
    %67 = vector.extract_strided_slice %66 {offsets = [0, 0], sizes = [4, 128], strides = [1, 1]} : vector<4x256xf32> to vector<4x128xf32>
    %68 = vector.extract_strided_slice %66 {offsets = [0, 128], sizes = [4, 128], strides = [1, 1]} : vector<4x256xf32> to vector<4x128xf32>
    %69 = arith.maximumf %67, %68 : vector<4x128xf32>
    %70 = vector.extract_strided_slice %45 {offsets = [0, 256], sizes = [4, 256], strides = [1, 1]} : vector<4x3072xf32> to vector<4x256xf32>
    %cst_23 = arith.constant dense<0.000000e+00> : vector<4x256xf32>
    %71 = tpu.matmul %70, %64, %cst_23 {dimension_numbers = #tpu.dot_dimension_numbers<[1], [0], [0], [1], [0, 0, 1, 1], [], []>} : vector<4x256xf32>, vector<256x256xf32>, vector<4x256xf32> -> vector<4x256xf32>
    %72 = vector.extract_strided_slice %71 {offsets = [0, 0], sizes = [4, 128], strides = [1, 1]} : vector<4x256xf32> to vector<4x128xf32>
    %73 = vector.extract_strided_slice %71 {offsets = [0, 128], sizes = [4, 128], strides = [1, 1]} : vector<4x256xf32> to vector<4x128xf32>
    %74 = arith.maximumf %72, %73 : vector<4x128xf32>
    %75 = vector.extract_strided_slice %45 {offsets = [0, 512], sizes = [4, 256], strides = [1, 1]} : vector<4x3072xf32> to vector<4x256xf32>
    %cst_24 = arith.constant dense<0.000000e+00> : vector<4x256xf32>
    %76 = tpu.matmul %75, %64, %cst_24 {dimension_numbers = #tpu.dot_dimension_numbers<[1], [0], [0], [1], [0, 0, 1, 1], [], []>} : vector<4x256xf32>, vector<256x256xf32>, vector<4x256xf32> -> vector<4x256xf32>
    %77 = vector.extract_strided_slice %76 {offsets = [0, 0], sizes = [4, 128], strides = [1, 1]} : vector<4x256xf32> to vector<4x128xf32>
    %78 = vector.extract_strided_slice %76 {offsets = [0, 128], sizes = [4, 128], strides = [1, 1]} : vector<4x256xf32> to vector<4x128xf32>
    %79 = arith.maximumf %77, %78 : vector<4x128xf32>
    %80 = vector.extract_strided_slice %45 {offsets = [0, 768], sizes = [4, 256], strides = [1, 1]} : vector<4x3072xf32> to vector<4x256xf32>
    %cst_25 = arith.constant dense<0.000000e+00> : vector<4x256xf32>
    %81 = tpu.matmul %80, %64, %cst_25 {dimension_numbers = #tpu.dot_dimension_numbers<[1], [0], [0], [1], [0, 0, 1, 1], [], []>} : vector<4x256xf32>, vector<256x256xf32>, vector<4x256xf32> -> vector<4x256xf32>
    %82 = vector.extract_strided_slice %81 {offsets = [0, 0], sizes = [4, 128], strides = [1, 1]} : vector<4x256xf32> to vector<4x128xf32>
    %83 = vector.extract_strided_slice %81 {offsets = [0, 128], sizes = [4, 128], strides = [1, 1]} : vector<4x256xf32> to vector<4x128xf32>
    %84 = arith.maximumf %82, %83 : vector<4x128xf32>
    %85 = vector.extract_strided_slice %45 {offsets = [0, 1024], sizes = [4, 256], strides = [1, 1]} : vector<4x3072xf32> to vector<4x256xf32>
    %cst_26 = arith.constant dense<0.000000e+00> : vector<4x256xf32>
    %86 = tpu.matmul %85, %64, %cst_26 {dimension_numbers = #tpu.dot_dimension_numbers<[1], [0], [0], [1], [0, 0, 1, 1], [], []>} : vector<4x256xf32>, vector<256x256xf32>, vector<4x256xf32> -> vector<4x256xf32>
    %87 = vector.extract_strided_slice %86 {offsets = [0, 0], sizes = [4, 128], strides = [1, 1]} : vector<4x256xf32> to vector<4x128xf32>
    %88 = vector.extract_strided_slice %86 {offsets = [0, 128], sizes = [4, 128], strides = [1, 1]} : vector<4x256xf32> to vector<4x128xf32>
    %89 = arith.maximumf %87, %88 : vector<4x128xf32>
    %90 = vector.extract_strided_slice %45 {offsets = [0, 1280], sizes = [4, 256], strides = [1, 1]} : vector<4x3072xf32> to vector<4x256xf32>
    %cst_27 = arith.constant dense<0.000000e+00> : vector<4x256xf32>
    %91 = tpu.matmul %90, %64, %cst_27 {dimension_numbers = #tpu.dot_dimension_numbers<[1], [0], [0], [1], [0, 0, 1, 1], [], []>} : vector<4x256xf32>, vector<256x256xf32>, vector<4x256xf32> -> vector<4x256xf32>
    %92 = vector.extract_strided_slice %91 {offsets = [0, 0], sizes = [4, 128], strides = [1, 1]} : vector<4x256xf32> to vector<4x128xf32>
    %93 = vector.extract_strided_slice %91 {offsets = [0, 128], sizes = [4, 128], strides = [1, 1]} : vector<4x256xf32> to vector<4x128xf32>
    %94 = arith.maximumf %92, %93 : vector<4x128xf32>
    %95 = vector.extract_strided_slice %45 {offsets = [0, 1536], sizes = [4, 256], strides = [1, 1]} : vector<4x3072xf32> to vector<4x256xf32>
    %cst_28 = arith.constant dense<0.000000e+00> : vector<4x256xf32>
    %96 = tpu.matmul %95, %64, %cst_28 {dimension_numbers = #tpu.dot_dimension_numbers<[1], [0], [0], [1], [0, 0, 1, 1], [], []>} : vector<4x256xf32>, vector<256x256xf32>, vector<4x256xf32> -> vector<4x256xf32>
    %97 = vector.extract_strided_slice %96 {offsets = [0, 0], sizes = [4, 128], strides = [1, 1]} : vector<4x256xf32> to vector<4x128xf32>
    %98 = vector.extract_strided_slice %96 {offsets = [0, 128], sizes = [4, 128], strides = [1, 1]} : vector<4x256xf32> to vector<4x128xf32>
    %99 = arith.maximumf %97, %98 : vector<4x128xf32>
    %100 = vector.extract_strided_slice %45 {offsets = [0, 1792], sizes = [4, 256], strides = [1, 1]} : vector<4x3072xf32> to vector<4x256xf32>
    %cst_29 = arith.constant dense<0.000000e+00> : vector<4x256xf32>
    %101 = tpu.matmul %100, %64, %cst_29 {dimension_numbers = #tpu.dot_dimension_numbers<[1], [0], [0], [1], [0, 0, 1, 1], [], []>} : vector<4x256xf32>, vector<256x256xf32>, vector<4x256xf32> -> vector<4x256xf32>
    %102 = vector.extract_strided_slice %101 {offsets = [0, 0], sizes = [4, 128], strides = [1, 1]} : vector<4x256xf32> to vector<4x128xf32>
    %103 = vector.extract_strided_slice %101 {offsets = [0, 128], sizes = [4, 128], strides = [1, 1]} : vector<4x256xf32> to vector<4x128xf32>
    %104 = arith.maximumf %102, %103 : vector<4x128xf32>
    %105 = vector.extract_strided_slice %45 {offsets = [0, 2048], sizes = [4, 256], strides = [1, 1]} : vector<4x3072xf32> to vector<4x256xf32>
    %cst_30 = arith.constant dense<0.000000e+00> : vector<4x256xf32>
    %106 = tpu.matmul %105, %64, %cst_30 {dimension_numbers = #tpu.dot_dimension_numbers<[1], [0], [0], [1], [0, 0, 1, 1], [], []>} : vector<4x256xf32>, vector<256x256xf32>, vector<4x256xf32> -> vector<4x256xf32>
    %107 = vector.extract_strided_slice %106 {offsets = [0, 0], sizes = [4, 128], strides = [1, 1]} : vector<4x256xf32> to vector<4x128xf32>
    %108 = vector.extract_strided_slice %106 {offsets = [0, 128], sizes = [4, 128], strides = [1, 1]} : vector<4x256xf32> to vector<4x128xf32>
    %109 = arith.maximumf %107, %108 : vector<4x128xf32>
    %110 = vector.extract_strided_slice %45 {offsets = [0, 2304], sizes = [4, 256], strides = [1, 1]} : vector<4x3072xf32> to vector<4x256xf32>
    %cst_31 = arith.constant dense<0.000000e+00> : vector<4x256xf32>
    %111 = tpu.matmul %110, %64, %cst_31 {dimension_numbers = #tpu.dot_dimension_numbers<[1], [0], [0], [1], [0, 0, 1, 1], [], []>} : vector<4x256xf32>, vector<256x256xf32>, vector<4x256xf32> -> vector<4x256xf32>
    %112 = vector.extract_strided_slice %111 {offsets = [0, 0], sizes = [4, 128], strides = [1, 1]} : vector<4x256xf32> to vector<4x128xf32>
    %113 = vector.extract_strided_slice %111 {offsets = [0, 128], sizes = [4, 128], strides = [1, 1]} : vector<4x256xf32> to vector<4x128xf32>
    %114 = arith.maximumf %112, %113 : vector<4x128xf32>
    %115 = vector.extract_strided_slice %45 {offsets = [0, 2560], sizes = [4, 256], strides = [1, 1]} : vector<4x3072xf32> to vector<4x256xf32>
    %cst_32 = arith.constant dense<0.000000e+00> : vector<4x256xf32>
    %116 = tpu.matmul %115, %64, %cst_32 {dimension_numbers = #tpu.dot_dimension_numbers<[1], [0], [0], [1], [0, 0, 1, 1], [], []>} : vector<4x256xf32>, vector<256x256xf32>, vector<4x256xf32> -> vector<4x256xf32>
    %117 = vector.extract_strided_slice %116 {offsets = [0, 0], sizes = [4, 128], strides = [1, 1]} : vector<4x256xf32> to vector<4x128xf32>
    %118 = vector.extract_strided_slice %116 {offsets = [0, 128], sizes = [4, 128], strides = [1, 1]} : vector<4x256xf32> to vector<4x128xf32>
    %119 = arith.maximumf %117, %118 : vector<4x128xf32>
    %120 = vector.extract_strided_slice %45 {offsets = [0, 2816], sizes = [4, 256], strides = [1, 1]} : vector<4x3072xf32> to vector<4x256xf32>
    %cst_33 = arith.constant dense<0.000000e+00> : vector<4x256xf32>
    %121 = tpu.matmul %120, %64, %cst_33 {dimension_numbers = #tpu.dot_dimension_numbers<[1], [0], [0], [1], [0, 0, 1, 1], [], []>} : vector<4x256xf32>, vector<256x256xf32>, vector<4x256xf32> -> vector<4x256xf32>
    %122 = vector.extract_strided_slice %121 {offsets = [0, 0], sizes = [4, 128], strides = [1, 1]} : vector<4x256xf32> to vector<4x128xf32>
    %123 = vector.extract_strided_slice %121 {offsets = [0, 128], sizes = [4, 128], strides = [1, 1]} : vector<4x256xf32> to vector<4x128xf32>
    %124 = arith.maximumf %122, %123 : vector<4x128xf32>
    %125 = tpu.concatenate %69, %74, %79, %84, %89, %94, %99, %104, %109, %114, %119, %124 in 1 : vector<4x128xf32>, vector<4x128xf32>, vector<4x128xf32>, vector<4x128xf32>, vector<4x128xf32>, vector<4x128xf32>, vector<4x128xf32>, vector<4x128xf32>, vector<4x128xf32>, vector<4x128xf32>, vector<4x128xf32>, vector<4x128xf32> -> vector<4x1536xf32>
    %cst_34 = arith.constant 0.000000e+00 : f32
    %126 = vector.broadcast %cst_34 : f32 to vector<4x4xf32>
    %127 = tpu.concatenate %126, %125, %126 in 1 : vector<4x4xf32>, vector<4x1536xf32>, vector<4x4xf32> -> vector<4x1544xf32>
    %128 = vector.extract_strided_slice %127 {offsets = [0, 0], sizes = [4, 1536], strides = [1, 1]} : vector<4x1544xf32> to vector<4x1536xf32>
    %129 = vector.extract_strided_slice %127 {offsets = [0, 1], sizes = [4, 1536], strides = [1, 1]} : vector<4x1544xf32> to vector<4x1536xf32>
    %130 = vector.extract_strided_slice %127 {offsets = [0, 2], sizes = [4, 1536], strides = [1, 1]} : vector<4x1544xf32> to vector<4x1536xf32>
    %131 = vector.extract_strided_slice %127 {offsets = [0, 3], sizes = [4, 1536], strides = [1, 1]} : vector<4x1544xf32> to vector<4x1536xf32>
    %132 = vector.extract_strided_slice %127 {offsets = [0, 4], sizes = [4, 1536], strides = [1, 1]} : vector<4x1544xf32> to vector<4x1536xf32>
    %133 = vector.extract_strided_slice %127 {offsets = [0, 5], sizes = [4, 1536], strides = [1, 1]} : vector<4x1544xf32> to vector<4x1536xf32>
    %134 = vector.extract_strided_slice %127 {offsets = [0, 6], sizes = [4, 1536], strides = [1, 1]} : vector<4x1544xf32> to vector<4x1536xf32>
    %135 = vector.extract_strided_slice %127 {offsets = [0, 7], sizes = [4, 1536], strides = [1, 1]} : vector<4x1544xf32> to vector<4x1536xf32>
    %136 = vector.extract_strided_slice %127 {offsets = [0, 8], sizes = [4, 1536], strides = [1, 1]} : vector<4x1544xf32> to vector<4x1536xf32>
    %137 = tpu.concatenate %128, %129, %130, %131, %132, %133, %134, %135, %136 in 0 : vector<4x1536xf32>, vector<4x1536xf32>, vector<4x1536xf32>, vector<4x1536xf32>, vector<4x1536xf32>, vector<4x1536xf32>, vector<4x1536xf32>, vector<4x1536xf32>, vector<4x1536xf32> -> vector<36x1536xf32>
    %c0_35 = arith.constant 0 : index
    %c0_36 = arith.constant 0 : index
    %138 = vector.load %arg6[%c0_35, %c0_36] : memref<4x36xf32, #tpu.memory_space<vmem>>, vector<4x36xf32>
    %cst_37 = arith.constant dense<0.000000e+00> : vector<4x1536xf32>
    %139 = tpu.matmul %138, %137, %cst_37 {dimension_numbers = #tpu.dot_dimension_numbers<[1], [0], [0], [1], [0, 0, 1, 1], [], []>} : vector<4x36xf32>, vector<36x1536xf32>, vector<4x1536xf32> -> vector<4x1536xf32>
    %c0_38 = arith.constant 0 : index
    %c0_39 = arith.constant 0 : index
    %140 = vector.load %arg7[%c0_38, %c0_39] : memref<4x1xf32, #tpu.memory_space<vmem>>, vector<4x1xf32>
    %141 = vector.broadcast %140 : vector<4x1xf32> to vector<4x1536xf32>
    %142 = arith.addf %139, %141 : vector<4x1536xf32>
    %cst_40 = arith.constant 0.000000e+00 : f32
    %143 = vector.broadcast %cst_40 : f32 to vector<4x1536xf32>
    %144 = arith.cmpf oge, %142, %143 : vector<4x1536xf32>
    %cst_41 = arith.constant 0.00999999977 : f32
    %145 = vector.broadcast %cst_41 : f32 to vector<4x1536xf32>
    %146 = arith.mulf %145, %142 : vector<4x1536xf32>
    %147 = arith.select %144, %142, %146 : vector<4x1536xi1>, vector<4x1536xf32>
    %148 = vector.extract_strided_slice %147 {offsets = [0, 0], sizes = [4, 256], strides = [1, 1]} : vector<4x1536xf32> to vector<4x256xf32>
    %cst_42 = arith.constant dense<0.000000e+00> : vector<4x256xf32>
    %149 = tpu.matmul %148, %64, %cst_42 {dimension_numbers = #tpu.dot_dimension_numbers<[1], [0], [0], [1], [0, 0, 1, 1], [], []>} : vector<4x256xf32>, vector<256x256xf32>, vector<4x256xf32> -> vector<4x256xf32>
    %150 = vector.extract_strided_slice %149 {offsets = [0, 0], sizes = [4, 128], strides = [1, 1]} : vector<4x256xf32> to vector<4x128xf32>
    %151 = vector.extract_strided_slice %149 {offsets = [0, 128], sizes = [4, 128], strides = [1, 1]} : vector<4x256xf32> to vector<4x128xf32>
    %152 = arith.maximumf %150, %151 : vector<4x128xf32>
    %153 = vector.extract_strided_slice %147 {offsets = [0, 256], sizes = [4, 256], strides = [1, 1]} : vector<4x1536xf32> to vector<4x256xf32>
    %cst_43 = arith.constant dense<0.000000e+00> : vector<4x256xf32>
    %154 = tpu.matmul %153, %64, %cst_43 {dimension_numbers = #tpu.dot_dimension_numbers<[1], [0], [0], [1], [0, 0, 1, 1], [], []>} : vector<4x256xf32>, vector<256x256xf32>, vector<4x256xf32> -> vector<4x256xf32>
    %155 = vector.extract_strided_slice %154 {offsets = [0, 0], sizes = [4, 128], strides = [1, 1]} : vector<4x256xf32> to vector<4x128xf32>
    %156 = vector.extract_strided_slice %154 {offsets = [0, 128], sizes = [4, 128], strides = [1, 1]} : vector<4x256xf32> to vector<4x128xf32>
    %157 = arith.maximumf %155, %156 : vector<4x128xf32>
    %158 = vector.extract_strided_slice %147 {offsets = [0, 512], sizes = [4, 256], strides = [1, 1]} : vector<4x1536xf32> to vector<4x256xf32>
    %cst_44 = arith.constant dense<0.000000e+00> : vector<4x256xf32>
    %159 = tpu.matmul %158, %64, %cst_44 {dimension_numbers = #tpu.dot_dimension_numbers<[1], [0], [0], [1], [0, 0, 1, 1], [], []>} : vector<4x256xf32>, vector<256x256xf32>, vector<4x256xf32> -> vector<4x256xf32>
    %160 = vector.extract_strided_slice %159 {offsets = [0, 0], sizes = [4, 128], strides = [1, 1]} : vector<4x256xf32> to vector<4x128xf32>
    %161 = vector.extract_strided_slice %159 {offsets = [0, 128], sizes = [4, 128], strides = [1, 1]} : vector<4x256xf32> to vector<4x128xf32>
    %162 = arith.maximumf %160, %161 : vector<4x128xf32>
    %163 = vector.extract_strided_slice %147 {offsets = [0, 768], sizes = [4, 256], strides = [1, 1]} : vector<4x1536xf32> to vector<4x256xf32>
    %cst_45 = arith.constant dense<0.000000e+00> : vector<4x256xf32>
    %164 = tpu.matmul %163, %64, %cst_45 {dimension_numbers = #tpu.dot_dimension_numbers<[1], [0], [0], [1], [0, 0, 1, 1], [], []>} : vector<4x256xf32>, vector<256x256xf32>, vector<4x256xf32> -> vector<4x256xf32>
    %165 = vector.extract_strided_slice %164 {offsets = [0, 0], sizes = [4, 128], strides = [1, 1]} : vector<4x256xf32> to vector<4x128xf32>
    %166 = vector.extract_strided_slice %164 {offsets = [0, 128], sizes = [4, 128], strides = [1, 1]} : vector<4x256xf32> to vector<4x128xf32>
    %167 = arith.maximumf %165, %166 : vector<4x128xf32>
    %168 = vector.extract_strided_slice %147 {offsets = [0, 1024], sizes = [4, 256], strides = [1, 1]} : vector<4x1536xf32> to vector<4x256xf32>
    %cst_46 = arith.constant dense<0.000000e+00> : vector<4x256xf32>
    %169 = tpu.matmul %168, %64, %cst_46 {dimension_numbers = #tpu.dot_dimension_numbers<[1], [0], [0], [1], [0, 0, 1, 1], [], []>} : vector<4x256xf32>, vector<256x256xf32>, vector<4x256xf32> -> vector<4x256xf32>
    %170 = vector.extract_strided_slice %169 {offsets = [0, 0], sizes = [4, 128], strides = [1, 1]} : vector<4x256xf32> to vector<4x128xf32>
    %171 = vector.extract_strided_slice %169 {offsets = [0, 128], sizes = [4, 128], strides = [1, 1]} : vector<4x256xf32> to vector<4x128xf32>
    %172 = arith.maximumf %170, %171 : vector<4x128xf32>
    %173 = vector.extract_strided_slice %147 {offsets = [0, 1280], sizes = [4, 256], strides = [1, 1]} : vector<4x1536xf32> to vector<4x256xf32>
    %cst_47 = arith.constant dense<0.000000e+00> : vector<4x256xf32>
    %174 = tpu.matmul %173, %64, %cst_47 {dimension_numbers = #tpu.dot_dimension_numbers<[1], [0], [0], [1], [0, 0, 1, 1], [], []>} : vector<4x256xf32>, vector<256x256xf32>, vector<4x256xf32> -> vector<4x256xf32>
    %175 = vector.extract_strided_slice %174 {offsets = [0, 0], sizes = [4, 128], strides = [1, 1]} : vector<4x256xf32> to vector<4x128xf32>
    %176 = vector.extract_strided_slice %174 {offsets = [0, 128], sizes = [4, 128], strides = [1, 1]} : vector<4x256xf32> to vector<4x128xf32>
    %177 = arith.maximumf %175, %176 : vector<4x128xf32>
    %178 = tpu.concatenate %152, %157, %162, %167, %172, %177 in 1 : vector<4x128xf32>, vector<4x128xf32>, vector<4x128xf32>, vector<4x128xf32>, vector<4x128xf32>, vector<4x128xf32> -> vector<4x768xf32>
    %cst_48 = arith.constant 0.000000e+00 : f32
    %179 = vector.broadcast %cst_48 : f32 to vector<4x4xf32>
    %180 = tpu.concatenate %179, %178, %179 in 1 : vector<4x4xf32>, vector<4x768xf32>, vector<4x4xf32> -> vector<4x776xf32>
    %181 = vector.extract_strided_slice %180 {offsets = [0, 0], sizes = [4, 768], strides = [1, 1]} : vector<4x776xf32> to vector<4x768xf32>
    %182 = vector.extract_strided_slice %180 {offsets = [0, 1], sizes = [4, 768], strides = [1, 1]} : vector<4x776xf32> to vector<4x768xf32>
    %183 = vector.extract_strided_slice %180 {offsets = [0, 2], sizes = [4, 768], strides = [1, 1]} : vector<4x776xf32> to vector<4x768xf32>
    %184 = vector.extract_strided_slice %180 {offsets = [0, 3], sizes = [4, 768], strides = [1, 1]} : vector<4x776xf32> to vector<4x768xf32>
    %185 = vector.extract_strided_slice %180 {offsets = [0, 4], sizes = [4, 768], strides = [1, 1]} : vector<4x776xf32> to vector<4x768xf32>
    %186 = vector.extract_strided_slice %180 {offsets = [0, 5], sizes = [4, 768], strides = [1, 1]} : vector<4x776xf32> to vector<4x768xf32>
    %187 = vector.extract_strided_slice %180 {offsets = [0, 6], sizes = [4, 768], strides = [1, 1]} : vector<4x776xf32> to vector<4x768xf32>
    %188 = vector.extract_strided_slice %180 {offsets = [0, 7], sizes = [4, 768], strides = [1, 1]} : vector<4x776xf32> to vector<4x768xf32>
    %189 = vector.extract_strided_slice %180 {offsets = [0, 8], sizes = [4, 768], strides = [1, 1]} : vector<4x776xf32> to vector<4x768xf32>
    %190 = tpu.concatenate %181, %182, %183, %184, %185, %186, %187, %188, %189 in 0 : vector<4x768xf32>, vector<4x768xf32>, vector<4x768xf32>, vector<4x768xf32>, vector<4x768xf32>, vector<4x768xf32>, vector<4x768xf32>, vector<4x768xf32>, vector<4x768xf32> -> vector<36x768xf32>
    %c0_49 = arith.constant 0 : index
    %c0_50 = arith.constant 0 : index
    %191 = vector.load %arg8[%c0_49, %c0_50] : memref<4x36xf32, #tpu.memory_space<vmem>>, vector<4x36xf32>
    %cst_51 = arith.constant dense<0.000000e+00> : vector<4x768xf32>
    %192 = tpu.matmul %191, %190, %cst_51 {dimension_numbers = #tpu.dot_dimension_numbers<[1], [0], [0], [1], [0, 0, 1, 1], [], []>} : vector<4x36xf32>, vector<36x768xf32>, vector<4x768xf32> -> vector<4x768xf32>
    %c0_52 = arith.constant 0 : index
    %c0_53 = arith.constant 0 : index
    %193 = vector.load %arg9[%c0_52, %c0_53] : memref<4x1xf32, #tpu.memory_space<vmem>>, vector<4x1xf32>
    %194 = vector.broadcast %193 : vector<4x1xf32> to vector<4x768xf32>
    %195 = arith.addf %192, %194 : vector<4x768xf32>
    %cst_54 = arith.constant 0.000000e+00 : f32
    %196 = vector.broadcast %cst_54 : f32 to vector<4x768xf32>
    %197 = arith.cmpf oge, %195, %196 : vector<4x768xf32>
    %cst_55 = arith.constant 0.00999999977 : f32
    %198 = vector.broadcast %cst_55 : f32 to vector<4x768xf32>
    %199 = arith.mulf %198, %195 : vector<4x768xf32>
    %200 = arith.select %197, %195, %199 : vector<4x768xi1>, vector<4x768xf32>
    %201 = vector.extract_strided_slice %200 {offsets = [0, 0], sizes = [4, 256], strides = [1, 1]} : vector<4x768xf32> to vector<4x256xf32>
    %cst_56 = arith.constant dense<0.000000e+00> : vector<4x256xf32>
    %202 = tpu.matmul %201, %64, %cst_56 {dimension_numbers = #tpu.dot_dimension_numbers<[1], [0], [0], [1], [0, 0, 1, 1], [], []>} : vector<4x256xf32>, vector<256x256xf32>, vector<4x256xf32> -> vector<4x256xf32>
    %203 = vector.extract_strided_slice %202 {offsets = [0, 0], sizes = [4, 128], strides = [1, 1]} : vector<4x256xf32> to vector<4x128xf32>
    %204 = vector.extract_strided_slice %202 {offsets = [0, 128], sizes = [4, 128], strides = [1, 1]} : vector<4x256xf32> to vector<4x128xf32>
    %205 = arith.maximumf %203, %204 : vector<4x128xf32>
    %206 = vector.extract_strided_slice %200 {offsets = [0, 256], sizes = [4, 256], strides = [1, 1]} : vector<4x768xf32> to vector<4x256xf32>
    %cst_57 = arith.constant dense<0.000000e+00> : vector<4x256xf32>
    %207 = tpu.matmul %206, %64, %cst_57 {dimension_numbers = #tpu.dot_dimension_numbers<[1], [0], [0], [1], [0, 0, 1, 1], [], []>} : vector<4x256xf32>, vector<256x256xf32>, vector<4x256xf32> -> vector<4x256xf32>
    %208 = vector.extract_strided_slice %207 {offsets = [0, 0], sizes = [4, 128], strides = [1, 1]} : vector<4x256xf32> to vector<4x128xf32>
    %209 = vector.extract_strided_slice %207 {offsets = [0, 128], sizes = [4, 128], strides = [1, 1]} : vector<4x256xf32> to vector<4x128xf32>
    %210 = arith.maximumf %208, %209 : vector<4x128xf32>
    %211 = vector.extract_strided_slice %200 {offsets = [0, 512], sizes = [4, 256], strides = [1, 1]} : vector<4x768xf32> to vector<4x256xf32>
    %cst_58 = arith.constant dense<0.000000e+00> : vector<4x256xf32>
    %212 = tpu.matmul %211, %64, %cst_58 {dimension_numbers = #tpu.dot_dimension_numbers<[1], [0], [0], [1], [0, 0, 1, 1], [], []>} : vector<4x256xf32>, vector<256x256xf32>, vector<4x256xf32> -> vector<4x256xf32>
    %213 = vector.extract_strided_slice %212 {offsets = [0, 0], sizes = [4, 128], strides = [1, 1]} : vector<4x256xf32> to vector<4x128xf32>
    %214 = vector.extract_strided_slice %212 {offsets = [0, 128], sizes = [4, 128], strides = [1, 1]} : vector<4x256xf32> to vector<4x128xf32>
    %215 = arith.maximumf %213, %214 : vector<4x128xf32>
    %216 = tpu.concatenate %205, %210, %215 in 1 : vector<4x128xf32>, vector<4x128xf32>, vector<4x128xf32> -> vector<4x384xf32>
    %cst_59 = arith.constant 0.000000e+00 : f32
    %217 = vector.broadcast %cst_59 : f32 to vector<1x64xf32>
    %218 = vector.extract_strided_slice %216 {offsets = [0, 0], sizes = [1, 384], strides = [1, 1]} : vector<4x384xf32> to vector<1x384xf32>
    %c0_60 = arith.constant 0 : index
    %c0_61 = arith.constant 0 : index
    %219 = vector.load %arg10[%c0_60, %c0_61] : memref<1536x64xf32, #tpu.memory_space<vmem>>, vector<384x64xf32>
    %cst_62 = arith.constant dense<0.000000e+00> : vector<1x64xf32>
    %220 = tpu.matmul %218, %219, %cst_62 {dimension_numbers = #tpu.dot_dimension_numbers<[1], [0], [0], [1], [0, 0, 1, 1], [], []>} : vector<1x384xf32>, vector<384x64xf32>, vector<1x64xf32> -> vector<1x64xf32>
    %221 = arith.addf %217, %220 : vector<1x64xf32>
    %222 = vector.extract_strided_slice %216 {offsets = [1, 0], sizes = [1, 384], strides = [1, 1]} : vector<4x384xf32> to vector<1x384xf32>
    %c384 = arith.constant 384 : index
    %c0_63 = arith.constant 0 : index
    %223 = vector.load %arg10[%c384, %c0_63] : memref<1536x64xf32, #tpu.memory_space<vmem>>, vector<384x64xf32>
    %cst_64 = arith.constant dense<0.000000e+00> : vector<1x64xf32>
    %224 = tpu.matmul %222, %223, %cst_64 {dimension_numbers = #tpu.dot_dimension_numbers<[1], [0], [0], [1], [0, 0, 1, 1], [], []>} : vector<1x384xf32>, vector<384x64xf32>, vector<1x64xf32> -> vector<1x64xf32>
    %225 = arith.addf %221, %224 : vector<1x64xf32>
    %226 = vector.extract_strided_slice %216 {offsets = [2, 0], sizes = [1, 384], strides = [1, 1]} : vector<4x384xf32> to vector<1x384xf32>
    %c768 = arith.constant 768 : index
    %c0_65 = arith.constant 0 : index
    %227 = vector.load %arg10[%c768, %c0_65] : memref<1536x64xf32, #tpu.memory_space<vmem>>, vector<384x64xf32>
    %cst_66 = arith.constant dense<0.000000e+00> : vector<1x64xf32>
    %228 = tpu.matmul %226, %227, %cst_66 {dimension_numbers = #tpu.dot_dimension_numbers<[1], [0], [0], [1], [0, 0, 1, 1], [], []>} : vector<1x384xf32>, vector<384x64xf32>, vector<1x64xf32> -> vector<1x64xf32>
    %229 = arith.addf %225, %228 : vector<1x64xf32>
    %230 = vector.extract_strided_slice %216 {offsets = [3, 0], sizes = [1, 384], strides = [1, 1]} : vector<4x384xf32> to vector<1x384xf32>
    %c1152 = arith.constant 1152 : index
    %c0_67 = arith.constant 0 : index
    %231 = vector.load %arg10[%c1152, %c0_67] : memref<1536x64xf32, #tpu.memory_space<vmem>>, vector<384x64xf32>
    %cst_68 = arith.constant dense<0.000000e+00> : vector<1x64xf32>
    %232 = tpu.matmul %230, %231, %cst_68 {dimension_numbers = #tpu.dot_dimension_numbers<[1], [0], [0], [1], [0, 0, 1, 1], [], []>} : vector<1x384xf32>, vector<384x64xf32>, vector<1x64xf32> -> vector<1x64xf32>
    %233 = arith.addf %229, %232 : vector<1x64xf32>
    %c0_69 = arith.constant 0 : index
    %c0_70 = arith.constant 0 : index
    %234 = vector.load %arg11[%c0_69, %c0_70] : memref<1x64xf32, #tpu.memory_space<vmem>>, vector<1x64xf32>
    %235 = arith.addf %233, %234 : vector<1x64xf32>
    %c0_71 = arith.constant 0 : index
    %c0_72 = arith.constant 0 : index
    %c0_73 = arith.constant 0 : index
    %236 = vector.load %arg12[%c0_71, %c0_72, %c0_73] : memref<1x1x64xf32, #tpu.memory_space<vmem>>, vector<1x1x64xf32>
    %237 = vector.shape_cast %236 : vector<1x1x64xf32> to vector<1x64xf32>
    %238 = vector.shape_cast %235 : vector<1x64xf32> to vector<1x1x64xf32>
    tpu.vector_store %arg12[%c0_71, %c0_72, %c0_73], %238 {strides = array<i32>} : memref<1x1x64xf32, #tpu.memory_space<vmem>>, vector<1x1x64xf32>,
    return
  }
  func.func @transform_0(%arg0: i32) -> (i32, i32, i32) {
    %c0_i32 = arith.constant 0 : i32
    %c0_i32_0 = arith.constant 0 : i32
    %c0_i32_1 = arith.constant 0 : i32
    return %arg0, %c0_i32, %c0_i32_0 : i32, i32, i32
  }
  func.func @transform_1(%arg0: i32) -> (i32, i32) {
    %c0_i32 = arith.constant 0 : i32
    %c0_i32_0 = arith.constant 0 : i32
    %c0_i32_1 = arith.constant 0 : i32
    return %c0_i32, %c0_i32_0 : i32, i32
  }
  func.func @transform_2(%arg0: i32) -> (i32, i32) {
    %c0_i32 = arith.constant 0 : i32
    %c0_i32_0 = arith.constant 0 : i32
    %c0_i32_1 = arith.constant 0 : i32
    return %c0_i32, %c0_i32_0 : i32, i32
  }
  func.func @transform_3(%arg0: i32) -> (i32, i32) {
    %c0_i32 = arith.constant 0 : i32
    %c0_i32_0 = arith.constant 0 : i32
    %c0_i32_1 = arith.constant 0 : i32
    return %c0_i32, %c0_i32_0 : i32, i32
  }
  func.func @transform_4(%arg0: i32) -> (i32, i32) {
    %c0_i32 = arith.constant 0 : i32
    %c0_i32_0 = arith.constant 0 : i32
    %c0_i32_1 = arith.constant 0 : i32
    return %c0_i32, %c0_i32_0 : i32, i32
  }
  func.func @transform_5(%arg0: i32) -> (i32, i32) {
    %c0_i32 = arith.constant 0 : i32
    %c0_i32_0 = arith.constant 0 : i32
    %c0_i32_1 = arith.constant 0 : i32
    return %c0_i32, %c0_i32_0 : i32, i32
  }
  func.func @transform_6(%arg0: i32) -> (i32, i32) {
    %c0_i32 = arith.constant 0 : i32
    %c0_i32_0 = arith.constant 0 : i32
    %c0_i32_1 = arith.constant 0 : i32
    return %c0_i32, %c0_i32_0 : i32, i32
  }
  func.func @transform_7(%arg0: i32) -> (i32, i32) {
    %c0_i32 = arith.constant 0 : i32
    %c0_i32_0 = arith.constant 0 : i32
    %c0_i32_1 = arith.constant 0 : i32
    return %c0_i32, %c0_i32_0 : i32, i32
  }
  func.func @transform_8(%arg0: i32) -> (i32, i32) {
    %c0_i32 = arith.constant 0 : i32
    %c0_i32_0 = arith.constant 0 : i32
    %c0_i32_1 = arith.constant 0 : i32
    return %c0_i32, %c0_i32_0 : i32, i32
  }
  func.func @transform_9(%arg0: i32) -> (i32, i32) {
    %c0_i32 = arith.constant 0 : i32
    %c0_i32_0 = arith.constant 0 : i32
    %c0_i32_1 = arith.constant 0 : i32
    return %c0_i32, %c0_i32_0 : i32, i32
  }
  func.func @transform_10(%arg0: i32) -> (i32, i32) {
    %c0_i32 = arith.constant 0 : i32
    %c0_i32_0 = arith.constant 0 : i32
    %c0_i32_1 = arith.constant 0 : i32
    return %c0_i32, %c0_i32_0 : i32, i32
  }
  func.func @transform_11(%arg0: i32) -> (i32, i32, i32) {
    %c0_i32 = arith.constant 0 : i32
    %c0_i32_0 = arith.constant 0 : i32
    %c0_i32_1 = arith.constant 0 : i32
    return %arg0, %c0_i32, %c0_i32_0 : i32, i32, i32
  }
}

</mosaic_0001>

<bundles_post_ra>
// kernel: encoder_forward.1
= control target key start
LH: loop header
LB: loop body
LE: loop exit
PB: predicated region body
PF: predicated region fallthrough
CT: control target
= control target key end

     0   :  { %s9073_s17 = smov 0   ;;  %s15606_s0 = inlined_call_operand.vmem [shape: f32[2,1,3072], index: 0, kind: input, shape index: {}]   ;;  %s15607_s1 = inlined_call_operand.vmem [shape: f32[4,9], index: 1, kind: input, shape index: {}]   ;;  %s15608_s2 = inlined_call_operand.vmem [shape: f32[4,1], index: 2, kind: input, shape index: {}]   ;;  %s15609_s3 = inlined_call_operand.vmem [shape: f32[4,36], index: 3, kind: input, shape index: {}]   ;;  %s15610_s4 = inlined_call_operand.vmem [shape: f32[4,1], index: 4, kind: input, shape index: {}]   ;;  %s15611_s5 = inlined_call_operand.vmem [shape: f32[4,36], index: 5, kind: input, shape index: {}]   ;;  %s15612_s6 = inlined_call_operand.vmem [shape: f32[4,1], index: 6, kind: input, shape index: {}]   ;;  %s15613_s7 = inlined_call_operand.vmem [shape: f32[4,36], index: 7, kind: input, shape index: {}]   ;;  %s15614_s8 = inlined_call_operand.vmem [shape: f32[4,1], index: 8, kind: input, shape index: {}]   ;;  %s15615_s9 = inlined_call_operand.vmem [shape: f32[1536,64], index: 9, kind: input, shape index: {}]   ;;  %s15616_s10 = inlined_call_operand.vmem [shape: f32[1,64], index: 10, kind: input, shape index: {}]   ;;  %s15617_s11 = inlined_call_operand.vmem [shape: f32[2,1,64], index: 11, kind: output, shape index: {}]  }
   0x1 LB: > { %s7675_s18 = sadd.s32 4294967295, %s9000_s17   ;;  %p7679_p0 = scmp.ge.s32.totalorder %s9000_s17, 1  ;;  %s9000_s17 = sphi %s9073_s17, %s21_s17  }
   0x2   : > { %p336_p1 = scmp.lt.s32.totalorder %s9000_s17, 3 }
   0x4   : > { %p337_p2 = pnand %p7679_p0, %p336_p1 }
   0x6   : > { %340 = sbr.rel (%p337_p2) target bundleno = 3081 (0xc09), region = 64 }
   0xb   : > { %p373_p3 = scmp.lt.s32.totalorder %s7675_s18, 1  ;;  %s9002_s23 = smov 4   ;;  %vm15657_vm0 = vcmask 31744   ;;  %vm586_vm1 = vcmask 1039360   ;;  %vm710_vm2 = vcmask 1031168   ;;  %vm1454_vm3 = vcmask 1040384  }
   0xc   : > { %s9003_s24 = smov 127   ;;  %s9004_s25 = smov 126   ;;  %vm1479_vm4 = vcmask 1041408   ;;  %vm834_vm5 = vcmask 1022976   ;;  %vm1504_vm6 = vcmask 1042432   ;;  %vm15668_vm7 = vcmask 982016  }
   0xd   : > { %s16409_s18 = smov (!%p373_p3, %s7675_s18), 1  ;;  %s9005_s26 = smov 125   ;;  %vm1082_vm8 = vcmask 1006592   ;;  %vm958_vm9 = vcmask 1014784   ;;  %vm1554_vm10 = vcmask 1044480   ;;  %vm1529_vm11 = vcmask 1043456  }
   0xe   : > { %s7815_s19 = smul.u32 24, %s16409_s18  ;;  %s9006_s27 = smov 124   ;;  %vm1206_vm12 = vcmask 998400   ;;  %vm15669_vm13 = vcmask 990208   ;;  %vm1579_vm14 = vcmask 1045504   ;;  %vm1604_vm15 = vcmask 1046528  }
   0xf   : > { %s9007_s28 = smov 122   ;;  %s9008_s29 = smov 123  }
  0x10   : > { %s9087_s22 = scalar_lea.vmem %s15606_s0, %s7815_s19  ;;  %s9009_s30 = smov 120  }
  0x11   : > { %v380_v0 = vld [vmem:[%s9087_s22] sm:$0xff]  ;;  %v381_v9 = vld [vmem:[%s9087_s22 + $0x8] sm:$0xff]  ;;  %v382_v17 = vld [vmem:[%s9087_s22 + $0x10] sm:$0xff]  ;;  %s9010_s12 = smov 121  }
  0x12   : > { %v388_v1 = vperm.slane %v380_v0, 2  ;;  %v386_v2 = vperm.slane %v380_v0, 0  ;;  %v390_v3 = vperm.slane %v380_v0, 4  ;;  %v389_v4 = vperm.slane %v380_v0, 3 }
  0x13   : > { %v387_v5 = vperm.slane %v380_v0, 1  ;;  %v391_v6 = vperm.slane %v380_v0, 5  ;;  %v393_v7 = vperm.slane %v380_v0, 7  ;;  %v392_v8 = vperm.slane %v380_v0, 6 }
  0x14   : > { %414 = vrot.lane.b32.xlu1 %v388_v1, %s9002_s23  ;;  %410 = vrot.lane.b32.xlu0 %v386_v2, %s9002_s23  ;;  %v394_v10 = vperm.slane %v381_v9, 0  ;;  %v396_v11 = vperm.slane %v381_v9, 2  ;;  %v395_v12 = vperm.slane %v381_v9, 1  ;;  %v397_v13 = vperm.slane %v381_v9, 3 }
  0x15   : > { %418 = vrot.lane.b32.xlu2 %v390_v3, %s9002_s23  ;;  %v399_v14 = vperm.slane %v381_v9, 5  ;;  %v398_v15 = vperm.slane %v381_v9, 4  ;;  %v400_v16 = vperm.slane %v381_v9, 6  ;;  %v402_v18 = vperm.slane %v382_v17, 0 }
  0x16   : > { %v401_v19 = vperm.slane %v381_v9, 7  ;;  %v403_v20 = vperm.slane %v382_v17, 1  ;;  %v405_v21 = vperm.slane %v382_v17, 3  ;;  %v404_v22 = vperm.slane %v382_v17, 2 }
  0x17   : > { %v406_v23 = vperm.slane %v382_v17, 4  ;;  %v408_v24 = vperm.slane %v382_v17, 6  ;;  %v407_v25 = vperm.slane %v382_v17, 5  ;;  %v409_v26 = vperm.slane %v382_v17, 7 }
  0x1c   : > { %416 = vrot.lane.b32.xlu1 %v389_v4, %s9002_s23  ;;  %412 = vrot.lane.b32.xlu0 %v387_v5, %s9002_s23 }
  0x1d   : > { %420 = vrot.lane.b32.xlu2 %v391_v6, %s9002_s23 }
  0x24   : > { %424 = vrot.lane.b32.xlu1 %v393_v7, %s9002_s23  ;;  %422 = vrot.lane.b32.xlu0 %v392_v8, %s9002_s23 }
  0x25   : > { %426 = vrot.lane.b32.xlu2 %v394_v10, %s9002_s23 }
  0x2c   : > { %430 = vrot.lane.b32.xlu1 %v396_v11, %s9002_s23  ;;  %428 = vrot.lane.b32.xlu0 %v395_v12, %s9002_s23 }
  0x2d   : > { %432 = vrot.lane.b32.xlu2 %v397_v13, %s9002_s23 }
  0x34   : > { %436 = vrot.lane.b32.xlu1 %v399_v14, %s9002_s23  ;;  %434 = vrot.lane.b32.xlu0 %v398_v15, %s9002_s23 }
  0x35   : > { %438 = vrot.lane.b32.xlu2 %v400_v16, %s9002_s23 }
  0x3c   : > { %442 = vrot.lane.b32.xlu1 %v402_v18, %s9002_s23  ;;  %440 = vrot.lane.b32.xlu0 %v401_v19, %s9002_s23 }
  0x3d   : > { %444 = vrot.lane.b32.xlu2 %v403_v20, %s9002_s23 }
  0x44   : > { %448 = vrot.lane.b32.xlu1 %v405_v21, %s9002_s23  ;;  %446 = vrot.lane.b32.xlu0 %v404_v22, %s9002_s23 }
  0x45   : > { %450 = vrot.lane.b32.xlu2 %v406_v23, %s9002_s23 }
  0x4c   : > { %454 = vrot.lane.b32.xlu1 %v408_v24, %s9002_s23  ;;  %452 = vrot.lane.b32.xlu0 %v407_v25, %s9002_s23 }
  0x4d   : > { %456 = vrot.lane.b32.xlu2 %v409_v26, %s9002_s23 }
  0x6f   : > { %v419_v27 = vpop.permute.xlu2 %418 }
  0x77   : > { %v421_v28 = vpop.permute.xlu2 %420 }
  0x78   : > { %v9117_v32 = vsel %vm15657_vm0, %v419_v27, %v421_v28 }
  0x79   : > { %15904 = vst [vmem:[#allocation2_spill] sm:$0xff] %v9117_v32  ;;  %v516_v36 = vrot.slane %v9117_v32, 7 }
  0x7f   : > { %v427_v31 = vpop.permute.xlu2 %426 }
  0x86   : > { %v415_v29 = vpop.permute.xlu1 %414  ;;  %v411_v30 = vpop.permute.xlu0 %410 }
  0x87   : > { %v9120_v33 = vsel %vm15657_vm0, 0.0, %v411_v30  ;;  %v433_v49 = vpop.permute.xlu2 %432 }
  0x88   : > { %15905 = vst [vmem:[#allocation3_spill] sm:$0xff] %v9120_v33  ;;  %v511_v37 = vrot.slane %v9120_v33, 7 }
  0x8e   : > { %v417_v34 = vpop.permute.xlu1 %416  ;;  %v413_v35 = vpop.permute.xlu0 %412 }
  0x8f   : > { %v9125_v38 = vsel %vm15657_vm0, %v415_v29, %v417_v34  ;;  %v9128_v39 = vsel %vm15657_vm0, %v417_v34, %v419_v27  ;;  %v9131_v40 = vsel %vm15657_vm0, %v411_v30, %v413_v35  ;;  %v9134_v41 = vsel %vm15657_vm0, %v413_v35, %v415_v29  ;;  %v439_v58 = vpop.permute.xlu2 %438 }
  0x90   : > { %15906 = vst [vmem:[#allocation4_spill] sm:$0xff] %v9125_v38  ;;  %v515_v42 = vrot.slane %v9128_v39, 7  ;;  %v513_v43 = vrot.slane %v9134_v41, 7  ;;  %v514_v44 = vrot.slane %v9125_v38, 7  ;;  %v512_v45 = vrot.slane %v9131_v40, 7 }
  0x91   : > { %15907 = vst [vmem:[#allocation5_spill] sm:$0xff] %v9128_v39 }
  0x92   : > { %15908 = vst [vmem:[#allocation6_spill] sm:$0xff] %v9131_v40  ;;  %v7845_v46 = vpack.i.bf16 %v516_v36, %v515_v42  ;;  %v7840_v47 = vpack.i.bf16 %v514_v44, %v513_v43  ;;  %v7835_v48 = vpack.i.bf16 %v512_v45, %v511_v37 }
  0x93   : > { %15909 = vst [vmem:[#allocation7_spill] sm:$0xff] %v9134_v41 }
  0x94   : > { %7846 = vrot.lane.b32.xlu2 %v7845_v46, %s9003_s24  ;;  %7841 = vrot.lane.b32.xlu1 %v7840_v47, %s9003_s24 }
  0x95   : > { %7836 = vrot.lane.b32.xlu0 %v7835_v48, %s9003_s24 }
  0x96   : > { %v425_v50 = vpop.permute.xlu1 %424  ;;  %v423_v51 = vpop.permute.xlu0 %422 }
  0x97   : > { %v9144_v52 = vsel %vm15657_vm0, %v421_v28, %v423_v51  ;;  %v9147_v53 = vsel %vm15657_vm0, %v423_v51, %v425_v50  ;;  %v9152_v57 = vsel %vm15657_vm0, %v425_v50, %v427_v31  ;;  %v445_v12 = vpop.permute.xlu2 %444 }
  0x98   : > { %15910 = vst [vmem:[#allocation8_spill] sm:$0xff] %v9144_v52  ;;  %v517_v54 = vrot.slane %v9144_v52, 7  ;;  %v518_v55 = vrot.slane %v9147_v53, 7  ;;  %v519_v2 = vrot.slane %v9152_v57, 7 }
  0x99   : > { %15911 = vst [vmem:[#allocation9_spill] sm:$0xff] %v9147_v53 }
  0x9a   : > { %v7850_v56 = vpack.i.bf16 %v518_v55, %v517_v54  ;;  %15912 = vst [vmem:[#allocation10_spill] sm:$0xff] %v9152_v57 }
  0x9d   : > { %7851 = vrot.lane.b32.xlu0 %v7850_v56, %s9003_s24 }
  0x9e   : > { %v431_v59 = vpop.permute.xlu1 %430  ;;  %v429_v60 = vpop.permute.xlu0 %428 }
  0x9f   : > { %v9156_v61 = vsel %vm15657_vm0, %v431_v59, %v433_v49  ;;  %v9159_v62 = vsel %vm15657_vm0, %v427_v31, %v429_v60  ;;  %v9162_v63 = vsel %vm15657_vm0, %v429_v60, %v431_v59  ;;  %v451_v26 = vpop.permute.xlu2 %450  ;;  %v637_v59 = vrot.slane %v9134_v41, 6 }
  0xa0   : > { %v521_v0 = vrot.slane %v9162_v63, 7  ;;  %v522_v1 = vrot.slane %v9156_v61, 7  ;;  %v520_v3 = vrot.slane %v9159_v62, 7  ;;  %v638_v60 = vrot.slane %v9125_v38, 6 }
  0xa2   : > { %v7860_v4 = vpack.i.bf16 %v522_v1, %v521_v0  ;;  %v7855_v5 = vpack.i.bf16 %v520_v3, %v519_v2  ;;  %v636_v0 = vrot.slane %v9131_v40, 6  ;;  %v640_v1 = vrot.slane %v9117_v32, 6 }
  0xa3   : > { %v635_v2 = vrot.slane %v9120_v33, 6 }
  0xa4   : > { %7861 = vrot.lane.b32.xlu2 %v7860_v4, %s9003_s24  ;;  %7856 = vrot.lane.b32.xlu1 %v7855_v5, %s9003_s24  ;;  %v7900_v4 = vpack.i.bf16 %v638_v60, %v637_v59 }
  0xa5   : > { %v7895_v5 = vpack.i.bf16 %v636_v0, %v635_v2  ;;  %v765_v2 = vrot.slane %v9144_v52, 5 }
  0xa6   : > { %v437_v6 = vpop.permute.xlu1 %436  ;;  %v435_v7 = vpop.permute.xlu0 %434 }
  0xa7   : > { %v9171_v8 = vsel %vm15657_vm0, %v433_v49, %v435_v7  ;;  %v9174_v9 = vsel %vm15657_vm0, %v435_v7, %v437_v6  ;;  %v9180_v14 = vsel %vm15657_vm0, %v437_v6, %v439_v58  ;;  %v457_v36 = vpop.permute.xlu2 %456  ;;  %v645_v6 = vrot.slane %v9162_v63, 6 }
  0xa8   : > { %v523_v10 = vrot.slane %v9171_v8, 7  ;;  %v524_v11 = vrot.slane %v9174_v9, 7  ;;  %v525_v22 = vrot.slane %v9180_v14, 7  ;;  %v9210_v44 = vsel %vm15657_vm0, %v457_v36, 0.0 }
  0xa9   : > { %15913 = vst [vmem:[#allocation11_spill] sm:$0xff] %v9210_v44  ;;  %v535_v54 = vrot.slane %v9210_v44, 7  ;;  %v646_v7 = vrot.slane %v9156_v61, 6  ;;  %v659_v0 = vrot.slane %v9210_v44, 6 }
  0xaa   : > { %v7865_v13 = vpack.i.bf16 %v524_v11, %v523_v10  ;;  %v644_v10 = vrot.slane %v9159_v62, 6  ;;  %v641_v11 = vrot.slane %v9144_v52, 6 }
  0xac   : > { %7866 = vrot.lane.b32.xlu0 %v7865_v13, %s9003_s24  ;;  %v643_v13 = vrot.slane %v9152_v57, 6 }
  0xae   : > { %v443_v15 = vpop.permute.xlu1 %442  ;;  %v441_v16 = vpop.permute.xlu0 %440 }
  0xaf   : > { %v9183_v17 = vsel %vm15657_vm0, %v443_v15, %v445_v12  ;;  %v9186_v18 = vsel %vm15657_vm0, %v439_v58, %v441_v16  ;;  %v9189_v19 = vsel %vm15657_vm0, %v441_v16, %v443_v15  ;;  %v639_v58 = vrot.slane %v9128_v39, 6 }
  0xb0   : > { %v527_v20 = vrot.slane %v9189_v19, 7  ;;  %v528_v21 = vrot.slane %v9183_v17, 7  ;;  %v526_v23 = vrot.slane %v9186_v18, 7  ;;  %v7920_v15 = vpack.i.bf16 %v646_v7, %v645_v6 }
  0xb1   : > { %v7905_v3 = vpack.i.bf16 %v640_v1, %v639_v58  ;;  %v7915_v16 = vpack.i.bf16 %v644_v10, %v643_v13  ;;  %v759_v58 = vrot.slane %v9120_v33, 5  ;;  %v768_v1 = vrot.slane %v9159_v62, 5 }
  0xb2   : > { %v7875_v24 = vpack.i.bf16 %v528_v21, %v527_v20  ;;  %v7870_v25 = vpack.i.bf16 %v526_v23, %v525_v22  ;;  %v651_v21 = vrot.slane %v9189_v19, 6  ;;  %v652_v22 = vrot.slane %v9183_v17, 6 }
  0xb3   : > { %v650_v23 = vrot.slane %v9186_v18, 6  ;;  %v764_v6 = vrot.slane %v9117_v32, 5  ;;  %v771_v13 = vrot.slane %v9171_v8, 5 }
  0xb4   : > { %7876 = vrot.lane.b32.xlu2 %v7875_v24, %s9003_s24  ;;  %7871 = vrot.lane.b32.xlu1 %v7870_v25, %s9003_s24  ;;  %v647_v24 = vrot.slane %v9171_v8, 6  ;;  %v648_v25 = vrot.slane %v9174_v9, 6 }
  0xb6   : > { %v449_v27 = vpop.permute.xlu1 %448  ;;  %v447_v28 = vpop.permute.xlu0 %446 }
  0xb7   : > { %v9198_v29 = vsel %vm15657_vm0, %v445_v12, %v447_v28  ;;  %v9201_v30 = vsel %vm15657_vm0, %v447_v28, %v449_v27  ;;  %v9207_v37 = vsel %vm15657_vm0, %v449_v27, %v451_v26  ;;  %v642_v12 = vrot.slane %v9147_v53, 6 }
  0xb8   : > { %v529_v31 = vrot.slane %v9198_v29, 7  ;;  %v530_v34 = vrot.slane %v9201_v30, 7  ;;  %v531_v50 = vrot.slane %v9207_v37, 7  ;;  %v7935_v27 = vpack.i.bf16 %v652_v22, %v651_v21 }
  0xb9   : > { %v7910_v20 = vpack.i.bf16 %v642_v12, %v641_v11  ;;  %v774_v12 = vrot.slane %v9186_v18, 5  ;;  %v773_v21 = vrot.slane %v9180_v14, 5 }
  0xba   : > { %v7880_v35 = vpack.i.bf16 %v530_v34, %v529_v31  ;;  %v7925_v31 = vpack.i.bf16 %v648_v25, %v647_v24 }
  0xbb   : > { %v7990_v22 = vpack.i.bf16 %v774_v12, %v773_v21  ;;  %v1010_v12 = vrot.slane %v9125_v38, 3  ;;  %v1134_v21 = vrot.slane %v9125_v38, 2 }
  0xbc   : > { %7881 = vrot.lane.b32.xlu0 %v7880_v35, %s9003_s24 }
  0xbe   : > { %v455_v42 = vpop.permute.xlu1 %454  ;;  %v453_v43 = vpop.permute.xlu0 %452 }
  0xbf   : > { %v9213_v45 = vsel %vm15657_vm0, %v455_v42, %v457_v36  ;;  %v9216_v46 = vsel %vm15657_vm0, %v451_v26, %v453_v43  ;;  %v9219_v47 = vsel %vm15657_vm0, %v453_v43, %v455_v42  ;;  %v649_v26 = vrot.slane %v9180_v14, 6 }
  0xc0   : > { %v533_v48 = vrot.slane %v9219_v47, 7  ;;  %v534_v49 = vrot.slane %v9213_v45, 7  ;;  %v532_v51 = vrot.slane %v9216_v46, 7  ;;  %v657_v34 = vrot.slane %v9219_v47, 6 }
  0xc1   : > { %v7930_v28 = vpack.i.bf16 %v650_v23, %v649_v26  ;;  %v658_v35 = vrot.slane %v9213_v45, 6  ;;  %v656_v36 = vrot.slane %v9216_v46, 6  ;;  %v653_v42 = vrot.slane %v9198_v29, 6 }
  0xc2   : > { %v7890_v55 = vpack.i.bf16 %v534_v49, %v533_v48  ;;  %v7885_v56 = vpack.i.bf16 %v532_v51, %v531_v50  ;;  %v654_v43 = vrot.slane %v9201_v30, 6  ;;  %v655_v48 = vrot.slane %v9207_v37, 6 }
  0xc3   : > { %v7950_v49 = vpack.i.bf16 %v658_v35, %v657_v34  ;;  %v780_v25 = vrot.slane %v9216_v46, 5  ;;  %v777_v26 = vrot.slane %v9198_v29, 5  ;;  %v779_v34 = vrot.slane %v9207_v37, 5 }
  0xc4   : > { %584 = vrot.lane.b32.xlu0 %v535_v54, %s9003_s24  ;;  %7891 = vrot.lane.b32.xlu2 %v7890_v55, %s9003_s24  ;;  %v7945_v50 = vpack.i.bf16 %v656_v36, %v655_v48  ;;  %v7940_v51 = vpack.i.bf16 %v654_v43, %v653_v42  ;;  %v761_v54 = vrot.slane %v9134_v41, 5  ;;  %v762_v55 = vrot.slane %v9125_v38, 5 }
  0xc5   : > { %7886 = vrot.lane.b32.xlu1 %v7885_v56, %s9003_s24  ;;  %v760_v56 = vrot.slane %v9131_v40, 5  ;;  %v8005_v35 = vpack.i.bf16 %v780_v25, %v779_v34  ;;  %v884_v48 = vrot.slane %v9131_v40, 4  ;;  %vm1636_vm0 = vcmask 72704  }
  0xc6   : > { %v7960_v59 = vpack.i.bf16 %v762_v55, %v761_v54  ;;  %v783_v55 = vrot.slane %v9210_v44, 5 }
  0xc7   : > { %v7955_v60 = vpack.i.bf16 %v760_v56, %v759_v58 }
  0xcc   : > { %7906 = vrot.lane.b32.xlu0 %v7905_v3, %s9004_s25  ;;  %7901 = vrot.lane.b32.xlu2 %v7900_v4, %s9004_s25  ;;  %v766_v3 = vrot.slane %v9147_v53, 5  ;;  %v763_v4 = vrot.slane %v9128_v39, 5 }
  0xcd   : > { %7896 = vrot.lane.b32.xlu1 %v7895_v5, %s9004_s25  ;;  %v767_v5 = vrot.slane %v9152_v57, 5 }
  0xce   : > { %v7970_v10 = vpack.i.bf16 %v766_v3, %v765_v2  ;;  %v7965_v11 = vpack.i.bf16 %v764_v6, %v763_v4  ;;  %v1131_v2 = vrot.slane %v9120_v33, 2  ;;  %v1007_v3 = vrot.slane %v9120_v33, 3 }
  0xcf   : > { %v7975_v7 = vpack.i.bf16 %v768_v1, %v767_v5  ;;  %v1008_v1 = vrot.slane %v9131_v40, 3 }
  0xd1   : > { %v8020_v6 = vpack.i.bf16 %v1008_v1, %v1007_v3 }
  0xd4   : > { %7921 = vrot.lane.b32.xlu0 %v7920_v15, %s9004_s25  ;;  %7916 = vrot.lane.b32.xlu2 %v7915_v16, %s9004_s25  ;;  %v772_v15 = vrot.slane %v9174_v9, 5  ;;  %v769_v16 = vrot.slane %v9162_v63, 5 }
  0xd5   : > { %7911 = vrot.lane.b32.xlu1 %v7910_v20, %s9004_s25  ;;  %v770_v20 = vrot.slane %v9156_v61, 5 }
  0xd6   : > { %v7985_v23 = vpack.i.bf16 %v772_v15, %v771_v13 }
  0xd7   : > { %v7980_v24 = vpack.i.bf16 %v770_v20, %v769_v16  ;;  %v1133_v20 = vrot.slane %v9134_v41, 2 }
  0xd9   : > { %v8045_v25 = vpack.i.bf16 %v1134_v21, %v1133_v20 }
  0xdc   : > { %7936 = vrot.lane.b32.xlu0 %v7935_v27, %s9004_s25  ;;  %7931 = vrot.lane.b32.xlu2 %v7930_v28, %s9004_s25  ;;  %v778_v27 = vrot.slane %v9201_v30, 5  ;;  %v775_v28 = vrot.slane %v9189_v19, 5 }
  0xdd   : > { %7926 = vrot.lane.b32.xlu1 %v7925_v31, %s9004_s25  ;;  %v776_v31 = vrot.slane %v9183_v17, 5 }
  0xde   : > { %v8000_v36 = vpack.i.bf16 %v778_v27, %v777_v26 }
  0xdf   : > { %v7995_v42 = vpack.i.bf16 %v776_v31, %v775_v28  ;;  %v887_v31 = vrot.slane %v9128_v39, 4 }
  0xe4   : > { %7951 = vrot.lane.b32.xlu0 %v7950_v49, %s9004_s25  ;;  %7946 = vrot.lane.b32.xlu2 %v7945_v50, %s9004_s25  ;;  %v781_v49 = vrot.slane %v9219_v47, 5  ;;  %v782_v50 = vrot.slane %v9213_v45, 5 }
  0xe5   : > { %7941 = vrot.lane.b32.xlu1 %v7940_v51, %s9004_s25  ;;  %v883_v51 = vrot.slane %v9120_v33, 4 }
  0xe6   : > { %v8010_v56 = vpack.i.bf16 %v782_v50, %v781_v49 }
  0xe7   : > { %v8015_v54 = vpack.i.bf16 %v884_v48, %v883_v51 }
  0xec   : > { %7961 = vrot.lane.b32.xlu0 %v7960_v59, %s9005_s26  ;;  %7956 = vrot.lane.b32.xlu2 %v7955_v60, %s9005_s26  ;;  %v1132_v59 = vrot.slane %v9131_v40, 2  ;;  %v885_v60 = vrot.slane %v9134_v41, 4 }
  0xed   : > { %708 = vrot.lane.b32.xlu1 %v659_v0, %s9004_s25  ;;  %v886_v0 = vrot.slane %v9125_v38, 4 }
  0xee   : > { %v9300_v43 = vpop.permute.xlu2 %7846  ;;  %v8030_v4 = vpack.i.bf16 %v1132_v59, %v1131_v2  ;;  %v1136_v59 = vrot.slane %v9117_v32, 2 }
  0xef   : > { %15914 = vst [vmem:[#allocation12_spill] sm:$0xff] %v9300_v43  ;;  %v8025_v5 = vpack.i.bf16 %v886_v0, %v885_v60  ;;  %v1012_v60 = vrot.slane %v9117_v32, 3  ;;  %v1266_v43 = vrot.slane %v9156_v61, 1 }
  0xf4   : > { %7976 = vrot.lane.b32.xlu0 %v7975_v7, %s9005_s26  ;;  %7971 = vrot.lane.b32.xlu2 %v7970_v10, %s9005_s26 }
  0xf5   : > { %7966 = vrot.lane.b32.xlu1 %v7965_v11, %s9005_s26  ;;  %v1009_v11 = vrot.slane %v9134_v41, 3 }
  0xf7   : > { %v8035_v13 = vpack.i.bf16 %v1010_v12, %v1009_v11  ;;  %v1259_v11 = vrot.slane %v9128_v39, 1  ;;  %v1260_v12 = vrot.slane %v9117_v32, 1 }
  0xf9   : > { %v8070_v20 = vpack.i.bf16 %v1260_v12, %v1259_v11  ;;  %v1140_v12 = vrot.slane %v9159_v62, 2 }
  0xfc   : > { %7991 = vrot.lane.b32.xlu0 %v7990_v22, %s9005_s26  ;;  %7986 = vrot.lane.b32.xlu2 %v7985_v23, %s9005_s26  ;;  %v1256_v23 = vrot.slane %v9131_v40, 1 }
  0xfd   : > { %7981 = vrot.lane.b32.xlu1 %v7980_v24, %s9005_s26  ;;  %v1255_v24 = vrot.slane %v9120_v33, 1 }
  0xfe   : > { %v9310_v58 = vpop.permute.xlu2 %7861 }
  0xff   : > { %v8040_v26 = vpack.i.bf16 %v1256_v23, %v1255_v24  ;;  %v1137_v24 = vrot.slane %v9144_v52, 2 }
 0x104   : > { %8006 = vrot.lane.b32.xlu0 %v8005_v35, %s9005_s26  ;;  %8001 = vrot.lane.b32.xlu2 %v8000_v36, %s9005_s26  ;;  %v1257_v35 = vrot.slane %v9134_v41, 1  ;;  %v1258_v36 = vrot.slane %v9125_v38, 1 }
 0x105   : > { %7996 = vrot.lane.b32.xlu1 %v7995_v42, %s9005_s26  ;;  %v888_v42 = vrot.slane %v9117_v32, 4 }
 0x106   : > { %v9338_v22 = vpop.permute.xlu1 %7841  ;;  %v8050_v49 = vpack.i.bf16 %v1258_v36, %v1257_v35  ;;  %v1013_v35 = vrot.slane %v9144_v52, 3  ;;  %v1014_v36 = vrot.slane %v9147_v53, 3 }
 0x107   : > { %v9318_v7 = vpop.permute.xlu0 %7836  ;;  %v8055_v48 = vpack.i.bf16 %v888_v42, %v887_v31  ;;  %v891_v42 = vrot.slane %v9152_v57, 4 }
 0x10c   : > { %8016 = vrot.lane.b32.xlu0 %v8015_v54, %s9006_s27  ;;  %832 = vrot.lane.b32.xlu2 %v783_v55, %s9005_s26  ;;  %v1135_v54 = vrot.slane %v9128_v39, 2 }
 0x10d   : > { %8011 = vrot.lane.b32.xlu1 %v8010_v56, %s9005_s26  ;;  %v1011_v56 = vrot.slane %v9128_v39, 3 }
 0x10e   : > { %v9323_v10 = vpop.permute.xlu2 %7876  ;;  %v8065_v0 = vpack.i.bf16 %v1136_v59, %v1135_v54  ;;  %v8080_v54 = vpack.i.bf16 %v1014_v36, %v1013_v35  ;;  %v893_v36 = vrot.slane %v9162_v63, 4 }
 0x10f   : > { %v9332_v15 = vpop.permute.xlu0 %7851  ;;  %v8060_v1 = vpack.i.bf16 %v1012_v60, %v1011_v56  ;;  %v1016_v60 = vrot.slane %v9159_v62, 3 }
 0x110   : > { %15915 = vst [vmem:[#allocation13_spill] sm:$0xff] %v9332_v15 }
 0x114   : > { %8031 = vrot.lane.b32.xlu0 %v8030_v4, %s9007_s28  ;;  %8026 = vrot.lane.b32.xlu2 %v8025_v5, %s9006_s27  ;;  %v889_v4 = vrot.slane %v9144_v52, 4  ;;  %v890_v5 = vrot.slane %v9147_v53, 4 }
 0x115   : > { %8021 = vrot.lane.b32.xlu1 %v8020_v6, %s9008_s29 }
 0x116   : > { %v9351_v34 = vpop.permute.xlu1 %7856 }
 0x117   : > { %15917 = vst [vmem:[#allocation15_spill] sm:$0xff] %v9351_v34 }
 0x11c   : > { %8036 = vrot.lane.b32.xlu0 %v8035_v13, %s9008_s29  ;;  %1381 = vrot.lane.b32.xlu2 %v9131_v40, %s9009_s30  ;;  %v8075_v13 = vpack.i.bf16 %v890_v5, %v889_v4 }
 0x11d   : > { %1379 = vrot.lane.b32.xlu1 %v9120_v33, %s9009_s30 }
 0x11e   : > { %v9334_v16 = vpop.permute.xlu2 %7891  ;;  %v9346_v27 = vpop.permute.xlu0 %7866 }
 0x11f   : > { %v15619_v35 = vunpack.i.l.bf16 %v9346_v27  ;;  %v15928_v33 = vunpack.i.l.bf16 %v9346_v27 }
 0x124   : > { %1383 = vrot.lane.b32.xlu0 %v9134_v41, %s9009_s30  ;;  %8046 = vrot.lane.b32.xlu2 %v8045_v25, %s9007_s28  ;;  %v1138_v25 = vrot.slane %v9147_v53, 2  ;;  %v15929_v41 = vunpack.i.h.bf16 %v9346_v27 }
 0x125   : > { %8041 = vrot.lane.b32.xlu1 %v8040_v26, %s9010_s12  ;;  %v892_v26 = vrot.slane %v9159_v62, 4 }
 0x126   : > { %v9348_v28 = vpop.permute.xlu2 %7901  ;;  %v9365_v55 = vpop.permute.xlu1 %7871 }
 0x127   : > { %15916 = vst [vmem:[#allocation14_spill] sm:$0xff] %v9348_v28 }
 0x12c   : > { %1385 = vrot.lane.b32.xlu0 %v9125_v38, %s9009_s30  ;;  %8056 = vrot.lane.b32.xlu2 %v8055_v48, %s9006_s27  ;;  %v8090_v48 = vpack.i.bf16 %v1138_v25, %v1137_v24  ;;  %v1262_v24 = vrot.slane %v9147_v53, 1  ;;  %v1139_v25 = vrot.slane %v9152_v57, 2 }
 0x12d   : > { %8051 = vrot.lane.b32.xlu1 %v8050_v49, %s9010_s12  ;;  %v8085_v49 = vpack.i.bf16 %v892_v26, %v891_v42  ;;  %v15618_v26 = vunpack.i.h.bf16 %v9346_v27 }
 0x12e   : > { %v9360_v50 = vpop.permute.xlu2 %7916  ;;  %v9362_v51 = vpop.permute.xlu0 %7881 }
 0x12f   : > { %15918 = vst [vmem:[#allocation16_spill] sm:$0xff] %v9360_v50 }
 0x134   : > { %1387 = vrot.lane.b32.xlu0 %v9128_v39, %s9009_s30  ;;  %8066 = vrot.lane.b32.xlu2 %v8065_v0, %s9007_s28  ;;  %v1144_v39 = vrot.slane %v9174_v9, 2 }
 0x135   : > { %8061 = vrot.lane.b32.xlu1 %v8060_v1, %s9008_s29  ;;  %v1015_v1 = vrot.slane %v9152_v57, 3 }
 0x136   : > { %v9374_v2 = vpop.permute.xlu2 %7931  ;;  %v9376_v3 = vpop.permute.xlu0 %584 }
 0x137   : > { %v9380_v6 = vpop.permute.xlu1 %7886  ;;  %v8095_v4 = vpack.i.bf16 %v1016_v60, %v1015_v1  ;;  %v599_v1 = vsel %vm586_vm1, %v15619_v35, %v15618_v26 }
 0x13c   : > { %8076 = vrot.lane.b32.xlu0 %v8075_v13, %s9006_s27  ;;  %1389 = vrot.lane.b32.xlu2 %v9117_v32, %s9009_s30 }
 0x13d   : > { %8071 = vrot.lane.b32.xlu1 %v8070_v20, %s9010_s12  ;;  %v1261_v20 = vrot.slane %v9144_v52, 1 }
 0x13e   : > { %v9388_v21 = vpop.permute.xlu2 %7946  ;;  %v9390_v23 = vpop.permute.xlu0 %7906 }
 0x13f   : > { %15919 = vst [vmem:[#allocation17_spill] sm:$0xff] %v9390_v23  ;;  %v9395_v31 = vpop.permute.xlu1 %7896  ;;  %v8100_v60 = vpack.i.bf16 %v1262_v24, %v1261_v20  ;;  %v1265_v23 = vrot.slane %v9162_v63, 1 }
 0x144   : > { %8091 = vrot.lane.b32.xlu0 %v8090_v48, %s9007_s28  ;;  %8086 = vrot.lane.b32.xlu2 %v8085_v49, %s9006_s27  ;;  %v8105_v49 = vpack.i.bf16 %v1140_v12, %v1139_v25  ;;  %v1263_v25 = vrot.slane %v9152_v57, 1 }
 0x145   : > { %8081 = vrot.lane.b32.xlu1 %v8080_v54, %s9008_s29  ;;  %v894_v54 = vrot.slane %v9156_v61, 4 }
 0x146   : > { %v9403_v56 = vpop.permute.xlu2 %7956  ;;  %v9405_v59 = vpop.permute.xlu0 %7921 }
 0x147   : > { %v9408_v0 = vpop.permute.xlu1 %7911  ;;  %v8115_v24 = vpack.i.bf16 %v894_v54, %v893_v36  ;;  %v15633_v54 = vunpack.i.l.bf16 %v9362_v51 }
 0x148   : > { %15920 = vst [vmem:[#allocation18_spill] sm:$0xff] %v9408_v0  ;;  %v1019_v0 = vrot.slane %v9171_v8, 3 }
 0x14c   : > { %8096 = vrot.lane.b32.xlu0 %v8095_v4, %s9008_s29  ;;  %1393 = vrot.lane.b32.xlu2 %v9147_v53, %s9009_s30  ;;  %v1141_v53 = vrot.slane %v9162_v63, 2 }
 0x14d   : > { %1391 = vrot.lane.b32.xlu1 %v9144_v52, %s9009_s30 }
 0x14e   : > { %v9416_v5 = vpop.permute.xlu2 %7971  ;;  %v9418_v11 = vpop.permute.xlu0 %7936 }
 0x14f   : > { %15921 = vst [vmem:[#allocation19_spill] sm:$0xff] %v9416_v5  ;;  %v9421_v13 = vpop.permute.xlu1 %7926  ;;  %v1142_v5 = vrot.slane %v9156_v61, 2 }
 0x150   : > { %v15622_v42 = vunpack.i.h.bf16 %v9421_v13  ;;  %v15621_v48 = vunpack.i.l.bf16 %v9421_v13 }
 0x152   : > { %v723_v4 = vsel %vm710_vm2, %v15621_v48, %v15622_v42  ;;  %v1467_v48 = vsel %vm1454_vm3, %v9171_v8, %v599_v1 }
 0x153   : > { %v1492_v42 = vsel %vm1479_vm4, %v1467_v48, %v723_v4  ;;  %v895_v48 = vrot.slane %v9171_v8, 4  ;;  %v896_v4 = vrot.slane %v9174_v9, 4 }
 0x154   : > { %1395 = vrot.lane.b32.xlu0 %v9152_v57, %s9009_s30  ;;  %8106 = vrot.lane.b32.xlu2 %v8105_v49, %s9007_s28  ;;  %v1264_v49 = vrot.slane %v9159_v62, 1 }
 0x155   : > { %8101 = vrot.lane.b32.xlu1 %v8100_v60, %s9010_s12 }
 0x156   : > { %v9446_v12 = vpop.permute.xlu2 %7986  ;;  %v9448_v20 = vpop.permute.xlu0 %7951  ;;  %v8110_v36 = vpack.i.bf16 %v1264_v49, %v1263_v25 }
 0x157   : > { %v15628_v26 = vunpack.i.h.bf16 %v9446_v12  ;;  %v15627_v60 = vunpack.i.l.bf16 %v9446_v12  ;;  %v9454_v35 = vpop.permute.xlu1 %7941 }
 0x158   : > { %v15635_v1 = vunpack.i.h.bf16 %v9454_v35  ;;  %v15634_v32 = vunpack.i.l.bf16 %v9454_v35 }
 0x159   : > { %v847_v57 = vsel %vm834_vm5, %v15627_v60, %v15628_v26  ;;  %v1017_v60 = vrot.slane %v9162_v63, 3 }
 0x15a   : > { %v9468_v52 = vsel %vm1504_vm6, %v1492_v42, %v847_v57  ;;  %v1018_v57 = vrot.slane %v9156_v61, 3  ;;  %v15923_v42 = vunpack.i.h.bf16 %v9362_v51 }
 0x15b   : > { %15922 = vst [vmem:[#allocation20_spill] sm:$0xff] %v9468_v52  ;;  %v8130_v52 = vpack.i.bf16 %v1142_v5, %v1141_v53 }
 0x15c   : > { %8116 = vrot.lane.b32.xlu0 %v8115_v24, %s9006_s27  ;;  %1397 = vrot.lane.b32.xlu2 %v9159_v62, %s9009_s30  ;;  %v605_v26 = vsel %vm586_vm1, %v15633_v54, %v15923_v42  ;;  %v729_v24 = vsel %vm710_vm2, %v15634_v32, %v15635_v1  ;;  %v1143_v54 = vrot.slane %v9171_v8, 2  ;;  %v8125_v1 = vpack.i.bf16 %v896_v4, %v895_v48 }
 0x15d   : > { %8111 = vrot.lane.b32.xlu1 %v8110_v36, %s9010_s12  ;;  %v1020_v36 = vrot.slane %v9174_v9, 3  ;;  %v1473_v32 = vsel %vm1454_vm3, %v9198_v29, %v605_v26  ;;  %v8120_v38 = vpack.i.bf16 %v1018_v57, %v1017_v60  ;;  %v898_v26 = vrot.slane %v9186_v18, 4 }
 0x15e   : > { %v9491_v25 = vpop.permute.xlu2 %8001  ;;  %v9493_v49 = vpop.permute.xlu0 %7961  ;;  %v1498_v53 = vsel %vm1479_vm4, %v1473_v32, %v729_v24  ;;  %v1267_v60 = vrot.slane %v9171_v8, 1  ;;  %v1268_v48 = vrot.slane %v9174_v9, 1  ;;  %v7864_v32 = vunpack.i.h.bf16 %v9310_v58 }
 0x15f   : > { %15924 = vst [vmem:[#allocation21_spill] sm:$0xff] %v9493_v49  ;;  %v15642_v44 = vunpack.i.h.bf16 %v9491_v25  ;;  %v15641_v15 = vunpack.i.l.bf16 %v9491_v25  ;;  %v9498_v42 = vpop.permute.xlu1 %708  ;;  %v7863_v4 = vunpack.i.l.bf16 %v9310_v58  ;;  %v7879_v57 = vunpack.i.h.bf16 %v9323_v10 }
 0x160   : > { %v7878_v24 = vunpack.i.l.bf16 %v9323_v10  ;;  %v9530_v58 = vpack.i.bf16 %v1144_v39, %v1143_v54  ;;  %v9532_v49 = vpack.i.bf16 %v1266_v43, %v1265_v23  ;;  %v9547_v43 = vpack.i.bf16 %v1268_v48, %v1267_v60 }
 0x161   : > { %v853_v5 = vsel %vm834_vm5, %v15641_v15, %v15642_v44  ;;  %v7874_v44 = vunpack.i.h.bf16 %v9365_v55  ;;  %v7933_v15 = vunpack.i.l.bf16 %v9374_v2  ;;  %v15927_v54 = vunpack.i.h.bf16 %v9351_v34 }
 0x162   : > { %v9514_v40 = vsel %vm1504_vm6, %v1498_v53, %v853_v5  ;;  %v8135_v53 = vpack.i.bf16 %v1020_v36, %v1019_v0  ;;  %v897_v5 = vrot.slane %v9180_v14, 4  ;;  %v7923_v36 = vunpack.i.l.bf16 %v9405_v59 }
 0x163   : > { %15925 = vst [vmem:[#allocation22_spill] sm:$0xff] %v9514_v40  ;;  %v7873_v40 = vunpack.i.l.bf16 %v9365_v55  ;;  %v597_v55 = vsel %vm586_vm1, %v7863_v4, %v7864_v32  ;;  %v596_v10 = vsel %vm586_vm1, %v15927_v54, %v7863_v4  ;;  %v7888_v23 = vunpack.i.l.bf16 %v9380_v6 }
 0x164   : > { %8131 = vrot.lane.b32.xlu0 %v8130_v52, %s9007_s28  ;;  %8126 = vrot.lane.b32.xlu2 %v8125_v1, %s9006_s27  ;;  %v9540_v0 = vpack.i.bf16 %v898_v26, %v897_v5  ;;  %v598_v26 = vsel %vm586_vm1, %v7864_v32, %v15928_v33  ;;  %v7924_v5 = vunpack.i.h.bf16 %v9405_v59  ;;  %v1465_v4 = vsel %vm1454_vm3, %v9162_v63, %v597_v55 }
 0x165   : > { %8121 = vrot.lane.b32.xlu1 %v8120_v38, %s9008_s29  ;;  %v603_v38 = vsel %vm586_vm1, %v7878_v24, %v7879_v57  ;;  %v601_v60 = vsel %vm586_vm1, %v7873_v40, %v7874_v44  ;;  %v15930_v54 = vunpack.i.h.bf16 %v9374_v2  ;;  %v7948_v59 = vunpack.i.l.bf16 %v9388_v21 }
 0x166   : > { %v9536_v52 = vpop.permute.xlu2 %832  ;;  %v9538_v1 = vpop.permute.xlu0 %7976  ;;  %v1466_v27 = vsel %vm1454_vm3, %v9156_v61, %v598_v26  ;;  %v602_v48 = vsel %vm586_vm1, %v7874_v44, %v7878_v24  ;;  %v15651_v32 = vunpack.i.h.bf16 %v9360_v50  ;;  %v721_v34 = vsel %vm710_vm2, %v7923_v36, %v7924_v5 }
 0x167   : > { %v9545_v39 = vpop.permute.xlu1 %7966  ;;  %v725_v33 = vsel %vm710_vm2, %v7933_v15, %v15930_v54  ;;  %v1469_v54 = vsel %vm1454_vm3, %v9180_v14, %v601_v60  ;;  %v15932_v24 = vunpack.i.h.bf16 %v9362_v51  ;;  %v15935_v60 = vunpack.i.h.bf16 %v9421_v13 }
 0x168   : > { %15926 = vst [vmem:[#allocation23_spill] sm:$0xff] %v9545_v39  ;;  %v600_v39 = vsel %vm586_vm1, %v15929_v41, %v7873_v40  ;;  %v1471_v41 = vsel %vm1454_vm3, %v9189_v19, %v603_v38  ;;  %v1464_v40 = vsel %vm1454_vm3, %v9159_v62, %v596_v10  ;;  %v15931_v62 = vunpack.i.l.bf16 %v9362_v51 }
 0x169   : > { %v1468_v55 = vsel %vm1454_vm3, %v9174_v9, %v600_v39  ;;  %v1494_v44 = vsel %vm1479_vm4, %v1469_v54, %v725_v33  ;;  %v606_v38 = vsel %vm586_vm1, %v15932_v24, %v7888_v23  ;;  %v15933_v39 = vunpack.i.h.bf16 %v9380_v6 }
 0x16a   : > { %v604_v10 = vsel %vm586_vm1, %v7879_v57, %v15931_v62  ;;  %v720_v57 = vsel %vm710_vm2, %v15651_v32, %v7923_v36  ;;  %v724_v51 = vsel %vm710_vm2, %v15935_v60, %v7933_v15  ;;  %v15936_v33 = vunpack.i.l.bf16 %v9421_v13 }
 0x16b   : > { %v607_v26 = vsel %vm586_vm1, %v7888_v23, %v15933_v39  ;;  %v7939_v24 = vunpack.i.h.bf16 %v9418_v11  ;;  %v7938_v36 = vunpack.i.l.bf16 %v9418_v11  ;;  %v15653_v32 = vunpack.i.h.bf16 %v9538_v1 }
 0x16c   : > { %8136 = vrot.lane.b32.xlu0 %v8135_v53, %s9008_s29  ;;  %1401 = vrot.lane.b32.xlu2 %v9156_v61, %s9009_s30  ;;  %v15934_v53 = vunpack.i.h.bf16 %v9388_v21  ;;  %v722_v54 = vsel %vm710_vm2, %v7924_v5, %v15936_v33  ;;  %v1493_v5 = vsel %vm1479_vm4, %v1468_v55, %v724_v51  ;;  %v15937_v60 = vunpack.i.h.bf16 %v9446_v12 }
 0x16d   : > { %1399 = vrot.lane.b32.xlu1 %v9162_v63, %s9009_s30  ;;  %v1490_v63 = vsel %vm1479_vm4, %v1465_v4, %v721_v34  ;;  %v1491_v13 = vsel %vm1479_vm4, %v1466_v27, %v722_v54  ;;  %v15938_v4 = vunpack.i.l.bf16 %v9446_v12  ;;  %v1489_v55 = vsel %vm1479_vm4, %v1464_v40, %v720_v57 }
 0x16e   : > { %v731_v61 = vsel %vm710_vm2, %v7948_v59, %v15934_v53  ;;  %v9611_v23 = vpop.permute.xlu2 %8026  ;;  %v7992_v62 = vpop.permute.xlu0 %7991  ;;  %v7894_v54 = vunpack.i.h.bf16 %v9334_v16  ;;  %v1470_v57 = vsel %vm1454_vm3, %v9186_v18, %v602_v48  ;;  %v15941_v48 = vunpack.i.l.bf16 %v9454_v35 }
 0x16f   : > { %v7982_v39 = vpop.permute.xlu1 %7981  ;;  %v7994_v53 = vunpack.i.h.bf16 %v7992_v62  ;;  %v7993_v50 = vunpack.i.l.bf16 %v7992_v62 }
 0x170   : > { %v7984_v28 = vunpack.i.h.bf16 %v7982_v39  ;;  %v7983_v15 = vunpack.i.l.bf16 %v7982_v39 }
 0x171   : > { %v848_v33 = vsel %vm834_vm5, %v15937_v60, %v7993_v50  ;;  %v849_v34 = vsel %vm834_vm5, %v7993_v50, %v7994_v53  ;;  %v15939_v60 = vunpack.i.h.bf16 %v9374_v2  ;;  %v1472_v2 = vsel %vm1454_vm3, %v9183_v17, %v604_v10 }
 0x172   : > { %v846_v62 = vsel %vm834_vm5, %v7984_v28, %v15938_v4  ;;  %v844_v11 = vsel %vm834_vm5, %v15653_v32, %v7983_v15  ;;  %v845_v39 = vsel %vm834_vm5, %v7983_v15, %v7984_v28  ;;  %v9631_v27 = vsel %vm1504_vm6, %v1493_v5, %v848_v33  ;;  %v15950_v32 = vld [vmem:[#allocation3_spill] sm:$0xff] }
 0x173   : > { %v9635_v51 = vsel %vm1504_vm6, %v1490_v63, %v845_v39  ;;  %v9638_v50 = vsel %vm1504_vm6, %v1491_v13, %v846_v62  ;;  %v9641_v12 = vsel %vm1504_vm6, %v1494_v44, %v849_v34  ;;  %v726_v28 = vsel %vm710_vm2, %v15939_v60, %v7938_v36 }
 0x174   : > { %v727_v15 = vsel %vm710_vm2, %v7938_v36, %v7939_v24  ;;  %1403 = vrot.lane.b32.xlu0 %v9171_v8, %s9009_s30  ;;  %8146 = vrot.lane.b32.xlu2 %v9530_v58, %s9007_s28  ;;  %v9653_v40 = vsel %vm1504_vm6, %v1489_v55, %v844_v11  ;;  %v7893_v44 = vunpack.i.l.bf16 %v9334_v16  ;;  %v1475_v63 = vsel %vm1454_vm3, %v9207_v37, %v607_v26 }
 0x175   : > { %8141 = vrot.lane.b32.xlu1 %v9532_v49, %s9010_s12  ;;  %v1474_v8 = vsel %vm1454_vm3, %v9201_v30, %v606_v38  ;;  %v1500_v58 = vsel %vm1479_vm4, %v1475_v63, %v731_v61  ;;  %v15940_v36 = vunpack.i.h.bf16 %v9454_v35  ;;  %v728_v13 = vsel %vm710_vm2, %v7939_v24, %v15941_v48 }
 0x176   : > { %v9673_v10 = vpop.permute.xlu2 %1381  ;;  %v8007_v5 = vpop.permute.xlu0 %8006  ;;  %v1495_v26 = vsel %vm1479_vm4, %v1470_v57, %v726_v28  ;;  %v1496_v49 = vsel %vm1479_vm4, %v1471_v41, %v727_v15  ;;  %v7954_v61 = vunpack.i.h.bf16 %v9448_v20  ;;  %v7953_v4 = vunpack.i.l.bf16 %v9448_v20 }
 0x177   : > { %v730_v16 = vsel %vm710_vm2, %v15940_v36, %v7948_v59  ;;  %v7997_v33 = vpop.permute.xlu1 %7996  ;;  %v8009_v34 = vunpack.i.h.bf16 %v8007_v5  ;;  %v8008_v38 = vunpack.i.l.bf16 %v8007_v5  ;;  %v1497_v35 = vsel %vm1479_vm4, %v1472_v2, %v728_v13 }
 0x178   : > { %v7999_v62 = vunpack.i.h.bf16 %v7997_v33  ;;  %v7998_v59 = vunpack.i.l.bf16 %v7997_v33  ;;  %v1499_v24 = vsel %vm1479_vm4, %v1474_v8, %v730_v16  ;;  %v15942_v11 = vunpack.i.h.bf16 %v9491_v25 }
 0x179   : > { %v855_v55 = vsel %vm834_vm5, %v8008_v38, %v8009_v34  ;;  %v15943_v41 = vunpack.i.l.bf16 %v9491_v25  ;;  %v15944_v8 = vunpack.i.h.bf16 %v9380_v6  ;;  %v1022_v16 = vrot.slane %v9186_v18, 3 }
 0x17a   : > { %v854_v39 = vsel %vm834_vm5, %v15942_v11, %v8008_v38  ;;  %v850_v28 = vsel %vm834_vm5, %v7994_v53, %v7998_v59  ;;  %v851_v20 = vsel %vm834_vm5, %v7998_v59, %v7999_v62  ;;  %v9703_v25 = vsel %vm1504_vm6, %v1500_v58, %v855_v55 }
 0x17b   : > { %v852_v60 = vsel %vm834_vm5, %v7999_v62, %v15943_v41  ;;  %v9691_v15 = vsel %vm1504_vm6, %v1499_v24, %v854_v39  ;;  %v9694_v57 = vsel %vm1504_vm6, %v1495_v26, %v850_v28  ;;  %v9697_v2 = vsel %vm1504_vm6, %v1496_v49, %v851_v20 }
 0x17c   : > { %v9700_v63 = vsel %vm1504_vm6, %v1497_v35, %v852_v60  ;;  %8156 = vrot.lane.b32.xlu0 %v9540_v0, %s9006_s27  ;;  %1405 = vrot.lane.b32.xlu2 %v9174_v9, %s9009_s30  ;;  %v609_v53 = vsel %vm586_vm1, %v7893_v44, %v7894_v54  ;;  %v608_v36 = vsel %vm586_vm1, %v15944_v8, %v7893_v44  ;;  %v15945_v48 = vunpack.i.h.bf16 %v9388_v21 }
 0x17d   : > { %8151 = vrot.lane.b32.xlu1 %v9547_v43, %s9010_s12  ;;  %v610_v58 = vsel %vm586_vm1, %v7894_v54, %v9376_v3  ;;  %v733_v9 = vsel %vm710_vm2, %v7953_v4, %v7954_v61  ;;  %v1021_v6 = vrot.slane %v9180_v14, 3  ;;  %v734_v43 = vsel %vm710_vm2, %v7954_v61, %v9498_v42 }
 0x17e   : > { %v732_v0 = vsel %vm710_vm2, %v15945_v48, %v7953_v4  ;;  %v9722_v13 = vpop.permute.xlu2 %8046  ;;  %v9724_v5 = vpop.permute.xlu0 %8016  ;;  %v15946_v26 = vrot.slane %v9189_v19, 3  ;;  %v15947_v3 = vrot.slane %v9183_v17, 3  ;;  %v899_v21 = vrot.slane %v9189_v19, 4 }
 0x17f   : > { %v8012_v44 = vpop.permute.xlu1 %8011  ;;  %v900_v49 = vrot.slane %v9183_v17, 4  ;;  %v1477_v33 = vsel %vm1454_vm3, %v9219_v47, %v609_v53  ;;  %v1476_v38 = vsel %vm1454_vm3, %v9216_v46, %v608_v36  ;;  %v1478_v42 = vsel %vm1454_vm3, %v9213_v45, %v610_v58 }
 0x180   : > { %v8170_v54 = vpack.i.bf16 %v15947_v3, %v15946_v26  ;;  %v8014_v4 = vunpack.i.h.bf16 %v8012_v44  ;;  %v8013_v62 = vunpack.i.l.bf16 %v8012_v44  ;;  %v1501_v61 = vsel %vm1479_vm4, %v1476_v38, %v732_v0 }
 0x181   : > { %v1502_v59 = vsel %vm1479_vm4, %v1477_v33, %v733_v9  ;;  %v8165_v35 = vpack.i.bf16 %v1022_v16, %v1021_v6  ;;  %v1503_v24 = vsel %vm1479_vm4, %v1478_v42, %v734_v43  ;;  %v8160_v28 = vpack.i.bf16 %v900_v49, %v899_v21 }
 0x182   : > { %v858_v11 = vsel %vm834_vm5, %v8014_v4, %v9536_v52  ;;  %v856_v39 = vsel %vm834_vm5, %v8009_v34, %v8013_v62  ;;  %v857_v55 = vsel %vm834_vm5, %v8013_v62, %v8014_v4  ;;  %v1147_v53 = vrot.slane %v9189_v19, 2 }
 0x183   : > { %v9749_v41 = vsel %vm1504_vm6, %v1501_v61, %v856_v39  ;;  %v9752_v60 = vsel %vm1504_vm6, %v1502_v59, %v857_v55  ;;  %v9755_v20 = vsel %vm1504_vm6, %v1503_v24, %v858_v11  ;;  %v1148_v8 = vrot.slane %v9183_v17, 2 }
 0x184   : > { %8171 = vrot.lane.b32.xlu0 %v8170_v54, %s9008_s29  ;;  %8166 = vrot.lane.b32.xlu2 %v8165_v35, %s9008_s29  ;;  %v1146_v16 = vrot.slane %v9186_v18, 2  ;;  %v1270_v58 = vrot.slane %v9186_v18, 1  ;;  %v1145_v48 = vrot.slane %v9180_v14, 2  ;;  %v1269_v0 = vrot.slane %v9180_v14, 1  ;;  %v15948_v35 = vld [vmem:[#allocation14_spill] sm:$0xff] }
 0x185   : > { %8161 = vrot.lane.b32.xlu1 %v8160_v28, %s9006_s27  ;;  %v904_v9 = vrot.slane %v9216_v46, 4  ;;  %v15654_v6 = vunpack.i.h.bf16 %v9338_v22  ;;  %v7843_v43 = vunpack.i.l.bf16 %v9338_v22  ;;  %v8180_v44 = vpack.i.bf16 %v1148_v8, %v1147_v53 }
 0x186   : > { %v9760_v52 = vpop.permute.xlu2 %8056  ;;  %v9762_v34 = vpop.permute.xlu0 %8031  ;;  %v903_v26 = vrot.slane %v9207_v37, 4  ;;  %v7839_v3 = vunpack.i.h.bf16 %v9318_v7  ;;  %v7838_v54 = vunpack.i.l.bf16 %v9318_v7  ;;  %v8175_v21 = vpack.i.bf16 %v1146_v16, %v1145_v48 }
 0x187   : > { %v9766_v36 = vpop.permute.xlu1 %8021  ;;  %v901_v49 = vrot.slane %v9198_v29, 4  ;;  %v7899_v33 = vunpack.i.h.bf16 %v9395_v31  ;;  %v7898_v38 = vunpack.i.l.bf16 %v9395_v31  ;;  %v8185_v4 = vpack.i.bf16 %v1270_v58, %v1269_v0 }
 0x188   : > { %v902_v62 = vrot.slane %v9201_v30, 4  ;;  %v7959_v42 = vunpack.i.h.bf16 %v9403_v56  ;;  %v7958_v61 = vunpack.i.l.bf16 %v9403_v56  ;;  %v9788_v7 = vpack.i.bf16 %v904_v9, %v903_v26  ;;  %v15949_v26 = vld [vmem:[#allocation7_spill] sm:$0xff]  ;;  %v9872_v56 = vld [vmem:[%s15607_s1] sm:$0xf] }
 0x189   : > { %v589_v59 = vsel %vm586_vm1, %v7843_v43, %v15654_v6  ;;  %v7903_v24 = vunpack.i.l.bf16 %v15948_v35  ;;  %v1271_v55 = vrot.slane %v9189_v19, 1  ;;  %v587_v28 = vsel %vm586_vm1, %v7838_v54, %v7839_v3 }
 0x18a   : > { %v8019_v53 = vunpack.i.h.bf16 %v9724_v5  ;;  %v8018_v8 = vunpack.i.l.bf16 %v9724_v5  ;;  %v1272_v58 = vrot.slane %v9183_v17, 1  ;;  %v711_v48 = vsel %vm710_vm2, %v7898_v38, %v7899_v33 }
 0x18b   : > { %v8024_v0 = vunpack.i.h.bf16 %v9766_v36  ;;  %v8023_v9 = vunpack.i.l.bf16 %v9766_v36  ;;  %v1457_v54 = vsel %vm1454_vm3, %v15949_v26, %v589_v59  ;;  %v835_v5 = vsel %vm834_vm5, %v7958_v61, %v7959_v42  ;;  %v15951_v26 = vld [vmem:[#allocation21_spill] sm:$0xff] }
 0x18c   : > { %1407 = vrot.lane.b32.xlu0 %v9180_v14, %s9009_s30  ;;  %8181 = vrot.lane.b32.xlu2 %v8180_v44, %s9007_s28  ;;  %v15655_v14 = vunpack.i.h.bf16 %v15948_v35  ;;  %v588_v38 = vsel %vm586_vm1, %v7839_v3, %v7843_v43  ;;  %v1455_v6 = vsel %vm1454_vm3, %v15950_v32, %v587_v28  ;;  %v15656_v61 = vunpack.i.h.bf16 %v9762_v34 }
 0x18d   : > { %8176 = vrot.lane.b32.xlu1 %v8175_v21, %s9007_s28  ;;  %v8195_v21 = vpack.i.bf16 %v902_v62, %v901_v49  ;;  %v1480_v59 = vsel %vm1479_vm4, %v1455_v6, %v711_v48  ;;  %v7964_v49 = vunpack.i.h.bf16 %v15951_v26  ;;  %v1083_v32 = vsel %vm1082_vm8, %v8023_v9, %v8024_v0 }
 0x18e   : > { %v9795_v11 = vpop.permute.xlu2 %8066  ;;  %v9797_v39 = vpop.permute.xlu0 %8036  ;;  %v713_v36 = vsel %vm710_vm2, %v7903_v24, %v15655_v14  ;;  %v1505_v43 = vsel %vm1504_vm6, %v1480_v59, %v835_v5  ;;  %v7963_v6 = vunpack.i.l.bf16 %v15951_v26  ;;  %v8028_v62 = vunpack.i.l.bf16 %v9611_v23 }
 0x18f   : > { %v1380_v16 = vpop.permute.xlu1 %1379  ;;  %v8038_v59 = vunpack.i.l.bf16 %v9797_v39 }
 0x190   : > { %v1430_v44 = vsel %vm15668_vm7, %v1380_v16, %v9673_v10  ;;  %v959_v16 = vsel %vm958_vm9, %v8018_v8, %v8019_v53  ;;  %v960_v31 = vsel %vm958_vm9, %v8019_v53, %v8028_v62  ;;  %v8049_v53 = vunpack.i.h.bf16 %v9722_v13 }
 0x191   : > { %7680 = vmatpush.msk.msra.mxu2 %vm1454_vm3, %v1430_v44  ;;  %v8033_v44 = vunpack.i.l.bf16 %v9762_v34 }
 0x193   : > { %v1207_v9 = vsel %vm1206_vm12, %v8033_v44, %v15656_v61  ;;  %v712_v44 = vsel %vm710_vm2, %v7899_v33, %v7903_v24  ;;  %v8190_v61 = vpack.i.bf16 %v1272_v58, %v1271_v55  ;;  %v1084_v24 = vsel %vm1082_vm8, %v8024_v0, %v8038_v59 }
 0x194   : > { %8186 = vrot.lane.b32.xlu0 %v8185_v4, %s9010_s12  ;;  %1411 = vrot.lane.b32.xlu2 %v9189_v19, %s9009_s30  ;;  %v1530_v19 = vsel %vm1529_vm11, %v1505_v43, %v959_v16  ;;  %v15952_v16 = vld [vmem:[#allocation6_spill] sm:$0xff]  ;;  %v8048_v58 = vunpack.i.l.bf16 %v9722_v13 }
 0x195   : > { %1409 = vrot.lane.b32.xlu1 %v9186_v18, %s9009_s30  ;;  %v1555_v5 = vsel %vm1554_vm10, %v1530_v19, %v1083_v32  ;;  %v8039_v18 = vunpack.i.h.bf16 %v9797_v39  ;;  %v1456_v43 = vsel %vm1454_vm3, %v15952_v16, %v588_v38  ;;  %v836_v32 = vsel %vm834_vm5, %v7959_v42, %v7963_v6 }
 0x196   : > { %v9838_v28 = vpop.permute.xlu2 %1389  ;;  %v1384_v4 = vpop.permute.xlu0 %1383  ;;  %v837_v19 = vsel %vm834_vm5, %v7963_v6, %v7964_v49  ;;  %v15953_v38 = vunpack.i.h.bf16 %v9611_v23  ;;  %v1481_v42 = vsel %vm1479_vm4, %v1456_v43, %v712_v44  ;;  %v1026_v43 = vrot.slane %v9201_v30, 3 }
 0x197   : > { %v8042_v8 = vpop.permute.xlu1 %8041  ;;  %v1431_v48 = vsel %vm15668_vm7, %v9673_v10, %v1384_v4  ;;  %v1482_v10 = vsel %vm1479_vm4, %v1457_v54, %v713_v36  ;;  %v1085_v55 = vsel %vm1082_vm8, %v8038_v59, %v8039_v18  ;;  %v1506_v36 = vsel %vm1504_vm6, %v1481_v42, %v836_v32 }
 0x198   : > { %v8044_v14 = vunpack.i.h.bf16 %v8042_v8  ;;  %v8043_v3 = vunpack.i.l.bf16 %v8042_v8  ;;  %7682 = vmatpush.msk.msra.mxu3 %vm1454_vm3, %v1431_v48  ;;  %v1580_v48 = vsel %vm1579_vm14, %v1555_v5, %v1207_v9  ;;  %v961_v54 = vsel %vm958_vm9, %v8028_v62, %v15953_v38 }
 0x199   : > { %v1507_v6 = vsel %vm1504_vm6, %v1482_v10, %v837_v19  ;;  %v1531_v0 = vsel %vm1529_vm11, %v1506_v36, %v960_v31  ;;  %v1028_v9 = vrot.slane %v9216_v46, 3  ;;  %v1025_v5 = vrot.slane %v9198_v29, 3 }
 0x19a   : > { %v1331_v8 = vsel %vm15669_vm13, %v8043_v3, %v8044_v14  ;;  %v1532_v62 = vsel %vm1529_vm11, %v1507_v6, %v961_v54  ;;  %v1556_v59 = vsel %vm1554_vm10, %v1531_v0, %v1084_v24  ;;  %v15954_v32 = vunpack.i.h.bf16 %v9762_v34 }
 0x19b   : > { %v1605_v33 = vsel %vm1604_vm15, %v1580_v48, %v1331_v8  ;;  %v1557_v16 = vsel %vm1554_vm10, %v1532_v62, %v1085_v55  ;;  %v1027_v8 = vrot.slane %v9207_v37, 3  ;;  %v8205_v24 = vpack.i.bf16 %v1026_v43, %v1025_v5  ;;  %v15955_v55 = vld [vmem:[#allocation12_spill] sm:$0xff] }
 0x19c   : > { %1703 = vmatpush.msra.mxu2 %v1605_v33  ;;  %8201 = vrot.lane.b32.xlu0 %v9788_v7, %s9006_s27  ;;  %v1208_v19 = vsel %vm1206_vm12, %v15954_v32, %v8048_v58  ;;  %v7848_v36 = vunpack.i.l.bf16 %v15955_v55  ;;  %v1151_v62 = vrot.slane %v9207_v37, 2  ;;  %v1150_v32 = vrot.slane %v9201_v30, 2 }
 0x19d   : > { %8196 = vrot.lane.b32.xlu2 %v8195_v21, %s9006_s27  ;;  %8191 = vrot.lane.b32.xlu1 %v8190_v61, %s9010_s12  ;;  %v1581_v38 = vsel %vm1579_vm14, %v1556_v59, %v1208_v19  ;;  %v8210_v42 = vpack.i.bf16 %v1028_v9, %v1027_v8  ;;  %v15957_v9 = vld [vmem:[#allocation23_spill] sm:$0xff]  ;;  %v8059_v19 = vunpack.i.h.bf16 %v9760_v52 }
 0x19e   : > { %v9887_v3 = vpop.permute.xlu2 %8086  ;;  %v1386_v7 = vpop.permute.xlu0 %1385  ;;  %7681 = vmatmul.msk.f32.vlgmr.msra.gmra.mxu2 %vm1636_vm0, %v9872_v56  ;;  %v7969_v5 = vunpack.i.h.bf16 %v15957_v9  ;;  %v7968_v59 = vunpack.i.l.bf16 %v15957_v9 }
 0x19f   : > { %v9895_v21 = vpop.permute.xlu1 %8051  ;;  %v1432_v61 = vsel %vm15668_vm7, %v1384_v4, %v1386_v7  ;;  %v1209_v4 = vsel %vm1206_vm12, %v8048_v58, %v8049_v53  ;;  %v15658_v58 = vunpack.i.h.bf16 %v15955_v55 }
 0x1a0   : > { %v8054_v10 = vunpack.i.h.bf16 %v9895_v21  ;;  %v8053_v44 = vunpack.i.l.bf16 %v9895_v21  ;;  %7684 = vmatpush.msk.msrb.mxu2 %vm1454_vm3, %v1432_v61  ;;  %v1582_v31 = vsel %vm1579_vm14, %v1557_v16, %v1209_v4  ;;  %v1152_v61 = vrot.slane %v9216_v46, 2 }
 0x1a1   : > { %v8058_v4 = vunpack.i.l.bf16 %v9760_v52  ;;  %v8088_v52 = vunpack.i.l.bf16 %v9887_v3 }
 0x1a2   : > { %v1332_v48 = vsel %vm15669_vm13, %v8044_v14, %v8053_v44  ;;  %v1333_v54 = vsel %vm15669_vm13, %v8053_v44, %v8054_v10  ;;  %v15956_v14 = vld [vmem:[#allocation17_spill] sm:$0xff]  ;;  %v1149_v44 = vrot.slane %v9198_v29, 2 }
 0x1a3   : > { %v1606_v34 = vsel %vm1604_vm15, %v1581_v38, %v1332_v48  ;;  %v1607_v33 = vsel %vm1604_vm15, %v1582_v31, %v1333_v54  ;;  %v7909_v6 = vunpack.i.h.bf16 %v15956_v14  ;;  %v7908_v0 = vunpack.i.l.bf16 %v15956_v14 }
 0x1a4   : > { %1723 = vmatpush.msra.mxu3 %v1606_v34  ;;  %1743 = vmatpush.msrb.mxu2 %v1607_v33  ;;  %v591_v38 = vsel %vm586_vm1, %v7848_v36, %v15658_v58  ;;  %v15958_v54 = vunpack.i.h.bf16 %v9338_v22  ;;  %v838_v22 = vsel %vm834_vm5, %v7964_v49, %v7968_v59  ;;  %v15962_v58 = vunpack.i.h.bf16 %v9611_v23 }
 0x1a5   : > { %8211 = vrot.lane.b32.xlu0 %v8210_v42, %s9008_s29  ;;  %8206 = vrot.lane.b32.xlu2 %v8205_v24, %s9008_s29  ;;  %v715_v24 = vsel %vm710_vm2, %v7908_v0, %v7909_v6  ;;  %v963_v26 = vsel %vm958_vm9, %v8058_v4, %v8059_v19  ;;  %v15660_v23 = vunpack.i.h.bf16 %v9795_v11 }
 0x1a6   : > { %1413 = vrot.lane.b32.xlu1 %v9183_v17, %s9009_s30  ;;  %v9931_v16 = vpop.permute.xlu2 %1393  ;;  %v1388_v43 = vpop.permute.xlu0 %1387  ;;  %7683 = vmatmul.msk.f32.vlgmr.msra.gmra.mxu3 %vm1636_vm0, %v9872_v56  ;;  %v590_v31 = vsel %vm586_vm1, %v15958_v54, %v7848_v36  ;;  %v839_v36 = vsel %vm834_vm5, %v7968_v59, %v7969_v5  ;;  %v15960_v54 = vld [vmem:[#allocation5_spill] sm:$0xff] }
 0x1a7   : > { %v9939_v8 = vpop.permute.xlu1 %8061  ;;  %v1433_v48 = vsel %vm15668_vm7, %v1386_v7, %v1388_v43  ;;  %v1434_v17 = vsel %vm15668_vm7, %v1388_v43, %v9838_v28  ;;  %7685 = vmatmul.msk.f32.vlgmr.msrb.gmra.mxu2 %vm1636_vm0, %v9872_v56  ;;  %v15959_v7 = vunpack.i.h.bf16 %v15948_v35  ;;  %v8220_v43 = vpack.i.bf16 %v1152_v61, %v1151_v62  ;;  %v15961_v35 = vld [vmem:[#allocation4_spill] sm:$0xff] }
 0x1a8   : > { %v15661_v34 = vunpack.i.h.bf16 %v9939_v8  ;;  %v8063_v33 = vunpack.i.l.bf16 %v9939_v8  ;;  %7686 = vmatpush.msk.msrb.mxu3 %vm1454_vm3, %v1433_v48  ;;  %7688 = vmatpush.msk.msra.mxu0 %vm1454_vm3, %v1434_v17  ;;  %v8215_v48 = vpack.i.bf16 %v1150_v32, %v1149_v44  ;;  %v1459_v17 = vsel %vm1454_vm3, %v15960_v54, %v591_v38 }
 0x1a9   : > { %v714_v42 = vsel %vm710_vm2, %v15959_v7, %v7908_v0  ;;  %v1458_v7 = vsel %vm1454_vm3, %v15961_v35, %v590_v31  ;;  %v962_v0 = vsel %vm958_vm9, %v15962_v58, %v8058_v4  ;;  %v1484_v59 = vsel %vm1479_vm4, %v1459_v17, %v715_v24 }
 0x1aa   : > { %v1483_v49 = vsel %vm1479_vm4, %v1458_v7, %v714_v42  ;;  %v1086_v62 = vsel %vm1082_vm8, %v8039_v18, %v8063_v33  ;;  %v1087_v61 = vsel %vm1082_vm8, %v8063_v33, %v15661_v34  ;;  %v8068_v58 = vunpack.i.l.bf16 %v9795_v11 }
 0x1ab   : > { %v1508_v44 = vsel %vm1504_vm6, %v1483_v49, %v838_v22  ;;  %v1509_v32 = vsel %vm1504_vm6, %v1484_v59, %v839_v36  ;;  %v1273_v24 = vrot.slane %v9198_v29, 1  ;;  %v1274_v22 = vrot.slane %v9201_v30, 1  ;;  %v15963_v59 = vld [vmem:[#allocation13_spill] sm:$0xff] }
 0x1ac   : > { %v1533_v4 = vsel %vm1529_vm11, %v1508_v44, %v962_v0  ;;  %v1534_v38 = vsel %vm1529_vm11, %v1509_v32, %v963_v26  ;;  %v1211_v54 = vsel %vm1206_vm12, %v8068_v58, %v15660_v23  ;;  %v905_v26 = vrot.slane %v9219_v47, 4  ;;  %v15970_v23 = vld [vmem:[#allocation8_spill] sm:$0xff] }
 0x1ad   : > { %1415 = vrot.lane.b32.xlu0 %v9198_v29, %s9009_s30  ;;  %8221 = vrot.lane.b32.xlu2 %v8220_v43, %s9007_s28  ;;  %v1558_v33 = vsel %vm1554_vm10, %v1533_v4, %v1086_v62  ;;  %v1559_v42 = vsel %vm1554_vm10, %v1534_v38, %v1087_v61  ;;  %v8225_v0 = vpack.i.bf16 %v1274_v22, %v1273_v24  ;;  %v906_v49 = vrot.slane %v9213_v45, 4  ;;  %v15965_v24 = vld [vmem:[#allocation15_spill] sm:$0xff] }
 0x1ae   : > { %8216 = vrot.lane.b32.xlu1 %v8215_v48, %s9007_s28  ;;  %v9994_v39 = vpop.permute.xlu2 %8106  ;;  %v9996_v18 = vpop.permute.xlu0 %8076  ;;  %v1210_v48 = vsel %vm1206_vm12, %v8049_v53, %v8068_v58  ;;  %v1584_v7 = vsel %vm1579_vm14, %v1559_v42, %v1211_v54  ;;  %v7854_v62 = vunpack.i.h.bf16 %v15963_v59  ;;  %v7853_v61 = vunpack.i.l.bf16 %v15963_v59 }
 0x1af   : > { %v10000_v31 = vpop.permute.xlu1 %8071  ;;  %v1583_v29 = vsel %vm1579_vm14, %v1558_v33, %v1210_v48  ;;  %v1276_v32 = vrot.slane %v9216_v46, 1  ;;  %v1029_v4 = vrot.slane %v9219_v47, 3  ;;  %v1030_v38 = vrot.slane %v9213_v45, 3 }
 0x1b0   : > { %v15659_v36 = vunpack.i.h.bf16 %v10000_v31  ;;  %v8073_v43 = vunpack.i.l.bf16 %v10000_v31  ;;  %v1153_v33 = vrot.slane %v9219_v47, 2  ;;  %v1154_v42 = vrot.slane %v9213_v45, 2 }
 0x1b1   : > { %v7858_v22 = vunpack.i.l.bf16 %v15965_v24  ;;  %v1275_v48 = vrot.slane %v9207_v37, 1  ;;  %v15966_v54 = vunpack.i.h.bf16 %v15955_v55  ;;  %v8240_v55 = vpack.i.bf16 %v1030_v38, %v1029_v4  ;;  %v15972_v4 = vld [vmem:[#allocation16_spill] sm:$0xff] }
 0x1b2   : > { %v1334_v17 = vsel %vm15669_vm13, %v8054_v10, %v8073_v43  ;;  %v1335_v35 = vsel %vm15669_vm13, %v8073_v43, %v15659_v36  ;;  %v8235_v43 = vpack.i.bf16 %v906_v49, %v905_v26  ;;  %v15968_v36 = vld [vmem:[#allocation19_spill] sm:$0xff]  ;;  %v10062_v49 = vpack.i.bf16 %v1154_v42, %v1153_v33 }
 0x1b3   : > { %v1608_v13 = vsel %vm1604_vm15, %v1583_v29, %v1334_v17  ;;  %v1609_v53 = vsel %vm1604_vm15, %v1584_v7, %v1335_v35  ;;  %v592_v17 = vsel %vm586_vm1, %v15966_v54, %v7853_v61  ;;  %v593_v29 = vsel %vm586_vm1, %v7853_v61, %v7854_v62  ;;  %v15967_v35 = vld [vmem:[#allocation18_spill] sm:$0xff] }
 0x1b4   : > { %1763 = vmatpush.msrb.mxu3 %v1608_v13  ;;  %1783 = vmatpush.msra.mxu0 %v1609_v53  ;;  %v15662_v7 = vunpack.i.h.bf16 %v15967_v35  ;;  %v7913_v13 = vunpack.i.l.bf16 %v15967_v35  ;;  %v9011_v53 = vmov 0   ;;  %v7974_v26 = vunpack.i.h.bf16 %v15968_v36  ;;  %v15969_v61 = vld [vmem:[#allocation2_spill] sm:$0xff] }
 0x1b5   : > { %8226 = vrot.lane.b32.xlu0 %v8225_v0, %s9010_s12  ;;  %1419 = vrot.lane.b32.xlu2 %v9207_v37, %s9009_s30  ;;  %v8230_v0 = vpack.i.bf16 %v1276_v32, %v1275_v48  ;;  %v7973_v37 = vunpack.i.l.bf16 %v15968_v36  ;;  %v1460_v54 = vsel %vm1454_vm3, %v15969_v61, %v592_v17  ;;  %v594_v32 = vsel %vm586_vm1, %v7854_v62, %v7858_v22 }
 0x1b6   : > { %1417 = vrot.lane.b32.xlu1 %v9201_v30, %s9009_s30  ;;  %7687 = vmatmul.msk.f32.vlgmr.msrb.gmra.mxu3 %vm1636_vm0, %v9872_v56  ;;  %v10031_v21 = vpop.permute.xlu2 %1397  ;;  %v10033_v10 = vpop.permute.xlu0 %8091  ;;  %v15964_v30 = vld [vmem:[#allocation11_spill] sm:$0xff]  ;;  %v15971_v48 = vunpack.i.h.bf16 %v15965_v24  ;;  %v7918_v38 = vunpack.i.l.bf16 %v15972_v4  ;;  %v717_v33 = vsel %vm710_vm2, %v7913_v13, %v15662_v7  ;;  %v8078_v62 = vunpack.i.l.bf16 %v9996_v18  ;;  %v15974_v7 = vld [vmem:[#allocation10_spill] sm:$0xff] }
 0x1b7   : > { %v10039_v58 = vpop.permute.xlu1 %8081  ;;  %7689 = vmatmul.msk.f32.vlgmr.msra.gmra.mxu0 %vm1636_vm0, %v9872_v56  ;;  %v907_v44 = vrot.slane %v15964_v30, 4  ;;  %8255 = vset.pattern.permute.xlu2 %v9011_v53  ;;  %v1031_v59 = vrot.slane %v15964_v30, 3  ;;  %v8094_v14 = vunpack.i.h.bf16 %v10033_v10 }
 0x1b8   : > { %8991 = vset.pattern.permute.xlu0 %v9011_v53  ;;  %v1461_v53 = vsel %vm1454_vm3, %v15970_v23, %v593_v29  ;;  %v595_v34 = vsel %vm586_vm1, %v7858_v22, %v15971_v48  ;;  %v8079_v23 = vunpack.i.h.bf16 %v9996_v18  ;;  %v8084_v24 = vunpack.i.h.bf16 %v10039_v58 }
 0x1b9   : > { %v8083_v22 = vunpack.i.l.bf16 %v10039_v58  ;;  %v716_v48 = vsel %vm710_vm2, %v7909_v6, %v7913_v13  ;;  %v841_v18 = vsel %vm834_vm5, %v7973_v37, %v7974_v26  ;;  %v1155_v58 = vrot.slane %v15964_v30, 2 }
 0x1ba   : > { %v8093_v6 = vunpack.i.l.bf16 %v10033_v10  ;;  %v15975_v13 = vunpack.i.h.bf16 %v15972_v4  ;;  %v1485_v9 = vsel %vm1479_vm4, %v1460_v54, %v716_v48 }
 0x1bd   : > { %956 = vrot.lane.b32.xlu0 %v907_v44, %s9006_s27  ;;  %8236 = vrot.lane.b32.xlu2 %v8235_v43, %s9006_s27 }
 0x1be   : > { %8231 = vrot.lane.b32.xlu1 %v8230_v0, %s9010_s12  ;;  %v10073_v44 = vpop.permute.xlu2 %8126  ;;  %v10075_v43 = vpop.permute.xlu0 %8096  ;;  %v15973_v0 = vld [vmem:[#allocation9_spill] sm:$0xff] }
 0x1bf   : > { %v1392_v42 = vpop.permute.xlu1 %1391  ;;  %v1462_v61 = vsel %vm1454_vm3, %v15973_v0, %v594_v32  ;;  %v840_v32 = vsel %vm834_vm5, %v7969_v5, %v7973_v37  ;;  %v15976_v37 = vunpack.i.h.bf16 %v9939_v8  ;;  %v7978_v0 = vunpack.i.l.bf16 %v9538_v1 }
 0x1c0   : > { %v1436_v17 = vsel %vm15668_vm7, %v1392_v42, %v9931_v16  ;;  %v1435_v29 = vsel %vm15668_vm7, %v9838_v28, %v1392_v42  ;;  %v1463_v28 = vsel %vm1454_vm3, %v15974_v7, %v595_v34  ;;  %v719_v42 = vsel %vm710_vm2, %v7918_v38, %v15975_v13 }
 0x1c1   : > { %7690 = vmatpush.msk.msra.mxu1 %vm1454_vm3, %v1435_v29  ;;  %7692 = vmatpush.msk.msra.mxu2 %vm1454_vm3, %v1436_v17  ;;  %v1486_v29 = vsel %vm1479_vm4, %v1461_v53, %v717_v33  ;;  %v964_v17 = vsel %vm958_vm9, %v8059_v19, %v8078_v62  ;;  %v965_v34 = vsel %vm958_vm9, %v8078_v62, %v8079_v23  ;;  %v8089_v53 = vunpack.i.h.bf16 %v9887_v3 }
 0x1c2   : > { %v1511_v5 = vsel %vm1504_vm6, %v1486_v29, %v841_v18  ;;  %v1089_v7 = vsel %vm1082_vm8, %v8083_v22, %v8084_v24  ;;  %v1088_v4 = vsel %vm1082_vm8, %v15976_v37, %v8083_v22  ;;  %v1510_v19 = vsel %vm1504_vm6, %v1485_v9, %v840_v32 }
 0x1c3   : > { %v15977_v33 = vunpack.i.h.bf16 %v9795_v11  ;;  %v1535_v22 = vsel %vm1529_vm11, %v1510_v19, %v964_v17  ;;  %v8099_v13 = vunpack.i.h.bf16 %v10075_v43  ;;  %v8098_v29 = vunpack.i.l.bf16 %v10075_v43 }
 0x1c4   : > { %v1560_v32 = vsel %vm1554_vm10, %v1535_v22, %v1088_v4  ;;  %v15980_v4 = vunpack.i.h.bf16 %v10000_v31  ;;  %v967_v36 = vsel %vm958_vm9, %v8088_v52, %v8089_v53 }
 0x1c5   : > { %1080 = vrot.lane.b32.xlu0 %v1031_v59, %s9008_s29  ;;  %8241 = vrot.lane.b32.xlu2 %v8240_v55, %s9008_s29  ;;  %v1212_v62 = vsel %vm1206_vm12, %v15977_v33, %v8093_v6  ;;  %v1213_v59 = vsel %vm1206_vm12, %v8093_v6, %v8094_v14  ;;  %v1536_v55 = vsel %vm1529_vm11, %v1511_v5, %v965_v34 }
 0x1c6   : > { %1421 = vrot.lane.b32.xlu1 %v9216_v46, %s9009_s30  ;;  %v10129_v54 = vpop.permute.xlu2 %1401  ;;  %v1396_v8 = vpop.permute.xlu0 %1395  ;;  %v1561_v11 = vsel %vm1554_vm10, %v1536_v55, %v1089_v7  ;;  %v1488_v6 = vsel %vm1479_vm4, %v1463_v28, %v719_v42  ;;  %v842_v5 = vsel %vm834_vm5, %v7974_v26, %v7978_v0  ;;  %v15979_v7 = vunpack.i.h.bf16 %v9538_v1 }
 0x1c7   : > { %v8102_v48 = vpop.permute.xlu1 %8101  ;;  %v1437_v18 = vsel %vm15668_vm7, %v9931_v16, %v1396_v8  ;;  %v1438_v46 = vsel %vm15668_vm7, %v1396_v8, %v10031_v21  ;;  %v15978_v16 = vunpack.i.h.bf16 %v15967_v35  ;;  %v1585_v8 = vsel %vm1579_vm14, %v1560_v32, %v1212_v62 }
 0x1c8   : > { %v8104_v17 = vunpack.i.h.bf16 %v8102_v48  ;;  %v8103_v9 = vunpack.i.l.bf16 %v8102_v48  ;;  %7694 = vmatpush.msk.msra.mxu3 %vm1454_vm3, %v1437_v18  ;;  %7696 = vmatpush.msk.msrb.mxu0 %vm1454_vm3, %v1438_v46  ;;  %v843_v37 = vsel %vm834_vm5, %v7978_v0, %v15979_v7  ;;  %v1586_v35 = vsel %vm1579_vm14, %v1561_v11, %v1213_v59 }
 0x1c9   : > { %v718_v34 = vsel %vm710_vm2, %v15978_v16, %v7918_v38  ;;  %v966_v26 = vsel %vm958_vm9, %v8079_v23, %v8088_v52  ;;  %v1090_v42 = vsel %vm1082_vm8, %v8084_v24, %v8098_v29  ;;  %v1091_v0 = vsel %vm1082_vm8, %v8098_v29, %v8099_v13 }
 0x1ca   : > { %v1336_v19 = vsel %vm15669_vm13, %v15980_v4, %v8103_v9  ;;  %v1337_v28 = vsel %vm15669_vm13, %v8103_v9, %v8104_v17  ;;  %v1487_v31 = vsel %vm1479_vm4, %v1462_v61, %v718_v34  ;;  %v8109_v62 = vunpack.i.h.bf16 %v9994_v39 }
 0x1cb   : > { %v1610_v1 = vsel %vm1604_vm15, %v1585_v8, %v1336_v19  ;;  %v1611_v38 = vsel %vm1604_vm15, %v1586_v35, %v1337_v28  ;;  %v1512_v33 = vsel %vm1504_vm6, %v1487_v31, %v842_v5  ;;  %v8108_v23 = vunpack.i.l.bf16 %v9994_v39 }
 0x1cc   : > { %1803 = vmatpush.msra.mxu1 %v1610_v1  ;;  %1823 = vmatpush.msra.mxu2 %v1611_v38  ;;  %v1513_v61 = vsel %vm1504_vm6, %v1488_v6, %v843_v37  ;;  %v1537_v22 = vsel %vm1529_vm11, %v1512_v33, %v966_v26  ;;  %v1277_v48 = vrot.slane %v9219_v47, 1  ;;  %v1278_v18 = vrot.slane %v9213_v45, 1  ;;  %v1630_v37 = vld [vmem:[%s15608_s2] sm:$0xf] }
 0x1cd   : > { %1423 = vrot.lane.b32.xlu0 %v9219_v47, %s9009_s30  ;;  %1204 = vrot.lane.b32.xlu2 %v1155_v58, %s9007_s28  ;;  %v1538_v59 = vsel %vm1529_vm11, %v1513_v61, %v967_v36  ;;  %v1562_v55 = vsel %vm1554_vm10, %v1537_v22, %v1090_v42  ;;  %v1214_v11 = vsel %vm1206_vm12, %v8094_v14, %v8108_v23  ;;  %v1279_v4 = vrot.slane %v15964_v30, 1 }
 0x1ce   : > { %8246 = vrot.lane.b32.xlu1 %v10062_v49, %s9007_s28  ;;  %7691 = vmatmul.msk.f32.vlgmr.msra.gmra.mxu1 %vm1636_vm0, %v9872_v56  ;;  %v10187_v24 = vpop.permute.xlu2 %8146  ;;  %v10189_v52 = vpop.permute.xlu0 %8116  ;;  %v1563_v49 = vsel %vm1554_vm10, %v1538_v59, %v1091_v0  ;;  %v1215_v29 = vsel %vm1206_vm12, %v8108_v23, %v8109_v62  ;;  %v1587_v6 = vsel %vm1579_vm14, %v1562_v55, %v1214_v11  ;;  %v8129_v23 = vunpack.i.h.bf16 %v10073_v44 }
 0x1cf   : > { %7693 = vmatmul.msk.f32.vlgmr.msra.gmra.mxu2 %vm1636_vm0, %v9872_v56  ;;  %v10195_v58 = vpop.permute.xlu1 %8111  ;;  %v1588_v16 = vsel %vm1579_vm14, %v1563_v49, %v1215_v29  ;;  %v8250_v7 = vpack.i.bf16 %v1278_v18, %v1277_v48  ;;  %v8119_v8 = vunpack.i.h.bf16 %v10189_v52  ;;  %v8118_v28 = vunpack.i.l.bf16 %v10189_v52 }
 0x1d0   : > { %v8114_v46 = vunpack.i.h.bf16 %v10195_v58  ;;  %v8113_v32 = vunpack.i.l.bf16 %v10195_v58  ;;  %v8128_v61 = vunpack.i.l.bf16 %v10073_v44 }
 0x1d1   : > { %v968_v42 = vsel %vm958_vm9, %v8089_v53, %v8118_v28  ;;  %v969_v0 = vsel %vm958_vm9, %v8118_v28, %v8119_v8 }
 0x1d2   : > { %v1338_v9 = vsel %vm15669_vm13, %v8104_v17, %v8113_v32  ;;  %v1339_v47 = vsel %vm15669_vm13, %v8113_v32, %v8114_v46  ;;  %v1539_v53 = vsel %vm1529_vm11, %v9653_v40, %v968_v42  ;;  %v1540_v43 = vsel %vm1529_vm11, %v9635_v51, %v969_v0 }
 0x1d3   : > { %v1612_v34 = vsel %vm1604_vm15, %v1587_v6, %v1338_v9  ;;  %v1613_v5 = vsel %vm1604_vm15, %v1588_v16, %v1339_v47  ;;  %v971_v29 = vsel %vm958_vm9, %v8128_v61, %v8129_v23  ;;  %v970_v9 = vsel %vm958_vm9, %v8119_v8, %v8128_v61 }
 0x1d4   : > { %1843 = vmatpush.msra.mxu3 %v1612_v34  ;;  %1863 = vmatpush.msrb.mxu0 %v1613_v5  ;;  %v8149_v34 = vunpack.i.h.bf16 %v10187_v24  ;;  %v8148_v5 = vunpack.i.l.bf16 %v10187_v24 }
 0x1d5   : > { %8251 = vrot.lane.b32.xlu0 %v8250_v7, %s9010_s12  ;;  %1427 = vrot.lane.b32.xlu2 %v15964_v30, %s9009_s30 }
 0x1d6   : > { %1425 = vrot.lane.b32.xlu1 %v9213_v45, %s9009_s30  ;;  %7695 = vmatmul.msk.f32.vlgmr.msra.gmra.mxu3 %vm1636_vm0, %v9872_v56  ;;  %v10222_v10 = vpop.permute.xlu2 %1405  ;;  %v10224_v14 = vpop.permute.xlu0 %8131 }
 0x1d7   : > { %7697 = vmatmul.msk.f32.vlgmr.msrb.gmra.mxu0 %vm1636_vm0, %v9872_v56  ;;  %v8122_v17 = vpop.permute.xlu1 %8121  ;;  %v8134_v38 = vunpack.i.h.bf16 %v10224_v14  ;;  %v8133_v31 = vunpack.i.l.bf16 %v10224_v14 }
 0x1d8   : > { %v8124_v36 = vunpack.i.h.bf16 %v8122_v17  ;;  %v8123_v26 = vunpack.i.l.bf16 %v8122_v17  ;;  %v1541_v17 = vsel %vm1529_vm11, %v9638_v50, %v970_v9 }
 0x1d9   : > { %v1216_v3 = vsel %vm1206_vm12, %v8109_v62, %v8133_v31  ;;  %v1217_v59 = vsel %vm1206_vm12, %v8133_v31, %v8134_v38 }
 0x1da   : > { %v1093_v33 = vsel %vm1082_vm8, %v8123_v26, %v8124_v36 }
 0x1db   : > { %v1565_v39 = vsel %vm1554_vm10, %v1540_v43, %v1093_v33 }
 0x1dc   : > { %v1590_v11 = vsel %vm1579_vm14, %v1565_v39, %v1217_v59 }
 0x1dd   : > { %1633 = vperm.xlu2 %8255, %v1630_v37   ;;  %v15981_v37 = vld [vmem:[#allocation20_spill] sm:$0xff] }
 0x1de   : > { %1328 = vrot.lane.b32.xlu1 %v1279_v4, %s9010_s12  ;;  %v10233_v45 = vpop.permute.xlu2 %8166  ;;  %v10235_v19 = vpop.permute.xlu0 %8136  ;;  %v1542_v4 = vsel %vm1529_vm11, %v15981_v37, %v971_v29 }
 0x1df   : > { %v1400_v35 = vpop.permute.xlu1 %1399  ;;  %v8139_v62 = vunpack.i.h.bf16 %v10235_v19  ;;  %v8138_v40 = vunpack.i.l.bf16 %v10235_v19  ;;  %v8168_v39 = vunpack.i.l.bf16 %v10233_v45 }
 0x1e0   : > { %v1440_v1 = vsel %vm15668_vm7, %v1400_v35, %v10129_v54  ;;  %v1439_v30 = vsel %vm15668_vm7, %v10031_v21, %v1400_v35  ;;  %v1092_v21 = vsel %vm1082_vm8, %v8099_v13, %v8123_v26  ;;  %v1218_v26 = vsel %vm1206_vm12, %v8134_v38, %v8148_v5 }
 0x1e1   : > { %7698 = vmatpush.msk.msrb.mxu1 %vm1454_vm3, %v1439_v30  ;;  %7700 = vmatpush.msk.msrb.mxu2 %vm1454_vm3, %v1440_v1  ;;  %v1564_v49 = vsel %vm1554_vm10, %v1539_v53, %v1092_v21  ;;  %v1094_v16 = vsel %vm1082_vm8, %v8124_v36, %v8138_v40  ;;  %v1219_v1 = vsel %vm1206_vm12, %v8148_v5, %v8149_v34 }
 0x1e2   : > { %v1566_v28 = vsel %vm1554_vm10, %v1541_v17, %v1094_v16 }
 0x1e3   : > { %v1591_v31 = vsel %vm1579_vm14, %v1566_v28, %v1218_v26 }
 0x1e6   : > { %v10257_v52 = vpop.permute.xlu2 %8181  ;;  %v1404_v22 = vpop.permute.xlu0 %1403 }
 0x1e7   : > { %v8142_v13 = vpop.permute.xlu1 %8141  ;;  %v1441_v58 = vsel %vm15668_vm7, %v10129_v54, %v1404_v22  ;;  %v1442_v55 = vsel %vm15668_vm7, %v1404_v22, %v10222_v10  ;;  %v1589_v54 = vsel %vm1579_vm14, %v1564_v49, %v1216_v3  ;;  %v8169_v49 = vunpack.i.h.bf16 %v10233_v45 }
 0x1e8   : > { %v8144_v48 = vunpack.i.h.bf16 %v8142_v13  ;;  %v8143_v18 = vunpack.i.l.bf16 %v8142_v13  ;;  %7702 = vmatpush.msk.msrb.mxu3 %vm1454_vm3, %v1441_v58  ;;  %7704 = vmatpush.msk.msra.mxu0 %vm1454_vm3, %v1442_v55 }
 0x1e9   : > { %v1097_v44 = vsel %vm1082_vm8, %v8168_v39, %v8169_v49 }
 0x1ea   : > { %v1340_v51 = vsel %vm15669_vm13, %v8114_v46, %v8143_v18  ;;  %v1341_v32 = vsel %vm15669_vm13, %v8143_v18, %v8144_v48  ;;  %v1095_v46 = vsel %vm1082_vm8, %v8138_v40, %v8139_v62 }
 0x1eb   : > { %v1614_v6 = vsel %vm1604_vm15, %v1589_v54, %v1340_v51  ;;  %v1615_v47 = vsel %vm1604_vm15, %v1590_v11, %v1341_v32  ;;  %v1567_v24 = vsel %vm1554_vm10, %v1542_v4, %v1095_v46  ;;  %v8183_v4 = vunpack.i.l.bf16 %v10257_v52 }
 0x1ec   : > { %1883 = vmatpush.msrb.mxu1 %v1614_v6  ;;  %1903 = vmatpush.msrb.mxu2 %v1615_v47  ;;  %v1592_v42 = vsel %vm1579_vm14, %v1567_v24, %v1219_v1 }
 0x1ed   : > { %7699 = vmatmul.msk.f32.vlgmr.msrb.gmra.mxu1 %vm1636_vm0, %v9872_v56  ;;  %7701 = vmatmul.msk.f32.vlgmr.msrb.gmra.mxu2 %vm1636_vm0, %v9872_v56 }
 0x1ee   : > { %v10297_v7 = vpop.permute.xlu2 %1411  ;;  %v10299_v14 = vpop.permute.xlu0 %8156 }
 0x1ef   : > { %v8152_v8 = vpop.permute.xlu1 %8151  ;;  %v8158_v22 = vunpack.i.l.bf16 %v10299_v14  ;;  %v8159_v3 = vunpack.i.h.bf16 %v10299_v14 }
 0x1f0   : > { %v8154_v35 = vunpack.i.h.bf16 %v8152_v8  ;;  %v8153_v36 = vunpack.i.l.bf16 %v8152_v8 }
 0x1f1   : > { %v972_v58 = vsel %vm958_vm9, %v8129_v23, %v8158_v22  ;;  %v973_v40 = vsel %vm958_vm9, %v8158_v22, %v8159_v3  ;;  %v1096_v23 = vsel %vm1082_vm8, %v8139_v62, %v8168_v39 }
 0x1f2   : > { %v1342_v30 = vsel %vm15669_vm13, %v8144_v48, %v8153_v36  ;;  %v1343_v50 = vsel %vm15669_vm13, %v8153_v36, %v8154_v35  ;;  %v1543_v18 = vsel %vm1529_vm11, %v9631_v27, %v972_v58 }
 0x1f3   : > { %v1616_v0 = vsel %vm1604_vm15, %v1591_v31, %v1342_v30  ;;  %v1617_v33 = vsel %vm1604_vm15, %v1592_v42, %v1343_v50  ;;  %v1568_v6 = vsel %vm1554_vm10, %v1543_v18, %v1096_v23 }
 0x1f4   : > { %1923 = vmatpush.msrb.mxu3 %v1616_v0  ;;  %1943 = vmatpush.msra.mxu0 %v1617_v33 }
 0x1f5   : > { %7703 = vmatmul.msk.f32.vlgmr.msrb.gmra.mxu3 %vm1636_vm0, %v9872_v56  ;;  %7705 = vmatmul.msk.f32.vlgmr.msra.gmra.mxu0 %vm1636_vm0, %v9872_v56 }
 0x1f6   : > { %v10319_v38 = vpop.permute.xlu0 %8171 }
 0x1f7   : > { %v10321_v21 = vpop.permute.xlu2 %8196  ;;  %v10323_v61 = vpop.permute.xlu1 %8161  ;;  %v8173_v5 = vunpack.i.l.bf16 %v10319_v38  ;;  %v8174_v30 = vunpack.i.h.bf16 %v10319_v38  ;;  %v8184_v38 = vunpack.i.h.bf16 %v10257_v52 }
 0x1f8   : > { %v8163_v32 = vunpack.i.l.bf16 %v10323_v61  ;;  %v8164_v8 = vunpack.i.h.bf16 %v10323_v61  ;;  %v8198_v18 = vunpack.i.l.bf16 %v10321_v21 }
 0x1f9   : > { %v1098_v28 = vsel %vm1082_vm8, %v8169_v49, %v8173_v5  ;;  %v1223_v39 = vsel %vm1206_vm12, %v8183_v4, %v8184_v38 }
 0x1fa   : > { %v974_v37 = vsel %vm958_vm9, %v8159_v3, %v8163_v32  ;;  %v975_v50 = vsel %vm958_vm9, %v8163_v32, %v8164_v8  ;;  %v976_v32 = vsel %vm958_vm9, %v8164_v8, %v8198_v18 }
 0x1fb   : > { %v1546_v3 = vsel %vm1529_vm11, %v9697_v2, %v975_v50 }
 0x1fe   : > { %v1408_v53 = vpop.permute.xlu0 %1407 }
 0x1ff   : > { %v10327_v59 = vpop.permute.xlu2 %8206  ;;  %v8177_v43 = vpop.permute.xlu1 %8176  ;;  %v1443_v13 = vsel %vm15668_vm7, %v10222_v10, %v1408_v53  ;;  %v1544_v10 = vsel %vm1529_vm11, %v9641_v12, %v973_v40 }
 0x200   : > { %7706 = vmatpush.msk.msra.mxu1 %vm1454_vm3, %v1443_v13  ;;  %v8178_v55 = vunpack.i.l.bf16 %v8177_v43  ;;  %v8179_v48 = vunpack.i.h.bf16 %v8177_v43  ;;  %v1569_v62 = vsel %vm1554_vm10, %v1544_v10, %v1097_v44  ;;  %v8199_v10 = vunpack.i.h.bf16 %v10321_v21 }
 0x201   : > { %v8208_v44 = vunpack.i.l.bf16 %v10327_v59  ;;  %v8209_v23 = vunpack.i.h.bf16 %v10327_v59 }
 0x202   : > { %v1220_v51 = vsel %vm1206_vm12, %v8149_v34, %v8178_v55  ;;  %v1221_v45 = vsel %vm1206_vm12, %v8178_v55, %v8179_v48  ;;  %v1222_v1 = vsel %vm1206_vm12, %v8179_v48, %v8183_v4 }
 0x203   : > { %v1593_v19 = vsel %vm1579_vm14, %v1568_v6, %v1220_v51  ;;  %v1594_v34 = vsel %vm1579_vm14, %v1569_v62, %v1221_v45 }
 0x206   : > { %v8187_v54 = vpop.permute.xlu0 %8186 }
 0x207   : > { %v10349_v11 = vpop.permute.xlu2 %8221  ;;  %v1410_v29 = vpop.permute.xlu1 %1409  ;;  %v8189_v27 = vunpack.i.h.bf16 %v8187_v54  ;;  %v8188_v9 = vunpack.i.l.bf16 %v8187_v54 }
 0x208   : > { %v1444_v12 = vsel %vm15668_vm7, %v1408_v53, %v1410_v29  ;;  %v1445_v47 = vsel %vm15668_vm7, %v1410_v29, %v10297_v7  ;;  %v977_v29 = vsel %vm958_vm9, %v8198_v18, %v8199_v10  ;;  %v8224_v18 = vunpack.i.h.bf16 %v10349_v11 }
 0x209   : > { %7708 = vmatpush.msk.msra.mxu2 %vm1454_vm3, %v1444_v12  ;;  %7710 = vmatpush.msk.msra.mxu3 %vm1454_vm3, %v1445_v47  ;;  %v1344_v16 = vsel %vm15669_vm13, %v8154_v35, %v8188_v9  ;;  %v1345_v46 = vsel %vm15669_vm13, %v8188_v9, %v8189_v27  ;;  %v1545_v35 = vsel %vm1529_vm11, %v9694_v57, %v974_v37 }
 0x20a   : > { %v1618_v14 = vsel %vm1604_vm15, %v1593_v19, %v1344_v16  ;;  %v1619_v17 = vsel %vm1604_vm15, %v1594_v34, %v1345_v46  ;;  %v1570_v42 = vsel %vm1554_vm10, %v1545_v35, %v1098_v28  ;;  %v1099_v57 = vsel %vm1082_vm8, %v8173_v5, %v8174_v30  ;;  %v15982_v34 = vld [vmem:[#allocation22_spill] sm:$0xff] }
 0x20b   : > { %1963 = vmatpush.msra.mxu1 %v1618_v14  ;;  %1983 = vmatpush.msra.mxu2 %v1619_v17  ;;  %v1595_v33 = vsel %vm1579_vm14, %v1570_v42, %v1222_v1  ;;  %v1571_v13 = vsel %vm1554_vm10, %v1546_v3, %v1099_v57  ;;  %v1101_v9 = vsel %vm1082_vm8, %v8208_v44, %v8209_v23 }
 0x20c   : > { %7707 = vmatmul.msk.f32.vlgmr.msra.gmra.mxu1 %vm1636_vm0, %v9872_v56  ;;  %7709 = vmatmul.msk.f32.vlgmr.msra.gmra.mxu2 %vm1636_vm0, %v9872_v56  ;;  %v1596_v2 = vsel %vm1579_vm14, %v1571_v13, %v1223_v39  ;;  %v1547_v47 = vsel %vm1529_vm11, %v9700_v63, %v976_v32  ;;  %v1548_v5 = vsel %vm1529_vm11, %v15982_v34, %v977_v29 }
 0x20d   : > { %v1573_v4 = vsel %vm1554_vm10, %v1548_v5, %v1101_v9 }
 0x20e   : > { %v10373_v24 = vpop.permute.xlu0 %8201 }
 0x20f   : > { %v10377_v36 = vpop.permute.xlu2 %1419  ;;  %v8192_v26 = vpop.permute.xlu1 %8191  ;;  %v8203_v63 = vunpack.i.l.bf16 %v10373_v24  ;;  %v8204_v42 = vunpack.i.h.bf16 %v10373_v24 }
 0x210   : > { %v8193_v31 = vunpack.i.l.bf16 %v8192_v26  ;;  %v8194_v22 = vunpack.i.h.bf16 %v8192_v26 }
 0x211   : > { %v978_v50 = vsel %vm958_vm9, %v8199_v10, %v8203_v63 }
 0x212   : > { %v1346_v0 = vsel %vm15669_vm13, %v8189_v27, %v8193_v31  ;;  %v1347_v55 = vsel %vm15669_vm13, %v8193_v31, %v8194_v22  ;;  %v1100_v27 = vsel %vm1082_vm8, %v8174_v30, %v8208_v44  ;;  %v8223_v31 = vunpack.i.l.bf16 %v10349_v11 }
 0x213   : > { %v1620_v61 = vsel %vm1604_vm15, %v1595_v33, %v1346_v0  ;;  %v1621_v52 = vsel %vm1604_vm15, %v1596_v2, %v1347_v55  ;;  %v1572_v46 = vsel %vm1554_vm10, %v1547_v47, %v1100_v27 }
 0x214   : > { %2003 = vmatpush.msra.mxu3 %v1620_v61 }
 0x215   : > { %7711 = vmatmul.msk.f32.vlgmr.msra.gmra.mxu3 %vm1636_vm0, %v9872_v56 }
 0x217   : > { %v10392_v53 = vpop.permute.xlu2 %8236  ;;  %v10394_v43 = vpop.permute.xlu0 %8211 }
 0x218   : > { %v1414_v58 = vpop.permute.xlu1 %1413  ;;  %v8213_v26 = vunpack.i.l.bf16 %v10394_v43  ;;  %v8214_v57 = vunpack.i.h.bf16 %v10394_v43 }
 0x219   : > { %v1446_v49 = vsel %vm15668_vm7, %v10297_v7, %v1414_v58 }
 0x21a   : > { %7712 = vmatpush.msk.msrb.mxu0 %vm1454_vm3, %v1446_v49  ;;  %v1102_v0 = vsel %vm1082_vm8, %v8209_v23, %v8213_v26  ;;  %v979_v49 = vsel %vm958_vm9, %v8203_v63, %v8204_v42  ;;  %v1103_v2 = vsel %vm1082_vm8, %v8213_v26, %v8214_v57 }
 0x21c   : > { %2023 = vmatpush.msrb.mxu0 %v1621_v52 }
 0x21d   : > { %7713 = vmatmul.msk.f32.vlgmr.msrb.gmra.mxu0 %vm1636_vm0, %v9872_v56 }
 0x21f   : > { %v10406_v40 = vpop.permute.xlu2 %8241  ;;  %v1416_v48 = vpop.permute.xlu0 %1415 }
 0x220   : > { %v8217_v51 = vpop.permute.xlu1 %8216  ;;  %v1447_v7 = vsel %vm15668_vm7, %v1414_v58, %v1416_v48  ;;  %v1549_v58 = vsel %vm1529_vm11, %v9691_v15, %v978_v50 }
 0x221   : > { %7714 = vmatpush.msk.msrb.mxu1 %vm1454_vm3, %v1447_v7  ;;  %v8218_v54 = vunpack.i.l.bf16 %v8217_v51  ;;  %v8219_v45 = vunpack.i.h.bf16 %v8217_v51  ;;  %v1574_v55 = vsel %vm1554_vm10, %v1549_v58, %v1102_v0  ;;  %v1705_v51 = vpop.f32.mrf.mxu2  ;;  %v1550_v7 = vsel %vm1529_vm11, %v9703_v25, %v979_v49 }
 0x222   : > { %v1575_v23 = vsel %vm1554_vm10, %v1550_v7, %v1103_v2  ;;  %v1227_v25 = vsel %vm1206_vm12, %v8223_v31, %v8224_v18 }
 0x223   : > { %v1224_v6 = vsel %vm1206_vm12, %v8184_v38, %v8218_v54  ;;  %v1225_v59 = vsel %vm1206_vm12, %v8218_v54, %v8219_v45  ;;  %v1226_v38 = vsel %vm1206_vm12, %v8219_v45, %v8223_v31  ;;  %v1600_v9 = vsel %vm1579_vm14, %v1575_v23, %v1227_v25 }
 0x224   : > { %v1597_v37 = vsel %vm1579_vm14, %v1572_v46, %v1224_v6  ;;  %v1598_v35 = vsel %vm1579_vm14, %v1573_v4, %v1225_v59  ;;  %v1599_v43 = vsel %vm1579_vm14, %v1574_v55, %v1226_v38  ;;  %v8238_v46 = vunpack.i.l.bf16 %v10392_v53 }
 0x225   : > { %v8244_v4 = vunpack.i.h.bf16 %v10406_v40 }
 0x227   : > { %v10419_v12 = vpop.permute.xlu2 %1204  ;;  %v8227_v21 = vpop.permute.xlu0 %8226 }
 0x228   : > { %v1418_v19 = vpop.permute.xlu1 %1417  ;;  %v8229_v62 = vunpack.i.h.bf16 %v8227_v21  ;;  %v8228_v16 = vunpack.i.l.bf16 %v8227_v21 }
 0x229   : > { %v1448_v14 = vsel %vm15668_vm7, %v1416_v48, %v1418_v19  ;;  %v1449_v17 = vsel %vm15668_vm7, %v1418_v19, %v10377_v36  ;;  %v1725_v3 = vpop.f32.mrf.mxu3 }
 0x22a   : > { %7716 = vmatpush.msk.msrb.mxu2 %vm1454_vm3, %v1448_v14  ;;  %7718 = vmatpush.msk.msrb.mxu3 %vm1454_vm3, %v1449_v17  ;;  %v1348_v8 = vsel %vm15669_vm13, %v8194_v22, %v8228_v16  ;;  %v1349_v28 = vsel %vm15669_vm13, %v8228_v16, %v8229_v62  ;;  %v8239_v17 = vunpack.i.h.bf16 %v10392_v53 }
 0x22b   : > { %v1622_v1 = vsel %vm1604_vm15, %v1597_v37, %v1348_v8  ;;  %v1623_v30 = vsel %vm1604_vm15, %v1598_v35, %v1349_v28  ;;  %v8243_v37 = vunpack.i.l.bf16 %v10406_v40  ;;  %v980_v28 = vsel %vm958_vm9, %v8204_v42, %v8238_v46 }
 0x22c   : > { %2043 = vmatpush.msrb.mxu1 %v1622_v1  ;;  %2063 = vmatpush.msrb.mxu2 %v1623_v30  ;;  %v981_v26 = vsel %vm958_vm9, %v8238_v46, %v8239_v17  ;;  %v1551_v24 = vsel %vm1529_vm11, %v9749_v41, %v980_v28  ;;  %v1745_v41 = vpop.f32.mrf.mxu2 }
 0x22d   : > { %7715 = vmatmul.msk.f32.vlgmr.msrb.gmra.mxu1 %vm1636_vm0, %v9872_v56  ;;  %7717 = vmatmul.msk.f32.vlgmr.msrb.gmra.mxu2 %vm1636_vm0, %v9872_v56  ;;  %v1104_v53 = vsel %vm1082_vm8, %v8214_v57, %v8243_v37  ;;  %v1105_v30 = vsel %vm1082_vm8, %v8243_v37, %v8244_v4  ;;  %v1552_v38 = vsel %vm1529_vm11, %v9752_v60, %v981_v26 }
 0x22e   : > { %v1576_v57 = vsel %vm1554_vm10, %v1551_v24, %v1104_v53  ;;  %v1577_v49 = vsel %vm1554_vm10, %v1552_v38, %v1105_v30 }
 0x22f   : > { %v10449_v33 = vpop.permute.xlu2 %1427  ;;  %v10451_v61 = vpop.permute.xlu0 %956 }
 0x230   : > { %v10454_v22 = vpop.permute.xlu1 %8231 }
 0x231   : > { %v8233_v13 = vunpack.i.l.bf16 %v10454_v22  ;;  %v8234_v52 = vunpack.i.h.bf16 %v10454_v22 }
 0x233   : > { %v1350_v39 = vsel %vm15669_vm13, %v8229_v62, %v8233_v13  ;;  %v1351_v11 = vsel %vm15669_vm13, %v8233_v13, %v8234_v52 }
 0x234   : > { %v1624_v48 = vsel %vm1604_vm15, %v1599_v43, %v1350_v39  ;;  %v1785_v15 = vpop.f32.mrf.mxu0  ;;  %v1625_v21 = vsel %vm1604_vm15, %v1600_v9, %v1351_v11 }
 0x235   : > { %2083 = vmatpush.msrb.mxu3 %v1624_v48 }
 0x236   : > { %7719 = vmatmul.msk.f32.vlgmr.msrb.gmra.mxu3 %vm1636_vm0, %v9872_v56 }
 0x237   : > { %v10474_v10 = vpop.permute.xlu2 %1633  ;;  %v10476_v44 = vpop.permute.xlu0 %1080 }
 0x238   : > { %v1422_v54 = vpop.permute.xlu1 %1421  ;;  %v1786_v45 = vadd.f32 %v1785_v15, %v10474_v10  ;;  %v1706_v32 = vadd.f32 %v1705_v51, %v10474_v10  ;;  %v1726_v19 = vadd.f32 %v1725_v3, %v10474_v10  ;;  %v1106_v22 = vsel %vm1082_vm8, %v8244_v4, %v10476_v44 }
 0x239   : > { %v1450_v29 = vsel %vm15668_vm7, %v10377_v36, %v1422_v54  ;;  %v1765_v27 = vpop.f32.mrf.mxu3 }
 0x23a   : > { %7720 = vmatpush.msk.msra.mxu0 %vm1454_vm3, %v1450_v29  ;;  %vm2172_vm4 = vcmp.ge.f32.partialorder %v1786_v45, 0.0  ;;  %v2196_v6 = vmul.f32 0.01, %v1786_v45  ;;  %vm2168_vm6 = vcmp.ge.f32.partialorder %v1706_v32, 0.0  ;;  %v2192_v47 = vmul.f32 0.01, %v1706_v32 }
 0x23b   : > { %v1766_v62 = vadd.f32 %v1765_v27, %v10474_v10  ;;  %v2193_v14 = vmul.f32 0.01, %v1726_v19 }
 0x23c   : > { %2103 = vmatpush.msra.mxu0 %v1625_v21  ;;  %v2220_v59 = vsel %vm2172_vm4, %v1786_v45, %v2196_v6  ;;  %v2216_v36 = vsel %vm2168_vm6, %v1706_v32, %v2192_v47  ;;  %vm2169_vm4 = vcmp.ge.f32.partialorder %v1726_v19, 0.0  ;;  %v1746_v21 = vadd.f32 %v1745_v41, %v10474_v10 }
 0x23d   : > { %7721 = vmatmul.msk.f32.vlgmr.msra.gmra.mxu0 %vm1636_vm0, %v9872_v56  ;;  %2272 = vrot.lane.b32.xlu1 %v2220_v59, %s9002_s23  ;;  %v2195_v56 = vmul.f32 0.01, %v1766_v62  ;;  %vm2171_vm6 = vcmp.ge.f32.partialorder %v1766_v62, 0.0  ;;  %v2217_v35 = vsel %vm2169_vm4, %v1726_v19, %v2193_v14 }
 0x23e   : > { %2264 = vrot.lane.b32.xlu0 %v2216_v36, %s9002_s23  ;;  %v2194_v36 = vmul.f32 0.01, %v1746_v21 }
 0x23f   : > { %v1424_v16 = vpop.permute.xlu0 %1423  ;;  %v2219_v1 = vsel %vm2171_vm6, %v1766_v62, %v2195_v56 }
 0x240   : > { %v8247_v34 = vpop.permute.xlu1 %8246  ;;  %v1451_v5 = vsel %vm15668_vm7, %v1422_v54, %v1424_v16 }
 0x241   : > { %7722 = vmatpush.msk.msra.mxu1 %vm1454_vm3, %v1451_v5  ;;  %v8248_v63 = vunpack.i.l.bf16 %v8247_v34  ;;  %v8249_v8 = vunpack.i.h.bf16 %v8247_v34 }
 0x243   : > { %v1228_v40 = vsel %vm1206_vm12, %v8224_v18, %v8248_v63  ;;  %v1229_v50 = vsel %vm1206_vm12, %v8248_v63, %v8249_v8  ;;  %v982_v18 = vsel %vm958_vm9, %v8239_v17, %v10451_v61  ;;  %v1230_v61 = vsel %vm1206_vm12, %v8249_v8, %v10419_v12 }
 0x244   : > { %v1601_v55 = vsel %vm1579_vm14, %v1576_v57, %v1228_v40  ;;  %v1602_v43 = vsel %vm1579_vm14, %v1577_v49, %v1229_v50  ;;  %v1553_v7 = vsel %vm1529_vm11, %v9755_v20, %v982_v18 }
 0x245   : > { %2266 = vrot.lane.b32.xlu1 %v2217_v35, %s9002_s23  ;;  %v1578_v23 = vsel %vm1554_vm10, %v1553_v7, %v1106_v22 }
 0x246   : > { %2270 = vrot.lane.b32.xlu0 %v2219_v1, %s9002_s23  ;;  %v1603_v11 = vsel %vm1579_vm14, %v1578_v23, %v1230_v61 }
 0x247   : > { %v8252_v31 = vpop.permute.xlu0 %8251 }
 0x248   : > { %v1426_v42 = vpop.permute.xlu1 %1425  ;;  %v8254_v0 = vunpack.i.h.bf16 %v8252_v31  ;;  %v8253_v3 = vunpack.i.l.bf16 %v8252_v31 }
 0x249   : > { %v1452_v13 = vsel %vm15668_vm7, %v1424_v16, %v1426_v42  ;;  %v1453_v58 = vsel %vm15668_vm7, %v1426_v42, %v10449_v33 }
 0x24a   : > { %7724 = vmatpush.msk.msra.mxu2 %vm1454_vm3, %v1452_v13  ;;  %7726 = vmatpush.msk.msra.mxu3 %vm1454_vm3, %v1453_v58  ;;  %v1352_v39 = vsel %vm15669_vm13, %v8234_v52, %v8253_v3  ;;  %v1353_v60 = vsel %vm15669_vm13, %v8253_v3, %v8254_v0  ;;  %v8992_v52 = vld [vmem:[%s15607_s1] sm:$0xf] }
 0x24b   : > { %v1805_v2 = vpop.f32.mrf.mxu1  ;;  %v1626_v33 = vsel %vm1604_vm15, %v1601_v55, %v1352_v39  ;;  %v1627_v48 = vsel %vm1604_vm15, %v1602_v43, %v1353_v60 }
 0x24c   : > { %v1806_v15 = vadd.f32 %v1805_v2, %v10474_v10  ;;  %2123 = vmatpush.msra.mxu1 %v1626_v33  ;;  %2143 = vmatpush.msra.mxu2 %v1627_v48 }
 0x24d   : > { %7723 = vmatmul.msk.f32.vlgmr.msra.gmra.mxu1 %vm1636_vm0, %v8992_v52  ;;  %7725 = vmatmul.msk.f32.vlgmr.msra.gmra.mxu2 %vm1636_vm0, %v8992_v52 }
 0x24e   : > { %vm2173_vm3 = vcmp.ge.f32.partialorder %v1806_v15, 0.0  ;;  %v2197_v51 = vmul.f32 0.01, %v1806_v15 }
 0x250   : > { %v1329_v54 = vpop.permute.xlu1 %1328  ;;  %v2221_v44 = vsel %vm2173_vm3, %v1806_v15, %v2197_v51 }
 0x251   : > { %v1354_v45 = vsel %vm15669_vm13, %v8254_v0, %v1329_v54  ;;  %2274 = vrot.lane.b32.xlu2 %v2221_v44, %s9002_s23 }
 0x252   : > { %v1825_v32 = vpop.f32.mrf.mxu2  ;;  %v1628_v29 = vsel %vm1604_vm15, %v1603_v11, %v1354_v45 }
 0x253   : > { %v1826_v25 = vadd.f32 %v1825_v32, %v10474_v10  ;;  %2163 = vmatpush.msra.mxu3 %v1628_v29 }
 0x254   : > { %v1865_v12 = vpop.f32.mrf.mxu0  ;;  %7727 = vmatmul.msk.f32.vlgmr.msra.gmra.mxu3 %vm1636_vm0, %v8992_v52  ;;  %vm2170_vm0 = vcmp.ge.f32.partialorder %v1746_v21, 0.0 }
 0x255   : > { %v2198_v20 = vmul.f32 0.01, %v1826_v25  ;;  %v1866_v27 = vadd.f32 %v1865_v12, %v10474_v10  ;;  %vm2174_vm10 = vcmp.ge.f32.partialorder %v1826_v25, 0.0  ;;  %v2218_v46 = vsel %vm2170_vm0, %v1746_v21, %v2194_v36 }
 0x257   : > { %v2222_v9 = vsel %vm2174_vm10, %v1826_v25, %v2198_v20  ;;  %vm2176_vm4 = vcmp.ge.f32.partialorder %v1866_v27, 0.0  ;;  %v2200_v6 = vmul.f32 0.01, %v1866_v27 }
 0x258   : > { %2276 = vrot.lane.b32.xlu0 %v2222_v9, %s9002_s23 }
 0x259   : > { %v2224_v47 = vsel %vm2176_vm4, %v1866_v27, %v2200_v6  ;;  %v1845_v59 = vpop.f32.mrf.mxu3  ;;  %vm15983_vm4 = vcmask 31744  }
 0x25a   : > { %2280 = vrot.lane.b32.xlu2 %v2224_v47, %s9002_s23  ;;  %v1846_v19 = vadd.f32 %v1845_v59, %v10474_v10  ;;  %vm15985_vm0 = vmmov %vm15983_vm4 }
 0x25c   : > { %v2199_v62 = vmul.f32 0.01, %v1846_v19  ;;  %vm2175_vm14 = vcmp.ge.f32.partialorder %v1846_v19, 0.0 }
 0x25e   : > { %v2223_v16 = vsel %vm2175_vm14, %v1846_v19, %v2199_v62  ;;  %vm15984_vm14 = vmmov %vm15983_vm4 }
 0x25f   : > { %2278 = vrot.lane.b32.xlu1 %v2223_v16, %s9002_s23 }
 0x262   : > { %2268 = vrot.lane.b32.xlu2 %v2218_v46, %s9002_s23 }
 0x26a   : > { %v1885_v34 = vpop.f32.mrf.mxu1 }
 0x26b   : > { %v1886_v5 = vadd.f32 %v1885_v34, %v10474_v10 }
 0x26d   : > { %v2201_v14 = vmul.f32 0.01, %v1886_v5  ;;  %vm2177_vm15 = vcmp.ge.f32.partialorder %v1886_v5, 0.0 }
 0x26f   : > { %v2225_v17 = vsel %vm2177_vm15, %v1886_v5, %v2201_v14  ;;  %vm15986_vm15 = vmmov %vm15985_vm0 }
 0x270   : > { %v1905_v37 = vpop.f32.mrf.mxu2  ;;  %2282 = vrot.lane.b32.xlu2 %v2225_v17, %s9002_s23 }
 0x271   : > { %v1906_v56 = vadd.f32 %v1905_v37, %v10474_v10 }
 0x272   : > { %v1945_v4 = vpop.f32.mrf.mxu0 }
 0x273   : > { %v2202_v63 = vmul.f32 0.01, %v1906_v56  ;;  %v1946_v8 = vadd.f32 %v1945_v4, %v10474_v10  ;;  %vm2178_vm6 = vcmp.ge.f32.partialorder %v1906_v56, 0.0 }
 0x275   : > { %v2204_v28 = vmul.f32 0.01, %v1946_v8  ;;  %v2226_v35 = vsel %vm2178_vm6, %v1906_v56, %v2202_v63  ;;  %vm2180_vm3 = vcmp.ge.f32.partialorder %v1946_v8, 0.0  ;;  %vm15987_vm6 = vmmov %vm15985_vm0 }
 0x276   : > { %2284 = vrot.lane.b32.xlu0 %v2226_v35, %s9002_s23 }
 0x277   : > { %v2228_v26 = vsel %vm2180_vm3, %v1946_v8, %v2204_v28  ;;  %vm15988_vm3 = vmmov %vm15985_vm0 }
 0x278   : > { %v1925_v53 = vpop.f32.mrf.mxu3  ;;  %2288 = vrot.lane.b32.xlu2 %v2228_v26, %s9002_s23 }
 0x279   : > { %v1926_v1 = vadd.f32 %v1925_v53, %v10474_v10 }
 0x27b   : > { %v2203_v30 = vmul.f32 0.01, %v1926_v1  ;;  %vm2179_vm10 = vcmp.ge.f32.partialorder %v1926_v1, 0.0 }
 0x27d   : > { %v2227_v40 = vsel %vm2179_vm10, %v1926_v1, %v2203_v30  ;;  %vm15989_vm10 = vmmov %vm15985_vm0 }
 0x27e   : > { %2286 = vrot.lane.b32.xlu1 %v2227_v40, %s9002_s23 }
 0x289   : > { %v1965_v34 = vpop.f32.mrf.mxu1 }
 0x28a   : > { %v1966_v37 = vadd.f32 %v1965_v34, %v10474_v10 }
 0x28c   : > { %v2205_v8 = vmul.f32 0.01, %v1966_v37 }
 0x28f   : > { %v1985_v56 = vpop.f32.mrf.mxu2 }
 0x290   : > { %v1986_v53 = vadd.f32 %v1985_v56, %v10474_v10 }
 0x298   : > { %v2005_v4 = vpop.f32.mrf.mxu3 }
 0x299   : > { %v2006_v28 = vadd.f32 %v2005_v4, %v10474_v10 }
 0x29a   : > { %v2025_v35 = vpop.f32.mrf.mxu0 }
 0x29b   : > { %v2207_v1 = vmul.f32 0.01, %v2006_v28  ;;  %v2026_v40 = vadd.f32 %v2025_v35, %v10474_v10 }
 0x2ab   : > { %v10567_v31 = vpop.permute.xlu2 %2274 }
 0x2af   : > { %v2273_v24 = vpop.permute.xlu1 %2272 }
 0x2b0   : > { %v10571_v50 = vsel %vm15983_vm4, %v2273_v24, %v10567_v31  ;;  %v2265_v42 = vpop.permute.xlu0 %2264  ;;  %vm15990_vm4 = vmmov %vm15985_vm0 }
 0x2b1   : > { %3085 = vrot.lane.b32.xlu0 %v10571_v50, %s9009_s30  ;;  %v10578_v3 = vsel %vm15984_vm14, 0.0, %v2265_v42  ;;  %v2369_v7 = vrot.slane %v10571_v50, 4  ;;  %vm15991_vm14 = vmmov %vm15985_vm0 }
 0x2b2   : > { %v2364_v13 = vrot.slane %v10578_v3, 4 }
 0x2b4   : > { %v10575_v0 = vpop.permute.xlu2 %2280 }
 0x2b7   : > { %v2267_v57 = vpop.permute.xlu1 %2266 }
 0x2b8   : > { %v10581_v38 = vsel %vm15985_vm0, %v2265_v42, %v2267_v57  ;;  %v2271_v49 = vpop.permute.xlu0 %2270 }
 0x2b9   : > { %v2365_v58 = vrot.slane %v10581_v38, 4  ;;  %3075 = vrot.lane.b32.xlu0 %v10578_v3, %s9009_s30  ;;  %3077 = vrot.lane.b32.xlu1 %v10581_v38, %s9009_s30  ;;  %v8256_v43 = vpack.i.bf16 %v10581_v38, %v10578_v3  ;;  %v10610_v33 = vsel %vm15988_vm3, %v2271_v49, %v2273_v24  ;;  %vm2181_vm3 = vcmp.ge.f32.partialorder %v1966_v37, 0.0 }
 0x2ba   : > { %v8301_v48 = vpack.i.bf16 %v10571_v50, %v10610_v33  ;;  %v2368_v51 = vrot.slane %v10610_v33, 4  ;;  %v2229_v30 = vsel %vm2181_vm3, %v1966_v37, %v2205_v8 }
 0x2bb   : > { %v8271_v55 = vpack.i.bf16 %v2365_v58, %v2364_v13 }
 0x2bc   : > { %v2269_v41 = vpop.permute.xlu2 %2268  ;;  %v8331_v23 = vpack.i.bf16 %v2369_v7, %v2368_v51 }
 0x2bd   : > { %v10590_v39 = vsel %vm15986_vm15, %v2267_v57, %v2269_v41  ;;  %v10593_v60 = vsel %vm15987_vm6, %v2269_v41, %v2271_v49  ;;  %8272 = vrot.lane.b32.xlu2 %v8271_v55, %s9010_s12  ;;  %vm15992_vm15 = vmmov %vm15985_vm0  ;;  %v2045_v49 = vpop.f32.mrf.mxu1  ;;  %v2085_v41 = vpop.f32.mrf.mxu3 }
 0x2be   : > { %v8291_v2 = vpack.i.bf16 %v10593_v60, %v10590_v39  ;;  %v2366_v18 = vrot.slane %v10590_v39, 4  ;;  %v2367_v15 = vrot.slane %v10593_v60, 4  ;;  %vm15993_vm6 = vmmov %vm15985_vm0 }
 0x2c0   : > { %v8321_v22 = vpack.i.bf16 %v2367_v15, %v2366_v18 }
 0x2c1   : > { %8257 = vrot.lane.b32.xlu0 %v8256_v43, %s9007_s28  ;;  %8292 = vrot.lane.b32.xlu1 %v8291_v2, %s9007_s28 }
 0x2c5   : > { %8277 = vrot.lane.b32.xlu2 %v8271_v55, %s9008_s29 }
 0x2c9   : > { %8262 = vrot.lane.b32.xlu0 %v8256_v43, %s9006_s27  ;;  %3081 = vrot.lane.b32.xlu1 %v10593_v60, %s9009_s30 }
 0x2ca   : > { %v2277_v52 = vpop.permute.xlu0 %2276  ;;  %v2283_v44 = vpop.permute.xlu2 %2282 }
 0x2cb   : > { %v10653_v27 = vsel %vm15985_vm0, %v10567_v31, %v2277_v52  ;;  %v10669_v21 = vsel %vm15993_vm6, %v10575_v0, %v2283_v44  ;;  %v2065_v31 = vpop.f32.mrf.mxu2 }
 0x2cc   : > { %v2370_v62 = vrot.slane %v10653_v27, 4  ;;  %v2373_v5 = vrot.slane %v10669_v21, 4  ;;  %v2066_v57 = vadd.f32 %v2065_v31, %v10474_v10  ;;  %v2125_v31 = vpop.f32.mrf.mxu1 }
 0x2cd   : > { %8282 = vrot.lane.b32.xlu2 %v8271_v55, %s9005_s26 }
 0x2ce   : > { %vm2186_vm0 = vcmp.ge.f32.partialorder %v2066_v57, 0.0 }
 0x2d1   : > { %8267 = vrot.lane.b32.xlu0 %v8256_v43, %s9004_s25  ;;  %8297 = vrot.lane.b32.xlu1 %v8291_v2, %s9006_s27  ;;  %v2279_v61 = vpop.permute.xlu1 %2278 }
 0x2d2   : > { %v10647_v20 = vsel %vm15991_vm14, %v2277_v52, %v2279_v61  ;;  %v10663_v6 = vsel %vm15992_vm15, %v2279_v61, %v10575_v0  ;;  %v10678_v19 = vpop.permute.xlu2 %2288  ;;  %v2206_v0 = vmul.f32 0.01, %v1986_v53  ;;  %vm2184_vm14 = vcmp.ge.f32.partialorder %v2026_v40, 0.0 }
 0x2d3   : > { %v8361_v9 = vpack.i.bf16 %v10647_v20, %v10653_v27  ;;  %v8381_v47 = vpack.i.bf16 %v10669_v21, %v10663_v6  ;;  %v2371_v59 = vrot.slane %v10647_v20, 4  ;;  %v2372_v46 = vrot.slane %v10663_v6, 4  ;;  %v2145_v37 = vpop.f32.mrf.mxu2 }
 0x2d5   : > { %3079 = vrot.lane.b32.xlu2 %v10590_v39, %s9009_s30  ;;  %v8406_v36 = vpack.i.bf16 %v2371_v59, %v2370_v62  ;;  %v8411_v17 = vpack.i.bf16 %v2373_v5, %v2372_v46 }
 0x2d9   : > { %8287 = vrot.lane.b32.xlu0 %v8271_v55, %s9003_s24  ;;  %8302 = vrot.lane.b32.xlu1 %v8301_v48, %s9007_s28  ;;  %v2208_v55 = vmul.f32 0.01, %v2026_v40 }
 0x2db   : > { %v2232_v52 = vsel %vm2184_vm14, %v2026_v40, %v2208_v55  ;;  %v2126_v55 = vadd.f32 %v2125_v31, %v10474_v10 }
 0x2dd   : > { %3083 = vrot.lane.b32.xlu2 %v10610_v33, %s9009_s30 }
 0x2e1   : > { %8307 = vrot.lane.b32.xlu1 %v8291_v2, %s9004_s25  ;;  %8322 = vrot.lane.b32.xlu0 %v8321_v22, %s9010_s12  ;;  %v2046_v2 = vadd.f32 %v2045_v49, %v10474_v10 }
 0x2e3   : > { %vm2185_vm15 = vcmp.ge.f32.partialorder %v2046_v2, 0.0 }
 0x2e5   : > { %8317 = vrot.lane.b32.xlu2 %v8301_v48, %s9004_s25 }
 0x2e8   : > { %v2285_v54 = vpop.permute.xlu0 %2284 }
 0x2e9   : > { %8312 = vrot.lane.b32.xlu1 %v8301_v48, %s9006_s27  ;;  %8327 = vrot.lane.b32.xlu0 %v8321_v22, %s9008_s29  ;;  %v10631_v45 = vsel %vm15989_vm10, %v2283_v44, %v2285_v54  ;;  %vm2183_vm10 = vcmp.ge.f32.partialorder %v2006_v28, 0.0  ;;  %v2210_v48 = vmul.f32 0.01, %v2066_v57  ;;  %v2105_v44 = vpop.f32.mrf.mxu0 }
 0x2ea   : > { %v2374_v29 = vrot.slane %v10631_v45, 4  ;;  %v2231_v58 = vsel %vm2183_vm10, %v2006_v28, %v2207_v1 }
 0x2ed   : > { %8332 = vrot.lane.b32.xlu2 %v8331_v23, %s9010_s12 }
 0x2f0   : > { %v10633_v11 = vpop.permute.xlu1 %2286 }
 0x2f1   : > { %v10637_v32 = vsel %vm15990_vm4, %v2285_v54, %v10633_v11  ;;  %8347 = vrot.lane.b32.xlu1 %v8321_v22, %s9003_s24  ;;  %8337 = vrot.lane.b32.xlu0 %v8321_v22, %s9005_s26  ;;  %vm2182_vm4 = vcmp.ge.f32.partialorder %v1986_v53, 0.0  ;;  %v2086_v22 = vadd.f32 %v2085_v41, %v10474_v10  ;;  %v2209_v54 = vmul.f32 0.01, %v2046_v2 }
 0x2f2   : > { %v2375_v25 = vrot.slane %v10637_v32, 4  ;;  %v2230_v15 = vsel %vm2182_vm4, %v1986_v53, %v2206_v0  ;;  %vm2189_vm4 = vcmp.ge.f32.partialorder %v2126_v55, 0.0  ;;  %v8431_v31 = vpack.i.bf16 %v10637_v32, %v10631_v45 }
 0x2f3   : > { %vm2187_vm6 = vcmp.ge.f32.partialorder %v2086_v22, 0.0  ;;  %v2233_v5 = vsel %vm2185_vm15, %v2046_v2, %v2209_v54  ;;  %vm3252_vm15 = vcmask 293888  }
 0x2f4   : > { %v10643_v12 = vpack.i.bf16 %v2375_v25, %v2374_v29 }
 0x2f5   : > { %8342 = vrot.lane.b32.xlu2 %v8331_v23, %s9008_s29 }
 0x2f9   : > { %8357 = vrot.lane.b32.xlu1 %v8331_v23, %s9003_s24  ;;  %8352 = vrot.lane.b32.xlu0 %v8331_v23, %s9005_s26 }
 0x2fd   : > { %8362 = vrot.lane.b32.xlu2 %v8361_v9, %s9007_s28 }
 0x301   : > { %8367 = vrot.lane.b32.xlu0 %v8361_v9, %s9006_s27  ;;  %3087 = vrot.lane.b32.xlu1 %v10653_v27, %s9009_s30 }
 0x305   : > { %3091 = vrot.lane.b32.xlu2 %v10663_v6, %s9009_s30 }
 0x309   : > { %8382 = vrot.lane.b32.xlu0 %v8381_v47, %s9006_s27  ;;  %3089 = vrot.lane.b32.xlu1 %v10647_v20, %s9009_s30 }
 0x30d   : > { %8372 = vrot.lane.b32.xlu2 %v8381_v47, %s9007_s28 }
 0x311   : > { %8387 = vrot.lane.b32.xlu0 %v8381_v47, %s9004_s25  ;;  %8377 = vrot.lane.b32.xlu1 %v8361_v9, %s9004_s25  ;;  %v2234_v9 = vsel %vm2186_vm0, %v2066_v57, %v2210_v48  ;;  %v2211_v47 = vmul.f32 0.01, %v2086_v22  ;;  %vm15994_vm0 = vcmask 31744  }
 0x315   : > { %8407 = vrot.lane.b32.xlu2 %v8406_v36, %s9005_s26 }
 0x317   : > { %v10684_v16 = vpop.permute.xlu2 %8272 }
 0x318   : > { %v8275_v51 = vunpack.i.h.bf16 %v10684_v16  ;;  %v8274_v61 = vunpack.i.l.bf16 %v10684_v16  ;;  %v10843_v16 = vsel %vm15994_vm0, %v10633_v11, %v10678_v19 }
 0x319   : > { %8397 = vrot.lane.b32.xlu1 %v8406_v36, %s9008_s29  ;;  %8392 = vrot.lane.b32.xlu0 %v8406_v36, %s9010_s12 }
 0x31a   : > { %v3027_v62 = vsel %vm15669_vm13, %v8274_v61, %v8275_v51 }
 0x31d   : > { %8417 = vrot.lane.b32.xlu2 %v8406_v36, %s9003_s24  ;;  %v2106_v36 = vadd.f32 %v2105_v44, %v10474_v10 }
 0x31f   : > { %v10691_v14 = vpop.permute.xlu2 %8277  ;;  %v2212_v8 = vmul.f32 0.01, %v2106_v36  ;;  %vm2188_vm3 = vcmp.ge.f32.partialorder %v2106_v36, 0.0 }
 0x320   : > { %v8280_v56 = vunpack.i.h.bf16 %v10691_v14  ;;  %v8279_v4 = vunpack.i.l.bf16 %v10691_v14 }
 0x321   : > { %8412 = vrot.lane.b32.xlu1 %v8411_v17, %s9008_s29  ;;  %8402 = vrot.lane.b32.xlu0 %v8411_v17, %s9010_s12  ;;  %v2236_v49 = vsel %vm2188_vm3, %v2106_v36, %v2212_v8  ;;  %vm15996_vm3 = vmmov %vm15994_vm0 }
 0x322   : > { %v2831_v57 = vsel %vm1082_vm8, %v8279_v4, %v8280_v56 }
 0x323   : > { %v10696_v63 = vpop.permute.xlu0 %3085 }
 0x325   : > { %8427 = vrot.lane.b32.xlu2 %v8411_v17, %s9003_s24 }
 0x327   : > { %v10700_v26 = vpop.permute.xlu2 %8282 }
 0x328   : > { %v8285_v2 = vunpack.i.h.bf16 %v10700_v26  ;;  %v8284_v48 = vunpack.i.l.bf16 %v10700_v26 }
 0x329   : > { %8422 = vrot.lane.b32.xlu1 %v8411_v17, %s9005_s26  ;;  %2290 = vrot.lane.b32.xlu0 %v2229_v30, %s9002_s23  ;;  %v2235_v17 = vsel %vm2187_vm6, %v2086_v22, %v2211_v47  ;;  %v2213_v22 = vmul.f32 0.01, %v2126_v55  ;;  %vm15995_vm6 = vmmov %vm15994_vm0 }
 0x32b   : > { %v3078_v24 = vpop.permute.xlu1 %3077  ;;  %v3076_v42 = vpop.permute.xlu0 %3075 }
 0x32c   : > { %v3125_v13 = vsel %vm15668_vm7, %v3076_v42, %v3078_v24  ;;  %v2165_v42 = vpop.f32.mrf.mxu3 }
 0x32d   : > { %2294 = vrot.lane.b32.xlu2 %v2231_v58, %s9002_s23  ;;  %7728 = vmatpush.msk.msrb.mxu0 %vm1529_vm11, %v3125_v13 }
 0x32f   : > { %v3080_v43 = vpop.permute.xlu2 %3079 }
 0x330   : > { %v3126_v18 = vsel %vm15668_vm7, %v3078_v24, %v3080_v43  ;;  %v2146_v24 = vadd.f32 %v2145_v37, %v10474_v10 }
 0x331   : > { %7730 = vmatpush.msk.msrb.mxu1 %vm1529_vm11, %v3126_v18  ;;  %2292 = vrot.lane.b32.xlu1 %v2230_v15, %s9002_s23 }
 0x332   : > { %2296 = vrot.lane.b32.xlu0 %v2232_v52, %s9002_s23  ;;  %v2214_v41 = vmul.f32 0.01, %v2146_v24  ;;  %vm2190_vm10 = vcmp.ge.f32.partialorder %v2146_v24, 0.0 }
 0x333   : > { %v10718_v7 = vpop.permute.xlu1 %8292  ;;  %v10720_v23 = vpop.permute.xlu0 %8257 }
 0x334   : > { %v8260_v29 = vunpack.i.h.bf16 %v10720_v23  ;;  %v8259_v25 = vunpack.i.l.bf16 %v10720_v23  ;;  %v2238_v54 = vsel %vm2190_vm10, %v2146_v24, %v2214_v41  ;;  %vm15997_vm10 = vmmov %vm15994_vm0 }
 0x335   : > { %2300 = vrot.lane.b32.xlu2 %v2234_v9, %s9002_s23 }
 0x336   : > { %v2929_v59 = vsel %vm1206_vm12, %v8259_v25, %v8260_v29  ;;  %v2635_v25 = vsel %vm834_vm5, %v8284_v48, %v8285_v2 }
 0x337   : > { %v10732_v46 = vpop.permute.xlu2 %3083  ;;  %v3221_v34 = vsel %vm1529_vm11, %v2929_v59, %v3027_v62  ;;  %v2237_v59 = vsel %vm2189_vm4, %v2126_v55, %v2213_v22  ;;  %vm15998_vm4 = vmmov %vm15994_vm0 }
 0x338   : > { %3316 = vmatpush.msrb.mxu0 %v3221_v34 }
 0x339   : > { %2298 = vrot.lane.b32.xlu1 %v2233_v5, %s9002_s23 }
 0x33a   : > { %2302 = vrot.lane.b32.xlu0 %v2235_v17, %s9002_s23 }
 0x33b   : > { %v3082_v28 = vpop.permute.xlu1 %3081  ;;  %v10739_v35 = vpop.permute.xlu0 %8262 }
 0x33c   : > { %v3127_v53 = vsel %vm15668_vm7, %v3080_v43, %v3082_v28  ;;  %v3128_v1 = vsel %vm15668_vm7, %v3082_v28, %v10732_v46  ;;  %v8265_v30 = vunpack.i.h.bf16 %v10739_v35  ;;  %v8264_v40 = vunpack.i.l.bf16 %v10739_v35 }
 0x33d   : > { %7732 = vmatpush.msk.msrb.mxu2 %vm1529_vm11, %v3127_v53  ;;  %7734 = vmatpush.msk.msrb.mxu3 %vm1529_vm11, %v3128_v1  ;;  %v2166_v43 = vadd.f32 %v2165_v42, %v10474_v10  ;;  %v3129_v42 = vsel %vm15668_vm7, %v10732_v46, %v10696_v63 }
 0x33e   : > { %3093 = vrot.lane.b32.xlu2 %v10669_v21, %s9009_s30  ;;  %v2733_v0 = vsel %vm958_vm9, %v8264_v40, %v8265_v30 }
 0x33f   : > { %v10757_v13 = vpop.permute.xlu2 %8317  ;;  %v3197_v58 = vsel %vm1529_vm11, %v2733_v0, %v2831_v57  ;;  %v2215_v10 = vmul.f32 0.01, %v2166_v43  ;;  %vm2191_vm14 = vcmp.ge.f32.partialorder %v2166_v43, 0.0  ;;  %v8295_v0 = vunpack.i.h.bf16 %v10718_v7 }
 0x340   : > { %3317 = vmatpush.msrb.mxu0 %v3197_v58  ;;  %v8294_v57 = vunpack.i.l.bf16 %v10718_v7  ;;  %v8320_v26 = vunpack.i.h.bf16 %v10757_v13 }
 0x341   : > { %2304 = vrot.lane.b32.xlu1 %v2236_v49, %s9002_s23  ;;  %v2239_v62 = vsel %vm2191_vm14, %v2166_v43, %v2215_v10  ;;  %vm15999_vm14 = vmmov %vm15994_vm0 }
 0x342   : > { %3095 = vrot.lane.b32.xlu0 %v10631_v45, %s9009_s30  ;;  %v2930_v7 = vsel %vm1206_vm12, %v8260_v29, %v8294_v57  ;;  %v2931_v43 = vsel %vm1206_vm12, %v8294_v57, %v8295_v0 }
 0x343   : > { %v10767_v18 = vpop.permute.xlu1 %8297  ;;  %v10769_v15 = vpop.permute.xlu0 %8267 }
 0x344   : > { %v8270_v52 = vunpack.i.h.bf16 %v10769_v15  ;;  %v8269_v61 = vunpack.i.l.bf16 %v10769_v15 }
 0x346   : > { %2308 = vrot.lane.b32.xlu2 %v2238_v54, %s9002_s23  ;;  %v2537_v44 = vsel %vm710_vm2, %v8269_v61, %v8270_v52 }
 0x347   : > { %v10780_v9 = vpop.permute.xlu2 %8332  ;;  %v3173_v47 = vsel %vm1529_vm11, %v2537_v44, %v2635_v25  ;;  %v8299_v25 = vunpack.i.l.bf16 %v10767_v18 }
 0x348   : > { %3318 = vmatpush.msrb.mxu0 %v3173_v47  ;;  %v8335_v8 = vunpack.i.h.bf16 %v10780_v9  ;;  %v8334_v28 = vunpack.i.l.bf16 %v10780_v9 }
 0x349   : > { %2306 = vrot.lane.b32.xlu1 %v2237_v59, %s9002_s23 }
 0x34a   : > { %2310 = vrot.lane.b32.xlu0 %v2239_v62, %s9002_s23 }
 0x34b   : > { %v10785_v36 = vpop.permute.xlu1 %8302  ;;  %v10787_v34 = vpop.permute.xlu0 %8287 }
 0x34c   : > { %v8305_v5 = vunpack.i.h.bf16 %v10785_v36  ;;  %v8304_v17 = vunpack.i.l.bf16 %v10785_v36  ;;  %v8290_v37 = vunpack.i.h.bf16 %v10787_v34  ;;  %v8289_v4 = vunpack.i.l.bf16 %v10787_v34 }
 0x34e   : > { %8437 = vrot.lane.b32.xlu2 %v10643_v12, %s9010_s12  ;;  %v2439_v53 = vsel %vm586_vm1, %v8289_v4, %v8290_v37  ;;  %v2933_v24 = vsel %vm1206_vm12, %v8304_v17, %v8305_v5  ;;  %v2932_v61 = vsel %vm1206_vm12, %v8295_v0, %v8304_v17 }
 0x34f   : > { %v10800_v1 = vpop.permute.xlu2 %8342  ;;  %v3149_v40 = vsel %vm1529_vm11, %v10578_v3, %v2439_v53  ;;  %v3031_v3 = vsel %vm15669_vm13, %v8334_v28, %v8335_v8  ;;  %v2734_v53 = vsel %vm958_vm9, %v8265_v30, %v8299_v25 }
 0x350   : > { %3319 = vmatpush.msrb.mxu0 %v3149_v40  ;;  %v3225_v58 = vsel %vm1529_vm11, %v2933_v24, %v3031_v3  ;;  %v8345_v47 = vunpack.i.h.bf16 %v10800_v1  ;;  %v8344_v59 = vunpack.i.l.bf16 %v10800_v1 }
 0x351   : > { %8432 = vrot.lane.b32.xlu1 %v8431_v31, %s9007_s28 }
 0x352   : > { %7736 = vmatpush.msk.msra.mxu0 %vm1529_vm11, %v3129_v42  ;;  %3097 = vrot.lane.b32.xlu0 %v10637_v32, %s9009_s30  ;;  %v2835_v24 = vsel %vm1082_vm8, %v8344_v59, %v8345_v47 }
 0x353   : > { %v10822_v55 = vpop.permute.xlu1 %8307  ;;  %v8323_v46 = vpop.permute.xlu0 %8322 }
 0x354   : > { %3396 = vmatpush.msra.mxu0 %v3225_v58  ;;  %v8325_v49 = vunpack.i.h.bf16 %v8323_v46  ;;  %v8324_v41 = vunpack.i.l.bf16 %v8323_v46 }
 0x356   : > { %8442 = vrot.lane.b32.xlu2 %v8431_v31, %s9006_s27  ;;  %v3028_v48 = vsel %vm15669_vm13, %v8275_v51, %v8324_v41  ;;  %v3029_v22 = vsel %vm15669_vm13, %v8324_v41, %v8325_v49  ;;  %v3030_v10 = vsel %vm15669_vm13, %v8325_v49, %v8334_v28  ;;  %v8300_v51 = vunpack.i.h.bf16 %v10767_v18 }
 0x357   : > { %v10835_v54 = vpop.permute.xlu2 %8362  ;;  %v3222_v23 = vsel %vm1529_vm11, %v2930_v7, %v3028_v48  ;;  %v3223_v29 = vsel %vm1529_vm11, %v2931_v43, %v3029_v22  ;;  %v3224_v44 = vsel %vm1529_vm11, %v2932_v61, %v3030_v10  ;;  %v8310_v49 = vunpack.i.h.bf16 %v10822_v55 }
 0x358   : > { %3336 = vmatpush.msrb.mxu1 %v3222_v23  ;;  %3356 = vmatpush.msrb.mxu2 %v3223_v29  ;;  %v2735_v40 = vsel %vm958_vm9, %v8299_v25, %v8300_v51  ;;  %v8309_v41 = vunpack.i.l.bf16 %v10822_v55 }
 0x359   : > { %3376 = vmatpush.msrb.mxu3 %v3224_v44  ;;  %3099 = vrot.lane.b32.xlu1 %v10843_v16, %s9009_s30 }
 0x35a   : > { %8447 = vrot.lane.b32.xlu0 %v10643_v12, %s9008_s29  ;;  %v2538_v23 = vsel %vm710_vm2, %v8270_v52, %v8309_v41  ;;  %v2539_v29 = vsel %vm710_vm2, %v8309_v41, %v8310_v49 }
 0x35b   : > { %v10853_v62 = vpop.permute.xlu1 %8312  ;;  %v8328_v11 = vpop.permute.xlu0 %8327 }
 0x35c   : > { %v8315_v17 = vunpack.i.h.bf16 %v10853_v62  ;;  %v8314_v4 = vunpack.i.l.bf16 %v10853_v62  ;;  %v8330_v28 = vunpack.i.h.bf16 %v8328_v11  ;;  %v8329_v18 = vunpack.i.l.bf16 %v8328_v11 }
 0x35e   : > { %v2832_v42 = vsel %vm1082_vm8, %v8280_v56, %v8329_v18  ;;  %v2833_v0 = vsel %vm1082_vm8, %v8329_v18, %v8330_v28  ;;  %v2736_v57 = vsel %vm958_vm9, %v8300_v51, %v8314_v4  ;;  %v2834_v3 = vsel %vm1082_vm8, %v8330_v28, %v8344_v59 }
 0x35f   : > { %v10870_v58 = vpop.permute.xlu2 %3091  ;;  %v3198_v35 = vsel %vm1529_vm11, %v2734_v53, %v2832_v42  ;;  %v3199_v30 = vsel %vm1529_vm11, %v2735_v40, %v2833_v0  ;;  %v3200_v46 = vsel %vm1529_vm11, %v2736_v57, %v2834_v3  ;;  %v2737_v14 = vsel %vm958_vm9, %v8314_v4, %v8315_v17 }
 0x360   : > { %3337 = vmatpush.msrb.mxu1 %v3198_v35  ;;  %3357 = vmatpush.msrb.mxu2 %v3199_v30  ;;  %v3201_v56 = vsel %vm1529_vm11, %v2737_v14, %v2835_v24 }
 0x361   : > { %3377 = vmatpush.msrb.mxu3 %v3200_v46  ;;  %3397 = vmatpush.msra.mxu0 %v3201_v56 }
 0x362   : > { %8462 = vrot.lane.b32.xlu0 %v8431_v31, %s9004_s25 }
 0x363   : > { %v8348_v7 = vpop.permute.xlu1 %8347  ;;  %v8338_v43 = vpop.permute.xlu0 %8337 }
 0x364   : > { %v8350_v48 = vunpack.i.h.bf16 %v8348_v7  ;;  %v8349_v22 = vunpack.i.l.bf16 %v8348_v7  ;;  %v8340_v61 = vunpack.i.h.bf16 %v8338_v43  ;;  %v8339_v10 = vunpack.i.l.bf16 %v8338_v43  ;;  %v10942_v7 = vld [vmem:[%s15609_s3] sm:$0xf] }
 0x365   : > { %7729 = vmatmul.msk.f32.vlgmr.msrb.gmra.mxu0 %vm3252_vm15, %v10942_v7 }
 0x366   : > { %v2636_v55 = vsel %vm834_vm5, %v8285_v2, %v8339_v10  ;;  %v2637_v44 = vsel %vm834_vm5, %v8339_v10, %v8340_v61  ;;  %v2440_v31 = vsel %vm586_vm1, %v8290_v37, %v8349_v22  ;;  %v2441_v51 = vsel %vm586_vm1, %v8349_v22, %v8350_v48 }
 0x367   : > { %v10894_v25 = vpop.permute.xlu2 %8372  ;;  %v3174_v15 = vsel %vm1529_vm11, %v2538_v23, %v2636_v55  ;;  %v3175_v52 = vsel %vm1529_vm11, %v2539_v29, %v2637_v44  ;;  %v8319_v2 = vunpack.i.l.bf16 %v10757_v13  ;;  %v3150_v59 = vsel %vm1529_vm11, %v10581_v38, %v2440_v31 }
 0x368   : > { %3338 = vmatpush.msrb.mxu1 %v3174_v15  ;;  %3358 = vmatpush.msrb.mxu2 %v3175_v52  ;;  %v3151_v34 = vsel %vm1529_vm11, %v10590_v39, %v2441_v51  ;;  %v8365_v10 = vunpack.i.h.bf16 %v10835_v54  ;;  %v8364_v23 = vunpack.i.l.bf16 %v10835_v54 }
 0x369   : > { %v2540_v40 = vsel %vm710_vm2, %v8310_v49, %v8319_v2  ;;  %v2541_v38 = vsel %vm710_vm2, %v8319_v2, %v8320_v26 }
 0x36a   : > { %3339 = vmatpush.msrb.mxu1 %v3150_v59  ;;  %3359 = vmatpush.msrb.mxu2 %v3151_v34  ;;  %v2934_v55 = vsel %vm1206_vm12, %v8305_v5, %v8364_v23  ;;  %v2935_v44 = vsel %vm1206_vm12, %v8364_v23, %v8365_v10  ;;  %v8375_v23 = vunpack.i.h.bf16 %v10894_v25 }
 0x36b   : > { %v10904_v37 = vpop.permute.xlu1 %8357  ;;  %v10906_v11 = vpop.permute.xlu0 %8352  ;;  %7731 = vmatmul.msk.f32.vlgmr.msrb.gmra.mxu1 %vm3252_vm15, %v10942_v7  ;;  %7733 = vmatmul.msk.f32.vlgmr.msrb.gmra.mxu2 %vm3252_vm15, %v10942_v7 }
 0x36c   : > { %v8360_v4 = vunpack.i.h.bf16 %v10904_v37  ;;  %v8359_v28 = vunpack.i.l.bf16 %v10904_v37  ;;  %v8355_v18 = vunpack.i.h.bf16 %v10906_v11  ;;  %v8354_v53 = vunpack.i.l.bf16 %v10906_v11 }
 0x36e   : > { %v2638_v39 = vsel %vm834_vm5, %v8340_v61, %v8354_v53  ;;  %v2639_v24 = vsel %vm834_vm5, %v8354_v53, %v8355_v18  ;;  %v2442_v42 = vsel %vm586_vm1, %v8350_v48, %v8359_v28  ;;  %v2443_v0 = vsel %vm586_vm1, %v8359_v28, %v8360_v4 }
 0x36f   : > { %v10924_v57 = vpop.permute.xlu2 %8407  ;;  %v3176_v3 = vsel %vm1529_vm11, %v2540_v40, %v2638_v39  ;;  %v3177_v35 = vsel %vm1529_vm11, %v2541_v38, %v2639_v24  ;;  %v3152_v30 = vsel %vm1529_vm11, %v10593_v60, %v2442_v42  ;;  %v3153_v46 = vsel %vm1529_vm11, %v10610_v33, %v2443_v0 }
 0x370   : > { %3378 = vmatpush.msrb.mxu3 %v3176_v3  ;;  %3398 = vmatpush.msra.mxu0 %v3177_v35  ;;  %v8410_v36 = vunpack.i.h.bf16 %v10924_v57  ;;  %v8409_v5 = vunpack.i.l.bf16 %v10924_v57 }
 0x372   : > { %3379 = vmatpush.msrb.mxu3 %v3152_v30  ;;  %3399 = vmatpush.msra.mxu0 %v3153_v46  ;;  %v2640_v62 = vsel %vm834_vm5, %v8355_v18, %v8409_v5  ;;  %v2641_v13 = vsel %vm834_vm5, %v8409_v5, %v8410_v36 }
 0x373   : > { %v3088_v14 = vpop.permute.xlu1 %3087  ;;  %v10932_v56 = vpop.permute.xlu0 %8367  ;;  %7735 = vmatmul.msk.f32.vlgmr.msrb.gmra.mxu3 %vm3252_vm15, %v10942_v7  ;;  %7737 = vmatmul.msk.f32.vlgmr.msra.gmra.mxu0 %vm3252_vm15, %v10942_v7 }
 0x374   : > { %v3130_v49 = vsel %vm15668_vm7, %v10696_v63, %v3088_v14  ;;  %v8370_v31 = vunpack.i.h.bf16 %v10932_v56  ;;  %v8369_v51 = vunpack.i.l.bf16 %v10932_v56 }
 0x375   : > { %7738 = vmatpush.msk.msra.mxu1 %vm1529_vm11, %v3130_v49 }
 0x376   : > { %v2738_v9 = vsel %vm958_vm9, %v8315_v17, %v8369_v51  ;;  %v8374_v17 = vunpack.i.l.bf16 %v10894_v25 }
 0x377   : > { %v10937_v41 = vpop.permute.xlu2 %8417 }
 0x378   : > { %v8420_v40 = vunpack.i.h.bf16 %v10937_v41  ;;  %v8419_v38 = vunpack.i.l.bf16 %v10937_v41 }
 0x37a   : > { %v2445_v56 = vsel %vm586_vm1, %v8419_v38, %v8420_v40 }
 0x37b   : > { %v3090_v60 = vpop.permute.xlu1 %3089  ;;  %v10948_v33 = vpop.permute.xlu0 %8382 }
 0x37c   : > { %v3131_v63 = vsel %vm15668_vm7, %v3088_v14, %v3090_v60  ;;  %v3132_v43 = vsel %vm15668_vm7, %v3090_v60, %v10870_v58 }
 0x37d   : > { %7740 = vmatpush.msk.msra.mxu2 %vm1529_vm11, %v3131_v63  ;;  %7742 = vmatpush.msk.msra.mxu3 %vm1529_vm11, %v3132_v43  ;;  %v8384_v63 = vunpack.i.l.bf16 %v10948_v33 }
 0x37f   : > { %v10959_v48 = vpop.permute.xlu2 %8427 }
 0x383   : > { %v10963_v22 = vpop.permute.xlu1 %8377  ;;  %v10965_v61 = vpop.permute.xlu0 %8387 }
 0x384   : > { %v8380_v15 = vunpack.i.h.bf16 %v10963_v22  ;;  %v8379_v52 = vunpack.i.l.bf16 %v10963_v22 }
 0x386   : > { %v2542_v1 = vsel %vm710_vm2, %v8320_v26, %v8379_v52  ;;  %v2444_v26 = vsel %vm586_vm1, %v8360_v4, %v8419_v38 }
 0x387   : > { %v10969_v29 = vpop.permute.xlu2 %2294  ;;  %v3178_v18 = vsel %vm1529_vm11, %v2542_v1, %v2640_v62 }
 0x38b   : > { %v8398_v2 = vpop.permute.xlu1 %8397  ;;  %v8393_v59 = vpop.permute.xlu0 %8392 }
 0x38c   : > { %v8400_v34 = vunpack.i.h.bf16 %v8398_v2  ;;  %v8399_v54 = vunpack.i.l.bf16 %v8398_v2  ;;  %v8395_v28 = vunpack.i.h.bf16 %v8393_v59  ;;  %v8394_v53 = vunpack.i.l.bf16 %v8393_v59 }
 0x38e   : > { %v3032_v39 = vsel %vm15669_vm13, %v8335_v8, %v8394_v53  ;;  %v3033_v24 = vsel %vm15669_vm13, %v8394_v53, %v8395_v28  ;;  %v2836_v42 = vsel %vm1082_vm8, %v8345_v47, %v8399_v54  ;;  %v2837_v0 = vsel %vm1082_vm8, %v8399_v54, %v8400_v34 }
 0x38f   : > { %v10991_v3 = vpop.permute.xlu2 %2300  ;;  %v3226_v35 = vsel %vm1529_vm11, %v2934_v55, %v3032_v39  ;;  %v3227_v30 = vsel %vm1529_vm11, %v2935_v44, %v3033_v24  ;;  %v2739_v8 = vsel %vm958_vm9, %v8369_v51, %v8370_v31  ;;  %v2543_v47 = vsel %vm710_vm2, %v8379_v52, %v8380_v15 }
 0x390   : > { %3416 = vmatpush.msra.mxu1 %v3226_v35  ;;  %3436 = vmatpush.msra.mxu2 %v3227_v30  ;;  %v3202_v46 = vsel %vm1529_vm11, %v2738_v9, %v2836_v42  ;;  %v3203_v14 = vsel %vm1529_vm11, %v2739_v8, %v2837_v0  ;;  %v3179_v60 = vsel %vm1529_vm11, %v2543_v47, %v2641_v13  ;;  %v8390_v39 = vunpack.i.h.bf16 %v10965_v61 }
 0x391   : > { %v3154_v55 = vsel %vm1529_vm11, %v10571_v50, %v2444_v26  ;;  %v3155_v44 = vsel %vm1529_vm11, %v10653_v27, %v2445_v56  ;;  %v2936_v52 = vsel %vm1206_vm12, %v8365_v10, %v8374_v17  ;;  %v8385_v50 = vunpack.i.h.bf16 %v10948_v33 }
 0x392   : > { %3417 = vmatpush.msra.mxu1 %v3202_v46  ;;  %3437 = vmatpush.msra.mxu2 %v3203_v14  ;;  %v2740_v27 = vsel %vm958_vm9, %v8370_v31, %v8384_v63  ;;  %v8430_v10 = vunpack.i.h.bf16 %v10959_v48  ;;  %v8389_v31 = vunpack.i.l.bf16 %v10965_v61  ;;  %v2937_v24 = vsel %vm1206_vm12, %v8374_v17, %v8375_v23 }
 0x393   : > { %v11020_v49 = vpop.permute.xlu1 %8412  ;;  %v11022_v11 = vpop.permute.xlu0 %8402  ;;  %v2741_v8 = vsel %vm958_vm9, %v8384_v63, %v8385_v50 }
 0x394   : > { %v8414_v43 = vunpack.i.l.bf16 %v11020_v49  ;;  %v8405_v37 = vunpack.i.h.bf16 %v11022_v11  ;;  %v8404_v4 = vunpack.i.l.bf16 %v11022_v11  ;;  %3418 = vmatpush.msra.mxu1 %v3178_v18  ;;  %3438 = vmatpush.msra.mxu2 %v3179_v60  ;;  %v8415_v51 = vunpack.i.h.bf16 %v11020_v49 }
 0x395   : > { %v2544_v14 = vsel %vm710_vm2, %v8380_v15, %v8389_v31  ;;  %v2545_v17 = vsel %vm710_vm2, %v8389_v31, %v8390_v39 }
 0x396   : > { %3419 = vmatpush.msra.mxu1 %v3154_v55  ;;  %3439 = vmatpush.msra.mxu2 %v3155_v44  ;;  %v3034_v2 = vsel %vm15669_vm13, %v8395_v28, %v8404_v4  ;;  %v2838_v59 = vsel %vm1082_vm8, %v8400_v34, %v8414_v43  ;;  %v3035_v5 = vsel %vm15669_vm13, %v8404_v4, %v8405_v37  ;;  %v8429_v34 = vunpack.i.l.bf16 %v10959_v48 }
 0x397   : > { %v3228_v54 = vsel %vm1529_vm11, %v2936_v52, %v3034_v2  ;;  %7739 = vmatmul.msk.f32.vlgmr.msra.gmra.mxu1 %vm3252_vm15, %v10942_v7  ;;  %7741 = vmatmul.msk.f32.vlgmr.msra.gmra.mxu2 %vm3252_vm15, %v10942_v7  ;;  %v3204_v38 = vsel %vm1529_vm11, %v2740_v27, %v2838_v59  ;;  %v2839_v42 = vsel %vm1082_vm8, %v8414_v43, %v8415_v51 }
 0x398   : > { %v3094_v53 = vpop.permute.xlu2 %3093  ;;  %3456 = vmatpush.msra.mxu3 %v3228_v54  ;;  %v3229_v35 = vsel %vm1529_vm11, %v2937_v24, %v3035_v5  ;;  %v3205_v1 = vsel %vm1529_vm11, %v2741_v8, %v2839_v42  ;;  %v2446_v47 = vsel %vm586_vm1, %v8420_v40, %v8429_v34  ;;  %v2447_v46 = vsel %vm586_vm1, %v8429_v34, %v8430_v10 }
 0x399   : > { %v3133_v28 = vsel %vm15668_vm7, %v10870_v58, %v3094_v53  ;;  %v3156_v22 = vsel %vm1529_vm11, %v10647_v20, %v2446_v47  ;;  %v3157_v57 = vsel %vm1529_vm11, %v10663_v6, %v2447_v46  ;;  %v2376_v20 = vrot.slane %v10843_v16, 4 }
 0x39a   : > { %7744 = vmatpush.msk.msrb.mxu0 %vm1529_vm11, %v3133_v28  ;;  %3457 = vmatpush.msra.mxu3 %v3204_v38 }
 0x39b   : > { %v11063_v0 = vpop.permute.xlu1 %8422  ;;  %v11065_v58 = vpop.permute.xlu0 %2290 }
 0x39c   : > { %v8425_v30 = vunpack.i.h.bf16 %v11063_v0  ;;  %v8424_v9 = vunpack.i.l.bf16 %v11063_v0  ;;  %3476 = vmatpush.msrb.mxu0 %v3229_v35 }
 0x39e   : > { %3477 = vmatpush.msrb.mxu0 %v3205_v1  ;;  %v2642_v62 = vsel %vm834_vm5, %v8410_v36, %v8424_v9  ;;  %v2643_v41 = vsel %vm834_vm5, %v8424_v9, %v8425_v30 }
 0x39f   : > { %v3180_v40 = vsel %vm1529_vm11, %v2544_v14, %v2642_v62  ;;  %v3181_v13 = vsel %vm1529_vm11, %v2545_v17, %v2643_v41 }
 0x3a0   : > { %3458 = vmatpush.msra.mxu3 %v3180_v40  ;;  %3478 = vmatpush.msrb.mxu0 %v3181_v13  ;;  %v11125_v4 = vpop.permute.xlu2 %2308 }
 0x3a2   : > { %3459 = vmatpush.msra.mxu3 %v3156_v22  ;;  %3479 = vmatpush.msrb.mxu0 %v3157_v57  ;;  %v11204_v22 = vsel %vm15999_vm14, %v10678_v19, %v11065_v58  ;;  %vm16004_vm14 = vmmov %vm15994_vm0 }
 0x3a3   : > { %v2293_v15 = vpop.permute.xlu1 %2292  ;;  %7743 = vmatmul.msk.f32.vlgmr.msra.gmra.mxu3 %vm3252_vm15, %v10942_v7  ;;  %7745 = vmatmul.msk.f32.vlgmr.msrb.gmra.mxu0 %vm3252_vm15, %v10942_v7 }
 0x3a4   : > { %v11104_v36 = vsel %vm15995_vm6, %v11065_v58, %v2293_v15  ;;  %v11106_v26 = vpop.permute.xlu0 %2296  ;;  %v11133_v52 = vsel %vm15996_vm3, %v2293_v15, %v10969_v29  ;;  %vm16000_vm6 = vmmov %vm15994_vm0 }
 0x3a5   : > { %v2378_v56 = vrot.slane %v11104_v36, 4  ;;  %v8451_v6 = vpack.i.bf16 %v11104_v36, %v10843_v16  ;;  %v11138_v2 = vsel %vm15997_vm10, %v10969_v29, %v11106_v26  ;;  %v2379_v59 = vrot.slane %v11133_v52, 4  ;;  %vm16001_vm3 = vmmov %vm15994_vm0 }
 0x3a6   : > { %v2380_v54 = vrot.slane %v11138_v2, 4  ;;  %v8501_v11 = vpack.i.bf16 %v11138_v2, %v11133_v52  ;;  %vm16002_vm10 = vmmov %vm15994_vm0 }
 0x3a7   : > { %8452 = vrot.lane.b32.xlu1 %v8451_v6, %s9007_s28  ;;  %v8476_v18 = vpack.i.bf16 %v2378_v56, %v2376_v20 }
 0x3a8   : > { %v11149_v27 = vpop.permute.xlu2 %8437  ;;  %v8506_v5 = vpack.i.bf16 %v2380_v54, %v2379_v59 }
 0x3a9   : > { %8477 = vrot.lane.b32.xlu0 %v8476_v18, %s9008_s29  ;;  %8457 = vrot.lane.b32.xlu2 %v8476_v18, %s9010_s12  ;;  %v8440_v29 = vunpack.i.h.bf16 %v11149_v27  ;;  %v8439_v34 = vunpack.i.l.bf16 %v11149_v27 }
 0x3ab   : > { %v11115_v60 = vpop.permute.xlu1 %2298  ;;  %v3036_v9 = vsel %vm15669_vm13, %v8405_v37, %v8439_v34  ;;  %v3037_v1 = vsel %vm15669_vm13, %v8439_v34, %v8440_v29 }
 0x3ac   : > { %v11117_v63 = vpop.permute.xlu0 %2302  ;;  %v11196_v41 = vsel %vm15998_vm4, %v11115_v60, %v10991_v3  ;;  %vm16003_vm4 = vmmov %vm15994_vm0 }
 0x3ad   : > { %v8531_v33 = vpack.i.bf16 %v11196_v41, %v11204_v22  ;;  %v2382_v49 = vrot.slane %v11196_v41, 4 }
 0x3af   : > { %8467 = vrot.lane.b32.xlu1 %v10643_v12, %s9005_s26 }
 0x3b1   : > { %8492 = vrot.lane.b32.xlu0 %v8476_v18, %s9005_s26  ;;  %8472 = vrot.lane.b32.xlu2 %v8451_v6, %s9006_s27 }
 0x3b3   : > { %v11123_v43 = vpop.permute.xlu1 %2304 }
 0x3b4   : > { %v3096_v55 = vpop.permute.xlu0 %3095 }
 0x3b5   : > { %v3134_v44 = vsel %vm15668_vm7, %v3094_v53, %v3096_v55 }
 0x3b6   : > { %7746 = vmatpush.msk.msrb.mxu1 %vm1529_vm11, %v3134_v44 }
 0x3b7   : > { %8482 = vrot.lane.b32.xlu1 %v10643_v12, %s9003_s24 }
 0x3b9   : > { %3105 = vrot.lane.b32.xlu0 %v11133_v52, %s9009_s30  ;;  %8487 = vrot.lane.b32.xlu2 %v8451_v6, %s9004_s25  ;;  %v11236_v6 = vsel %vm15994_vm0, %v11117_v63, %v11123_v43 }
 0x3bb   : > { %v11145_v53 = vpop.permute.xlu1 %2306 }
 0x3bc   : > { %v11147_v12 = vpop.permute.xlu0 %2310 }
 0x3bf   : > { %8497 = vrot.lane.b32.xlu1 %v8476_v18, %s9003_s24  ;;  %v11243_v18 = vsel %vm16000_vm6, %v10991_v3, %v11117_v63  ;;  %v11269_v63 = vsel %vm16001_vm3, %v11106_v26, %v11115_v60 }
 0x3c0   : > { %v2383_v44 = vrot.slane %v11243_v18, 4  ;;  %v8556_v54 = vpack.i.bf16 %v11236_v6, %v11243_v18  ;;  %v2381_v26 = vrot.slane %v11269_v63, 4 }
 0x3c1   : > { %3103 = vrot.lane.b32.xlu2 %v11104_v36, %s9009_s30  ;;  %8507 = vrot.lane.b32.xlu0 %v8506_v5, %s9010_s12 }
 0x3c3   : > { %v11157_v28 = vpop.permute.xlu1 %8432 }
 0x3c4   : > { %v8435_v38 = vunpack.i.h.bf16 %v11157_v28  ;;  %v8434_v31 = vunpack.i.l.bf16 %v11157_v28  ;;  %v3098_v24 = vpop.permute.xlu0 %3097 }
 0x3c5   : > { %v3135_v42 = vsel %vm15668_vm7, %v3096_v55, %v3098_v24  ;;  %v2384_v55 = vrot.slane %v11236_v6, 4 }
 0x3c6   : > { %7748 = vmatpush.msk.msrb.mxu2 %vm1529_vm11, %v3135_v42  ;;  %v2938_v35 = vsel %vm1206_vm12, %v8375_v23, %v8434_v31  ;;  %v2939_v8 = vsel %vm1206_vm12, %v8434_v31, %v8435_v38  ;;  %v11181_v23 = vpop.permute.xlu2 %8442  ;;  %v11292_v42 = vsel %vm16003_vm4, %v11125_v4, %v11147_v12 }
 0x3c7   : > { %3107 = vrot.lane.b32.xlu1 %v11138_v2, %s9009_s30  ;;  %v3230_v47 = vsel %vm1529_vm11, %v2938_v35, %v3036_v9  ;;  %v3231_v25 = vsel %vm1529_vm11, %v2939_v8, %v3037_v1  ;;  %v8445_v37 = vunpack.i.h.bf16 %v11181_v23  ;;  %v8444_v46 = vunpack.i.l.bf16 %v11181_v23 }
 0x3c8   : > { %3496 = vmatpush.msrb.mxu1 %v3230_v47  ;;  %3516 = vmatpush.msrb.mxu2 %v3231_v25  ;;  %v8561_v59 = vpack.i.bf16 %v2384_v55, %v2383_v44  ;;  %v2361_v35 = vsel %vm16004_vm14, %v11147_v12, 0.0  ;;  %v2387_v1 = vrot.slane %v11292_v42, 4 }
 0x3c9   : > { %8502 = vrot.lane.b32.xlu2 %v8501_v11, %s9007_s28  ;;  %8522 = vrot.lane.b32.xlu0 %v8501_v11, %s9004_s25  ;;  %v2742_v57 = vsel %vm958_vm9, %v8385_v50, %v8444_v46  ;;  %v2743_v20 = vsel %vm958_vm9, %v8444_v46, %v8445_v37  ;;  %v2388_v47 = vrot.slane %v2361_v35, 4 }
 0x3cb   : > { %v11187_v14 = vpop.permute.xlu1 %3099  ;;  %v11305_v25 = vpack.i.bf16 %v2388_v47, %v2387_v1 }
 0x3cc   : > { %v3136_v62 = vsel %vm15668_vm7, %v3098_v24, %v11187_v14  ;;  %v11191_v17 = vpop.permute.xlu0 %8447 }
 0x3cd   : > { %v8450_v40 = vunpack.i.h.bf16 %v11191_v17  ;;  %v8449_v13 = vunpack.i.l.bf16 %v11191_v17  ;;  %7750 = vmatpush.msk.msrb.mxu3 %vm1529_vm11, %v3136_v62 }
 0x3cf   : > { %8512 = vrot.lane.b32.xlu1 %v8501_v11, %s9006_s27  ;;  %v2840_v15 = vsel %vm1082_vm8, %v8415_v51, %v8449_v13  ;;  %v2841_v56 = vsel %vm1082_vm8, %v8449_v13, %v8450_v40  ;;  %v2377_v51 = vrot.slane %v11204_v22, 4 }
 0x3d0   : > { %v3206_v19 = vsel %vm1529_vm11, %v2742_v57, %v2840_v15  ;;  %v3207_v58 = vsel %vm1529_vm11, %v2743_v20, %v2841_v56 }
 0x3d1   : > { %3497 = vmatpush.msrb.mxu1 %v3206_v19  ;;  %3517 = vmatpush.msrb.mxu2 %v3207_v58  ;;  %v8536_v50 = vpack.i.bf16 %v2382_v49, %v2377_v51 }
 0x3d2   : > { %8517 = vrot.lane.b32.xlu2 %v8506_v5, %s9008_s29  ;;  %8532 = vrot.lane.b32.xlu0 %v8531_v33, %s9007_s28 }
 0x3d4   : > { %v8463_v9 = vpop.permute.xlu0 %8462 }
 0x3d5   : > { %v8464_v58 = vunpack.i.l.bf16 %v8463_v9 }
 0x3d7   : > { %8527 = vrot.lane.b32.xlu1 %v8506_v5, %s9005_s26 }
 0x3da   : > { %3101 = vrot.lane.b32.xlu2 %v11204_v22, %s9009_s30  ;;  %3111 = vrot.lane.b32.xlu0 %v11196_v41, %s9009_s30 }
 0x3df   : > { %8537 = vrot.lane.b32.xlu1 %v8536_v50, %s9010_s12 }
 0x3e2   : > { %8542 = vrot.lane.b32.xlu2 %v8506_v5, %s9003_s24  ;;  %8547 = vrot.lane.b32.xlu0 %v8531_v33, %s9006_s27  ;;  %v11274_v5 = vsel %vm16002_vm10, %v11145_v53, %v11125_v4 }
 0x3e3   : > { %v2386_v31 = vrot.slane %v11274_v5, 4  ;;  %v8606_v24 = vpack.i.bf16 %v11274_v5, %v11269_v63 }
 0x3e5   : > { %v11287_v60 = vpack.i.bf16 %v2386_v31, %v2381_v26 }
 0x3e7   : > { %3113 = vrot.lane.b32.xlu1 %v11243_v18, %s9009_s30 }
 0x3ea   : > { %3115 = vrot.lane.b32.xlu2 %v11236_v6, %s9009_s30  ;;  %8562 = vrot.lane.b32.xlu0 %v8561_v59, %s9010_s12 }
 0x3ef   : > { %8552 = vrot.lane.b32.xlu1 %v8536_v50, %s9008_s29 }
 0x3f2   : > { %8557 = vrot.lane.b32.xlu2 %v8556_v54, %s9007_s28  ;;  %8577 = vrot.lane.b32.xlu0 %v8556_v54, %s9006_s27 }
 0x3f7   : > { %8567 = vrot.lane.b32.xlu1 %v8531_v33, %s9004_s25 }
 0x3fa   : > { %8572 = vrot.lane.b32.xlu2 %v8536_v50, %s9005_s26  ;;  %8592 = vrot.lane.b32.xlu0 %v8556_v54, %s9004_s25 }
 0x3ff   : > { %8582 = vrot.lane.b32.xlu1 %v8561_v59, %s9008_s29 }
 0x402   : > { %8587 = vrot.lane.b32.xlu2 %v8536_v50, %s9003_s24  ;;  %8602 = vrot.lane.b32.xlu0 %v8561_v59, %s9003_s24  ;;  %v2546_v50 = vsel %vm710_vm2, %v8390_v39, %v8464_v58 }
 0x403   : > { %v11263_v3 = vpop.permute.xlu2 %8457 }
 0x404   : > { %v8459_v4 = vunpack.i.l.bf16 %v11263_v3 }
 0x406   : > { %v3038_v20 = vsel %vm15669_vm13, %v8440_v29, %v8459_v4  ;;  %v8626_v29 = vpack.i.bf16 %v2361_v35, %v11292_v42 }
 0x407   : > { %8597 = vrot.lane.b32.xlu1 %v8561_v59, %s9005_s26 }
 0x40a   : > { %3109 = vrot.lane.b32.xlu2 %v11269_v63, %s9009_s30  ;;  %3119 = vrot.lane.b32.xlu0 %v11274_v5, %s9009_s30 }
 0x40b   : > { %v11280_v34 = vpop.permute.xlu2 %8472 }
 0x40c   : > { %v8474_v12 = vunpack.i.l.bf16 %v11280_v34 }
 0x40e   : > { %v2744_v19 = vsel %vm958_vm9, %v8445_v37, %v8474_v12 }
 0x40f   : > { %8607 = vrot.lane.b32.xlu1 %v8606_v24, %s9007_s28 }
 0x412   : > { %8612 = vrot.lane.b32.xlu2 %v11287_v60, %s9010_s12  ;;  %8617 = vrot.lane.b32.xlu0 %v8606_v24, %s9006_s27 }
 0x413   : > { %v11299_v8 = vpop.permute.xlu2 %8487 }
 0x414   : > { %v8489_v23 = vunpack.i.l.bf16 %v11299_v8 }
 0x417   : > { %3121 = vrot.lane.b32.xlu1 %v11292_v42, %s9009_s30 }
 0x419   : > { %v11307_v11 = vpop.permute.xlu1 %8452 }
 0x41a   : > { %v8454_v46 = vunpack.i.l.bf16 %v11307_v11  ;;  %3123 = vrot.lane.b32.xlu2 %v2361_v35, %s9009_s30  ;;  %8632 = vrot.lane.b32.xlu0 %v11305_v25, %s9010_s12 }
 0x41b   : > { %v11314_v62 = vpop.permute.xlu2 %3103  ;;  %v11316_v13 = vpop.permute.xlu0 %8477 }
 0x41c   : > { %v8479_v57 = vunpack.i.l.bf16 %v11316_v13  ;;  %v2940_v15 = vsel %vm1206_vm12, %v8435_v38, %v8454_v46  ;;  %v8465_v38 = vunpack.i.h.bf16 %v8463_v9 }
 0x41d   : > { %v3232_v56 = vsel %vm1529_vm11, %v2940_v15, %v3038_v20 }
 0x41e   : > { %3536 = vmatpush.msrb.mxu3 %v3232_v56  ;;  %v2842_v28 = vsel %vm1082_vm8, %v8450_v40, %v8479_v57  ;;  %v2547_v44 = vsel %vm710_vm2, %v8464_v58, %v8465_v38  ;;  %v2548_v26 = vsel %vm710_vm2, %v8465_v38, %v8489_v23 }
 0x41f   : > { %8622 = vrot.lane.b32.xlu1 %v11287_v60, %s9008_s29  ;;  %v3208_v27 = vsel %vm1529_vm11, %v2744_v19, %v2842_v28  ;;  %v8460_v19 = vunpack.i.h.bf16 %v11263_v3  ;;  %v8455_v28 = vunpack.i.h.bf16 %v11307_v11 }
 0x420   : > { %3537 = vmatpush.msrb.mxu3 %v3208_v27 }
 0x421   : > { %v8468_v33 = vpop.permute.xlu1 %8467 }
 0x422   : > { %v8470_v37 = vunpack.i.h.bf16 %v8468_v33  ;;  %v8469_v49 = vunpack.i.l.bf16 %v8468_v33  ;;  %8627 = vrot.lane.b32.xlu2 %v8626_v29, %s9007_s28  ;;  %8647 = vrot.lane.b32.xlu0 %v8626_v29, %s9006_s27 }
 0x423   : > { %v11347_v17 = vpop.permute.xlu2 %8502  ;;  %v11349_v40 = vpop.permute.xlu0 %8492 }
 0x424   : > { %v8494_v51 = vunpack.i.l.bf16 %v11349_v40  ;;  %v2644_v55 = vsel %vm834_vm5, %v8425_v30, %v8469_v49  ;;  %v2645_v59 = vsel %vm834_vm5, %v8469_v49, %v8470_v37 }
 0x425   : > { %v3182_v54 = vsel %vm1529_vm11, %v2546_v50, %v2644_v55  ;;  %v3183_v31 = vsel %vm1529_vm11, %v2547_v44, %v2645_v59  ;;  %v8505_v50 = vunpack.i.h.bf16 %v11347_v17 }
 0x426   : > { %v2646_v61 = vsel %vm834_vm5, %v8470_v37, %v8494_v51  ;;  %3498 = vmatpush.msrb.mxu1 %v3182_v54  ;;  %3518 = vmatpush.msrb.mxu2 %v3183_v31 }
 0x427   : > { %v3184_v39 = vsel %vm1529_vm11, %v2548_v26, %v2646_v61  ;;  %8637 = vrot.lane.b32.xlu1 %v8606_v24, %s9004_s25 }
 0x428   : > { %3538 = vmatpush.msrb.mxu3 %v3184_v39 }
 0x429   : > { %v8483_v0 = vpop.permute.xlu1 %8482 }
 0x42a   : > { %v8485_v30 = vunpack.i.h.bf16 %v8483_v0  ;;  %v8484_v35 = vunpack.i.l.bf16 %v8483_v0  ;;  %8642 = vrot.lane.b32.xlu2 %v11287_v60, %s9005_s26  ;;  %8662 = vrot.lane.b32.xlu0 %v8626_v29, %s9004_s25  ;;  %v8475_v0 = vunpack.i.h.bf16 %v11280_v34 }
 0x42b   : > { %v3106_v9 = vpop.permute.xlu0 %3105 }
 0x42c   : > { %v11373_v1 = vpop.permute.xlu2 %8517  ;;  %v2448_v47 = vsel %vm586_vm1, %v8430_v10, %v8484_v35  ;;  %v2449_v15 = vsel %vm586_vm1, %v8484_v35, %v8485_v30  ;;  %v3139_v56 = vsel %vm15668_vm7, %v11314_v62, %v3106_v9 }
 0x42d   : > { %v3158_v24 = vsel %vm1529_vm11, %v10669_v21, %v2448_v47  ;;  %v3159_v20 = vsel %vm1529_vm11, %v10631_v45, %v2449_v15  ;;  %v8504_v45 = vunpack.i.l.bf16 %v11347_v17  ;;  %v8520_v31 = vunpack.i.h.bf16 %v11373_v1 }
 0x42e   : > { %3499 = vmatpush.msrb.mxu1 %v3158_v24  ;;  %3519 = vmatpush.msrb.mxu2 %v3159_v20  ;;  %v8519_v26 = vunpack.i.l.bf16 %v11373_v1 }
 0x42f   : > { %7747 = vmatmul.msk.f32.vlgmr.msrb.gmra.mxu1 %vm3252_vm15, %v10942_v7  ;;  %7749 = vmatmul.msk.f32.vlgmr.msrb.gmra.mxu2 %vm3252_vm15, %v10942_v7  ;;  %v2943_v49 = vsel %vm1206_vm12, %v8455_v28, %v8504_v45 }
 0x430   : > { %8652 = vrot.lane.b32.xlu1 %v11305_v25, %s9008_s29  ;;  %7756 = vmatpush.msk.msra.mxu2 %vm1529_vm11, %v3139_v56 }
 0x431   : > { %v11392_v21 = vpop.permute.xlu1 %8497 }
 0x432   : > { %v8499_v48 = vunpack.i.l.bf16 %v11392_v21  ;;  %8657 = vrot.lane.b32.xlu2 %v11287_v60, %s9003_s24  ;;  %8672 = vrot.lane.b32.xlu0 %v11305_v25, %s9003_s24 }
 0x433   : > { %v11400_v10 = vpop.permute.xlu0 %8507 }
 0x434   : > { %v3102_v27 = vpop.permute.xlu2 %3101  ;;  %v8509_v29 = vunpack.i.l.bf16 %v11400_v10  ;;  %v2450_v38 = vsel %vm586_vm1, %v8485_v30, %v8499_v48  ;;  %v8510_v33 = vunpack.i.h.bf16 %v11400_v10  ;;  %v8480_v30 = vunpack.i.h.bf16 %v11316_v13 }
 0x435   : > { %v3137_v58 = vsel %vm15668_vm7, %v11187_v14, %v3102_v27  ;;  %v3138_v60 = vsel %vm15668_vm7, %v3102_v27, %v11314_v62  ;;  %v3160_v37 = vsel %vm1529_vm11, %v10637_v32, %v2450_v38  ;;  %v11432_v32 = vsel %vm15994_vm0, %v11123_v43, %v11145_v53 }
 0x436   : > { %7752 = vmatpush.msk.msra.mxu0 %vm1529_vm11, %v3137_v58  ;;  %7754 = vmatpush.msk.msra.mxu1 %vm1529_vm11, %v3138_v60  ;;  %v3041_v14 = vsel %vm15669_vm13, %v8460_v19, %v8509_v29  ;;  %v3042_v44 = vsel %vm15669_vm13, %v8509_v29, %v8510_v33  ;;  %v2944_v43 = vsel %vm1206_vm12, %v8504_v45, %v8505_v50  ;;  %v2385_v61 = vrot.slane %v11432_v32, 4 }
 0x437   : > { %3539 = vmatpush.msrb.mxu3 %v3160_v37  ;;  %v3235_v62 = vsel %vm1529_vm11, %v2943_v49, %v3041_v14  ;;  %v3236_v54 = vsel %vm1529_vm11, %v2944_v43, %v3042_v44  ;;  %v2845_v20 = vsel %vm1082_vm8, %v8480_v30, %v8519_v26  ;;  %v2846_v45 = vsel %vm1082_vm8, %v8519_v26, %v8520_v31 }
 0x438   : > { %8667 = vrot.lane.b32.xlu1 %v11305_v25, %s9005_s26  ;;  %7751 = vmatmul.msk.f32.vlgmr.msrb.gmra.mxu3 %vm3252_vm15, %v10942_v7  ;;  %v8490_v37 = vunpack.i.h.bf16 %v11299_v8  ;;  %v8500_v44 = vunpack.i.h.bf16 %v11392_v21 }
 0x439   : > { %3596 = vmatpush.msra.mxu2 %v3235_v62  ;;  %v11434_v55 = vpop.permute.xlu1 %3107  ;;  %v8495_v62 = vunpack.i.h.bf16 %v11349_v40 }
 0x43a   : > { %v3140_v59 = vsel %vm15668_vm7, %v3106_v9, %v11434_v55  ;;  %3117 = vrot.lane.b32.xlu2 %v11432_v32, %s9009_s30  ;;  %2725 = vrot.lane.b32.xlu0 %v11432_v32, %s9006_s27 }
 0x43b   : > { %v11445_v25 = vpop.permute.xlu0 %8522  ;;  %7758 = vmatpush.msk.msra.mxu3 %vm1529_vm11, %v3140_v59 }
 0x43c   : > { %v11451_v53 = vpop.permute.xlu2 %8542  ;;  %v8524_v38 = vunpack.i.l.bf16 %v11445_v25  ;;  %v15664_v60 = vunpack.i.h.bf16 %v11445_v25 }
 0x43d   : > { %3616 = vmatpush.msra.mxu3 %v3236_v54  ;;  %v8544_v58 = vunpack.i.l.bf16 %v11451_v53  ;;  %v8545_v49 = vunpack.i.h.bf16 %v11451_v53 }
 0x43e   : > { %v2551_v54 = vsel %vm710_vm2, %v8490_v37, %v8524_v38 }
 0x440   : > { %2921 = vrot.lane.b32.xlu1 %v11432_v32, %s9007_s28 }
 0x441   : > { %v11459_v39 = vpop.permute.xlu1 %8512 }
 0x442   : > { %v15663_v35 = vunpack.i.h.bf16 %v11459_v39  ;;  %v8514_v9 = vunpack.i.l.bf16 %v11459_v39  ;;  %3019 = vrot.lane.b32.xlu2 %v2385_v61, %s9010_s12  ;;  %2627 = vrot.lane.b32.xlu0 %v2385_v61, %s9005_s26 }
 0x444   : > { %v11467_v47 = vpop.permute.xlu2 %3115  ;;  %v11469_v15 = vpop.permute.xlu0 %8532  ;;  %v2747_v24 = vsel %vm958_vm9, %v8475_v0, %v8514_v9  ;;  %v2748_v56 = vsel %vm958_vm9, %v8514_v9, %v15663_v35  ;;  %v2454_v35 = vsel %vm586_vm1, %v8544_v58, %v8545_v49 }
 0x445   : > { %v3211_v27 = vsel %vm1529_vm11, %v2747_v24, %v2845_v20  ;;  %v3212_v29 = vsel %vm1529_vm11, %v2748_v56, %v2846_v45  ;;  %v2552_v20 = vsel %vm710_vm2, %v8524_v38, %v15664_v60  ;;  %v2453_v45 = vsel %vm586_vm1, %v8500_v44, %v8544_v58 }
 0x446   : > { %3597 = vmatpush.msra.mxu2 %v3211_v27  ;;  %3617 = vmatpush.msra.mxu3 %v3212_v29  ;;  %v3163_v38 = vsel %vm1529_vm11, %v11104_v36, %v2453_v45 }
 0x448   : > { %2823 = vrot.lane.b32.xlu1 %v2385_v61, %s9008_s29 }
 0x449   : > { %v11491_v14 = vpop.permute.xlu1 %8527 }
 0x44a   : > { %v15665_v59 = vunpack.i.h.bf16 %v11491_v14  ;;  %v8529_v43 = vunpack.i.l.bf16 %v11491_v14  ;;  %2529 = vrot.lane.b32.xlu2 %v11432_v32, %s9004_s25  ;;  %v16006_v53 = vunpack.i.h.bf16 %v11491_v14 }
 0x44c   : > { %v11502_v26 = vpop.permute.xlu2 %8557  ;;  %v11504_v9 = vpop.permute.xlu0 %3111  ;;  %v2649_v24 = vsel %vm834_vm5, %v8495_v62, %v8529_v43  ;;  %v2650_v56 = vsel %vm834_vm5, %v8529_v43, %v15665_v59  ;;  %v3246_v43 = vld [vmem:[%s15610_s4] sm:$0xf] }
 0x44d   : > { %v3187_v27 = vsel %vm1529_vm11, %v2551_v54, %v2649_v24  ;;  %v3188_v29 = vsel %vm1529_vm11, %v2552_v20, %v2650_v56  ;;  %v3164_v54 = vsel %vm1529_vm11, %v11133_v52, %v2454_v35  ;;  %v8534_v24 = vunpack.i.l.bf16 %v11469_v15 }
 0x44e   : > { %3598 = vmatpush.msra.mxu2 %v3187_v27  ;;  %3618 = vmatpush.msra.mxu3 %v3188_v29 }
 0x44f   : > { %v2941_v56 = vsel %vm1206_vm12, %v8454_v46, %v8534_v24  ;;  %v2942_v45 = vsel %vm1206_vm12, %v8534_v24, %v8455_v28  ;;  %v8559_v46 = vunpack.i.l.bf16 %v11502_v26 }
 0x450   : > { %2431 = vrot.lane.b32.xlu1 %v2385_v61, %s9003_s24  ;;  %3599 = vmatpush.msra.mxu2 %v3163_v38 }
 0x451   : > { %3619 = vmatpush.msra.mxu3 %v3164_v54  ;;  %v11532_v20 = vpop.permute.xlu1 %8537  ;;  %7757 = vmatmul.msk.f32.vlgmr.msra.gmra.mxu2 %vm3252_vm15, %v10942_v7 }
 0x452   : > { %v8539_v36 = vunpack.i.l.bf16 %v11532_v20  ;;  %3249 = vperm.xlu2 %8255, %v3246_v43   ;;  %7759 = vmatmul.msk.f32.vlgmr.msra.gmra.mxu3 %vm3252_vm15, %v10942_v7  ;;  %v8535_v43 = vunpack.i.h.bf16 %v11469_v15  ;;  %v8540_v54 = vunpack.i.h.bf16 %v11532_v20 }
 0x454   : > { %v11539_v58 = vpop.permute.xlu2 %8572  ;;  %v11541_v61 = vpop.permute.xlu0 %8547  ;;  %v3039_v52 = vsel %vm15669_vm13, %v8459_v4, %v8539_v36  ;;  %v3040_v35 = vsel %vm15669_vm13, %v8539_v36, %v8460_v19  ;;  %v15672_v19 = vunpack.i.h.bf16 %v11502_v26 }
 0x455   : > { %v3233_v27 = vsel %vm1529_vm11, %v2941_v56, %v3039_v52  ;;  %v3234_v29 = vsel %vm1529_vm11, %v2942_v45, %v3040_v35  ;;  %v2947_v52 = vsel %vm1206_vm12, %v8535_v43, %v8559_v46  ;;  %v8550_v21 = vunpack.i.h.bf16 %v11541_v61 }
 0x456   : > { %3556 = vmatpush.msra.mxu0 %v3233_v27  ;;  %3576 = vmatpush.msra.mxu1 %v3234_v29  ;;  %v2948_v56 = vsel %vm1206_vm12, %v8559_v46, %v15672_v19 }
 0x459   : > { %v3114_v38 = vpop.permute.xlu1 %3113 }
 0x45a   : > { %v3143_v3 = vsel %vm15668_vm7, %v11504_v9, %v3114_v38  ;;  %v3144_v4 = vsel %vm15668_vm7, %v3114_v38, %v11467_v47  ;;  %v8549_v38 = vunpack.i.l.bf16 %v11541_v61 }
 0x45b   : > { %7764 = vmatpush.msk.msrb.mxu2 %vm1529_vm11, %v3143_v3  ;;  %7766 = vmatpush.msk.msrb.mxu3 %vm1529_vm11, %v3144_v4 }
 0x45c   : > { %v11565_v11 = vpop.permute.xlu2 %8587  ;;  %v11567_v28 = vpop.permute.xlu0 %8562 }
 0x45d   : > { %v8565_v24 = vunpack.i.h.bf16 %v11567_v28  ;;  %v8564_v36 = vunpack.i.l.bf16 %v11567_v28  ;;  %v8589_v13 = vunpack.i.l.bf16 %v11565_v11 }
 0x45f   : > { %v3045_v35 = vsel %vm15669_vm13, %v8540_v54, %v8564_v36  ;;  %v3046_v45 = vsel %vm15669_vm13, %v8564_v36, %v8565_v24 }
 0x460   : > { %v3239_v27 = vsel %vm1529_vm11, %v2947_v52, %v3045_v35  ;;  %v3240_v29 = vsel %vm1529_vm11, %v2948_v56, %v3046_v45  ;;  %v2745_v52 = vsel %vm958_vm9, %v8474_v12, %v8549_v38  ;;  %v2746_v35 = vsel %vm958_vm9, %v8549_v38, %v8475_v0 }
 0x461   : > { %3676 = vmatpush.msrb.mxu2 %v3239_v27  ;;  %3696 = vmatpush.msrb.mxu3 %v3240_v29  ;;  %v11588_v3 = vpop.permute.xlu1 %8552 }
 0x462   : > { %v8554_v4 = vunpack.i.l.bf16 %v11588_v3 }
 0x464   : > { %v3110_v60 = vpop.permute.xlu2 %3109  ;;  %v11591_v59 = vpop.permute.xlu0 %8577  ;;  %v2843_v46 = vsel %vm1082_vm8, %v8479_v57, %v8554_v4  ;;  %v2844_v36 = vsel %vm1082_vm8, %v8554_v4, %v8480_v30  ;;  %v8574_v57 = vunpack.i.l.bf16 %v11539_v58 }
 0x465   : > { %v3209_v56 = vsel %vm1529_vm11, %v2745_v52, %v2843_v46  ;;  %v3210_v45 = vsel %vm1529_vm11, %v2746_v35, %v2844_v36  ;;  %v2451_v46 = vsel %vm586_vm1, %v8499_v48, %v8589_v13  ;;  %v8579_v40 = vunpack.i.l.bf16 %v11591_v59 }
 0x466   : > { %3557 = vmatpush.msra.mxu0 %v3209_v56  ;;  %3577 = vmatpush.msra.mxu1 %v3210_v45  ;;  %v2647_v38 = vsel %vm834_vm5, %v8494_v51, %v8574_v57  ;;  %v2648_v4 = vsel %vm834_vm5, %v8574_v57, %v8495_v62  ;;  %v15674_v51 = vunpack.i.h.bf16 %v11591_v59  ;;  %v3161_v62 = vsel %vm1529_vm11, %v10843_v16, %v2451_v46 }
 0x467   : > { %v3141_v52 = vsel %vm15668_vm7, %v11434_v55, %v3110_v60  ;;  %v3142_v35 = vsel %vm15668_vm7, %v3110_v60, %v11504_v9  ;;  %v2751_v55 = vsel %vm958_vm9, %v8550_v21, %v8579_v40 }
 0x468   : > { %v2752_v9 = vsel %vm958_vm9, %v8579_v40, %v15674_v51 }
 0x469   : > { %v11609_v27 = vpop.permute.xlu1 %8567 }
 0x46a   : > { %v8569_v30 = vunpack.i.l.bf16 %v11609_v27 }
 0x46c   : > { %v11612_v29 = vpop.permute.xlu2 %8612  ;;  %v11614_v12 = vpop.permute.xlu0 %8592  ;;  %v2549_v34 = vsel %vm710_vm2, %v8489_v23, %v8569_v30  ;;  %v2550_v0 = vsel %vm710_vm2, %v8569_v30, %v8490_v37  ;;  %v2452_v23 = vsel %vm586_vm1, %v8589_v13, %v8500_v44  ;;  %v8555_v44 = vunpack.i.h.bf16 %v11588_v3 }
 0x46d   : > { %v3185_v8 = vsel %vm1529_vm11, %v2549_v34, %v2647_v38  ;;  %v3186_v37 = vsel %vm1529_vm11, %v2550_v0, %v2648_v4  ;;  %v3162_v48 = vsel %vm1529_vm11, %v11204_v22, %v2452_v23  ;;  %v8595_v30 = vunpack.i.h.bf16 %v11614_v12 }
 0x46e   : > { %3558 = vmatpush.msra.mxu0 %v3185_v8  ;;  %3578 = vmatpush.msra.mxu1 %v3186_v37  ;;  %v8594_v34 = vunpack.i.l.bf16 %v11614_v12  ;;  %v8570_v4 = vunpack.i.h.bf16 %v11609_v27  ;;  %v8575_v23 = vunpack.i.h.bf16 %v11539_v58  ;;  %v8590_v8 = vunpack.i.h.bf16 %v11565_v11 }
 0x470   : > { %3559 = vmatpush.msra.mxu0 %v3161_v62  ;;  %3579 = vmatpush.msra.mxu1 %v3162_v48  ;;  %v2555_v62 = vsel %vm710_vm2, %v8570_v4, %v8594_v34  ;;  %v2556_v48 = vsel %vm710_vm2, %v8594_v34, %v8595_v30 }
 0x471   : > { %v11644_v36 = vpop.permute.xlu1 %8582  ;;  %7753 = vmatmul.msk.f32.vlgmr.msra.gmra.mxu0 %vm3252_vm15, %v10942_v7  ;;  %7755 = vmatmul.msk.f32.vlgmr.msra.gmra.mxu1 %vm3252_vm15, %v10942_v7 }
 0x472   : > { %v15666_v56 = vunpack.i.h.bf16 %v11644_v36  ;;  %v8584_v16 = vunpack.i.l.bf16 %v11644_v36  ;;  %7760 = vmatpush.msk.msrb.mxu0 %vm1529_vm11, %v3141_v52  ;;  %7762 = vmatpush.msk.msrb.mxu1 %vm1529_vm11, %v3142_v35 }
 0x474   : > { %v3124_v22 = vpop.permute.xlu2 %3123  ;;  %v11658_v45 = vpop.permute.xlu0 %8602  ;;  %v2849_v60 = vsel %vm1082_vm8, %v8555_v44, %v8584_v16  ;;  %v2850_v7 = vsel %vm1082_vm8, %v8584_v16, %v15666_v56 }
 0x475   : > { %v3215_v57 = vsel %vm1529_vm11, %v2751_v55, %v2849_v60  ;;  %v3216_v13 = vsel %vm1529_vm11, %v2752_v9, %v2850_v7  ;;  %v15667_v0 = vunpack.i.h.bf16 %v11658_v45  ;;  %v8604_v38 = vunpack.i.l.bf16 %v11658_v45 }
 0x476   : > { %3677 = vmatpush.msrb.mxu2 %v3215_v57  ;;  %3697 = vmatpush.msrb.mxu3 %v3216_v13 }
 0x477   : > { %v2457_v60 = vsel %vm586_vm1, %v8590_v8, %v8604_v38  ;;  %v2458_v9 = vsel %vm586_vm1, %v8604_v38, %v15667_v0  ;;  %v11717_v38 = vld [vmem:[%s15609_s3] sm:$0xf] }
 0x478   : > { %v3167_v13 = vsel %vm1529_vm11, %v11196_v41, %v2457_v60  ;;  %v3168_v34 = vsel %vm1529_vm11, %v11243_v18, %v2458_v9 }
 0x479   : > { %v11679_v46 = vpop.permute.xlu1 %8597 }
 0x47a   : > { %v15670_v37 = vunpack.i.h.bf16 %v11679_v46  ;;  %v8599_v40 = vunpack.i.l.bf16 %v11679_v46 }
 0x47c   : > { %v8628_v52 = vpop.permute.xlu2 %8627  ;;  %v11691_v35 = vpop.permute.xlu0 %3119  ;;  %v2653_v16 = vsel %vm834_vm5, %v8575_v23, %v8599_v40  ;;  %v2654_v55 = vsel %vm834_vm5, %v8599_v40, %v15670_v37  ;;  %v8614_v40 = vunpack.i.l.bf16 %v11612_v29 }
 0x47d   : > { %v3191_v7 = vsel %vm1529_vm11, %v2555_v62, %v2653_v16  ;;  %v3192_v57 = vsel %vm1529_vm11, %v2556_v48, %v2654_v55  ;;  %v8629_v10 = vunpack.i.l.bf16 %v8628_v52 }
 0x47e   : > { %3678 = vmatpush.msrb.mxu2 %v3191_v7  ;;  %3698 = vmatpush.msrb.mxu3 %v3192_v57  ;;  %v3043_v55 = vsel %vm15669_vm13, %v8510_v33, %v8614_v40  ;;  %v3044_v60 = vsel %vm15669_vm13, %v8614_v40, %v8540_v54  ;;  %v8615_v57 = vunpack.i.h.bf16 %v11612_v29 }
 0x480   : > { %3679 = vmatpush.msrb.mxu2 %v3167_v13  ;;  %3699 = vmatpush.msrb.mxu3 %v3168_v34 }
 0x481   : > { %v11712_v56 = vpop.permute.xlu1 %8607  ;;  %7765 = vmatmul.msk.f32.vlgmr.msrb.gmra.mxu2 %vm3252_vm15, %v11717_v38  ;;  %7767 = vmatmul.msk.f32.vlgmr.msrb.gmra.mxu3 %vm3252_vm15, %v11717_v38 }
 0x482   : > { %v8609_v41 = vunpack.i.l.bf16 %v11712_v56  ;;  %v15671_v33 = vunpack.i.h.bf16 %v11712_v56 }
 0x484   : > { %v11724_v18 = vpop.permute.xlu2 %8642  ;;  %v11726_v62 = vpop.permute.xlu0 %8617  ;;  %v2945_v48 = vsel %vm1206_vm12, %v8505_v50, %v8609_v41  ;;  %v2946_v16 = vsel %vm1206_vm12, %v8609_v41, %v8535_v43  ;;  %v8630_v43 = vunpack.i.h.bf16 %v8628_v52  ;;  %v2951_v40 = vsel %vm1206_vm12, %v15671_v33, %v8629_v10 }
 0x485   : > { %v3237_v9 = vsel %vm1529_vm11, %v2945_v48, %v3043_v55  ;;  %v3238_v7 = vsel %vm1529_vm11, %v2946_v16, %v3044_v60  ;;  %v8619_v55 = vunpack.i.l.bf16 %v11726_v62 }
 0x486   : > { %3636 = vmatpush.msrb.mxu0 %v3237_v9  ;;  %3656 = vmatpush.msrb.mxu1 %v3238_v7  ;;  %v2952_v52 = vsel %vm1206_vm12, %v8629_v10, %v8630_v43 }
 0x489   : > { %v3122_v17 = vpop.permute.xlu1 %3121 }
 0x48a   : > { %v3147_v50 = vsel %vm15668_vm7, %v11691_v35, %v3122_v17  ;;  %v3148_v15 = vsel %vm15668_vm7, %v3122_v17, %v3124_v22  ;;  %v8644_v17 = vunpack.i.l.bf16 %v11724_v18 }
 0x48b   : > { %7772 = vmatpush.msk.msra.mxu2 %vm1529_vm11, %v3147_v50  ;;  %7774 = vmatpush.msk.msra.mxu3 %vm1529_vm11, %v3148_v15  ;;  %v3856_v50 = vlaneseq }
 0x48c   : > { %v11748_v20 = vpop.permute.xlu2 %8657  ;;  %v8633_v54 = vpop.permute.xlu0 %8632 }
 0x48d   : > { %v8635_v13 = vunpack.i.h.bf16 %v8633_v54  ;;  %v8634_v34 = vunpack.i.l.bf16 %v8633_v54  ;;  %v8659_v60 = vunpack.i.l.bf16 %v11748_v20 }
 0x48f   : > { %v3049_v22 = vsel %vm15669_vm13, %v8615_v57, %v8634_v34  ;;  %v3050_v41 = vsel %vm15669_vm13, %v8634_v34, %v8635_v13  ;;  %v16005_v13 = vunpack.i.h.bf16 %v11459_v39  ;;  %v2456_v1 = vsel %vm586_vm1, %v8659_v60, %v8590_v8 }
 0x490   : > { %v3243_v48 = vsel %vm1529_vm11, %v2951_v40, %v3049_v22  ;;  %v3244_v16 = vsel %vm1529_vm11, %v2952_v52, %v3050_v41  ;;  %v2750_v40 = vsel %vm958_vm9, %v8619_v55, %v8550_v21  ;;  %v2455_v22 = vsel %vm586_vm1, %v8545_v49, %v8659_v60 }
 0x491   : > { %3756 = vmatpush.msra.mxu2 %v3243_v48  ;;  %3776 = vmatpush.msra.mxu3 %v3244_v16  ;;  %v11763_v9 = vpop.permute.xlu1 %8622  ;;  %v2749_v34 = vsel %vm958_vm9, %v16005_v13, %v8619_v55  ;;  %v11789_v39 = vand.u32 127, %v3856_v50  ;;  %v15673_v21 = vunpack.i.h.bf16 %v11726_v62  ;;  %v2651_v49 = vsel %vm834_vm5, %v16006_v53, %v8644_v17 }
 0x492   : > { %v8624_v7 = vunpack.i.l.bf16 %v11763_v9  ;;  %v2652_v8 = vsel %vm834_vm5, %v8644_v17, %v8575_v23  ;;  %v8660_v16 = vunpack.i.h.bf16 %v11748_v20  ;;  %v15675_v55 = vunpack.i.h.bf16 %v11763_v9 }
 0x493   : > { %v3891_v41 = vadd.s32 128, %v11789_v39  ;;  %v11801_v48 = vmul.u32 2, %v11789_v39  ;;  %v3165_v60 = vsel %vm1529_vm11, %v11138_v2, %v2455_v22  ;;  %v3166_v14 = vsel %vm1529_vm11, %v11269_v63, %v2456_v1 }
 0x494   : > { %v3118_v15 = vpop.permute.xlu2 %3117  ;;  %v8648_v43 = vpop.permute.xlu0 %8647  ;;  %v2847_v10 = vsel %vm1082_vm8, %v8520_v31, %v8624_v7  ;;  %v2848_v54 = vsel %vm1082_vm8, %v8624_v7, %v8555_v44  ;;  %v11787_v44 = vshrl.u32 %v3856_v50, 7 }
 0x495   : > { %v3213_v31 = vsel %vm1529_vm11, %v2749_v34, %v2847_v10  ;;  %v3214_v3 = vsel %vm1529_vm11, %v2750_v40, %v2848_v54  ;;  %v8649_v52 = vunpack.i.l.bf16 %v8648_v43  ;;  %v8650_v11 = vunpack.i.h.bf16 %v8648_v43 }
 0x496   : > { %3637 = vmatpush.msrb.mxu0 %v3213_v31  ;;  %3657 = vmatpush.msrb.mxu1 %v3214_v3  ;;  %v3145_v58 = vsel %vm15668_vm7, %v11467_v47, %v3118_v15  ;;  %v11814_v23 = vadd.s32 120, %v11787_v44  ;;  %v11816_v17 = vmul.u32 2, %v3891_v41  ;;  %v3146_v50 = vsel %vm15668_vm7, %v3118_v15, %v11691_v35 }
 0x497   : > { %v2755_v2 = vsel %vm958_vm9, %v15673_v21, %v8649_v52  ;;  %v11825_v63 = vadd.s32 1, %v11801_v48  ;;  %v2756_v54 = vsel %vm958_vm9, %v8649_v52, %v8650_v11  ;;  %v11829_v13 = vadd.s32 248, %v11787_v44 }
 0x498   : > { %v11832_v34 = vadd.s32 112, %v11787_v44  ;;  %v11835_v35 = vadd.s32 240, %v11787_v44  ;;  %v11838_v15 = vadd.s32 104, %v11787_v44  ;;  %v11841_v40 = vadd.s32 232, %v11787_v44 }
 0x499   : > { %v11811_v7 = vpop.permute.xlu1 %8637  ;;  %v11844_v22 = vadd.s32 96, %v11787_v44  ;;  %v11847_v1 = vadd.s32 224, %v11787_v44  ;;  %v16007_v3 = vunpack.i.h.bf16 %v11445_v25  ;;  %vm3925_vm6 = vcmp.eq.s32.totalorder %v11814_v23, %v11816_v17 }
 0x49a   : > { %v8639_v43 = vunpack.i.l.bf16 %v11811_v7  ;;  %v8640_v31 = vunpack.i.h.bf16 %v11811_v7  ;;  %vm4057_vm3 = vcmp.eq.s32.totalorder %v11814_v23, %v11825_v63  ;;  %vm3957_vm10 = vcmp.eq.s32.totalorder %v11829_v13, %v11816_v17 }
 0x49b   : > { %vm4089_vm4 = vcmp.eq.s32.totalorder %v11829_v13, %v11825_v63  ;;  %v11872_v27 = vadd.s32 88, %v11787_v44  ;;  %vm3923_vm14 = vcmp.eq.s32.totalorder %v11832_v34, %v11816_v17  ;;  %vm4055_vm0 = vcmp.eq.s32.totalorder %v11832_v34, %v11825_v63 }
 0x49c   : > { %v3020_v47 = vpop.permute.xlu2 %3019  ;;  %v8663_v10 = vpop.permute.xlu0 %8662  ;;  %v2553_v52 = vsel %vm710_vm2, %v16007_v3, %v8639_v43  ;;  %v2554_v53 = vsel %vm710_vm2, %v8639_v43, %v8570_v4  ;;  %vm3955_vm7 = vcmp.eq.s32.totalorder %v11835_v35, %v11816_v17 }
 0x49d   : > { %v8664_v11 = vunpack.i.l.bf16 %v8663_v10  ;;  %v3189_v41 = vsel %vm1529_vm11, %v2553_v52, %v2651_v49  ;;  %v3190_v0 = vsel %vm1529_vm11, %v2554_v53, %v2652_v8  ;;  %v11865_v25 = vsel %vm15669_vm13, %v8565_v24, %v3020_v47 }
 0x49e   : > { %3638 = vmatpush.msrb.mxu0 %v3189_v41  ;;  %3658 = vmatpush.msrb.mxu1 %v3190_v0  ;;  %v11877_v4 = vsel %vm15669_vm13, %v3020_v47, %v8615_v57  ;;  %v8665_v28 = vunpack.i.h.bf16 %v8663_v10  ;;  %v9012_v0 = vmov 0.0   ;;  %vm4087_vm13 = vcmp.eq.s32.totalorder %v11835_v35, %v11825_v63 }
 0x49f   : > { %v3989_v29 = vsel %vm3925_vm6, 1.0, %v9012_v0  ;;  %v4121_v57 = vsel %vm4057_vm3, 1.0, %v9012_v0  ;;  %v4153_v47 = vsel %vm4089_vm4, 1.0, %v9012_v0  ;;  %v3987_v10 = vsel %vm3923_vm14, 1.0, %v9012_v0 }
 0x4a0   : > { %3639 = vmatpush.msrb.mxu0 %v3165_v60  ;;  %3659 = vmatpush.msrb.mxu1 %v3166_v14  ;;  %v2559_v60 = vsel %vm710_vm2, %v8640_v31, %v8664_v11  ;;  %v4021_v14 = vsel %vm3957_vm10, 1.0, %v9012_v0  ;;  %v4119_v3 = vsel %vm4055_vm0, 1.0, %v9012_v0  ;;  %v4151_v53 = vsel %vm4087_vm13, 1.0, %v9012_v0 }
 0x4a1   : > { %7761 = vmatmul.msk.f32.vlgmr.msrb.gmra.mxu0 %vm3252_vm15, %v11717_v38  ;;  %7763 = vmatmul.msk.f32.vlgmr.msrb.gmra.mxu1 %vm3252_vm15, %v11717_v38  ;;  %vm3921_vm6 = vcmp.eq.s32.totalorder %v11838_v15, %v11816_v17  ;;  %v2560_v33 = vsel %vm710_vm2, %v8664_v11, %v8665_v28  ;;  %v11939_v21 = vadd.f32 %v4121_v57, %v3989_v29  ;;  %v11973_v57 = vadd.s32 216, %v11787_v44 }
 0x4a2   : > { %v8653_v24 = vpop.permute.xlu1 %8652  ;;  %7768 = vmatpush.msk.msra.mxu0 %vm1529_vm11, %v3145_v58  ;;  %7770 = vmatpush.msk.msra.mxu1 %vm1529_vm11, %v3146_v50  ;;  %v4019_v58 = vsel %vm3955_vm7, 1.0, %v9012_v0  ;;  %vm4053_vm7 = vcmp.eq.s32.totalorder %v11838_v15, %v11825_v63  ;;  %v11941_v51 = vadd.f32 %v4153_v47, %v4021_v14  ;;  %v11943_v61 = vadd.f32 %v4119_v3, %v3987_v10 }
 0x4a3   : > { %v8655_v49 = vunpack.i.h.bf16 %v8653_v24  ;;  %v8654_v8 = vunpack.i.l.bf16 %v8653_v24  ;;  %vm3953_vm13 = vcmp.eq.s32.totalorder %v11841_v40, %v11816_v17  ;;  %vm4085_vm3 = vcmp.eq.s32.totalorder %v11841_v40, %v11825_v63 }
 0x4a4   : > { %v8673_v43 = vpop.permute.xlu0 %8672  ;;  %v2530_v41 = vpop.permute.xlu2 %2529  ;;  %16008 = vst [vmem:[#allocation14_spill] sm:$0xff] %v11941_v51  ;;  %vm3919_vm10 = vcmp.eq.s32.totalorder %v11844_v22, %v11816_v17  ;;  %vm4051_vm4 = vcmp.eq.s32.totalorder %v11844_v22, %v11825_v63  ;;  %v4017_v29 = vsel %vm3953_vm13, 1.0, %v9012_v0  ;;  %vm3951_vm14 = vcmp.eq.s32.totalorder %v11847_v1, %v11816_v17 }
 0x4a5   : > { %v8675_v50 = vunpack.i.h.bf16 %v8673_v43  ;;  %v8674_v52 = vunpack.i.l.bf16 %v8673_v43  ;;  %v2853_v24 = vsel %vm1082_vm8, %v15675_v55, %v8654_v8  ;;  %v2854_v37 = vsel %vm1082_vm8, %v8654_v8, %v8655_v49  ;;  %16009 = vst [vmem:[#allocation7_spill] sm:$0xff] %v11943_v61 }
 0x4a6   : > { %v3219_v43 = vsel %vm1529_vm11, %v2755_v2, %v2853_v24  ;;  %v3220_v19 = vsel %vm1529_vm11, %v2756_v54, %v2854_v37  ;;  %v11945_v55 = vadd.f32 %v4151_v53, %v4019_v58  ;;  %v3985_v49 = vsel %vm3921_vm6, 1.0, %v9012_v0 }
 0x4a7   : > { %3757 = vmatpush.msra.mxu2 %v3219_v43  ;;  %3777 = vmatpush.msra.mxu3 %v3220_v19  ;;  %v11953_v2 = vsel %vm710_vm2, %v8595_v30, %v2530_v41  ;;  %v2461_v37 = vsel %vm586_vm1, %v8660_v16, %v8674_v52  ;;  %v2462_v19 = vsel %vm586_vm1, %v8674_v52, %v8675_v50  ;;  %v4117_v54 = vsel %vm4053_vm7, 1.0, %v9012_v0 }
 0x4a8   : > { %16010 = vst [vmem:[#allocation3_spill] sm:$0xff] %v11945_v55  ;;  %v11963_v11 = vsel %vm710_vm2, %v2530_v41, %v8640_v31  ;;  %v3171_v31 = vsel %vm1529_vm11, %v11274_v5, %v2461_v37  ;;  %v3172_v8 = vsel %vm1529_vm11, %v11292_v42, %v2462_v19  ;;  %v11979_v14 = vadd.f32 %v4117_v54, %v3985_v49 }
 0x4a9   : > { %v4149_v47 = vsel %vm4085_vm3, 1.0, %v9012_v0  ;;  %v3983_v10 = vsel %vm3919_vm10, 1.0, %v9012_v0  ;;  %v4115_v3 = vsel %vm4051_vm4, 1.0, %v9012_v0  ;;  %vm4083_vm0 = vcmp.eq.s32.totalorder %v11847_v1, %v11825_v63 }
 0x4aa   : > { %v8668_v28 = vpop.permute.xlu1 %8667  ;;  %16011 = vst [vmem:[#allocation21_spill] sm:$0xff] %v11979_v14  ;;  %v16012_v58 = vunpack.i.h.bf16 %v11724_v18  ;;  %vm3917_vm6 = vcmp.eq.s32.totalorder %v11872_v27, %v11816_v17  ;;  %vm4049_vm7 = vcmp.eq.s32.totalorder %v11872_v27, %v11825_v63  ;;  %v4015_v53 = vsel %vm3951_vm14, 1.0, %v9012_v0 }
 0x4ab   : > { %v8670_v12 = vunpack.i.h.bf16 %v8668_v28  ;;  %v8669_v30 = vunpack.i.l.bf16 %v8668_v28  ;;  %vm3949_vm13 = vcmp.eq.s32.totalorder %v11973_v57, %v11816_v17  ;;  %v16013_v41 = vunpack.i.h.bf16 %v11591_v59 }
 0x4ac   : > { %v2726_v7 = vpop.permute.xlu0 %2725  ;;  %v12006_v43 = vadd.f32 %v4149_v47, %v4017_v29  ;;  %v12008_v49 = vadd.f32 %v4115_v3, %v3983_v10  ;;  %v4113_v37 = vsel %vm4049_vm7, 1.0, %v9012_v0  ;;  %vm4081_vm3 = vcmp.eq.s32.totalorder %v11973_v57, %v11825_v63 }
 0x4ad   : > { %v2657_v5 = vsel %vm834_vm5, %v16012_v58, %v8669_v30  ;;  %v2658_v42 = vsel %vm834_vm5, %v8669_v30, %v8670_v12  ;;  %v12004_v24 = vsel %vm958_vm9, %v16013_v41, %v2726_v7  ;;  %v12016_v59 = vadd.s32 80, %v11787_v44 }
 0x4ae   : > { %v3195_v50 = vsel %vm1529_vm11, %v2559_v60, %v2657_v5  ;;  %v3196_v52 = vsel %vm1529_vm11, %v2560_v33, %v2658_v42  ;;  %16014 = vst [vmem:[#allocation6_spill] sm:$0xff] %v12006_v43  ;;  %v4147_v60 = vsel %vm4083_vm0, 1.0, %v9012_v0  ;;  %v3981_v33 = vsel %vm3917_vm6, 1.0, %v9012_v0 }
 0x4af   : > { %3758 = vmatpush.msra.mxu2 %v3195_v50  ;;  %3778 = vmatpush.msra.mxu3 %v3196_v52  ;;  %16015 = vst [vmem:[#allocation12_spill] sm:$0xff] %v12008_v49  ;;  %v16016_v19 = vunpack.i.h.bf16 %v11726_v62  ;;  %v4013_v12 = vsel %vm3949_vm13, 1.0, %v9012_v0  ;;  %v4145_v30 = vsel %vm4081_vm3, 1.0, %v9012_v0  ;;  %v12024_v29 = vadd.s32 208, %v11787_v44 }
 0x4b0   : > { %v16017_v47 = vunpack.i.h.bf16 %v11502_v26  ;;  %v16018_v3 = vunpack.i.h.bf16 %v11712_v56  ;;  %v12047_v58 = vadd.f32 %v4113_v37, %v3981_v33  ;;  %v12050_v5 = vadd.s32 200, %v11787_v44 }
 0x4b1   : > { %v2754_v54 = vsel %vm958_vm9, %v2726_v7, %v16016_v19  ;;  %3759 = vmatpush.msra.mxu2 %v3171_v31  ;;  %3779 = vmatpush.msra.mxu3 %v3172_v8  ;;  %v12036_v7 = vadd.f32 %v4147_v60, %v4015_v53  ;;  %v12039_v31 = vadd.s32 72, %v11787_v44  ;;  %v16021_v42 = vunpack.i.h.bf16 %v11679_v46 }
 0x4b2   : > { %v2922_v28 = vpop.permute.xlu1 %2921  ;;  %7773 = vmatmul.msk.f32.vlgmr.msra.gmra.mxu2 %vm3252_vm15, %v11717_v38  ;;  %7775 = vmatmul.msk.f32.vlgmr.msra.gmra.mxu3 %vm3252_vm15, %v11717_v38  ;;  %16020 = vst [vmem:[#allocation23_spill] sm:$0xff] %v12047_v58  ;;  %v12055_v52 = vadd.f32 %v4145_v30, %v4013_v12  ;;  %vm3915_vm10 = vcmp.eq.s32.totalorder %v12016_v59, %v11816_v17  ;;  %v16023_v60 = vunpack.i.h.bf16 %v11724_v18  ;;  %v12085_v19 = vadd.s32 192, %v11787_v44 }
 0x4b3   : > { %v2949_v10 = vsel %vm1206_vm12, %v16017_v47, %v2922_v28  ;;  %v2950_v62 = vsel %vm1206_vm12, %v2922_v28, %v16018_v3  ;;  %16019 = vst [vmem:[#allocation17_spill] sm:$0xff] %v12036_v7  ;;  %4258 = vmatpush.msrb.mxu2 %v11939_v21  ;;  %4278 = vmatpush.msrb.mxu3 %v11941_v51 }
 0x4b4   : > { %v2628_v26 = vpop.permute.xlu0 %2627  ;;  %v3241_v56 = vsel %vm1529_vm11, %v2949_v10, %v11865_v25  ;;  %v3242_v8 = vsel %vm1529_vm11, %v2950_v62, %v11877_v4  ;;  %16022 = vst [vmem:[#allocation5_spill] sm:$0xff] %v12055_v52  ;;  %v12060_v25 = vadd.s32 64, %v11787_v44  ;;  %v3979_v4 = vsel %vm3915_vm10, 1.0, %v9012_v0 }
 0x4b5   : > { %v2655_v50 = vsel %vm834_vm5, %v16021_v42, %v2628_v26  ;;  %3716 = vmatpush.msra.mxu0 %v3241_v56  ;;  %3736 = vmatpush.msra.mxu1 %v3242_v8  ;;  %vm4047_vm4 = vcmp.eq.s32.totalorder %v12016_v59, %v11825_v63  ;;  %vm3947_vm14 = vcmp.eq.s32.totalorder %v12024_v29, %v11816_v17  ;;  %v16026_v62 = vunpack.i.h.bf16 %v11644_v36 }
 0x4b6   : > { %4259 = vmatpush.msrb.mxu2 %v11943_v61  ;;  %4279 = vmatpush.msrb.mxu3 %v11945_v55  ;;  %vm4079_vm0 = vcmp.eq.s32.totalorder %v12024_v29, %v11825_v63  ;;  %v4111_v46 = vsel %vm4047_vm4, 1.0, %v9012_v0  ;;  %v4011_v53 = vsel %vm3947_vm14, 1.0, %v9012_v0  ;;  %vm3913_vm6 = vcmp.eq.s32.totalorder %v12039_v31, %v11816_v17 }
 0x4b7   : > { %v4143_v41 = vsel %vm4079_vm0, 1.0, %v9012_v0  ;;  %v2656_v33 = vsel %vm834_vm5, %v2628_v26, %v16023_v60  ;;  %v3977_v37 = vsel %vm3913_vm6, 1.0, %v9012_v0  ;;  %vm4045_vm7 = vcmp.eq.s32.totalorder %v12039_v31, %v11825_v63 }
 0x4b8   : > { %4260 = vmatpush.msrb.mxu2 %v11979_v14  ;;  %4280 = vmatpush.msrb.mxu3 %v12006_v43  ;;  %v4109_v28 = vsel %vm4045_vm7, 1.0, %v9012_v0  ;;  %vm3945_vm13 = vcmp.eq.s32.totalorder %v12050_v5, %v11816_v17  ;;  %vm4077_vm3 = vcmp.eq.s32.totalorder %v12050_v5, %v11825_v63  ;;  %v3193_v18 = vsel %vm1529_vm11, %v11953_v2, %v2655_v50 }
 0x4b9   : > { %v12096_v30 = vadd.f32 %v4111_v46, %v3979_v4  ;;  %v12098_v47 = vadd.f32 %v4143_v41, %v4011_v53  ;;  %v4009_v10 = vsel %vm3945_vm13, 1.0, %v9012_v0  ;;  %v4141_v3 = vsel %vm4077_vm3, 1.0, %v9012_v0 }
 0x4ba   : > { %4261 = vmatpush.msrb.mxu2 %v12008_v49  ;;  %4281 = vmatpush.msrb.mxu3 %v12036_v7  ;;  %v2824_v12 = vpop.permute.xlu1 %2823  ;;  %v16027_v56 = vunpack.i.h.bf16 %v11763_v9  ;;  %v12108_v8 = vadd.f32 %v4109_v28, %v3977_v37  ;;  %vm3911_vm10 = vcmp.eq.s32.totalorder %v12060_v25, %v11816_v17  ;;  %v12117_v50 = vadd.f32 %v4141_v3, %v4009_v10 }
 0x4bb   : > { %16024 = vst [vmem:[#allocation4_spill] sm:$0xff] %v12096_v30  ;;  %v2851_v26 = vsel %vm1082_vm8, %v16026_v62, %v2824_v12  ;;  %v3975_v9 = vsel %vm3911_vm10, 1.0, %v9012_v0  ;;  %vm4043_vm4 = vcmp.eq.s32.totalorder %v12060_v25, %v11825_v63  ;;  %vm3943_vm14 = vcmp.eq.s32.totalorder %v12085_v19, %v11816_v17 }
 0x4bc   : > { %16025 = vst [vmem:[#allocation13_spill] sm:$0xff] %v12098_v47  ;;  %v2852_v2 = vsel %vm1082_vm8, %v2824_v12, %v16027_v56  ;;  %4262 = vmatpush.msrb.mxu2 %v12047_v58  ;;  %4282 = vmatpush.msrb.mxu3 %v12055_v52  ;;  %v3217_v42 = vsel %vm1529_vm11, %v12004_v24, %v2851_v26  ;;  %v12127_v4 = vadd.s32 56, %v11787_v44  ;;  %v4007_v46 = vsel %vm3943_vm14, 1.0, %v9012_v0 }
 0x4bd   : > { %16028 = vst [vmem:[#allocation11_spill] sm:$0xff] %v12108_v8  ;;  %v3218_v36 = vsel %vm1529_vm11, %v2754_v54, %v2852_v2  ;;  %3717 = vmatpush.msra.mxu0 %v3217_v42  ;;  %vm4075_vm0 = vcmp.eq.s32.totalorder %v12085_v19, %v11825_v63  ;;  %v3194_v24 = vsel %vm1529_vm11, %v11963_v11, %v2656_v33  ;;  %v4107_v54 = vsel %vm4043_vm4, 1.0, %v9012_v0 }
 0x4be   : > { %16029 = vst [vmem:[#allocation15_spill] sm:$0xff] %v12117_v50  ;;  %3737 = vmatpush.msra.mxu1 %v3218_v36  ;;  %4263 = vmatpush.msrb.mxu2 %v12096_v30  ;;  %v4139_v53 = vsel %vm4075_vm0, 1.0, %v9012_v0  ;;  %v12136_v41 = vadd.f32 %v4107_v54, %v3975_v9  ;;  %vm3909_vm6 = vcmp.eq.s32.totalorder %v12127_v4, %v11816_v17  ;;  %v12143_v37 = vadd.s32 184, %v11787_v44 }
 0x4bf   : > { %4283 = vmatpush.msrb.mxu3 %v12098_v47  ;;  %3718 = vmatpush.msra.mxu0 %v3193_v18  ;;  %v12138_v60 = vadd.f32 %v4139_v53, %v4007_v46  ;;  %v3973_v11 = vsel %vm3909_vm6, 1.0, %v9012_v0  ;;  %vm4041_vm7 = vcmp.eq.s32.totalorder %v12127_v4, %v11825_v63  ;;  %v12151_v33 = vadd.s32 48, %v11787_v44 }
 0x4c0   : > { %3738 = vmatpush.msra.mxu1 %v3194_v24  ;;  %16030 = vst [vmem:[#allocation18_spill] sm:$0xff] %v12136_v41  ;;  %4264 = vmatpush.msrb.mxu2 %v12108_v8  ;;  %v12154_v28 = vadd.s32 176, %v11787_v44  ;;  %v4105_v18 = vsel %vm4041_vm7, 1.0, %v9012_v0  ;;  %vm3941_vm13 = vcmp.eq.s32.totalorder %v12143_v37, %v11816_v17  ;;  %vm4073_vm3 = vcmp.eq.s32.totalorder %v12143_v37, %v11825_v63 }
 0x4c1   : > { %16031 = vst [vmem:[#allocation19_spill] sm:$0xff] %v12138_v60  ;;  %4284 = vmatpush.msrb.mxu3 %v12117_v50  ;;  %vm3924_vm10 = vcmp.eq.s32.totalorder %v11814_v23, %v11801_v48  ;;  %v12165_v10 = vadd.f32 %v4105_v18, %v3973_v11  ;;  %v4005_v3 = vsel %vm3941_vm13, 1.0, %v9012_v0  ;;  %v4137_v62 = vsel %vm4073_vm3, 1.0, %v9012_v0 }
 0x4c2   : > { %4265 = vmatpush.msrb.mxu2 %v12136_v41  ;;  %v2432_v12 = vpop.permute.xlu1 %2431  ;;  %vm3907_vm4 = vcmp.eq.s32.totalorder %v12151_v33, %v11816_v17  ;;  %v16033_v26 = vunpack.i.h.bf16 %v11658_v45  ;;  %v12177_v42 = vadd.f32 %v4137_v62, %v4005_v3  ;;  %vm4039_vm14 = vcmp.eq.s32.totalorder %v12151_v33, %v11825_v63 }
 0x4c3   : > { %4285 = vmatpush.msrb.mxu3 %v12138_v60  ;;  %16032 = vst [vmem:[#allocation2_spill] sm:$0xff] %v12165_v10  ;;  %v2460_v2 = vsel %vm586_vm1, %v2432_v12, %v8660_v16  ;;  %v3971_v36 = vsel %vm3907_vm4, 1.0, %v9012_v0  ;;  %vm3939_vm0 = vcmp.eq.s32.totalorder %v12154_v28, %v11816_v17  ;;  %vm4071_vm6 = vcmp.eq.s32.totalorder %v12154_v28, %v11825_v63 }
 0x4c4   : > { %v2459_v56 = vsel %vm586_vm1, %v16033_v26, %v2432_v12  ;;  %16034 = vst [vmem:[#allocation8_spill] sm:$0xff] %v12177_v42  ;;  %4266 = vmatpush.msrb.mxu2 %v12165_v10  ;;  %v4103_v20 = vsel %vm4039_vm14, 1.0, %v9012_v0  ;;  %v4003_v16 = vsel %vm3939_vm0, 1.0, %v9012_v0  ;;  %v4135_v9 = vsel %vm4071_vm6, 1.0, %v9012_v0 }
 0x4c5   : > { %v3169_v45 = vsel %vm1529_vm11, %v11236_v6, %v2459_v56  ;;  %4286 = vmatpush.msrb.mxu3 %v12177_v42  ;;  %v3170_v24 = vsel %vm1529_vm11, %v11432_v32, %v2460_v2  ;;  %v12195_v54 = vadd.f32 %v4103_v20, %v3971_v36  ;;  %v12197_v46 = vadd.f32 %v4135_v9, %v4003_v16 }
 0x4c6   : > { %3719 = vmatpush.msra.mxu0 %v3169_v45  ;;  %3739 = vmatpush.msra.mxu1 %v3170_v24  ;;  %v3988_v6 = vsel %vm3924_vm10, 1.0, %v9012_v0  ;;  %v7776_v53 = vadd.s32 4294967168, %v11789_v39  ;;  %vm3956_vm7 = vcmp.eq.s32.totalorder %v11829_v13, %v11801_v48  ;;  %v12211_v32 = vadd.s32 40, %v11787_v44 }
 0x4c7   : > { %16035 = vst [vmem:[#allocation16_spill] sm:$0xff] %v12195_v54  ;;  %7769 = vmatmul.msk.f32.vlgmr.msra.gmra.mxu0 %vm3252_vm15, %v11717_v38  ;;  %7771 = vmatmul.msk.f32.vlgmr.msra.gmra.mxu1 %vm3252_vm15, %v11717_v38  ;;  %v12214_v11 = vadd.s32 168, %v11787_v44  ;;  %vm3922_vm13 = vcmp.eq.s32.totalorder %v11832_v34, %v11801_v48  ;;  %v4020_v18 = vsel %vm3956_vm7, 1.0, %v9012_v0  ;;  %vm3954_vm3 = vcmp.eq.s32.totalorder %v11835_v35, %v11801_v48 }
 0x4c8   : > { %16036 = vst [vmem:[#allocation9_spill] sm:$0xff] %v12197_v46  ;;  %4267 = vmatpush.msrb.mxu2 %v12195_v54  ;;  %4287 = vmatpush.msrb.mxu3 %v12197_v46  ;;  %v4023_v39 = vmul.u32 2, %v7776_v53  ;;  %v3986_v38 = vsel %vm3922_vm13, 1.0, %v9012_v0  ;;  %vm3905_vm10 = vcmp.eq.s32.totalorder %v12211_v32, %v11816_v17  ;;  %vm4037_vm4 = vcmp.eq.s32.totalorder %v12211_v32, %v11825_v63 }
 0x4c9   : > { %vm3937_vm14 = vcmp.eq.s32.totalorder %v12214_v11, %v11816_v17  ;;  %vm4069_vm0 = vcmp.eq.s32.totalorder %v12214_v11, %v11825_v63  ;;  %v3969_v3 = vsel %vm3905_vm10, 1.0, %v9012_v0  ;;  %v4101_v62 = vsel %vm4037_vm4, 1.0, %v9012_v0 }
 0x4ca   : > { %v12232_v12 = vadd.s32 1, %v4023_v39  ;;  %v4001_v26 = vsel %vm3937_vm14, 1.0, %v9012_v0  ;;  %v12237_v56 = vadd.f32 %v4101_v62, %v3969_v3  ;;  %v4133_v2 = vsel %vm4069_vm0, 1.0, %v9012_v0 }
 0x4cb   : > { %v4018_v36 = vsel %vm3954_vm3, 1.0, %v9012_v0  ;;  %v12242_v45 = vadd.s32 32, %v11787_v44  ;;  %v12248_v20 = vadd.f32 %v4133_v2, %v4001_v26  ;;  %vm3920_vm14 = vcmp.eq.s32.totalorder %v11838_v15, %v11801_v48 }
 0x4cc   : > { %16037 = vst [vmem:[#allocation10_spill] sm:$0xff] %v12237_v56  ;;  %vm4056_vm6 = vcmp.eq.s32.totalorder %v11814_v23, %v12232_v12  ;;  %vm4088_vm7 = vcmp.eq.s32.totalorder %v11829_v13, %v12232_v12  ;;  %vm4054_vm13 = vcmp.eq.s32.totalorder %v11832_v34, %v12232_v12  ;;  %4268 = vmatpush.msrb.mxu2 %v12237_v56  ;;  %v3984_v3 = vsel %vm3920_vm14, 1.0, %v9012_v0 }
 0x4cd   : > { %16038 = vst [vmem:[#allocation20_spill] sm:$0xff] %v12248_v20  ;;  %v4120_v16 = vsel %vm4056_vm6, 1.0, %v9012_v0  ;;  %v4152_v9 = vsel %vm4088_vm7, 1.0, %v9012_v0  ;;  %v4118_v24 = vsel %vm4054_vm13, 1.0, %v9012_v0  ;;  %vm4086_vm3 = vcmp.eq.s32.totalorder %v11835_v35, %v12232_v12  ;;  %4288 = vmatpush.msrb.mxu3 %v12248_v20 }
 0x4ce   : > { %v12258_v23 = vadd.f32 %v4120_v16, %v3988_v6  ;;  %v12260_v53 = vadd.f32 %v4152_v9, %v4020_v18  ;;  %v12263_v13 = vadd.f32 %v4118_v24, %v3986_v38  ;;  %v4150_v34 = vsel %vm4086_vm3, 1.0, %v9012_v0 }
 0x4cf   : > { %v12266_v39 = vadd.f32 %v4150_v34, %v4018_v36  ;;  %vm3903_vm10 = vcmp.eq.s32.totalorder %v12242_v45, %v11816_v17  ;;  %vm4035_vm4 = vcmp.eq.s32.totalorder %v12242_v45, %v11825_v63  ;;  %v12273_v35 = vadd.s32 160, %v11787_v44 }
 0x4d0   : > { %16039 = vst [vmem:[#allocation22_spill] sm:$0xff] %v12258_v23  ;;  %4218 = vmatpush.msrb.mxu0 %v12258_v23  ;;  %4238 = vmatpush.msrb.mxu1 %v12260_v53  ;;  %v3967_v6 = vsel %vm3903_vm10, 1.0, %v9012_v0  ;;  %v4099_v18 = vsel %vm4035_vm4, 1.0, %v9012_v0  ;;  %vm4052_vm0 = vcmp.eq.s32.totalorder %v11838_v15, %v12232_v12  ;;  %vm3952_vm13 = vcmp.eq.s32.totalorder %v11841_v40, %v11801_v48 }
 0x4d1   : > { %16040 = vst [vmem:[#allocation24_spill] sm:$0xff] %v12260_v53  ;;  %v12283_v38 = vadd.f32 %v4099_v18, %v3967_v6  ;;  %vm3935_vm6 = vcmp.eq.s32.totalorder %v12273_v35, %v11816_v17  ;;  %vm4067_vm7 = vcmp.eq.s32.totalorder %v12273_v35, %v11825_v63  ;;  %v4116_v15 = vsel %vm4052_vm0, 1.0, %v9012_v0 }
 0x4d2   : > { %16041 = vst [vmem:[#allocation25_spill] sm:$0xff] %v12263_v13  ;;  %4219 = vmatpush.msrb.mxu0 %v12263_v13  ;;  %4239 = vmatpush.msrb.mxu1 %v12266_v39  ;;  %v3999_v62 = vsel %vm3935_vm6, 1.0, %v9012_v0  ;;  %v4131_v26 = vsel %vm4067_vm7, 1.0, %v9012_v0  ;;  %v12300_v36 = vadd.f32 %v4116_v15, %v3984_v3  ;;  %v4016_v16 = vsel %vm3952_vm13, 1.0, %v9012_v0 }
 0x4d3   : > { %16042 = vst [vmem:[#allocation26_spill] sm:$0xff] %v12266_v39  ;;  %4269 = vmatpush.msrb.mxu2 %v12283_v38  ;;  %v12298_v2 = vadd.f32 %v4131_v26, %v3999_v62  ;;  %vm4084_vm3 = vcmp.eq.s32.totalorder %v11841_v40, %v12232_v12  ;;  %v12307_v24 = vadd.s32 24, %v11787_v44  ;;  %v12310_v34 = vadd.s32 152, %v11787_v44 }
 0x4d4   : > { %16043 = vst [vmem:[#allocation27_spill] sm:$0xff] %v12283_v38  ;;  %v4148_v9 = vsel %vm4084_vm3, 1.0, %v9012_v0  ;;  %vm3918_vm10 = vcmp.eq.s32.totalorder %v11844_v22, %v11801_v48  ;;  %4220 = vmatpush.msrb.mxu0 %v12300_v36  ;;  %vm4050_vm4 = vcmp.eq.s32.totalorder %v11844_v22, %v12232_v12  ;;  %vm3950_vm14 = vcmp.eq.s32.totalorder %v11847_v1, %v11801_v48 }
 0x4d5   : > { %16044 = vst [vmem:[#allocation28_spill] sm:$0xff] %v12298_v2  ;;  %4289 = vmatpush.msrb.mxu3 %v12298_v2  ;;  %v12316_v6 = vadd.f32 %v4148_v9, %v4016_v16  ;;  %v3982_v18 = vsel %vm3918_vm10, 1.0, %v9012_v0  ;;  %vm3901_vm0 = vcmp.eq.s32.totalorder %v12307_v24, %v11816_v17  ;;  %vm4033_vm6 = vcmp.eq.s32.totalorder %v12307_v24, %v11825_v63 }
 0x4d6   : > { %16045 = vst [vmem:[#allocation29_spill] sm:$0xff] %v12300_v36  ;;  %vm3933_vm7 = vcmp.eq.s32.totalorder %v12310_v34, %v11816_v17  ;;  %vm4065_vm13 = vcmp.eq.s32.totalorder %v12310_v34, %v11825_v63  ;;  %v3965_v40 = vsel %vm3901_vm0, 1.0, %v9012_v0  ;;  %v4097_v22 = vsel %vm4033_vm6, 1.0, %v9012_v0 }
 0x4d7   : > { %16046 = vst [vmem:[#allocation30_spill] sm:$0xff] %v12316_v6  ;;  %4240 = vmatpush.msrb.mxu1 %v12316_v6  ;;  %v3997_v3 = vsel %vm3933_vm7, 1.0, %v9012_v0  ;;  %v4129_v62 = vsel %vm4065_vm13, 1.0, %v9012_v0  ;;  %v12336_v26 = vadd.f32 %v4097_v22, %v3965_v40  ;;  %v4114_v16 = vsel %vm4050_vm4, 1.0, %v9012_v0 }
 0x4d8   : > { %v12338_v15 = vadd.f32 %v4129_v62, %v3997_v3  ;;  %v4014_v9 = vsel %vm3950_vm14, 1.0, %v9012_v0  ;;  %v12342_v36 = vadd.f32 %v4114_v16, %v3982_v18  ;;  %vm4082_vm3 = vcmp.eq.s32.totalorder %v11847_v1, %v12232_v12 }
 0x4d9   : > { %16047 = vst [vmem:[#allocation31_spill] sm:$0xff] %v12336_v26  ;;  %v12347_v6 = vadd.s32 16, %v11787_v44  ;;  %v12350_v39 = vadd.s32 144, %v11787_v44  ;;  %4270 = vmatpush.msrb.mxu2 %v12336_v26  ;;  %v4146_v40 = vsel %vm4082_vm3, 1.0, %v9012_v0  ;;  %vm3916_vm10 = vcmp.eq.s32.totalorder %v11872_v27, %v11801_v48 }
 0x4da   : > { %16048 = vst [vmem:[#allocation32_spill] sm:$0xff] %v12338_v15  ;;  %4290 = vmatpush.msrb.mxu3 %v12338_v15  ;;  %vm4048_vm4 = vcmp.eq.s32.totalorder %v11872_v27, %v12232_v12  ;;  %vm3948_vm14 = vcmp.eq.s32.totalorder %v11973_v57, %v11801_v48  ;;  %4221 = vmatpush.msrb.mxu0 %v12342_v36  ;;  %v3980_v16 = vsel %vm3916_vm10, 1.0, %v9012_v0 }
 0x4db   : > { %16049 = vst [vmem:[#allocation33_spill] sm:$0xff] %v12342_v36  ;;  %v12362_v1 = vadd.f32 %v4146_v40, %v4014_v9  ;;  %vm3899_vm0 = vcmp.eq.s32.totalorder %v12347_v6, %v11816_v17  ;;  %vm4031_vm6 = vcmp.eq.s32.totalorder %v12347_v6, %v11825_v63  ;;  %vm3931_vm7 = vcmp.eq.s32.totalorder %v12350_v39, %v11816_v17 }
 0x4dc   : > { %v3963_v18 = vsel %vm3899_vm0, 1.0, %v9012_v0  ;;  %v4095_v27 = vsel %vm4031_vm6, 1.0, %v9012_v0  ;;  %v3995_v22 = vsel %vm3931_vm7, 1.0, %v9012_v0  ;;  %vm4063_vm13 = vcmp.eq.s32.totalorder %v12350_v39, %v11825_v63 }
 0x4dd   : > { %16050 = vst [vmem:[#allocation34_spill] sm:$0xff] %v12362_v1  ;;  %4241 = vmatpush.msrb.mxu1 %v12362_v1  ;;  %v12376_v3 = vadd.f32 %v4095_v27, %v3963_v18  ;;  %v4127_v62 = vsel %vm4063_vm13, 1.0, %v9012_v0  ;;  %v4112_v9 = vsel %vm4048_vm4, 1.0, %v9012_v0  ;;  %v4012_v13 = vsel %vm3948_vm14, 1.0, %v9012_v0 }
 0x4de   : > { %v12381_v40 = vadd.f32 %v4127_v62, %v3995_v22  ;;  %v12383_v36 = vadd.f32 %v4112_v9, %v3980_v16  ;;  %vm4080_vm3 = vcmp.eq.s32.totalorder %v11973_v57, %v12232_v12  ;;  %v12394_v27 = vadd.s32 8, %v11787_v44 }
 0x4df   : > { %16051 = vst [vmem:[#allocation35_spill] sm:$0xff] %v12376_v3  ;;  %4271 = vmatpush.msrb.mxu2 %v12376_v3  ;;  %v4144_v18 = vsel %vm4080_vm3, 1.0, %v9012_v0  ;;  %v12397_v22 = vadd.s32 136, %v11787_v44  ;;  %vm3914_vm10 = vcmp.eq.s32.totalorder %v12016_v59, %v11801_v48  ;;  %vm4046_vm4 = vcmp.eq.s32.totalorder %v12016_v59, %v12232_v12 }
 0x4e0   : > { %16052 = vst [vmem:[#allocation36_spill] sm:$0xff] %v12381_v40  ;;  %4291 = vmatpush.msrb.mxu3 %v12381_v40  ;;  %4222 = vmatpush.msrb.mxu0 %v12383_v36  ;;  %v12403_v62 = vadd.f32 %v4144_v18, %v4012_v13  ;;  %v3978_v57 = vsel %vm3914_vm10, 1.0, %v9012_v0  ;;  %vm3946_vm14 = vcmp.eq.s32.totalorder %v12024_v29, %v11801_v48  ;;  %v12423_v18 = vpop.permute.xlu2 %3249  ;;  %v4110_v40 = vsel %vm4046_vm4, 1.0, %v9012_v0 }
 0x4e1   : > { %16053 = vst [vmem:[#allocation37_spill] sm:$0xff] %v12383_v36  ;;  %vm3897_vm0 = vcmp.eq.s32.totalorder %v12394_v27, %v11816_v17  ;;  %vm4029_vm6 = vcmp.eq.s32.totalorder %v12394_v27, %v11825_v63  ;;  %vm3929_vm7 = vcmp.eq.s32.totalorder %v12397_v22, %v11816_v17  ;;  %vm4061_vm13 = vcmp.eq.s32.totalorder %v12397_v22, %v11825_v63 }
 0x4e2   : > { %16054 = vst [vmem:[#allocation38_spill] sm:$0xff] %v12403_v62  ;;  %4242 = vmatpush.msrb.mxu1 %v12403_v62  ;;  %v3961_v13 = vsel %vm3897_vm0, 1.0, %v9012_v0  ;;  %v4093_v59 = vsel %vm4029_vm6, 1.0, %v9012_v0  ;;  %v3993_v16 = vsel %vm3929_vm7, 1.0, %v9012_v0  ;;  %v4125_v9 = vsel %vm4061_vm13, 1.0, %v9012_v0  ;;  %v3321_v62 = vpop.f32.mrf.mxu0 }
 0x4e3   : > { %16055 = vst [vmem:[#allocation39_spill] sm:$0xff] %v12423_v18  ;;  %v12425_v36 = vadd.f32 %v4093_v59, %v3961_v13  ;;  %v12427_v1 = vadd.f32 %v4125_v9, %v3993_v16  ;;  %v4010_v3 = vsel %vm3946_vm14, 1.0, %v9012_v0  ;;  %v12431_v53 = vadd.f32 %v4110_v40, %v3978_v57  ;;  %v3341_v13 = vpop.f32.mrf.mxu1 }
 0x4e4   : > { %vm4078_vm3 = vcmp.eq.s32.totalorder %v12024_v29, %v12232_v12  ;;  %vm3895_vm10 = vcmp.eq.s32.totalorder %v11787_v44, %v11816_v17  ;;  %vm4027_vm0 = vcmp.eq.s32.totalorder %v11787_v44, %v11825_v63  ;;  %v12445_v29 = vadd.s32 128, %v11787_v44 }
 0x4e5   : > { %16056 = vst [vmem:[#allocation40_spill] sm:$0xff] %v12425_v36  ;;  %4272 = vmatpush.msrb.mxu2 %v12425_v36  ;;  %4292 = vmatpush.msrb.mxu3 %v12427_v1  ;;  %v4142_v59 = vsel %vm4078_vm3, 1.0, %v9012_v0  ;;  %v3959_v40 = vsel %vm3895_vm10, 1.0, %v9012_v0  ;;  %v4091_v57 = vsel %vm4027_vm0, 1.0, %v9012_v0  ;;  %v3322_v15 = vadd.f32 %v3321_v62, %v12423_v18 }
 0x4e6   : > { %16057 = vst [vmem:[#allocation41_spill] sm:$0xff] %v12427_v1  ;;  %4223 = vmatpush.msrb.mxu0 %v12431_v53  ;;  %v12448_v16 = vadd.f32 %v4142_v59, %v4010_v3  ;;  %v12450_v9 = vadd.f32 %v4091_v57, %v3959_v40  ;;  %v3342_v36 = vadd.f32 %v3341_v13, %v12423_v18 }
 0x4e7   : > { %vm3927_vm4 = vcmp.eq.s32.totalorder %v12445_v29, %v11816_v17  ;;  %vm4059_vm14 = vcmp.eq.s32.totalorder %v12445_v29, %v11825_v63  ;;  %vm3912_vm6 = vcmp.eq.s32.totalorder %v12039_v31, %v11801_v48  ;;  %vm4044_vm7 = vcmp.eq.s32.totalorder %v12039_v31, %v12232_v12 }
 0x4e8   : > { %16058 = vst [vmem:[#allocation42_spill] sm:$0xff] %v12448_v16  ;;  %4243 = vmatpush.msrb.mxu1 %v12448_v16  ;;  %4273 = vmatpush.msrb.mxu2 %v12450_v9  ;;  %v3991_v3 = vsel %vm3927_vm4, 1.0, %v9012_v0  ;;  %v4123_v62 = vsel %vm4059_vm14, 1.0, %v9012_v0  ;;  %vm3784_vm13 = vcmp.ge.f32.partialorder %v3322_v15, 0.0  ;;  %v3808_v13 = vmul.f32 0.01, %v3322_v15 }
 0x4e9   : > { %16059 = vst [vmem:[#allocation43_spill] sm:$0xff] %v12450_v9  ;;  %v12466_v17 = vadd.f32 %v4123_v62, %v3991_v3  ;;  %vm3785_vm3 = vcmp.ge.f32.partialorder %v3342_v36, 0.0  ;;  %v3809_v63 = vmul.f32 0.01, %v3342_v36  ;;  %v3976_v59 = vsel %vm3912_vm6, 1.0, %v9012_v0 }
 0x4ea   : > { %4339 = vmatpush.msra.mxu2 %v11939_v21  ;;  %v12470_v40 = vsel %vm3784_vm13, %v3322_v15, %v3808_v13  ;;  %v4108_v31 = vsel %vm4044_vm7, 1.0, %v9012_v0  ;;  %vm3944_vm10 = vcmp.eq.s32.totalorder %v12050_v5, %v11801_v48  ;;  %vm4076_vm0 = vcmp.eq.s32.totalorder %v12050_v5, %v12232_v12 }
 0x4eb   : > { %16060 = vst [vmem:[#allocation44_spill] sm:$0xff] %v12466_v17  ;;  %4293 = vmatpush.msrb.mxu3 %v12466_v17  ;;  %4274 = vmatmul.f32.vlgmr.msrb.gmra.mxu2 %v12470_v40  ;;  %v12479_v57 = vsel %vm3785_vm3, %v3342_v36, %v3809_v63  ;;  %v12481_v3 = vadd.f32 %v4108_v31, %v3976_v59  ;;  %v4008_v62 = vsel %vm3944_vm10, 1.0, %v9012_v0  ;;  %v4140_v15 = vsel %vm4076_vm0, 1.0, %v9012_v0 }
 0x4ec   : > { %4294 = vmatmul.f32.vlgmr.msrb.gmra.mxu3 %v12479_v57  ;;  %v12486_v13 = vadd.f32 %v4140_v15, %v4008_v62  ;;  %4340 = vmatpush.msra.mxu2 %v11943_v61  ;;  %vm3910_vm4 = vcmp.eq.s32.totalorder %v12060_v25, %v11801_v48  ;;  %vm4042_vm14 = vcmp.eq.s32.totalorder %v12060_v25, %v12232_v12 }
 0x4ed   : > { %16061 = vst [vmem:[#allocation45_spill] sm:$0xff] %v12481_v3  ;;  %4359 = vmatpush.msra.mxu3 %v11941_v51  ;;  %4224 = vmatpush.msrb.mxu0 %v12481_v3  ;;  %v3974_v5 = vsel %vm3910_vm4, 1.0, %v9012_v0  ;;  %v4106_v36 = vsel %vm4042_vm14, 1.0, %v9012_v0  ;;  %vm3942_vm6 = vcmp.eq.s32.totalorder %v12085_v19, %v11801_v48  ;;  %vm4074_vm7 = vcmp.eq.s32.totalorder %v12085_v19, %v12232_v12 }
 0x4ee   : > { %16062 = vst [vmem:[#allocation46_spill] sm:$0xff] %v12486_v13  ;;  %4244 = vmatpush.msrb.mxu1 %v12486_v13  ;;  %v12502_v63 = vadd.f32 %v4106_v36, %v3974_v5  ;;  %v4006_v25 = vsel %vm3942_vm6, 1.0, %v9012_v0  ;;  %v4138_v59 = vsel %vm4074_vm7, 1.0, %v9012_v0  ;;  %4341 = vmatpush.msra.mxu2 %v11979_v14  ;;  %vm3908_vm13 = vcmp.eq.s32.totalorder %v12127_v4, %v11801_v48 }
 0x4ef   : > { %4360 = vmatpush.msra.mxu3 %v11945_v55  ;;  %v12508_v31 = vadd.f32 %v4138_v59, %v4006_v25  ;;  %vm4040_vm3 = vcmp.eq.s32.totalorder %v12127_v4, %v12232_v12  ;;  %v3972_v19 = vsel %vm3908_vm13, 1.0, %v9012_v0  ;;  %vm3940_vm10 = vcmp.eq.s32.totalorder %v12143_v37, %v11801_v48 }
 0x4f0   : > { %16063 = vst [vmem:[#allocation47_spill] sm:$0xff] %v12502_v63  ;;  %4225 = vmatpush.msrb.mxu0 %v12502_v63  ;;  %v4104_v62 = vsel %vm4040_vm3, 1.0, %v9012_v0  ;;  %4342 = vmatpush.msra.mxu2 %v12008_v49  ;;  %v4004_v5 = vsel %vm3940_vm10, 1.0, %v9012_v0  ;;  %vm4072_vm0 = vcmp.eq.s32.totalorder %v12143_v37, %v12232_v12  ;;  %vm3906_vm4 = vcmp.eq.s32.totalorder %v12151_v33, %v11801_v48 }
 0x4f1   : > { %16064 = vst [vmem:[#allocation48_spill] sm:$0xff] %v12508_v31  ;;  %4245 = vmatpush.msrb.mxu1 %v12508_v31  ;;  %4361 = vmatpush.msra.mxu3 %v12006_v43  ;;  %v12522_v15 = vadd.f32 %v4104_v62, %v3972_v19  ;;  %v4136_v4 = vsel %vm4072_vm0, 1.0, %v9012_v0  ;;  %vm4038_vm14 = vcmp.eq.s32.totalorder %v12151_v33, %v12232_v12  ;;  %v3970_v37 = vsel %vm3906_vm4, 1.0, %v9012_v0 }
 0x4f2   : > { %vm3938_vm6 = vcmp.eq.s32.totalorder %v12154_v28, %v11801_v48  ;;  %4343 = vmatpush.msra.mxu2 %v12047_v58  ;;  %v12536_v36 = vadd.f32 %v4136_v4, %v4004_v5  ;;  %v4102_v25 = vsel %vm4038_vm14, 1.0, %v9012_v0  ;;  %vm4070_vm7 = vcmp.eq.s32.totalorder %v12154_v28, %v12232_v12 }
 0x4f3   : > { %16065 = vst [vmem:[#allocation49_spill] sm:$0xff] %v12522_v15  ;;  %4226 = vmatpush.msrb.mxu0 %v12522_v15  ;;  %4362 = vmatpush.msra.mxu3 %v12036_v7  ;;  %v4002_v59 = vsel %vm3938_vm6, 1.0, %v9012_v0  ;;  %v12542_v19 = vadd.f32 %v4102_v25, %v3970_v37  ;;  %vm3904_vm13 = vcmp.eq.s32.totalorder %v12211_v32, %v11801_v48  ;;  %v4134_v33 = vsel %vm4070_vm7, 1.0, %v9012_v0 }
 0x4f4   : > { %16066 = vst [vmem:[#allocation50_spill] sm:$0xff] %v12536_v36  ;;  %vm4036_vm3 = vcmp.eq.s32.totalorder %v12211_v32, %v12232_v12  ;;  %4344 = vmatpush.msra.mxu2 %v12096_v30  ;;  %4246 = vmatpush.msrb.mxu1 %v12536_v36  ;;  %v3968_v62 = vsel %vm3904_vm13, 1.0, %v9012_v0  ;;  %vm3936_vm10 = vcmp.eq.s32.totalorder %v12214_v11, %v11801_v48 }
 0x4f5   : > { %16067 = vst [vmem:[#allocation51_spill] sm:$0xff] %v12542_v19  ;;  %4363 = vmatpush.msra.mxu3 %v12055_v52  ;;  %v4100_v5 = vsel %vm4036_vm3, 1.0, %v9012_v0  ;;  %4227 = vmatpush.msrb.mxu0 %v12542_v19  ;;  %v12559_v28 = vadd.f32 %v4134_v33, %v4002_v59  ;;  %v4000_v4 = vsel %vm3936_vm10, 1.0, %v9012_v0  ;;  %vm4068_vm0 = vcmp.eq.s32.totalorder %v12214_v11, %v12232_v12 }
 0x4f6   : > { %v12561_v32 = vadd.f32 %v4100_v5, %v3968_v62  ;;  %4345 = vmatpush.msra.mxu2 %v12108_v8  ;;  %v4132_v37 = vsel %vm4068_vm0, 1.0, %v9012_v0  ;;  %vm3902_vm4 = vcmp.eq.s32.totalorder %v12242_v45, %v11801_v48  ;;  %vm4034_vm14 = vcmp.eq.s32.totalorder %v12242_v45, %v12232_v12 }
 0x4f7   : > { %16068 = vst [vmem:[#allocation52_spill] sm:$0xff] %v12559_v28  ;;  %4364 = vmatpush.msra.mxu3 %v12098_v47  ;;  %vm3934_vm6 = vcmp.eq.s32.totalorder %v12273_v35, %v11801_v48  ;;  %4247 = vmatpush.msrb.mxu1 %v12559_v28  ;;  %v12577_v11 = vadd.f32 %v4132_v37, %v4000_v4  ;;  %v3966_v25 = vsel %vm3902_vm4, 1.0, %v9012_v0  ;;  %v4098_v59 = vsel %vm4034_vm14, 1.0, %v9012_v0 }
 0x4f8   : > { %16069 = vst [vmem:[#allocation53_spill] sm:$0xff] %v12561_v32  ;;  %4228 = vmatpush.msrb.mxu0 %v12561_v32  ;;  %v3998_v33 = vsel %vm3934_vm6, 1.0, %v9012_v0  ;;  %v12582_v62 = vadd.f32 %v4098_v59, %v3966_v25  ;;  %vm4066_vm7 = vcmp.eq.s32.totalorder %v12273_v35, %v12232_v12  ;;  %vm3900_vm13 = vcmp.eq.s32.totalorder %v12307_v24, %v11801_v48 }
 0x4f9   : > { %16070 = vst [vmem:[#allocation54_spill] sm:$0xff] %v12577_v11  ;;  %4365 = vmatpush.msra.mxu3 %v12117_v50  ;;  %vm4032_vm3 = vcmp.eq.s32.totalorder %v12307_v24, %v12232_v12  ;;  %4248 = vmatpush.msrb.mxu1 %v12577_v11  ;;  %v4130_v45 = vsel %vm4066_vm7, 1.0, %v9012_v0  ;;  %v3964_v5 = vsel %vm3900_vm13, 1.0, %v9012_v0  ;;  %vm3932_vm10 = vcmp.eq.s32.totalorder %v12310_v34, %v11801_v48 }
 0x4fa   : > { %16071 = vst [vmem:[#allocation55_spill] sm:$0xff] %v12582_v62  ;;  %v4096_v4 = vsel %vm4032_vm3, 1.0, %v9012_v0  ;;  %4346 = vmatpush.msra.mxu2 %v12136_v41  ;;  %4229 = vmatpush.msrb.mxu0 %v12582_v62  ;;  %v12599_v35 = vadd.f32 %v4130_v45, %v3998_v33  ;;  %v3996_v24 = vsel %vm3932_vm10, 1.0, %v9012_v0  ;;  %vm4064_vm0 = vcmp.eq.s32.totalorder %v12310_v34, %v12232_v12 }
 0x4fb   : > { %v12601_v37 = vadd.f32 %v4096_v4, %v3964_v5  ;;  %4366 = vmatpush.msra.mxu3 %v12138_v60  ;;  %v4128_v25 = vsel %vm4064_vm0, 1.0, %v9012_v0  ;;  %vm3898_vm4 = vcmp.eq.s32.totalorder %v12347_v6, %v11801_v48  ;;  %vm4030_vm14 = vcmp.eq.s32.totalorder %v12347_v6, %v12232_v12 }
 0x4fc   : > { %16072 = vst [vmem:[#allocation56_spill] sm:$0xff] %v12599_v35  ;;  %vm3930_vm6 = vcmp.eq.s32.totalorder %v12350_v39, %v11801_v48  ;;  %4347 = vmatpush.msra.mxu2 %v12165_v10  ;;  %4249 = vmatpush.msrb.mxu1 %v12599_v35  ;;  %v12617_v34 = vadd.f32 %v4128_v25, %v3996_v24  ;;  %v3962_v59 = vsel %vm3898_vm4, 1.0, %v9012_v0  ;;  %v4094_v33 = vsel %vm4030_vm14, 1.0, %v9012_v0 }
 0x4fd   : > { %16073 = vst [vmem:[#allocation57_spill] sm:$0xff] %v12601_v37  ;;  %4230 = vmatpush.msrb.mxu0 %v12601_v37  ;;  %v3994_v45 = vsel %vm3930_vm6, 1.0, %v9012_v0  ;;  %v12622_v5 = vadd.f32 %v4094_v33, %v3962_v59  ;;  %vm4062_vm7 = vcmp.eq.s32.totalorder %v12350_v39, %v12232_v12  ;;  %4367 = vmatpush.msra.mxu3 %v12177_v42 }
 0x4fe   : > { %16074 = vst [vmem:[#allocation58_spill] sm:$0xff] %v12617_v34  ;;  %vm3896_vm13 = vcmp.eq.s32.totalorder %v12394_v27, %v11801_v48  ;;  %vm4028_vm3 = vcmp.eq.s32.totalorder %v12394_v27, %v12232_v12  ;;  %4250 = vmatpush.msrb.mxu1 %v12617_v34  ;;  %v4126_v6 = vsel %vm4062_vm7, 1.0, %v9012_v0  ;;  %vm3928_vm10 = vcmp.eq.s32.totalorder %v12397_v22, %v11801_v48 }
 0x4ff   : > { %16075 = vst [vmem:[#allocation59_spill] sm:$0xff] %v12622_v5  ;;  %v3960_v4 = vsel %vm3896_vm13, 1.0, %v9012_v0  ;;  %v4092_v24 = vsel %vm4028_vm3, 1.0, %v9012_v0  ;;  %4348 = vmatpush.msra.mxu2 %v12195_v54  ;;  %4231 = vmatpush.msrb.mxu0 %v12622_v5  ;;  %v12639_v39 = vadd.f32 %v4126_v6, %v3994_v45  ;;  %v3992_v27 = vsel %vm3928_vm10, 1.0, %v9012_v0 }
 0x500   : > { %v12641_v25 = vadd.f32 %v4092_v24, %v3960_v4  ;;  %vm4060_vm0 = vcmp.eq.s32.totalorder %v12397_v22, %v12232_v12  ;;  %4368 = vmatpush.msra.mxu3 %v12197_v46  ;;  %vm3894_vm4 = vcmp.eq.s32.totalorder %v11787_v44, %v11801_v48  ;;  %vm4026_vm14 = vcmp.eq.s32.totalorder %v11787_v44, %v12232_v12  ;;  %v3361_v24 = vpop.f32.mrf.mxu2 }
 0x501   : > { %16076 = vst [vmem:[#allocation60_spill] sm:$0xff] %v12639_v39  ;;  %v4124_v59 = vsel %vm4060_vm0, 1.0, %v9012_v0  ;;  %vm3926_vm6 = vcmp.eq.s32.totalorder %v12445_v29, %v11801_v48  ;;  %4349 = vmatpush.msra.mxu2 %v12237_v56  ;;  %4251 = vmatpush.msrb.mxu1 %v12639_v39  ;;  %v3958_v33 = vsel %vm3894_vm4, 1.0, %v9012_v0  ;;  %v4090_v45 = vsel %vm4026_vm14, 1.0, %v9012_v0 }
 0x502   : > { %16077 = vst [vmem:[#allocation61_spill] sm:$0xff] %v12641_v25  ;;  %4232 = vmatpush.msrb.mxu0 %v12641_v25  ;;  %v12657_v22 = vadd.f32 %v4124_v59, %v3992_v27  ;;  %v3990_v6 = vsel %vm3926_vm6, 1.0, %v9012_v0  ;;  %v12662_v4 = vadd.f32 %v4090_v45, %v3958_v33  ;;  %vm4058_vm7 = vcmp.eq.s32.totalorder %v12445_v29, %v12232_v12  ;;  %v3381_v27 = vpop.f32.mrf.mxu3  ;;  %v16081_v29 = vld [vmem:[#allocation32_spill] sm:$0xff]  ;;  %v16083_v33 = vld [vmem:[#allocation25_spill] sm:$0xff]  ;;  %v16084_v45 = vld [vmem:[#allocation35_spill] sm:$0xff] }
 0x503   : > { %4369 = vmatpush.msra.mxu3 %v12248_v20  ;;  %4350 = vmatpush.msra.mxu2 %v12283_v38  ;;  %v4122_v44 = vsel %vm4058_vm7, 1.0, %v9012_v0  ;;  %v3362_v12 = vadd.f32 %v3361_v24, %v12423_v18  ;;  %v3382_v0 = vadd.f32 %v3381_v27, %v12423_v18  ;;  %v16082_v59 = vld [vmem:[#allocation24_spill] sm:$0xff]  ;;  %v16090_v27 = vld [vmem:[#allocation33_spill] sm:$0xff] }
 0x504   : > { %16078 = vst [vmem:[#allocation62_spill] sm:$0xff] %v12657_v22  ;;  %4252 = vmatpush.msrb.mxu1 %v12657_v22  ;;  %4233 = vmatpush.msrb.mxu0 %v12662_v4  ;;  %v12671_v48 = vadd.f32 %v4122_v44, %v3990_v6  ;;  %v16086_v6 = vld [vmem:[#allocation26_spill] sm:$0xff]  ;;  %v16087_v44 = vld [vmem:[#allocation29_spill] sm:$0xff] }
 0x505   : > { %16079 = vst [vmem:[#allocation63_spill] sm:$0xff] %v12662_v4  ;;  %4370 = vmatpush.msra.mxu3 %v12298_v2  ;;  %4234 = vmatmul.f32.vlgmr.msrb.gmra.mxu0 %v12470_v40  ;;  %v16085_v40 = vld [vmem:[#allocation36_spill] sm:$0xff]  ;;  %v3811_v24 = vmul.f32 0.01, %v3382_v0  ;;  %vm3786_vm13 = vcmp.ge.f32.partialorder %v3362_v12, 0.0  ;;  %vm3787_vm3 = vcmp.ge.f32.partialorder %v3382_v0, 0.0 }
 0x506   : > { %16080 = vst [vmem:[#allocation64_spill] sm:$0xff] %v12671_v48  ;;  %4351 = vmatpush.msra.mxu2 %v12336_v26  ;;  %4253 = vmatpush.msrb.mxu1 %v12671_v48  ;;  %v3810_v26 = vmul.f32 0.01, %v3362_v12  ;;  %v16088_v2 = vld [vmem:[#allocation40_spill] sm:$0xff] }
 0x507   : > { %4299 = vmatpush.msra.mxu0 %v12258_v23  ;;  %4254 = vmatmul.f32.vlgmr.msrb.gmra.mxu1 %v12479_v57  ;;  %v16089_v57 = vld [vmem:[#allocation30_spill] sm:$0xff] }
 0x508   : > { %4371 = vmatpush.msra.mxu3 %v16081_v29  ;;  %4319 = vmatpush.msra.mxu1 %v16082_v59  ;;  %v3834_v29 = vsel %vm3786_vm13, %v3362_v12, %v3810_v26  ;;  %v3401_v26 = vpop.f32.mrf.mxu0  ;;  %v3421_v12 = vpop.f32.mrf.mxu1 }
 0x509   : > { %4300 = vmatpush.msra.mxu0 %v16083_v33  ;;  %4352 = vmatpush.msra.mxu2 %v16084_v45  ;;  %v16092_v45 = vld [vmem:[#allocation37_spill] sm:$0xff] }
 0x50a   : > { %4372 = vmatpush.msra.mxu3 %v16085_v40  ;;  %4320 = vmatpush.msra.mxu1 %v16086_v6  ;;  %v16091_v40 = vld [vmem:[#allocation34_spill] sm:$0xff] }
 0x50b   : > { %4301 = vmatpush.msra.mxu0 %v16087_v44  ;;  %4353 = vmatpush.msra.mxu2 %v16088_v2  ;;  %v3835_v44 = vsel %vm3787_vm3, %v3382_v0, %v3811_v24  ;;  %v16093_v2 = vld [vmem:[#allocation38_spill] sm:$0xff]  ;;  %v16094_v0 = vld [vmem:[#allocation28_spill] sm:$0xff]  ;;  %v16095_v24 = vld [vmem:[#allocation29_spill] sm:$0xff] }
 0x50c   : > { %4373 = vmatpush.msra.mxu3 %v12427_v1  ;;  %4321 = vmatpush.msra.mxu1 %v16089_v57 }
 0x50d   : > { %4302 = vmatpush.msra.mxu0 %v16090_v27  ;;  %4354 = vmatpush.msra.mxu2 %v12450_v9 }
 0x50e   : > { %4374 = vmatpush.msra.mxu3 %v12466_v17  ;;  %4322 = vmatpush.msra.mxu1 %v16091_v40 }
 0x50f   : > { %4303 = vmatpush.msra.mxu0 %v16092_v45  ;;  %4355 = vmatmul.f32.vlgmr.msra.gmra.mxu2 %v3834_v29 }
 0x510   : > { %4375 = vmatmul.f32.vlgmr.msra.gmra.mxu3 %v3835_v44  ;;  %4323 = vmatpush.msra.mxu1 %v16093_v2 }
 0x511   : > { %4304 = vmatpush.msra.mxu0 %v12431_v53  ;;  %4420 = vmatpush.msrb.mxu2 %v11939_v21 }
 0x512   : > { %4440 = vmatpush.msrb.mxu3 %v11941_v51  ;;  %4324 = vmatpush.msra.mxu1 %v12448_v16 }
 0x513   : > { %4305 = vmatpush.msra.mxu0 %v12481_v3  ;;  %4421 = vmatpush.msrb.mxu2 %v11943_v61 }
 0x514   : > { %4441 = vmatpush.msrb.mxu3 %v11945_v55  ;;  %4325 = vmatpush.msra.mxu1 %v12486_v13 }
 0x515   : > { %4306 = vmatpush.msra.mxu0 %v12502_v63  ;;  %4422 = vmatpush.msrb.mxu2 %v11979_v14 }
 0x516   : > { %4442 = vmatpush.msrb.mxu3 %v12006_v43  ;;  %4326 = vmatpush.msra.mxu1 %v12508_v31 }
 0x517   : > { %4307 = vmatpush.msra.mxu0 %v12522_v15  ;;  %4423 = vmatpush.msrb.mxu2 %v12008_v49 }
 0x518   : > { %4443 = vmatpush.msrb.mxu3 %v12036_v7  ;;  %4327 = vmatpush.msra.mxu1 %v12536_v36 }
 0x519   : > { %4308 = vmatpush.msra.mxu0 %v12542_v19  ;;  %4424 = vmatpush.msrb.mxu2 %v12047_v58 }
 0x51a   : > { %4444 = vmatpush.msrb.mxu3 %v12055_v52  ;;  %4328 = vmatpush.msra.mxu1 %v12559_v28 }
 0x51b   : > { %4309 = vmatpush.msra.mxu0 %v12561_v32  ;;  %4425 = vmatpush.msrb.mxu2 %v12096_v30 }
 0x51c   : > { %4445 = vmatpush.msrb.mxu3 %v12098_v47  ;;  %4329 = vmatpush.msra.mxu1 %v12577_v11 }
 0x51d   : > { %4310 = vmatpush.msra.mxu0 %v12582_v62  ;;  %4426 = vmatpush.msrb.mxu2 %v12108_v8 }
 0x51e   : > { %4446 = vmatpush.msrb.mxu3 %v12117_v50  ;;  %4330 = vmatpush.msra.mxu1 %v12599_v35 }
 0x51f   : > { %4311 = vmatpush.msra.mxu0 %v12601_v37  ;;  %4427 = vmatpush.msrb.mxu2 %v12136_v41 }
 0x520   : > { %4447 = vmatpush.msrb.mxu3 %v12138_v60  ;;  %4331 = vmatpush.msra.mxu1 %v12617_v34 }
 0x521   : > { %4312 = vmatpush.msra.mxu0 %v12622_v5  ;;  %4428 = vmatpush.msrb.mxu2 %v12165_v10 }
 0x522   : > { %4448 = vmatpush.msrb.mxu3 %v12177_v42  ;;  %4332 = vmatpush.msra.mxu1 %v12639_v39 }
 0x523   : > { %4313 = vmatpush.msra.mxu0 %v12641_v25  ;;  %4429 = vmatpush.msrb.mxu2 %v12195_v54 }
 0x524   : > { %4449 = vmatpush.msrb.mxu3 %v12197_v46  ;;  %4333 = vmatpush.msra.mxu1 %v12657_v22 }
 0x525   : > { %4314 = vmatpush.msra.mxu0 %v12662_v4  ;;  %4430 = vmatpush.msrb.mxu2 %v12237_v56  ;;  %v16096_v56 = vld [vmem:[#allocation31_spill] sm:$0xff] }
 0x526   : > { %4315 = vmatmul.f32.vlgmr.msra.gmra.mxu0 %v3834_v29  ;;  %4334 = vmatpush.msra.mxu1 %v12671_v48  ;;  %v3402_v29 = vadd.f32 %v3401_v26, %v12423_v18 }
 0x527   : > { %4380 = vmatpush.msrb.mxu0 %v12258_v23  ;;  %4335 = vmatmul.f32.vlgmr.msra.gmra.mxu1 %v3835_v44  ;;  %v3422_v44 = vadd.f32 %v3421_v12, %v12423_v18  ;;  %v16100_v12 = vld [vmem:[#allocation40_spill] sm:$0xff] }
 0x528   : > { %4450 = vmatpush.msrb.mxu3 %v12248_v20  ;;  %4400 = vmatpush.msrb.mxu1 %v16082_v59  ;;  %v16097_v20 = vld [vmem:[#allocation32_spill] sm:$0xff]  ;;  %vm3788_vm10 = vcmp.ge.f32.partialorder %v3402_v29, 0.0 }
 0x529   : > { %4381 = vmatpush.msrb.mxu0 %v16083_v33  ;;  %4431 = vmatpush.msrb.mxu2 %v12283_v38  ;;  %v16098_v33 = vld [vmem:[#allocation35_spill] sm:$0xff]  ;;  %v16099_v38 = vld [vmem:[#allocation36_spill] sm:$0xff]  ;;  %v3813_v26 = vmul.f32 0.01, %v3422_v44  ;;  %vm3789_vm0 = vcmp.ge.f32.partialorder %v3422_v44, 0.0 }
 0x52a   : > { %4451 = vmatpush.msrb.mxu3 %v16094_v0  ;;  %4401 = vmatpush.msrb.mxu1 %v16086_v6  ;;  %v3812_v0 = vmul.f32 0.01, %v3402_v29 }
 0x52b   : > { %4382 = vmatpush.msrb.mxu0 %v16095_v24  ;;  %4432 = vmatpush.msrb.mxu2 %v16096_v56 }
 0x52c   : > { %4452 = vmatpush.msrb.mxu3 %v16097_v20  ;;  %4402 = vmatpush.msrb.mxu1 %v16089_v57 }
 0x52d   : > { %4383 = vmatpush.msrb.mxu0 %v16090_v27  ;;  %4433 = vmatpush.msrb.mxu2 %v16098_v33 }
 0x52e   : > { %4453 = vmatpush.msrb.mxu3 %v16099_v38  ;;  %4403 = vmatpush.msrb.mxu1 %v16091_v40  ;;  %v3836_v38 = vsel %vm3788_vm10, %v3402_v29, %v3812_v0  ;;  %v3441_v0 = vpop.f32.mrf.mxu2  ;;  %v3461_v29 = vpop.f32.mrf.mxu3 }
 0x52f   : > { %4384 = vmatpush.msrb.mxu0 %v16092_v45  ;;  %4434 = vmatpush.msrb.mxu2 %v16100_v12  ;;  %v3837_v45 = vsel %vm3789_vm0, %v3422_v44, %v3813_v26  ;;  %v16101_v44 = vld [vmem:[#allocation10_spill] sm:$0xff]  ;;  %v16102_v26 = vld [vmem:[#allocation20_spill] sm:$0xff] }
 0x530   : > { %4454 = vmatpush.msrb.mxu3 %v12427_v1  ;;  %4404 = vmatpush.msrb.mxu1 %v16093_v2 }
 0x531   : > { %4385 = vmatpush.msrb.mxu0 %v12431_v53  ;;  %4435 = vmatpush.msrb.mxu2 %v12450_v9 }
 0x532   : > { %4455 = vmatpush.msrb.mxu3 %v12466_v17  ;;  %4405 = vmatpush.msrb.mxu1 %v12448_v16 }
 0x533   : > { %4436 = vmatmul.f32.vlgmr.msrb.gmra.mxu2 %v3836_v38  ;;  %4456 = vmatmul.f32.vlgmr.msrb.gmra.mxu3 %v3837_v45 }
 0x534   : > { %4501 = vmatpush.msra.mxu2 %v11939_v21  ;;  %4521 = vmatpush.msra.mxu3 %v11941_v51 }
 0x535   : > { %4386 = vmatpush.msrb.mxu0 %v12481_v3  ;;  %4406 = vmatpush.msrb.mxu1 %v12486_v13 }
 0x536   : > { %4502 = vmatpush.msra.mxu2 %v11943_v61  ;;  %4522 = vmatpush.msra.mxu3 %v11945_v55 }
 0x537   : > { %4387 = vmatpush.msrb.mxu0 %v12502_v63  ;;  %4407 = vmatpush.msrb.mxu1 %v12508_v31 }
 0x538   : > { %4503 = vmatpush.msra.mxu2 %v11979_v14  ;;  %4523 = vmatpush.msra.mxu3 %v12006_v43 }
 0x539   : > { %4388 = vmatpush.msrb.mxu0 %v12522_v15  ;;  %4408 = vmatpush.msrb.mxu1 %v12536_v36 }
 0x53a   : > { %4504 = vmatpush.msra.mxu2 %v12008_v49  ;;  %4524 = vmatpush.msra.mxu3 %v12036_v7 }
 0x53b   : > { %4389 = vmatpush.msrb.mxu0 %v12542_v19  ;;  %4409 = vmatpush.msrb.mxu1 %v12559_v28 }
 0x53c   : > { %4505 = vmatpush.msra.mxu2 %v12047_v58  ;;  %4525 = vmatpush.msra.mxu3 %v12055_v52 }
 0x53d   : > { %4390 = vmatpush.msrb.mxu0 %v12561_v32  ;;  %4410 = vmatpush.msrb.mxu1 %v12577_v11 }
 0x53e   : > { %4506 = vmatpush.msra.mxu2 %v12096_v30  ;;  %4526 = vmatpush.msra.mxu3 %v12098_v47 }
 0x53f   : > { %4391 = vmatpush.msrb.mxu0 %v12582_v62  ;;  %4411 = vmatpush.msrb.mxu1 %v12599_v35 }
 0x540   : > { %4507 = vmatpush.msra.mxu2 %v12108_v8  ;;  %4527 = vmatpush.msra.mxu3 %v12117_v50 }
 0x541   : > { %4392 = vmatpush.msrb.mxu0 %v12601_v37  ;;  %4412 = vmatpush.msrb.mxu1 %v12617_v34 }
 0x542   : > { %4508 = vmatpush.msra.mxu2 %v12136_v41  ;;  %4528 = vmatpush.msra.mxu3 %v12138_v60 }
 0x543   : > { %4393 = vmatpush.msrb.mxu0 %v12622_v5  ;;  %4413 = vmatpush.msrb.mxu1 %v12639_v39 }
 0x544   : > { %4509 = vmatpush.msra.mxu2 %v12165_v10  ;;  %4529 = vmatpush.msra.mxu3 %v12177_v42 }
 0x545   : > { %4394 = vmatpush.msrb.mxu0 %v12641_v25  ;;  %4414 = vmatpush.msrb.mxu1 %v12657_v22  ;;  %v16103_v22 = vld [vmem:[#allocation25_spill] sm:$0xff] }
 0x546   : > { %4510 = vmatpush.msra.mxu2 %v12195_v54  ;;  %4530 = vmatpush.msra.mxu3 %v12197_v46  ;;  %v16104_v46 = vld [vmem:[#allocation27_spill] sm:$0xff] }
 0x547   : > { %4395 = vmatpush.msrb.mxu0 %v12662_v4  ;;  %4415 = vmatpush.msrb.mxu1 %v12671_v48  ;;  %v3442_v48 = vadd.f32 %v3441_v0, %v12423_v18 }
 0x548   : > { %4396 = vmatmul.f32.vlgmr.msrb.gmra.mxu0 %v3836_v38  ;;  %4416 = vmatmul.f32.vlgmr.msrb.gmra.mxu1 %v3837_v45  ;;  %v3462_v38 = vadd.f32 %v3461_v29, %v12423_v18  ;;  %v16105_v45 = vld [vmem:[#allocation28_spill] sm:$0xff]  ;;  %v16107_v29 = vld [vmem:[#allocation37_spill] sm:$0xff] }
 0x549   : > { %4461 = vmatpush.msra.mxu0 %v12258_v23  ;;  %4481 = vmatpush.msra.mxu1 %v16082_v59  ;;  %vm3790_vm4 = vcmp.ge.f32.partialorder %v3442_v48, 0.0 }
 0x54a   : > { %4511 = vmatpush.msra.mxu2 %v16101_v44  ;;  %4531 = vmatpush.msra.mxu3 %v16102_v26  ;;  %v3815_v0 = vmul.f32 0.01, %v3462_v38  ;;  %vm3791_vm14 = vcmp.ge.f32.partialorder %v3462_v38, 0.0 }
 0x54b   : > { %4462 = vmatpush.msra.mxu0 %v16103_v22  ;;  %4482 = vmatpush.msra.mxu1 %v16086_v6  ;;  %v16106_v6 = vld [vmem:[#allocation36_spill] sm:$0xff] }
 0x54c   : > { %4512 = vmatpush.msra.mxu2 %v16104_v46  ;;  %4532 = vmatpush.msra.mxu3 %v16105_v45  ;;  %v3814_v46 = vmul.f32 0.01, %v3442_v48 }
 0x54d   : > { %4463 = vmatpush.msra.mxu0 %v16095_v24  ;;  %4483 = vmatpush.msra.mxu1 %v16089_v57 }
 0x54e   : > { %4513 = vmatpush.msra.mxu2 %v16096_v56  ;;  %4533 = vmatpush.msra.mxu3 %v16097_v20 }
 0x54f   : > { %4464 = vmatpush.msra.mxu0 %v16090_v27  ;;  %4484 = vmatpush.msra.mxu1 %v16091_v40 }
 0x550   : > { %4514 = vmatpush.msra.mxu2 %v16098_v33  ;;  %4534 = vmatpush.msra.mxu3 %v16106_v6  ;;  %v3838_v33 = vsel %vm3790_vm4, %v3442_v48, %v3814_v46  ;;  %v3839_v6 = vsel %vm3791_vm14, %v3462_v38, %v3815_v0  ;;  %v16108_v46 = vld [vmem:[#allocation62_spill] sm:$0xff]  ;;  %v16109_v48 = vld [vmem:[#allocation9_spill] sm:$0xff]  ;;  %v3481_v38 = vpop.f32.mrf.mxu0  ;;  %v3501_v0 = vpop.f32.mrf.mxu1 }
 0x551   : > { %4465 = vmatpush.msra.mxu0 %v16107_v29  ;;  %4485 = vmatpush.msra.mxu1 %v16093_v2 }
 0x552   : > { %4515 = vmatpush.msra.mxu2 %v16100_v12  ;;  %4535 = vmatpush.msra.mxu3 %v12427_v1 }
 0x553   : > { %4466 = vmatpush.msra.mxu0 %v12431_v53  ;;  %4486 = vmatpush.msra.mxu1 %v12448_v16 }
 0x554   : > { %4516 = vmatpush.msra.mxu2 %v12450_v9  ;;  %4536 = vmatpush.msra.mxu3 %v12466_v17 }
 0x555   : > { %4517 = vmatmul.f32.vlgmr.msra.gmra.mxu2 %v3838_v33  ;;  %4537 = vmatmul.f32.vlgmr.msra.gmra.mxu3 %v3839_v6 }
 0x556   : > { %4582 = vmatpush.msrb.mxu2 %v11939_v21  ;;  %4602 = vmatpush.msrb.mxu3 %v11941_v51 }
 0x557   : > { %4467 = vmatpush.msra.mxu0 %v12481_v3  ;;  %4487 = vmatpush.msra.mxu1 %v12486_v13 }
 0x558   : > { %4583 = vmatpush.msrb.mxu2 %v11943_v61  ;;  %4603 = vmatpush.msrb.mxu3 %v11945_v55 }
 0x559   : > { %4468 = vmatpush.msra.mxu0 %v12502_v63  ;;  %4488 = vmatpush.msra.mxu1 %v12508_v31 }
 0x55a   : > { %4584 = vmatpush.msrb.mxu2 %v11979_v14  ;;  %4604 = vmatpush.msrb.mxu3 %v12006_v43 }
 0x55b   : > { %4469 = vmatpush.msra.mxu0 %v12522_v15  ;;  %4489 = vmatpush.msra.mxu1 %v12536_v36 }
 0x55c   : > { %4585 = vmatpush.msrb.mxu2 %v12008_v49  ;;  %4605 = vmatpush.msrb.mxu3 %v12036_v7 }
 0x55d   : > { %4470 = vmatpush.msra.mxu0 %v12542_v19  ;;  %4490 = vmatpush.msra.mxu1 %v12559_v28 }
 0x55e   : > { %4586 = vmatpush.msrb.mxu2 %v12047_v58  ;;  %4606 = vmatpush.msrb.mxu3 %v12055_v52 }
 0x55f   : > { %4471 = vmatpush.msra.mxu0 %v12561_v32  ;;  %4491 = vmatpush.msra.mxu1 %v12577_v11 }
 0x560   : > { %4587 = vmatpush.msrb.mxu2 %v12096_v30  ;;  %4607 = vmatpush.msrb.mxu3 %v12098_v47 }
 0x561   : > { %4472 = vmatpush.msra.mxu0 %v12582_v62  ;;  %4492 = vmatpush.msra.mxu1 %v12599_v35 }
 0x562   : > { %4588 = vmatpush.msrb.mxu2 %v12108_v8  ;;  %4608 = vmatpush.msrb.mxu3 %v12117_v50 }
 0x563   : > { %4473 = vmatpush.msra.mxu0 %v12601_v37  ;;  %4493 = vmatpush.msra.mxu1 %v12617_v34 }
 0x564   : > { %4589 = vmatpush.msrb.mxu2 %v12136_v41  ;;  %4609 = vmatpush.msrb.mxu3 %v12138_v60  ;;  %v16110_v60 = vld [vmem:[#allocation64_spill] sm:$0xff] }
 0x565   : > { %4474 = vmatpush.msra.mxu0 %v12622_v5  ;;  %4494 = vmatpush.msra.mxu1 %v12639_v39 }
 0x566   : > { %4590 = vmatpush.msrb.mxu2 %v12165_v10  ;;  %4610 = vmatpush.msrb.mxu3 %v12177_v42  ;;  %v12872_v10 = vpop.f32.mrf.mxu2  ;;  %v12874_v42 = vpop.f32.mrf.mxu3 }
 0x567   : > { %4475 = vmatpush.msra.mxu0 %v12641_v25  ;;  %4495 = vmatpush.msra.mxu1 %v16108_v46  ;;  %16111 = vst [vmem:[#allocation30_spill] sm:$0xff] %v12872_v10  ;;  %v12892_v10 = vpop.f32.mrf.mxu1 }
 0x568   : > { %4591 = vmatpush.msrb.mxu2 %v12195_v54  ;;  %4611 = vmatpush.msrb.mxu3 %v16109_v48  ;;  %16112 = vst [vmem:[#allocation34_spill] sm:$0xff] %v12874_v42  ;;  %v16113_v48 = vld [vmem:[#allocation26_spill] sm:$0xff] }
 0x569   : > { %4476 = vmatpush.msra.mxu0 %v12662_v4  ;;  %4496 = vmatpush.msra.mxu1 %v16110_v60  ;;  %v3482_v4 = vadd.f32 %v3481_v38, %v12423_v18  ;;  %v12890_v38 = vpop.f32.mrf.mxu0  ;;  %16116 = vst [vmem:[#allocation37_spill] sm:$0xff] %v12892_v10 }
 0x56a   : > { %4477 = vmatmul.f32.vlgmr.msra.gmra.mxu0 %v3838_v33  ;;  %4497 = vmatmul.f32.vlgmr.msra.gmra.mxu1 %v3839_v6  ;;  %v16114_v33 = vld [vmem:[#allocation27_spill] sm:$0xff]  ;;  %v3502_v6 = vadd.f32 %v3501_v0, %v12423_v18  ;;  %16115 = vst [vmem:[#allocation25_spill] sm:$0xff] %v12890_v38  ;;  %v16118_v18 = vld [vmem:[#allocation36_spill] sm:$0xff] }
 0x56b   : > { %4542 = vmatpush.msrb.mxu0 %v12258_v23  ;;  %4562 = vmatpush.msrb.mxu1 %v16082_v59  ;;  %v3816_v42 = vmul.f32 0.01, %v3482_v4  ;;  %v16117_v0 = vld [vmem:[#allocation35_spill] sm:$0xff]  ;;  %vm3792_vm6 = vcmp.ge.f32.partialorder %v3482_v4, 0.0 }
 0x56c   : > { %4592 = vmatpush.msrb.mxu2 %v16101_v44  ;;  %4612 = vmatpush.msrb.mxu3 %v16102_v26  ;;  %vm3793_vm7 = vcmp.ge.f32.partialorder %v3502_v6, 0.0 }
 0x56d   : > { %4543 = vmatpush.msrb.mxu0 %v16103_v22  ;;  %4563 = vmatpush.msrb.mxu1 %v16113_v48  ;;  %v3840_v10 = vsel %vm3792_vm6, %v3482_v4, %v3816_v42 }
 0x56e   : > { %4593 = vmatpush.msrb.mxu2 %v16114_v33  ;;  %4613 = vmatpush.msrb.mxu3 %v16105_v45  ;;  %v3817_v45 = vmul.f32 0.01, %v3502_v6 }
 0x56f   : > { %4544 = vmatpush.msrb.mxu0 %v16095_v24  ;;  %4564 = vmatpush.msrb.mxu1 %v16089_v57  ;;  %v12914_v38 = vpop.f32.mrf.mxu1 }
 0x570   : > { %4594 = vmatpush.msrb.mxu2 %v16096_v56  ;;  %4614 = vmatpush.msrb.mxu3 %v16097_v20  ;;  %v12898_v56 = vpop.f32.mrf.mxu2  ;;  %v12900_v20 = vpop.f32.mrf.mxu3  ;;  %16122 = vst [vmem:[#allocation68_spill] sm:$0xff] %v12914_v38 }
 0x571   : > { %4545 = vmatpush.msrb.mxu0 %v16090_v27  ;;  %4565 = vmatpush.msrb.mxu1 %v16091_v40  ;;  %16119 = vst [vmem:[#allocation65_spill] sm:$0xff] %v12898_v56  ;;  %v3841_v56 = vsel %vm3793_vm7, %v3502_v6, %v3817_v45 }
 0x572   : > { %4595 = vmatpush.msrb.mxu2 %v16117_v0  ;;  %4615 = vmatpush.msrb.mxu3 %v16118_v18  ;;  %16120 = vst [vmem:[#allocation66_spill] sm:$0xff] %v12900_v20  ;;  %v12912_v20 = vpop.f32.mrf.mxu0 }
 0x573   : > { %4546 = vmatpush.msrb.mxu0 %v16107_v29  ;;  %4566 = vmatpush.msrb.mxu1 %v16093_v2  ;;  %16121 = vst [vmem:[#allocation67_spill] sm:$0xff] %v12912_v20  ;;  %v16132_v20 = vld [vmem:[#allocation9_spill] sm:$0xff] }
 0x574   : > { %4596 = vmatpush.msrb.mxu2 %v16100_v12  ;;  %4616 = vmatpush.msrb.mxu3 %v12427_v1 }
 0x575   : > { %4547 = vmatpush.msrb.mxu0 %v12431_v53  ;;  %4567 = vmatpush.msrb.mxu1 %v12448_v16 }
 0x576   : > { %4597 = vmatpush.msrb.mxu2 %v12450_v9  ;;  %4617 = vmatpush.msrb.mxu3 %v12466_v17 }
 0x577   : > { %4598 = vmatmul.f32.vlgmr.msrb.gmra.mxu2 %v3840_v10  ;;  %4618 = vmatmul.f32.vlgmr.msrb.gmra.mxu3 %v3841_v56  ;;  %v12938_v6 = vpop.f32.mrf.mxu1 }
 0x578   : > { %4663 = vmatpush.msra.mxu2 %v11939_v21  ;;  %4683 = vmatpush.msra.mxu3 %v11941_v51  ;;  %v12920_v42 = vpop.f32.mrf.mxu2  ;;  %v12922_v4 = vpop.f32.mrf.mxu3  ;;  %16126 = vst [vmem:[#allocation72_spill] sm:$0xff] %v12938_v6  ;;  %v16129_v6 = vld [vmem:[#allocation19_spill] sm:$0xff] }
 0x579   : > { %4548 = vmatpush.msrb.mxu0 %v12481_v3  ;;  %4568 = vmatpush.msrb.mxu1 %v12486_v13  ;;  %16123 = vst [vmem:[#allocation69_spill] sm:$0xff] %v12920_v42 }
 0x57a   : > { %4664 = vmatpush.msra.mxu2 %v11943_v61  ;;  %4684 = vmatpush.msra.mxu3 %v11945_v55  ;;  %16124 = vst [vmem:[#allocation70_spill] sm:$0xff] %v12922_v4  ;;  %v12936_v45 = vpop.f32.mrf.mxu0 }
 0x57b   : > { %4549 = vmatpush.msrb.mxu0 %v12502_v63  ;;  %4569 = vmatpush.msrb.mxu1 %v12508_v31  ;;  %16125 = vst [vmem:[#allocation71_spill] sm:$0xff] %v12936_v45 }
 0x57c   : > { %4665 = vmatpush.msra.mxu2 %v11979_v14  ;;  %4685 = vmatpush.msra.mxu3 %v12006_v43 }
 0x57d   : > { %4550 = vmatpush.msrb.mxu0 %v12522_v15  ;;  %4570 = vmatpush.msrb.mxu1 %v12536_v36 }
 0x57e   : > { %4666 = vmatpush.msra.mxu2 %v12008_v49  ;;  %4686 = vmatpush.msra.mxu3 %v12036_v7 }
 0x57f   : > { %4551 = vmatpush.msrb.mxu0 %v12542_v19  ;;  %4571 = vmatpush.msrb.mxu1 %v12559_v28 }
 0x580   : > { %4667 = vmatpush.msra.mxu2 %v12047_v58  ;;  %4687 = vmatpush.msra.mxu3 %v12055_v52  ;;  %v12944_v4 = vpop.f32.mrf.mxu2  ;;  %v12946_v42 = vpop.f32.mrf.mxu3 }
 0x581   : > { %4552 = vmatpush.msrb.mxu0 %v12561_v32  ;;  %4572 = vmatpush.msrb.mxu1 %v12577_v11  ;;  %16127 = vst [vmem:[#allocation73_spill] sm:$0xff] %v12944_v4  ;;  %v16130_v4 = vld [vmem:[#allocation2_spill] sm:$0xff] }
 0x582   : > { %4668 = vmatpush.msra.mxu2 %v12096_v30  ;;  %4688 = vmatpush.msra.mxu3 %v12098_v47  ;;  %16128 = vst [vmem:[#allocation74_spill] sm:$0xff] %v12946_v42  ;;  %v16131_v42 = vld [vmem:[#allocation8_spill] sm:$0xff]  ;;  %v4235_v45 = vpop.f32.mrf.mxu0 }
 0x583   : > { %4553 = vmatpush.msrb.mxu0 %v12582_v62  ;;  %4573 = vmatpush.msrb.mxu1 %v12599_v35 }
 0x584   : > { %4669 = vmatpush.msra.mxu2 %v12108_v8  ;;  %4689 = vmatpush.msra.mxu3 %v12117_v50  ;;  %v4255_v38 = vpop.f32.mrf.mxu1 }
 0x585   : > { %4554 = vmatpush.msrb.mxu0 %v12601_v37  ;;  %4574 = vmatpush.msrb.mxu1 %v12617_v34 }
 0x586   : > { %4670 = vmatpush.msra.mxu2 %v12136_v41  ;;  %4690 = vmatpush.msra.mxu3 %v16129_v6  ;;  %v16133_v41 = vld [vmem:[#allocation63_spill] sm:$0xff] }
 0x587   : > { %4555 = vmatpush.msrb.mxu0 %v12622_v5  ;;  %4575 = vmatpush.msrb.mxu1 %v12639_v39 }
 0x588   : > { %4671 = vmatpush.msra.mxu2 %v16130_v4  ;;  %4691 = vmatpush.msra.mxu3 %v16131_v42  ;;  %v4275_v6 = vpop.f32.mrf.mxu2  ;;  %v4295_v5 = vpop.f32.mrf.mxu3  ;;  %v4256_v42 = vadd.f32 %v4255_v38, %v4235_v45  ;;  %v16137_v45 = vld [vmem:[#allocation28_spill] sm:$0xff] }
 0x589   : > { %4556 = vmatpush.msrb.mxu0 %v12641_v25  ;;  %4576 = vmatpush.msrb.mxu1 %v16108_v46 }
 0x58a   : > { %4672 = vmatpush.msra.mxu2 %v12195_v54  ;;  %4692 = vmatpush.msra.mxu3 %v16132_v20  ;;  %v4296_v54 = vadd.f32 %v4295_v5, %v4275_v6  ;;  %v16138_v5 = vld [vmem:[#allocation31_spill] sm:$0xff]  ;;  %v16139_v6 = vld [vmem:[#allocation32_spill] sm:$0xff] }
 0x58b   : > { %4557 = vmatpush.msrb.mxu0 %v16133_v41  ;;  %4577 = vmatpush.msrb.mxu1 %v16110_v60  ;;  %v16134_v41 = vld [vmem:[#allocation39_spill] sm:$0xff]  ;;  %v16135_v60 = vld [vmem:[#allocation30_spill] sm:$0xff] }
 0x58c   : > { %4558 = vmatmul.f32.vlgmr.msrb.gmra.mxu0 %v3840_v10  ;;  %4578 = vmatmul.f32.vlgmr.msrb.gmra.mxu1 %v3841_v56  ;;  %v3522_v10 = vadd.f32 %v16135_v60, %v16134_v41  ;;  %v16136_v56 = vld [vmem:[#allocation34_spill] sm:$0xff]  ;;  %v4298_v38 = vmax.f32 %v4256_v42, %v4296_v54 }
 0x58d   : > { %4623 = vmatpush.msra.mxu0 %v12258_v23  ;;  %4643 = vmatpush.msra.mxu1 %v16082_v59  ;;  %v3542_v23 = vadd.f32 %v16136_v56, %v16134_v41  ;;  %v16143_v56 = vld [vmem:[#allocation8_spill] sm:$0xff] }
 0x58e   : > { %4673 = vmatpush.msra.mxu2 %v16101_v44  ;;  %4693 = vmatpush.msra.mxu3 %v16102_v26  ;;  %v3818_v60 = vmul.f32 0.01, %v3522_v10  ;;  %vm3794_vm13 = vcmp.ge.f32.partialorder %v3522_v10, 0.0 }
 0x58f   : > { %4624 = vmatpush.msra.mxu0 %v16103_v22  ;;  %4644 = vmatpush.msra.mxu1 %v16113_v48  ;;  %vm3795_vm3 = vcmp.ge.f32.partialorder %v3542_v23, 0.0 }
 0x590   : > { %4674 = vmatpush.msra.mxu2 %v16114_v33  ;;  %4694 = vmatpush.msra.mxu3 %v16137_v45  ;;  %v3819_v33 = vmul.f32 0.01, %v3542_v23  ;;  %v3842_v54 = vsel %vm3794_vm13, %v3522_v10, %v3818_v60  ;;  %v16142_v10 = vld [vmem:[#allocation59_spill] sm:$0xff] }
 0x591   : > { %4625 = vmatpush.msra.mxu0 %v16095_v24  ;;  %4645 = vmatpush.msra.mxu1 %v16089_v57 }
 0x592   : > { %4675 = vmatpush.msra.mxu2 %v16138_v5  ;;  %4695 = vmatpush.msra.mxu3 %v16139_v6  ;;  %v3843_v42 = vsel %vm3795_vm3, %v3542_v23, %v3819_v33  ;;  %v16140_v23 = vld [vmem:[#allocation18_spill] sm:$0xff]  ;;  %v16141_v33 = vld [vmem:[#allocation19_spill] sm:$0xff] }
 0x593   : > { %4626 = vmatpush.msra.mxu0 %v16090_v27  ;;  %4646 = vmatpush.msra.mxu1 %v16091_v40 }
 0x594   : > { %4676 = vmatpush.msra.mxu2 %v16117_v0  ;;  %4696 = vmatpush.msra.mxu3 %v16118_v18 }
 0x595   : > { %5202 = vrot.lane.b32.xlu0 %v4298_v38, %s9002_s23  ;;  %4627 = vmatpush.msra.mxu0 %v16107_v29  ;;  %v16144_v38 = vld [vmem:[#allocation16_spill] sm:$0xff] }
 0x596   : > { %4647 = vmatpush.msra.mxu1 %v16093_v2  ;;  %4677 = vmatpush.msra.mxu2 %v16100_v12 }
 0x597   : > { %4697 = vmatpush.msra.mxu3 %v12427_v1  ;;  %4628 = vmatpush.msra.mxu0 %v12431_v53 }
 0x598   : > { %4648 = vmatpush.msra.mxu1 %v12448_v16  ;;  %4678 = vmatpush.msra.mxu2 %v12450_v9 }
 0x599   : > { %4698 = vmatpush.msra.mxu3 %v12466_v17  ;;  %4679 = vmatmul.f32.vlgmr.msra.gmra.mxu2 %v3842_v54 }
 0x59a   : > { %4699 = vmatmul.f32.vlgmr.msra.gmra.mxu3 %v3843_v42  ;;  %4744 = vmatpush.msrb.mxu2 %v11939_v21 }
 0x59b   : > { %4764 = vmatpush.msrb.mxu3 %v11941_v51  ;;  %4629 = vmatpush.msra.mxu0 %v12481_v3 }
 0x59c   : > { %4649 = vmatpush.msra.mxu1 %v12486_v13  ;;  %4745 = vmatpush.msrb.mxu2 %v11943_v61 }
 0x59d   : > { %4765 = vmatpush.msrb.mxu3 %v11945_v55  ;;  %4630 = vmatpush.msra.mxu0 %v12502_v63 }
 0x59e   : > { %4650 = vmatpush.msra.mxu1 %v12508_v31  ;;  %4746 = vmatpush.msrb.mxu2 %v11979_v14 }
 0x59f   : > { %4766 = vmatpush.msrb.mxu3 %v12006_v43  ;;  %4631 = vmatpush.msra.mxu0 %v12522_v15 }
 0x5a0   : > { %4651 = vmatpush.msra.mxu1 %v12536_v36  ;;  %4747 = vmatpush.msrb.mxu2 %v12008_v49 }
 0x5a1   : > { %4767 = vmatpush.msrb.mxu3 %v12036_v7  ;;  %4632 = vmatpush.msra.mxu0 %v12542_v19 }
 0x5a2   : > { %4652 = vmatpush.msra.mxu1 %v12559_v28  ;;  %4748 = vmatpush.msrb.mxu2 %v12047_v58 }
 0x5a3   : > { %4768 = vmatpush.msrb.mxu3 %v12055_v52  ;;  %4633 = vmatpush.msra.mxu0 %v12561_v32  ;;  %v4316_v60 = vpop.f32.mrf.mxu0 }
 0x5a4   : > { %4653 = vmatpush.msra.mxu1 %v12577_v11  ;;  %4749 = vmatpush.msrb.mxu2 %v12096_v30 }
 0x5a5   : > { %4769 = vmatpush.msrb.mxu3 %v12098_v47  ;;  %4634 = vmatpush.msra.mxu0 %v12582_v62 }
 0x5a6   : > { %4654 = vmatpush.msra.mxu1 %v12599_v35  ;;  %4750 = vmatpush.msrb.mxu2 %v12108_v8 }
 0x5a7   : > { %4770 = vmatpush.msrb.mxu3 %v12117_v50  ;;  %4635 = vmatpush.msra.mxu0 %v12601_v37 }
 0x5a8   : > { %4655 = vmatpush.msra.mxu1 %v12617_v34  ;;  %4751 = vmatpush.msrb.mxu2 %v16140_v23  ;;  %v4336_v23 = vpop.f32.mrf.mxu1  ;;  %v16145_v34 = vld [vmem:[#allocation63_spill] sm:$0xff] }
 0x5a9   : > { %4771 = vmatpush.msrb.mxu3 %v16141_v33  ;;  %4636 = vmatpush.msra.mxu0 %v16142_v10  ;;  %v16146_v33 = vld [vmem:[#allocation64_spill] sm:$0xff]  ;;  %v4356_v10 = vpop.f32.mrf.mxu2 }
 0x5aa   : > { %4656 = vmatpush.msra.mxu1 %v12639_v39  ;;  %4752 = vmatpush.msrb.mxu2 %v16130_v4  ;;  %v4376_v39 = vpop.f32.mrf.mxu3  ;;  %v16147_v4 = vld [vmem:[#allocation22_spill] sm:$0xff] }
 0x5ab   : > { %4772 = vmatpush.msrb.mxu3 %v16143_v56  ;;  %4637 = vmatpush.msra.mxu0 %v12641_v25  ;;  %v4337_v25 = vadd.f32 %v4336_v23, %v4316_v60  ;;  %v16153_v60 = vld [vmem:[#allocation19_spill] sm:$0xff] }
 0x5ac   : > { %4657 = vmatpush.msra.mxu1 %v16108_v46  ;;  %4753 = vmatpush.msrb.mxu2 %v16144_v38  ;;  %v16149_v38 = vld [vmem:[#allocation27_spill] sm:$0xff] }
 0x5ad   : > { %4773 = vmatpush.msrb.mxu3 %v16132_v20  ;;  %4638 = vmatpush.msra.mxu0 %v16145_v34  ;;  %v4377_v20 = vadd.f32 %v4376_v39, %v4356_v10  ;;  %v16152_v10 = vld [vmem:[#allocation18_spill] sm:$0xff] }
 0x5ae   : > { %4658 = vmatpush.msra.mxu1 %v16146_v33  ;;  %4639 = vmatmul.f32.vlgmr.msra.gmra.mxu0 %v3842_v54  ;;  %v16148_v33 = vld [vmem:[#allocation25_spill] sm:$0xff] }
 0x5af   : > { %4659 = vmatmul.f32.vlgmr.msra.gmra.mxu1 %v3843_v42  ;;  %4704 = vmatpush.msrb.mxu0 %v16147_v4  ;;  %v3562_v34 = vadd.f32 %v16148_v33, %v16134_v41  ;;  %v16150_v54 = vld [vmem:[#allocation37_spill] sm:$0xff]  ;;  %v4379_v23 = vmax.f32 %v4337_v25, %v4377_v20 }
 0x5b0   : > { %4724 = vmatpush.msrb.mxu1 %v16082_v59  ;;  %4754 = vmatpush.msrb.mxu2 %v16101_v44  ;;  %v3582_v42 = vadd.f32 %v16150_v54, %v16134_v41  ;;  %v16154_v54 = vld [vmem:[#allocation59_spill] sm:$0xff] }
 0x5b1   : > { %4774 = vmatpush.msrb.mxu3 %v16102_v26  ;;  %4705 = vmatpush.msrb.mxu0 %v16103_v22  ;;  %v3820_v39 = vmul.f32 0.01, %v3562_v34  ;;  %vm3796_vm10 = vcmp.ge.f32.partialorder %v3562_v34, 0.0 }
 0x5b2   : > { %4725 = vmatpush.msrb.mxu1 %v16113_v48  ;;  %4755 = vmatpush.msrb.mxu2 %v16149_v38  ;;  %v3821_v33 = vmul.f32 0.01, %v3582_v42  ;;  %vm3797_vm0 = vcmp.ge.f32.partialorder %v3582_v42, 0.0 }
 0x5b3   : > { %4775 = vmatpush.msrb.mxu3 %v16137_v45  ;;  %4706 = vmatpush.msrb.mxu0 %v16095_v24  ;;  %v3844_v20 = vsel %vm3796_vm10, %v3562_v34, %v3820_v39  ;;  %v16151_v34 = vld [vmem:[#allocation58_spill] sm:$0xff]  ;;  %v16157_v39 = vld [vmem:[#allocation61_spill] sm:$0xff] }
 0x5b4   : > { %4726 = vmatpush.msrb.mxu1 %v16089_v57  ;;  %4756 = vmatpush.msrb.mxu2 %v16138_v5  ;;  %v3845_v25 = vsel %vm3797_vm0, %v3582_v42, %v3821_v33  ;;  %v16155_v42 = vld [vmem:[#allocation60_spill] sm:$0xff] }
 0x5b5   : > { %4776 = vmatpush.msrb.mxu3 %v16139_v6  ;;  %4707 = vmatpush.msrb.mxu0 %v16090_v27  ;;  %v16158_v33 = vld [vmem:[#allocation16_spill] sm:$0xff] }
 0x5b6   : > { %4727 = vmatpush.msrb.mxu1 %v16091_v40  ;;  %4757 = vmatpush.msrb.mxu2 %v16117_v0 }
 0x5b7   : > { %4777 = vmatpush.msrb.mxu3 %v16118_v18  ;;  %5204 = vrot.lane.b32.xlu1 %v4379_v23, %s9002_s23  ;;  %v16156_v23 = vld [vmem:[#allocation2_spill] sm:$0xff] }
 0x5b8   : > { %4708 = vmatpush.msrb.mxu0 %v16107_v29  ;;  %4728 = vmatpush.msrb.mxu1 %v16093_v2 }
 0x5b9   : > { %4758 = vmatpush.msrb.mxu2 %v16100_v12  ;;  %4778 = vmatpush.msrb.mxu3 %v12427_v1 }
 0x5ba   : > { %4709 = vmatpush.msrb.mxu0 %v12431_v53  ;;  %4729 = vmatpush.msrb.mxu1 %v12448_v16 }
 0x5bb   : > { %4759 = vmatpush.msrb.mxu2 %v12450_v9  ;;  %4779 = vmatpush.msrb.mxu3 %v12466_v17 }
 0x5bc   : > { %4760 = vmatmul.f32.vlgmr.msrb.gmra.mxu2 %v3844_v20  ;;  %4780 = vmatmul.f32.vlgmr.msrb.gmra.mxu3 %v3845_v25 }
 0x5bd   : > { %4825 = vmatpush.msra.mxu2 %v11939_v21  ;;  %4845 = vmatpush.msra.mxu3 %v11941_v51 }
 0x5be   : > { %4710 = vmatpush.msrb.mxu0 %v12481_v3  ;;  %4730 = vmatpush.msrb.mxu1 %v12486_v13 }
 0x5bf   : > { %4826 = vmatpush.msra.mxu2 %v11943_v61  ;;  %4846 = vmatpush.msra.mxu3 %v11945_v55 }
 0x5c0   : > { %4711 = vmatpush.msrb.mxu0 %v12502_v63  ;;  %4731 = vmatpush.msrb.mxu1 %v12508_v31 }
 0x5c1   : > { %4827 = vmatpush.msra.mxu2 %v11979_v14  ;;  %4847 = vmatpush.msra.mxu3 %v12006_v43 }
 0x5c2   : > { %4712 = vmatpush.msrb.mxu0 %v12522_v15  ;;  %4732 = vmatpush.msrb.mxu1 %v12536_v36 }
 0x5c3   : > { %4828 = vmatpush.msra.mxu2 %v12008_v49  ;;  %4848 = vmatpush.msra.mxu3 %v12036_v7 }
 0x5c4   : > { %4713 = vmatpush.msrb.mxu0 %v12542_v19  ;;  %4733 = vmatpush.msrb.mxu1 %v12559_v28 }
 0x5c5   : > { %4829 = vmatpush.msra.mxu2 %v12047_v58  ;;  %4849 = vmatpush.msra.mxu3 %v12055_v52 }
 0x5c6   : > { %4714 = vmatpush.msrb.mxu0 %v12561_v32  ;;  %4734 = vmatpush.msrb.mxu1 %v12577_v11 }
 0x5c7   : > { %4830 = vmatpush.msra.mxu2 %v12096_v30  ;;  %4850 = vmatpush.msra.mxu3 %v12098_v47 }
 0x5c8   : > { %4715 = vmatpush.msrb.mxu0 %v12582_v62  ;;  %4735 = vmatpush.msrb.mxu1 %v12599_v35 }
 0x5c9   : > { %4831 = vmatpush.msra.mxu2 %v12108_v8  ;;  %4851 = vmatpush.msra.mxu3 %v12117_v50  ;;  %v16159_v50 = vld [vmem:[#allocation9_spill] sm:$0xff]  ;;  %v16161_v8 = vld [vmem:[#allocation64_spill] sm:$0xff] }
 0x5ca   : > { %4716 = vmatpush.msrb.mxu0 %v12601_v37  ;;  %4736 = vmatpush.msrb.mxu1 %v16151_v34  ;;  %v4397_v37 = vpop.f32.mrf.mxu0  ;;  %v4417_v34 = vpop.f32.mrf.mxu1 }
 0x5cb   : > { %4832 = vmatpush.msra.mxu2 %v16152_v10  ;;  %4852 = vmatpush.msra.mxu3 %v16153_v60  ;;  %v16160_v10 = vld [vmem:[#allocation63_spill] sm:$0xff]  ;;  %v4437_v60 = vpop.f32.mrf.mxu2 }
 0x5cc   : > { %4717 = vmatpush.msrb.mxu0 %v16154_v54  ;;  %4737 = vmatpush.msrb.mxu1 %v16155_v42  ;;  %v4457_v54 = vpop.f32.mrf.mxu3 }
 0x5cd   : > { %4833 = vmatpush.msra.mxu2 %v16156_v23  ;;  %4853 = vmatpush.msra.mxu3 %v16143_v56  ;;  %v4418_v56 = vadd.f32 %v4417_v34, %v4397_v37 }
 0x5ce   : > { %4718 = vmatpush.msrb.mxu0 %v16157_v39  ;;  %4738 = vmatpush.msrb.mxu1 %v16108_v46 }
 0x5cf   : > { %4834 = vmatpush.msra.mxu2 %v16158_v33  ;;  %4854 = vmatpush.msra.mxu3 %v16159_v50  ;;  %v4458_v33 = vadd.f32 %v4457_v54, %v4437_v60  ;;  %v16165_v54 = vld [vmem:[#allocation15_spill] sm:$0xff] }
 0x5d0   : > { %4719 = vmatpush.msrb.mxu0 %v16160_v10  ;;  %4739 = vmatpush.msrb.mxu1 %v16161_v8  ;;  %v16162_v8 = vld [vmem:[#allocation65_spill] sm:$0xff] }
 0x5d1   : > { %4720 = vmatmul.f32.vlgmr.msrb.gmra.mxu0 %v3844_v20  ;;  %4740 = vmatmul.f32.vlgmr.msrb.gmra.mxu1 %v3845_v25  ;;  %v3602_v20 = vadd.f32 %v16162_v8, %v16134_v41  ;;  %v16163_v25 = vld [vmem:[#allocation66_spill] sm:$0xff]  ;;  %v4460_v37 = vmax.f32 %v4418_v56, %v4458_v33  ;;  %v16166_v33 = vld [vmem:[#allocation57_spill] sm:$0xff] }
 0x5d2   : > { %4785 = vmatpush.msra.mxu0 %v16147_v4  ;;  %4805 = vmatpush.msra.mxu1 %v16082_v59  ;;  %v3622_v4 = vadd.f32 %v16163_v25, %v16134_v41  ;;  %v16168_v25 = vld [vmem:[#allocation18_spill] sm:$0xff] }
 0x5d3   : > { %4835 = vmatpush.msra.mxu2 %v16101_v44  ;;  %4855 = vmatpush.msra.mxu3 %v16102_v26  ;;  %v3822_v8 = vmul.f32 0.01, %v3602_v20  ;;  %vm3798_vm4 = vcmp.ge.f32.partialorder %v3602_v20, 0.0 }
 0x5d4   : > { %4786 = vmatpush.msra.mxu0 %v16103_v22  ;;  %4806 = vmatpush.msra.mxu1 %v16113_v48  ;;  %v3823_v34 = vmul.f32 0.01, %v3622_v4  ;;  %vm3799_vm14 = vcmp.ge.f32.partialorder %v3622_v4, 0.0 }
 0x5d5   : > { %4836 = vmatpush.msra.mxu2 %v16149_v38  ;;  %4856 = vmatpush.msra.mxu3 %v16137_v45  ;;  %v3846_v56 = vsel %vm3798_vm4, %v3602_v20, %v3822_v8  ;;  %v16167_v20 = vld [vmem:[#allocation58_spill] sm:$0xff]  ;;  %v16170_v8 = vld [vmem:[#allocation59_spill] sm:$0xff]  ;;  %vm16203_vm4 = vcmask 31744  }
 0x5d6   : > { %4787 = vmatpush.msra.mxu0 %v16095_v24  ;;  %4807 = vmatpush.msra.mxu1 %v16089_v57  ;;  %v3847_v60 = vsel %vm3799_vm14, %v3622_v4, %v3823_v34  ;;  %v16164_v4 = vld [vmem:[#allocation11_spill] sm:$0xff]  ;;  %v16171_v34 = vld [vmem:[#allocation8_spill] sm:$0xff]  ;;  %vm16204_vm14 = vmmov %vm16203_vm4 }
 0x5d7   : > { %4837 = vmatpush.msra.mxu2 %v16138_v5  ;;  %4857 = vmatpush.msra.mxu3 %v16139_v6 }
 0x5d8   : > { %4788 = vmatpush.msra.mxu0 %v16090_v27  ;;  %4808 = vmatpush.msra.mxu1 %v16091_v40 }
 0x5d9   : > { %4838 = vmatpush.msra.mxu2 %v16117_v0  ;;  %4858 = vmatpush.msra.mxu3 %v16118_v18 }
 0x5da   : > { %5206 = vrot.lane.b32.xlu2 %v4460_v37, %s9002_s23  ;;  %4789 = vmatpush.msra.mxu0 %v16107_v29  ;;  %v16169_v37 = vld [vmem:[#allocation19_spill] sm:$0xff] }
 0x5db   : > { %4809 = vmatpush.msra.mxu1 %v16093_v2  ;;  %4839 = vmatpush.msra.mxu2 %v16100_v12 }
 0x5dc   : > { %4859 = vmatpush.msra.mxu3 %v12427_v1  ;;  %4790 = vmatpush.msra.mxu0 %v12431_v53 }
 0x5dd   : > { %4810 = vmatpush.msra.mxu1 %v12448_v16  ;;  %4840 = vmatpush.msra.mxu2 %v12450_v9 }
 0x5de   : > { %4860 = vmatpush.msra.mxu3 %v12466_v17  ;;  %4841 = vmatmul.f32.vlgmr.msra.gmra.mxu2 %v3846_v56 }
 0x5df   : > { %4861 = vmatmul.f32.vlgmr.msra.gmra.mxu3 %v3847_v60  ;;  %4906 = vmatpush.msrb.mxu2 %v11939_v21 }
 0x5e0   : > { %4926 = vmatpush.msrb.mxu3 %v11941_v51  ;;  %4791 = vmatpush.msra.mxu0 %v12481_v3 }
 0x5e1   : > { %4811 = vmatpush.msra.mxu1 %v12486_v13  ;;  %4907 = vmatpush.msrb.mxu2 %v11943_v61 }
 0x5e2   : > { %4927 = vmatpush.msrb.mxu3 %v11945_v55  ;;  %4792 = vmatpush.msra.mxu0 %v12502_v63 }
 0x5e3   : > { %4812 = vmatpush.msra.mxu1 %v12508_v31  ;;  %4908 = vmatpush.msrb.mxu2 %v11979_v14 }
 0x5e4   : > { %4928 = vmatpush.msrb.mxu3 %v12006_v43  ;;  %4793 = vmatpush.msra.mxu0 %v12522_v15 }
 0x5e5   : > { %4813 = vmatpush.msra.mxu1 %v12536_v36  ;;  %4909 = vmatpush.msrb.mxu2 %v12008_v49 }
 0x5e6   : > { %4929 = vmatpush.msrb.mxu3 %v12036_v7  ;;  %4794 = vmatpush.msra.mxu0 %v12542_v19 }
 0x5e7   : > { %4814 = vmatpush.msra.mxu1 %v12559_v28  ;;  %4910 = vmatpush.msrb.mxu2 %v12047_v58 }
 0x5e8   : > { %4930 = vmatpush.msrb.mxu3 %v12055_v52  ;;  %4795 = vmatpush.msra.mxu0 %v12561_v32 }
 0x5e9   : > { %4815 = vmatpush.msra.mxu1 %v12577_v11  ;;  %4911 = vmatpush.msrb.mxu2 %v12096_v30 }
 0x5ea   : > { %4931 = vmatpush.msrb.mxu3 %v12098_v47  ;;  %4796 = vmatpush.msra.mxu0 %v12582_v62 }
 0x5eb   : > { %4816 = vmatpush.msra.mxu1 %v12599_v35  ;;  %4912 = vmatpush.msrb.mxu2 %v16164_v4 }
 0x5ec   : > { %4932 = vmatpush.msrb.mxu3 %v16165_v54  ;;  %4797 = vmatpush.msra.mxu0 %v16166_v33  ;;  %v16172_v54 = vld [vmem:[#allocation16_spill] sm:$0xff] }
 0x5ed   : > { %4817 = vmatpush.msra.mxu1 %v16167_v20  ;;  %4913 = vmatpush.msrb.mxu2 %v16168_v25  ;;  %v4478_v20 = vpop.f32.mrf.mxu0  ;;  %v4498_v25 = vpop.f32.mrf.mxu1 }
 0x5ee   : > { %4933 = vmatpush.msrb.mxu3 %v16169_v37  ;;  %4798 = vmatpush.msra.mxu0 %v16170_v8  ;;  %v16173_v37 = vld [vmem:[#allocation64_spill] sm:$0xff]  ;;  %v4518_v8 = vpop.f32.mrf.mxu2 }
 0x5ef   : > { %4818 = vmatpush.msra.mxu1 %v16155_v42  ;;  %4914 = vmatpush.msrb.mxu2 %v16156_v23  ;;  %v4538_v42 = vpop.f32.mrf.mxu3  ;;  %v16174_v23 = vld [vmem:[#allocation22_spill] sm:$0xff] }
 0x5f0   : > { %4934 = vmatpush.msrb.mxu3 %v16171_v34  ;;  %4799 = vmatpush.msra.mxu0 %v16157_v39  ;;  %v4499_v39 = vadd.f32 %v4498_v25, %v4478_v20 }
 0x5f1   : > { %4819 = vmatpush.msra.mxu1 %v16108_v46  ;;  %4915 = vmatpush.msrb.mxu2 %v16172_v54 }
 0x5f2   : > { %4935 = vmatpush.msrb.mxu3 %v16159_v50  ;;  %4800 = vmatpush.msra.mxu0 %v16160_v10  ;;  %v4539_v50 = vadd.f32 %v4538_v42, %v4518_v8  ;;  %v16179_v8 = vld [vmem:[#allocation18_spill] sm:$0xff] }
 0x5f3   : > { %4820 = vmatpush.msra.mxu1 %v16173_v37  ;;  %4801 = vmatmul.f32.vlgmr.msra.gmra.mxu0 %v3846_v56  ;;  %v16175_v37 = vld [vmem:[#allocation67_spill] sm:$0xff]  ;;  %v16176_v56 = vld [vmem:[#allocation68_spill] sm:$0xff] }
 0x5f4   : > { %4821 = vmatmul.f32.vlgmr.msra.gmra.mxu1 %v3847_v60  ;;  %4866 = vmatpush.msrb.mxu0 %v16174_v23  ;;  %v3642_v10 = vadd.f32 %v16175_v37, %v16134_v41  ;;  %v3662_v60 = vadd.f32 %v16176_v56, %v16134_v41  ;;  %v4541_v20 = vmax.f32 %v4499_v39, %v4539_v50  ;;  %v16178_v37 = vld [vmem:[#allocation58_spill] sm:$0xff]  ;;  %v16180_v56 = vld [vmem:[#allocation19_spill] sm:$0xff] }
 0x5f5   : > { %4886 = vmatpush.msrb.mxu1 %v16082_v59  ;;  %4916 = vmatpush.msrb.mxu2 %v16101_v44 }
 0x5f6   : > { %4936 = vmatpush.msrb.mxu3 %v16102_v26  ;;  %4867 = vmatpush.msrb.mxu0 %v16103_v22  ;;  %v3824_v42 = vmul.f32 0.01, %v3642_v10  ;;  %v3825_v25 = vmul.f32 0.01, %v3662_v60  ;;  %vm3800_vm6 = vcmp.ge.f32.partialorder %v3642_v10, 0.0  ;;  %vm3801_vm7 = vcmp.ge.f32.partialorder %v3662_v60, 0.0 }
 0x5f7   : > { %4887 = vmatpush.msrb.mxu1 %v16113_v48  ;;  %4917 = vmatpush.msrb.mxu2 %v16149_v38 }
 0x5f8   : > { %4937 = vmatpush.msrb.mxu3 %v16137_v45  ;;  %4868 = vmatpush.msrb.mxu0 %v16095_v24  ;;  %v3848_v50 = vsel %vm3800_vm6, %v3642_v10, %v3824_v42  ;;  %v3849_v39 = vsel %vm3801_vm7, %v3662_v60, %v3825_v25  ;;  %v16177_v10 = vld [vmem:[#allocation15_spill] sm:$0xff]  ;;  %v16183_v42 = vld [vmem:[#allocation2_spill] sm:$0xff]  ;;  %v16184_v25 = vld [vmem:[#allocation61_spill] sm:$0xff] }
 0x5f9   : > { %4888 = vmatpush.msrb.mxu1 %v16089_v57  ;;  %4918 = vmatpush.msrb.mxu2 %v16138_v5  ;;  %v16181_v60 = vld [vmem:[#allocation59_spill] sm:$0xff] }
 0x5fa   : > { %4938 = vmatpush.msrb.mxu3 %v16139_v6  ;;  %4869 = vmatpush.msrb.mxu0 %v16090_v27 }
 0x5fb   : > { %4889 = vmatpush.msrb.mxu1 %v16091_v40  ;;  %4919 = vmatpush.msrb.mxu2 %v16117_v0 }
 0x5fc   : > { %4939 = vmatpush.msrb.mxu3 %v16118_v18  ;;  %5208 = vrot.lane.b32.xlu0 %v4541_v20, %s9002_s23  ;;  %v16182_v20 = vld [vmem:[#allocation60_spill] sm:$0xff] }
 0x5fd   : > { %4870 = vmatpush.msrb.mxu0 %v16107_v29  ;;  %4890 = vmatpush.msrb.mxu1 %v16093_v2 }
 0x5fe   : > { %4920 = vmatpush.msrb.mxu2 %v16100_v12  ;;  %4940 = vmatpush.msrb.mxu3 %v12427_v1 }
 0x5ff   : > { %4871 = vmatpush.msrb.mxu0 %v12431_v53  ;;  %4891 = vmatpush.msrb.mxu1 %v12448_v16 }
 0x600   : > { %4921 = vmatpush.msrb.mxu2 %v12450_v9  ;;  %4941 = vmatpush.msrb.mxu3 %v12466_v17 }
 0x601   : > { %4922 = vmatmul.f32.vlgmr.msrb.gmra.mxu2 %v3848_v50  ;;  %4942 = vmatmul.f32.vlgmr.msrb.gmra.mxu3 %v3849_v39 }
 0x602   : > { %4987 = vmatpush.msra.mxu2 %v11939_v21  ;;  %5007 = vmatpush.msra.mxu3 %v11941_v51 }
 0x603   : > { %4872 = vmatpush.msrb.mxu0 %v12481_v3  ;;  %4892 = vmatpush.msrb.mxu1 %v12486_v13 }
 0x604   : > { %4988 = vmatpush.msra.mxu2 %v11943_v61  ;;  %5008 = vmatpush.msra.mxu3 %v11945_v55 }
 0x605   : > { %4873 = vmatpush.msrb.mxu0 %v12502_v63  ;;  %4893 = vmatpush.msrb.mxu1 %v12508_v31 }
 0x606   : > { %4989 = vmatpush.msra.mxu2 %v11979_v14  ;;  %5009 = vmatpush.msra.mxu3 %v12006_v43 }
 0x607   : > { %4874 = vmatpush.msrb.mxu0 %v12522_v15  ;;  %4894 = vmatpush.msrb.mxu1 %v12536_v36 }
 0x608   : > { %4990 = vmatpush.msra.mxu2 %v12008_v49  ;;  %5010 = vmatpush.msra.mxu3 %v12036_v7 }
 0x609   : > { %4875 = vmatpush.msrb.mxu0 %v12542_v19  ;;  %4895 = vmatpush.msrb.mxu1 %v12559_v28 }
 0x60a   : > { %4991 = vmatpush.msra.mxu2 %v12047_v58  ;;  %5011 = vmatpush.msra.mxu3 %v12055_v52 }
 0x60b   : > { %4876 = vmatpush.msrb.mxu0 %v12561_v32  ;;  %4896 = vmatpush.msrb.mxu1 %v12577_v11 }
 0x60c   : > { %4992 = vmatpush.msra.mxu2 %v12096_v30  ;;  %5012 = vmatpush.msra.mxu3 %v12098_v47 }
 0x60d   : > { %4877 = vmatpush.msrb.mxu0 %v12582_v62  ;;  %4897 = vmatpush.msrb.mxu1 %v12599_v35 }
 0x60e   : > { %4993 = vmatpush.msra.mxu2 %v16164_v4  ;;  %5013 = vmatpush.msra.mxu3 %v16177_v10  ;;  %v16185_v10 = vld [vmem:[#allocation9_spill] sm:$0xff]  ;;  %v16187_v4 = vld [vmem:[#allocation64_spill] sm:$0xff] }
 0x60f   : > { %4878 = vmatpush.msrb.mxu0 %v16166_v33  ;;  %4898 = vmatpush.msrb.mxu1 %v16178_v37  ;;  %v4559_v33 = vpop.f32.mrf.mxu0  ;;  %v4579_v37 = vpop.f32.mrf.mxu1 }
 0x610   : > { %4994 = vmatpush.msra.mxu2 %v16179_v8  ;;  %5014 = vmatpush.msra.mxu3 %v16180_v56  ;;  %v16186_v8 = vld [vmem:[#allocation63_spill] sm:$0xff]  ;;  %v4599_v56 = vpop.f32.mrf.mxu2 }
 0x611   : > { %4879 = vmatpush.msrb.mxu0 %v16181_v60  ;;  %4899 = vmatpush.msrb.mxu1 %v16182_v20  ;;  %v4619_v60 = vpop.f32.mrf.mxu3 }
 0x612   : > { %4995 = vmatpush.msra.mxu2 %v16183_v42  ;;  %5015 = vmatpush.msra.mxu3 %v16171_v34  ;;  %v4580_v34 = vadd.f32 %v4579_v37, %v4559_v33 }
 0x613   : > { %4880 = vmatpush.msrb.mxu0 %v16184_v25  ;;  %4900 = vmatpush.msrb.mxu1 %v16108_v46 }
 0x614   : > { %4996 = vmatpush.msra.mxu2 %v16172_v54  ;;  %5016 = vmatpush.msra.mxu3 %v16185_v10  ;;  %v4620_v54 = vadd.f32 %v4619_v60, %v4599_v56  ;;  %v16191_v56 = vld [vmem:[#allocation15_spill] sm:$0xff]  ;;  %v16192_v60 = vld [vmem:[#allocation57_spill] sm:$0xff] }
 0x615   : > { %4881 = vmatpush.msrb.mxu0 %v16186_v8  ;;  %4901 = vmatpush.msrb.mxu1 %v16187_v4  ;;  %v16188_v4 = vld [vmem:[#allocation69_spill] sm:$0xff] }
 0x616   : > { %4882 = vmatmul.f32.vlgmr.msrb.gmra.mxu0 %v3848_v50  ;;  %4902 = vmatmul.f32.vlgmr.msrb.gmra.mxu1 %v3849_v39  ;;  %v3682_v50 = vadd.f32 %v16188_v4, %v16134_v41  ;;  %v16189_v39 = vld [vmem:[#allocation70_spill] sm:$0xff]  ;;  %v4622_v33 = vmax.f32 %v4580_v34, %v4620_v54 }
 0x617   : > { %4947 = vmatpush.msra.mxu0 %v16174_v23  ;;  %4967 = vmatpush.msra.mxu1 %v16082_v59  ;;  %v3702_v23 = vadd.f32 %v16189_v39, %v16134_v41  ;;  %v16194_v39 = vld [vmem:[#allocation18_spill] sm:$0xff] }
 0x618   : > { %4997 = vmatpush.msra.mxu2 %v16101_v44  ;;  %5017 = vmatpush.msra.mxu3 %v16102_v26  ;;  %v3826_v4 = vmul.f32 0.01, %v3682_v50  ;;  %vm3802_vm13 = vcmp.ge.f32.partialorder %v3682_v50, 0.0 }
 0x619   : > { %4948 = vmatpush.msra.mxu0 %v16103_v22  ;;  %4968 = vmatpush.msra.mxu1 %v16113_v48  ;;  %v3827_v37 = vmul.f32 0.01, %v3702_v23  ;;  %vm3803_vm3 = vcmp.ge.f32.partialorder %v3702_v23, 0.0 }
 0x61a   : > { %4998 = vmatpush.msra.mxu2 %v16149_v38  ;;  %5018 = vmatpush.msra.mxu3 %v16137_v45  ;;  %v3850_v54 = vsel %vm3802_vm13, %v3682_v50, %v3826_v4  ;;  %v16193_v50 = vld [vmem:[#allocation58_spill] sm:$0xff]  ;;  %v16196_v4 = vld [vmem:[#allocation59_spill] sm:$0xff]  ;;  %vm16218_vm13 = vmmov %vm16203_vm4 }
 0x61b   : > { %4949 = vmatpush.msra.mxu0 %v16095_v24  ;;  %4969 = vmatpush.msra.mxu1 %v16089_v57  ;;  %v3851_v34 = vsel %vm3803_vm3, %v3702_v23, %v3827_v37  ;;  %v16190_v23 = vld [vmem:[#allocation11_spill] sm:$0xff]  ;;  %v16197_v37 = vld [vmem:[#allocation8_spill] sm:$0xff]  ;;  %vm16219_vm3 = vmmov %vm16203_vm4 }
 0x61c   : > { %4999 = vmatpush.msra.mxu2 %v16138_v5  ;;  %5019 = vmatpush.msra.mxu3 %v16139_v6 }
 0x61d   : > { %4950 = vmatpush.msra.mxu0 %v16090_v27  ;;  %4970 = vmatpush.msra.mxu1 %v16091_v40 }
 0x61e   : > { %5000 = vmatpush.msra.mxu2 %v16117_v0  ;;  %5020 = vmatpush.msra.mxu3 %v16118_v18 }
 0x61f   : > { %5210 = vrot.lane.b32.xlu1 %v4622_v33, %s9002_s23  ;;  %4951 = vmatpush.msra.mxu0 %v16107_v29  ;;  %v16195_v33 = vld [vmem:[#allocation19_spill] sm:$0xff] }
 0x620   : > { %4971 = vmatpush.msra.mxu1 %v16093_v2  ;;  %5001 = vmatpush.msra.mxu2 %v16100_v12 }
 0x621   : > { %5021 = vmatpush.msra.mxu3 %v12427_v1  ;;  %4952 = vmatpush.msra.mxu0 %v12431_v53 }
 0x622   : > { %4972 = vmatpush.msra.mxu1 %v12448_v16  ;;  %5002 = vmatpush.msra.mxu2 %v12450_v9 }
 0x623   : > { %5022 = vmatpush.msra.mxu3 %v12466_v17  ;;  %5003 = vmatmul.f32.vlgmr.msra.gmra.mxu2 %v3850_v54 }
 0x624   : > { %5023 = vmatmul.f32.vlgmr.msra.gmra.mxu3 %v3851_v34  ;;  %5068 = vmatpush.msrb.mxu2 %v11939_v21 }
 0x625   : > { %5088 = vmatpush.msrb.mxu3 %v11941_v51  ;;  %4953 = vmatpush.msra.mxu0 %v12481_v3 }
 0x626   : > { %4973 = vmatpush.msra.mxu1 %v12486_v13  ;;  %5069 = vmatpush.msrb.mxu2 %v11943_v61 }
 0x627   : > { %5089 = vmatpush.msrb.mxu3 %v11945_v55  ;;  %4954 = vmatpush.msra.mxu0 %v12502_v63 }
 0x628   : > { %4974 = vmatpush.msra.mxu1 %v12508_v31  ;;  %5070 = vmatpush.msrb.mxu2 %v11979_v14 }
 0x629   : > { %5090 = vmatpush.msrb.mxu3 %v12006_v43  ;;  %4955 = vmatpush.msra.mxu0 %v12522_v15 }
 0x62a   : > { %4975 = vmatpush.msra.mxu1 %v12536_v36  ;;  %5071 = vmatpush.msrb.mxu2 %v12008_v49 }
 0x62b   : > { %5091 = vmatpush.msrb.mxu3 %v12036_v7  ;;  %4956 = vmatpush.msra.mxu0 %v12542_v19 }
 0x62c   : > { %4976 = vmatpush.msra.mxu1 %v12559_v28  ;;  %5072 = vmatpush.msrb.mxu2 %v12047_v58 }
 0x62d   : > { %5092 = vmatpush.msrb.mxu3 %v12055_v52  ;;  %4957 = vmatpush.msra.mxu0 %v12561_v32 }
 0x62e   : > { %4977 = vmatpush.msra.mxu1 %v12577_v11  ;;  %5073 = vmatpush.msrb.mxu2 %v12096_v30 }
 0x62f   : > { %5093 = vmatpush.msrb.mxu3 %v12098_v47  ;;  %4958 = vmatpush.msra.mxu0 %v12582_v62 }
 0x630   : > { %4978 = vmatpush.msra.mxu1 %v12599_v35  ;;  %5074 = vmatpush.msrb.mxu2 %v16190_v23 }
 0x631   : > { %5094 = vmatpush.msrb.mxu3 %v16191_v56  ;;  %4959 = vmatpush.msra.mxu0 %v16192_v60  ;;  %v16198_v56 = vld [vmem:[#allocation16_spill] sm:$0xff] }
 0x632   : > { %4979 = vmatpush.msra.mxu1 %v16193_v50  ;;  %5075 = vmatpush.msrb.mxu2 %v16194_v39  ;;  %v4640_v50 = vpop.f32.mrf.mxu0  ;;  %v4660_v39 = vpop.f32.mrf.mxu1 }
 0x633   : > { %5095 = vmatpush.msrb.mxu3 %v16195_v33  ;;  %4960 = vmatpush.msra.mxu0 %v16196_v4  ;;  %v16199_v33 = vld [vmem:[#allocation64_spill] sm:$0xff]  ;;  %v4680_v4 = vpop.f32.mrf.mxu2 }
 0x634   : > { %4980 = vmatpush.msra.mxu1 %v16182_v20  ;;  %5076 = vmatpush.msrb.mxu2 %v16183_v42  ;;  %v4700_v20 = vpop.f32.mrf.mxu3  ;;  %v16200_v42 = vld [vmem:[#allocation22_spill] sm:$0xff] }
 0x635   : > { %5096 = vmatpush.msrb.mxu3 %v16197_v37  ;;  %4961 = vmatpush.msra.mxu0 %v16184_v25  ;;  %v4661_v25 = vadd.f32 %v4660_v39, %v4640_v50 }
 0x636   : > { %4981 = vmatpush.msra.mxu1 %v16108_v46  ;;  %5077 = vmatpush.msrb.mxu2 %v16198_v56 }
 0x637   : > { %5097 = vmatpush.msrb.mxu3 %v16185_v10  ;;  %4962 = vmatpush.msra.mxu0 %v16186_v8  ;;  %v4701_v10 = vadd.f32 %v4700_v20, %v4680_v4 }
 0x638   : > { %4982 = vmatpush.msra.mxu1 %v16199_v33  ;;  %4963 = vmatmul.f32.vlgmr.msra.gmra.mxu0 %v3850_v54  ;;  %v16201_v33 = vld [vmem:[#allocation71_spill] sm:$0xff]  ;;  %v16202_v54 = vld [vmem:[#allocation72_spill] sm:$0xff] }
 0x639   : > { %4983 = vmatmul.f32.vlgmr.msra.gmra.mxu1 %v3851_v34  ;;  %5028 = vmatpush.msrb.mxu0 %v16200_v42  ;;  %v3722_v8 = vadd.f32 %v16201_v33, %v16134_v41  ;;  %v3742_v34 = vadd.f32 %v16202_v54, %v16134_v41  ;;  %v4703_v50 = vmax.f32 %v4661_v25, %v4701_v10  ;;  %v13332_v10 = vpop.permute.xlu1 %5204  ;;  %v5203_v25 = vpop.permute.xlu0 %5202 }
 0x63a   : > { %5048 = vmatpush.msrb.mxu1 %v16082_v59  ;;  %5078 = vmatpush.msrb.mxu2 %v16101_v44  ;;  %v13342_v4 = vsel %vm16203_vm4, %v5203_v25, %v13332_v10  ;;  %vm16222_vm4 = vcmask 982016  }
 0x63b   : > { %5098 = vmatpush.msrb.mxu3 %v16102_v26  ;;  %5029 = vmatpush.msrb.mxu0 %v16103_v22  ;;  %v3828_v20 = vmul.f32 0.01, %v3722_v8  ;;  %v3829_v39 = vmul.f32 0.01, %v3742_v34  ;;  %vm3804_vm10 = vcmp.ge.f32.partialorder %v3722_v8, 0.0  ;;  %vm3805_vm0 = vcmp.ge.f32.partialorder %v3742_v34, 0.0 }
 0x63c   : > { %5049 = vmatpush.msrb.mxu1 %v16113_v48  ;;  %5079 = vmatpush.msrb.mxu2 %v16149_v38 }
 0x63d   : > { %5099 = vmatpush.msrb.mxu3 %v16137_v45  ;;  %5030 = vmatpush.msrb.mxu0 %v16095_v24  ;;  %v3852_v33 = vsel %vm3804_vm10, %v3722_v8, %v3828_v20  ;;  %v3853_v54 = vsel %vm3805_vm0, %v3742_v34, %v3829_v39  ;;  %v5255_v34 = vrot.slane %v13342_v4, 4  ;;  %vm16220_vm10 = vmmov %vm16219_vm3 }
 0x63e   : > { %5050 = vmatpush.msrb.mxu1 %v16089_v57  ;;  %5080 = vmatpush.msrb.mxu2 %v16138_v5  ;;  %vm16221_vm0 = vmmov %vm16219_vm3 }
 0x63f   : > { %5100 = vmatpush.msrb.mxu3 %v16139_v6  ;;  %5031 = vmatpush.msrb.mxu0 %v16090_v27 }
 0x640   : > { %5051 = vmatpush.msrb.mxu1 %v16091_v40  ;;  %5081 = vmatpush.msrb.mxu2 %v16117_v0 }
 0x641   : > { %5101 = vmatpush.msrb.mxu3 %v16118_v18  ;;  %5212 = vrot.lane.b32.xlu2 %v4703_v50, %s9002_s23  ;;  %v13347_v50 = vsel %vm16204_vm14, 0.0, %v5203_v25  ;;  %v16205_v25 = vld [vmem:[#allocation15_spill] sm:$0xff]  ;;  %vm16223_vm14 = vcmask 990208  }
 0x642   : > { %5032 = vmatpush.msrb.mxu0 %v16107_v29  ;;  %5052 = vmatpush.msrb.mxu1 %v16093_v2  ;;  %v13355_v8 = vpack.i.bf16 %v13342_v4, %v13347_v50  ;;  %v5254_v20 = vrot.slane %v13347_v50, 4 }
 0x643   : > { %5082 = vmatpush.msrb.mxu2 %v16100_v12  ;;  %5102 = vmatpush.msrb.mxu3 %v12427_v1 }
 0x644   : > { %5033 = vmatpush.msrb.mxu0 %v12431_v53  ;;  %5053 = vmatpush.msrb.mxu1 %v12448_v16  ;;  %v13378_v39 = vpack.i.bf16 %v5255_v34, %v5254_v20  ;;  %v16209_v34 = vld [vmem:[#allocation59_spill] sm:$0xff]  ;;  %v16210_v20 = vld [vmem:[#allocation60_spill] sm:$0xff] }
 0x645   : > { %5083 = vmatpush.msrb.mxu2 %v12450_v9  ;;  %5103 = vmatpush.msrb.mxu3 %v12466_v17 }
 0x646   : > { %5084 = vmatmul.f32.vlgmr.msrb.gmra.mxu2 %v3852_v33  ;;  %5104 = vmatmul.f32.vlgmr.msrb.gmra.mxu3 %v3853_v54 }
 0x647   : > { %5149 = vmatpush.msra.mxu2 %v11939_v21  ;;  %5169 = vmatpush.msra.mxu3 %v11941_v51 }
 0x648   : > { %5034 = vmatpush.msrb.mxu0 %v12481_v3  ;;  %5054 = vmatpush.msrb.mxu1 %v12486_v13 }
 0x649   : > { %5150 = vmatpush.msra.mxu2 %v11943_v61  ;;  %5170 = vmatpush.msra.mxu3 %v11945_v55 }
 0x64a   : > { %5035 = vmatpush.msrb.mxu0 %v12502_v63  ;;  %5055 = vmatpush.msrb.mxu1 %v12508_v31 }
 0x64b   : > { %8687 = vrot.lane.b32.xlu2 %v13355_v8, %s9004_s25  ;;  %5151 = vmatpush.msra.mxu2 %v11979_v14  ;;  %v16215_v14 = vld [vmem:[#allocation64_spill] sm:$0xff] }
 0x64c   : > { %5171 = vmatpush.msra.mxu3 %v12006_v43  ;;  %5036 = vmatpush.msrb.mxu0 %v12522_v15  ;;  %v4781_v43 = vpop.f32.mrf.mxu3 }
 0x64d   : > { %5056 = vmatpush.msrb.mxu1 %v12536_v36  ;;  %5152 = vmatpush.msra.mxu2 %v12008_v49  ;;  %v16213_v49 = vld [vmem:[#allocation9_spill] sm:$0xff] }
 0x64e   : > { %5172 = vmatpush.msra.mxu3 %v12036_v7  ;;  %5037 = vmatpush.msrb.mxu0 %v12542_v19  ;;  %v16212_v7 = vld [vmem:[#allocation61_spill] sm:$0xff] }
 0x64f   : > { %5057 = vmatpush.msrb.mxu1 %v12559_v28  ;;  %5153 = vmatpush.msra.mxu2 %v12047_v58  ;;  %v16211_v58 = vld [vmem:[#allocation2_spill] sm:$0xff] }
 0x650   : > { %5173 = vmatpush.msra.mxu3 %v12055_v52  ;;  %5038 = vmatpush.msrb.mxu0 %v12561_v32  ;;  %v16206_v52 = vld [vmem:[#allocation58_spill] sm:$0xff] }
 0x651   : > { %5058 = vmatpush.msrb.mxu1 %v12577_v11  ;;  %5154 = vmatpush.msra.mxu2 %v12096_v30  ;;  %v16207_v30 = vld [vmem:[#allocation18_spill] sm:$0xff] }
 0x652   : > { %5174 = vmatpush.msra.mxu3 %v12098_v47  ;;  %5039 = vmatpush.msrb.mxu0 %v12582_v62  ;;  %v16208_v47 = vld [vmem:[#allocation19_spill] sm:$0xff] }
 0x653   : > { %5059 = vmatpush.msrb.mxu1 %v12599_v35  ;;  %8692 = vrot.lane.b32.xlu2 %v13378_v39, %s9010_s12 }
 0x654   : > { %5155 = vmatpush.msra.mxu2 %v16190_v23  ;;  %5175 = vmatpush.msra.mxu3 %v16205_v25  ;;  %v4721_v25 = vpop.f32.mrf.mxu0  ;;  %v4741_v23 = vpop.f32.mrf.mxu1 }
 0x655   : > { %5040 = vmatpush.msrb.mxu0 %v16192_v60  ;;  %5060 = vmatpush.msrb.mxu1 %v16206_v52 }
 0x656   : > { %5156 = vmatpush.msra.mxu2 %v16207_v30  ;;  %5176 = vmatpush.msra.mxu3 %v16208_v47  ;;  %v16214_v30 = vld [vmem:[#allocation63_spill] sm:$0xff]  ;;  %v4761_v47 = vpop.f32.mrf.mxu2 }
 0x657   : > { %5041 = vmatpush.msrb.mxu0 %v16209_v34  ;;  %5061 = vmatpush.msrb.mxu1 %v16210_v20 }
 0x658   : > { %5157 = vmatpush.msra.mxu2 %v16211_v58  ;;  %5177 = vmatpush.msra.mxu3 %v16197_v37  ;;  %v4742_v37 = vadd.f32 %v4741_v23, %v4721_v25 }
 0x659   : > { %5042 = vmatpush.msrb.mxu0 %v16212_v7  ;;  %5062 = vmatpush.msrb.mxu1 %v16108_v46 }
 0x65a   : > { %5158 = vmatpush.msra.mxu2 %v16198_v56  ;;  %5178 = vmatpush.msra.mxu3 %v16213_v49  ;;  %v4782_v56 = vadd.f32 %v4781_v43, %v4761_v47  ;;  %v16216_v49 = vld [vmem:[#allocation73_spill] sm:$0xff] }
 0x65b   : > { %5043 = vmatpush.msrb.mxu0 %v16214_v30  ;;  %5063 = vmatpush.msrb.mxu1 %v16215_v14 }
 0x65c   : > { %5044 = vmatmul.f32.vlgmr.msrb.gmra.mxu0 %v3852_v33  ;;  %5064 = vmatmul.f32.vlgmr.msrb.gmra.mxu1 %v3853_v54  ;;  %v3762_v33 = vadd.f32 %v16216_v49, %v16134_v41  ;;  %v16217_v54 = vld [vmem:[#allocation74_spill] sm:$0xff]  ;;  %v4784_v23 = vmax.f32 %v4742_v37, %v4782_v56  ;;  %v5207_v56 = vpop.permute.xlu2 %5206 }
 0x65d   : > { %5109 = vmatpush.msra.mxu0 %v16200_v42  ;;  %5129 = vmatpush.msra.mxu1 %v16082_v59  ;;  %v3782_v58 = vadd.f32 %v16217_v54, %v16134_v41  ;;  %v13445_v54 = vsel %vm16219_vm3, %v13332_v10, %v5207_v56  ;;  %vm16227_vm3 = vmmov %vm16221_vm0 }
 0x65e   : > { %5159 = vmatpush.msra.mxu2 %v16101_v44  ;;  %5179 = vmatpush.msra.mxu3 %v16102_v26  ;;  %v3830_v43 = vmul.f32 0.01, %v3762_v33  ;;  %vm3806_vm6 = vcmp.ge.f32.partialorder %v3762_v33, 0.0 }
 0x65f   : > { %5110 = vmatpush.msra.mxu0 %v16103_v22  ;;  %5130 = vmatpush.msra.mxu1 %v16113_v48  ;;  %v3831_v49 = vmul.f32 0.01, %v3782_v58  ;;  %vm3807_vm7 = vcmp.ge.f32.partialorder %v3782_v58, 0.0 }
 0x660   : > { %5160 = vmatpush.msra.mxu2 %v16149_v38  ;;  %5180 = vmatpush.msra.mxu3 %v16137_v45  ;;  %v3854_v47 = vsel %vm3806_vm6, %v3762_v33, %v3830_v43  ;;  %vm16224_vm6 = vmmov %vm16221_vm0 }
 0x661   : > { %5111 = vmatpush.msra.mxu0 %v16095_v24  ;;  %5131 = vmatpush.msra.mxu1 %v16089_v57  ;;  %v3855_v41 = vsel %vm3807_vm7, %v3782_v58, %v3831_v49  ;;  %v4842_v37 = vpop.f32.mrf.mxu2  ;;  %vm16225_vm7 = vmmov %vm16221_vm0 }
 0x662   : > { %5161 = vmatpush.msra.mxu2 %v16138_v5  ;;  %5181 = vmatpush.msra.mxu3 %v16139_v6  ;;  %v4862_v58 = vpop.f32.mrf.mxu3 }
 0x663   : > { %5112 = vmatpush.msra.mxu0 %v16090_v27  ;;  %5132 = vmatpush.msra.mxu1 %v16091_v40  ;;  %v4863_v49 = vadd.f32 %v4862_v58, %v4842_v37 }
 0x664   : > { %5162 = vmatpush.msra.mxu2 %v16117_v0  ;;  %5182 = vmatpush.msra.mxu3 %v16118_v18 }
 0x665   : > { %5214 = vrot.lane.b32.xlu0 %v4784_v23, %s9002_s23  ;;  %5113 = vmatpush.msra.mxu0 %v16107_v29 }
 0x666   : > { %5133 = vmatpush.msra.mxu1 %v16093_v2  ;;  %5163 = vmatpush.msra.mxu2 %v16100_v12 }
 0x667   : > { %5183 = vmatpush.msra.mxu3 %v12427_v1  ;;  %5114 = vmatpush.msra.mxu0 %v12431_v53  ;;  %v5256_v1 = vrot.slane %v13445_v54, 4 }
 0x668   : > { %5134 = vmatpush.msra.mxu1 %v12448_v16  ;;  %5164 = vmatpush.msra.mxu2 %v12450_v9 }
 0x669   : > { %5184 = vmatpush.msra.mxu3 %v12466_v17  ;;  %5165 = vmatmul.f32.vlgmr.msra.gmra.mxu2 %v3854_v47 }
 0x66a   : > { %5185 = vmatmul.f32.vlgmr.msra.gmra.mxu3 %v3855_v41  ;;  %5115 = vmatpush.msra.mxu0 %v12481_v3 }
 0x66b   : > { %5135 = vmatpush.msra.mxu1 %v12486_v13 }
 0x66c   : > { %5116 = vmatpush.msra.mxu0 %v12502_v63 }
 0x66d   : > { %5136 = vmatpush.msra.mxu1 %v12508_v31  ;;  %5617 = vrot.lane.b32.xlu0 %v13347_v50, %s9009_s30 }
 0x66e   : > { %5117 = vmatpush.msra.mxu0 %v12522_v15  ;;  %v13437_v25 = vpop.permute.xlu0 %5208 }
 0x66f   : > { %5137 = vmatpush.msra.mxu1 %v12536_v36  ;;  %v13441_v33 = vsel %vm16218_vm13, %v5207_v56, %v13437_v25  ;;  %vm16226_vm13 = vmmov %vm16221_vm0 }
 0x670   : > { %5118 = vmatpush.msra.mxu0 %v12542_v19  ;;  %v4802_v23 = vpop.f32.mrf.mxu0  ;;  %v5257_v17 = vrot.slane %v13441_v33, 4 }
 0x671   : > { %5138 = vmatpush.msra.mxu1 %v12559_v28  ;;  %v4822_v43 = vpop.f32.mrf.mxu1 }
 0x672   : > { %v4823_v9 = vadd.f32 %v4822_v43, %v4802_v23  ;;  %5119 = vmatpush.msra.mxu0 %v12561_v32  ;;  %v8736_v10 = vpack.i.bf16 %v5257_v17, %v5256_v1  ;;  %v8721_v1 = vpack.i.bf16 %v13441_v33, %v13445_v54 }
 0x673   : > { %5139 = vmatpush.msra.mxu1 %v12577_v11 }
 0x674   : > { %v4865_v12 = vmax.f32 %v4823_v9, %v4863_v49  ;;  %5120 = vmatpush.msra.mxu0 %v12582_v62 }
 0x675   : > { %5140 = vmatpush.msra.mxu1 %v12599_v35  ;;  %8677 = vrot.lane.b32.xlu0 %v13355_v8, %s9007_s28 }
 0x676   : > { %5216 = vrot.lane.b32.xlu1 %v4865_v12, %s9002_s23  ;;  %5121 = vmatpush.msra.mxu0 %v16192_v60 }
 0x677   : > { %5141 = vmatpush.msra.mxu1 %v16206_v52 }
 0x678   : > { %5122 = vmatpush.msra.mxu0 %v16209_v34 }
 0x679   : > { %5142 = vmatpush.msra.mxu1 %v16210_v20 }
 0x67a   : > { %5123 = vmatpush.msra.mxu0 %v16212_v7 }
 0x67b   : > { %5143 = vmatpush.msra.mxu1 %v16108_v46 }
 0x67c   : > { %5124 = vmatpush.msra.mxu0 %v16214_v30 }
 0x67d   : > { %5144 = vmatpush.msra.mxu1 %v16215_v14  ;;  %8697 = vrot.lane.b32.xlu0 %v13378_v39, %s9008_s29 }
 0x67e   : > { %5125 = vmatmul.f32.vlgmr.msra.gmra.mxu0 %v3854_v47  ;;  %5145 = vmatmul.f32.vlgmr.msra.gmra.mxu1 %v3855_v41 }
 0x67f   : > { %5619 = vrot.lane.b32.xlu1 %v13342_v4, %s9009_s30 }
 0x684   : > { %v4923_v9 = vpop.f32.mrf.mxu2  ;;  %v4943_v17 = vpop.f32.mrf.mxu3 }
 0x685   : > { %8707 = vrot.lane.b32.xlu0 %v13378_v39, %s9003_s24  ;;  %v4944_v41 = vadd.f32 %v4943_v17, %v4923_v9 }
 0x687   : > { %8682 = vrot.lane.b32.xlu1 %v13355_v8, %s9006_s27 }
 0x68d   : > { %8722 = vrot.lane.b32.xlu0 %v8721_v1, %s9004_s25 }
 0x68f   : > { %8702 = vrot.lane.b32.xlu1 %v13378_v39, %s9005_s26 }
 0x693   : > { %v4883_v12 = vpop.f32.mrf.mxu0  ;;  %v4903_v47 = vpop.f32.mrf.mxu1 }
 0x694   : > { %v4904_v56 = vadd.f32 %v4903_v47, %v4883_v12 }
 0x695   : > { %8727 = vrot.lane.b32.xlu0 %v8736_v10, %s9010_s12 }
 0x696   : > { %v4946_v37 = vmax.f32 %v4904_v56, %v4944_v41 }
 0x697   : > { %8712 = vrot.lane.b32.xlu1 %v8721_v1, %s9007_s28 }
 0x698   : > { %5218 = vrot.lane.b32.xlu2 %v4946_v37, %s9002_s23 }
 0x69b   : > { %v5213_v9 = vpop.permute.xlu2 %5212 }
 0x69f   : > { %8732 = vrot.lane.b32.xlu1 %v8736_v10, %s9008_s29 }
 0x6a6   : > { %v5004_v8 = vpop.f32.mrf.mxu2 }
 0x6a7   : > { %8742 = vrot.lane.b32.xlu1 %v8736_v10, %s9003_s24  ;;  %v5024_v58 = vpop.f32.mrf.mxu3 }
 0x6a8   : > { %v5025_v43 = vadd.f32 %v5024_v58, %v5004_v8  ;;  %v5211_v58 = vpop.permute.xlu1 %5210 }
 0x6b5   : > { %v4964_v39 = vpop.f32.mrf.mxu0 }
 0x6b6   : > { %v4984_v23 = vpop.f32.mrf.mxu1 }
 0x6b7   : > { %v4985_v49 = vadd.f32 %v4984_v23, %v4964_v39  ;;  %v13492_v39 = vsel %vm16220_vm10, %v5211_v58, %v5213_v9  ;;  %vm16228_vm10 = vmmov %vm16222_vm4 }
 0x6b9   : > { %v5027_v18 = vmax.f32 %v4985_v49, %v5025_v43  ;;  %v13503_v49 = vpop.permute.xlu2 %8687 }
 0x6ba   : > { %v15825_v11 = vunpack.i.h.bf16 %v13503_v49  ;;  %v8689_v28 = vunpack.i.l.bf16 %v13503_v49 }
 0x6bb   : > { %5220 = vrot.lane.b32.xlu2 %v5027_v18, %s9002_s23 }
 0x6c3   : > { %5621 = vrot.lane.b32.xlu2 %v13445_v54, %s9009_s30 }
 0x6c9   : > { %v5085_v12 = vpop.f32.mrf.mxu2  ;;  %v5105_v47 = vpop.f32.mrf.mxu3 }
 0x6ca   : > { %v5106_v37 = vadd.f32 %v5105_v47, %v5085_v12  ;;  %v5259_v47 = vrot.slane %v13492_v39, 4 }
 0x6cb   : > { %8717 = vrot.lane.b32.xlu2 %v8721_v1, %s9006_s27  ;;  %v13497_v1 = vsel %vm16221_vm0, %v13437_v25, %v5211_v58  ;;  %v13515_v25 = vpop.permute.xlu2 %8692  ;;  %vm16231_vm0 = vmmov %vm16223_vm14 }
 0x6cc   : > { %v13501_v43 = vpack.i.bf16 %v13492_v39, %v13497_v1  ;;  %v8694_v58 = vunpack.i.l.bf16 %v13515_v25 }
 0x6d3   : > { %5623 = vrot.lane.b32.xlu2 %v13441_v33, %s9009_s30 }
 0x6d7   : > { %v5215_v17 = vpop.permute.xlu0 %5214 }
 0x6d9   : > { %v5045_v41 = vpop.f32.mrf.mxu0  ;;  %v5065_v56 = vpop.f32.mrf.mxu1 }
 0x6da   : > { %v5066_v8 = vadd.f32 %v5065_v56, %v5045_v41 }
 0x6db   : > { %8737 = vrot.lane.b32.xlu2 %v8736_v10, %s9005_s26 }
 0x6dc   : > { %v5108_v18 = vmax.f32 %v5066_v8, %v5106_v37  ;;  %v5258_v37 = vrot.slane %v13497_v1, 4  ;;  %v15808_v8 = vunpack.i.h.bf16 %v13515_v25 }
 0x6de   : > { %5222 = vrot.lane.b32.xlu0 %v5108_v18, %s9002_s23  ;;  %v13525_v18 = vpack.i.bf16 %v5259_v47, %v5258_v37  ;;  %v5593_v47 = vsel %vm16223_vm14, %v8694_v58, %v15808_v8  ;;  %vm16234_vm14 = vmmov %vm16231_vm0 }
 0x6df   : > { %v5618_v23 = vpop.permute.xlu0 %5617 }
 0x6e3   : > { %8757 = vrot.lane.b32.xlu2 %v13501_v43, %s9004_s25 }
 0x6e6   : > { %5625 = vrot.lane.b32.xlu0 %v13497_v1, %s9009_s30 }
 0x6e7   : > { %v13511_v12 = vpop.permute.xlu0 %8677 }
 0x6e8   : > { %v13509_v10 = vpop.permute.xlu1 %5216  ;;  %v15807_v41 = vunpack.i.h.bf16 %v13511_v12  ;;  %v8679_v56 = vunpack.i.l.bf16 %v13511_v12 }
 0x6ea   : > { %v5543_v6 = vsel %vm1206_vm12, %v8679_v56, %v15807_v41  ;;  %v13545_v56 = vsel %vm16224_vm6, %v5215_v17, %v13509_v10  ;;  %vm16239_vm6 = vmmov %vm16227_vm3 }
 0x6eb   : > { %5627 = vrot.lane.b32.xlu2 %v13492_v39, %s9009_s30  ;;  %v5691_v37 = vsel %vm1529_vm11, %v5543_v6, %v5593_v47 }
 0x6ec   : > { %v5166_v6 = vpop.f32.mrf.mxu2 }
 0x6ed   : > { %v5186_v47 = vpop.f32.mrf.mxu3 }
 0x6ee   : > { %8752 = vrot.lane.b32.xlu0 %v13501_v43, %s9006_s27  ;;  %v5187_v26 = vadd.f32 %v5186_v47, %v5166_v6 }
 0x6ef   : > { %v13534_v14 = vpop.permute.xlu0 %8697 }
 0x6f0   : > { %v15826_v41 = vunpack.i.h.bf16 %v13534_v14  ;;  %v16233_v36 = vunpack.i.h.bf16 %v13534_v14 }
 0x6f1   : > { %v13527_v0 = vpop.permute.xlu1 %5619 }
 0x6f2   : > { %v5643_v5 = vsel %vm16222_vm4, %v5618_v23, %v13527_v0  ;;  %v13550_v23 = vsel %vm16225_vm7, %v5213_v9, %v5215_v17  ;;  %vm16240_vm7 = vmmov %vm16222_vm4 }
 0x6f3   : > { %8762 = vrot.lane.b32.xlu2 %v13525_v18, %s9010_s12  ;;  %7777 = vmatpush.msk.msrb.mxu0 %vm1529_vm11, %v5643_v5  ;;  %v8699_v5 = vunpack.i.l.bf16 %v13534_v14  ;;  %v8791_v58 = vpack.i.bf16 %v13545_v56, %v13550_v23  ;;  %v5260_v47 = vrot.slane %v13550_v23, 4 }
 0x6f5   : > { %5749 = vmatpush.msrb.mxu0 %v5691_v37  ;;  %v5493_v46 = vsel %vm1082_vm8, %v8699_v5, %v15826_v41 }
 0x6f6   : > { %8772 = vrot.lane.b32.xlu0 %v13525_v18, %s9005_s26 }
 0x6f7   : > { %v13567_v44 = vpop.permute.xlu0 %8707 }
 0x6f9   : > { %v13556_v8 = vpop.permute.xlu1 %8682 }
 0x6fa   : > { %v15822_v37 = vunpack.i.h.bf16 %v13556_v8  ;;  %v8684_v45 = vunpack.i.l.bf16 %v13556_v8  ;;  %v16232_v41 = vunpack.i.h.bf16 %v13556_v8 }
 0x6fb   : > { %v5126_v38 = vpop.f32.mrf.mxu0  ;;  %8792 = vrot.lane.b32.xlu2 %v8791_v58, %s9004_s25  ;;  %v5146_v9 = vpop.f32.mrf.mxu1 }
 0x6fc   : > { %v5443_v17 = vsel %vm958_vm9, %v8684_v45, %v15822_v37  ;;  %v5147_v20 = vadd.f32 %v5146_v9, %v5126_v38  ;;  %v15823_v45 = vunpack.i.h.bf16 %v13567_v44  ;;  %v8709_v37 = vunpack.i.l.bf16 %v13567_v44 }
 0x6fd   : > { %v5679_v52 = vsel %vm1529_vm11, %v5443_v17, %v5493_v46 }
 0x6fe   : > { %5750 = vmatpush.msrb.mxu0 %v5679_v52  ;;  %v5189_v35 = vmax.f32 %v5147_v20, %v5187_v26  ;;  %5629 = vrot.lane.b32.xlu0 %v13550_v23, %s9009_s30  ;;  %v5343_v26 = vsel %vm710_vm2, %v8689_v28, %v15825_v11  ;;  %v5261_v20 = vrot.slane %v13545_v56, 4 }
 0x6ff   : > { %v13601_v17 = vpop.permute.xlu0 %8722 }
 0x700   : > { %5224 = vrot.lane.b32.xlu1 %v5189_v35, %s9002_s23  ;;  %v5293_v35 = vsel %vm586_vm1, %v8709_v37, %v15823_v45  ;;  %v8796_v9 = vpack.i.bf16 %v5261_v20, %v5260_v47  ;;  %v5219_v37 = vpop.permute.xlu2 %5218 }
 0x701   : > { %v13577_v5 = vpop.permute.xlu1 %8702  ;;  %v5655_v28 = vsel %vm1529_vm11, %v13347_v50, %v5293_v35  ;;  %v13610_v50 = vsel %vm16226_vm13, %v13509_v10, %v5219_v37  ;;  %vm16241_vm13 = vmmov %vm16222_vm4 }
 0x702   : > { %v15824_v38 = vunpack.i.h.bf16 %v13577_v5  ;;  %v8704_v52 = vunpack.i.l.bf16 %v13577_v5 }
 0x703   : > { %5631 = vrot.lane.b32.xlu2 %v13545_v56, %s9009_s30 }
 0x704   : > { %v5393_v46 = vsel %vm834_vm5, %v8704_v52, %v15824_v38 }
 0x705   : > { %v5667_v6 = vsel %vm1529_vm11, %v5343_v26, %v5393_v46 }
 0x706   : > { %5751 = vmatpush.msrb.mxu0 %v5667_v6  ;;  %8787 = vrot.lane.b32.xlu0 %v8791_v58, %s9006_s27 }
 0x707   : > { %v13622_v35 = vpop.permute.xlu0 %8727 }
 0x708   : > { %5752 = vmatpush.msrb.mxu0 %v5655_v28  ;;  %8747 = vrot.lane.b32.xlu1 %v13501_v43, %s9007_s28  ;;  %v8729_v20 = vunpack.i.l.bf16 %v13622_v35  ;;  %v16229_v28 = vunpack.i.h.bf16 %v13511_v12  ;;  %v5262_v12 = vrot.slane %v13610_v50, 4 }
 0x709   : > { %v13616_v26 = vpop.permute.xlu1 %8712 }
 0x70a   : > { %v8714_v10 = vunpack.i.l.bf16 %v13616_v26 }
 0x70b   : > { %8797 = vrot.lane.b32.xlu2 %v8796_v9, %s9010_s12 }
 0x70e   : > { %8807 = vrot.lane.b32.xlu0 %v8796_v9, %s9005_s26 }
 0x710   : > { %8767 = vrot.lane.b32.xlu1 %v13525_v18, %s9008_s29 }
 0x711   : > { %v13640_v11 = vpop.permute.xlu1 %8732 }
 0x715   : > { %v13606_v52 = vpop.permute.xlu2 %5220 }
 0x716   : > { %v13614_v43 = vsel %vm16227_vm3, %v5219_v37, %v13606_v52  ;;  %5633 = vrot.lane.b32.xlu0 %v13610_v50, %s9009_s30  ;;  %v5544_v37 = vsel %vm1206_vm12, %v16229_v28, %v8714_v10  ;;  %vm16242_vm3 = vmmov %vm16222_vm4 }
 0x717   : > { %v8826_v46 = vpack.i.bf16 %v13614_v43, %v13610_v50  ;;  %v5263_v38 = vrot.slane %v13614_v43, 4 }
 0x718   : > { %8777 = vrot.lane.b32.xlu1 %v13525_v18, %s9003_s24  ;;  %v16230_v18 = vunpack.i.h.bf16 %v13515_v25 }
 0x719   : > { %8827 = vrot.lane.b32.xlu2 %v8826_v46, %s9004_s25  ;;  %v8841_v28 = vpack.i.bf16 %v5263_v38, %v5262_v12  ;;  %v13677_v8 = vpop.permute.xlu1 %8742 }
 0x71a   : > { %v5594_v45 = vsel %vm16231_vm0, %v16230_v18, %v8729_v20  ;;  %vm16244_vm0 = vmmov %vm16239_vm6 }
 0x71d   : > { %v5622_v6 = vpop.permute.xlu2 %5621 }
 0x71e   : > { %v5644_v47 = vsel %vm16228_vm10, %v13527_v0, %v5622_v6  ;;  %8822 = vrot.lane.b32.xlu0 %v8826_v46, %s9006_s27  ;;  %v5692_v0 = vsel %vm1529_vm11, %v5544_v37, %v5594_v45  ;;  %v15829_v37 = vunpack.i.h.bf16 %v13616_v26  ;;  %vm16243_vm10 = vmmov %vm16242_vm3 }
 0x71f   : > { %7779 = vmatpush.msk.msrb.mxu1 %vm1529_vm11, %v5644_v47  ;;  %v8734_v47 = vunpack.i.l.bf16 %v13640_v11 }
 0x720   : > { %8782 = vrot.lane.b32.xlu1 %v8791_v58, %s9007_s28  ;;  %v5545_v14 = vsel %vm1206_vm12, %v8714_v10, %v15829_v37  ;;  %v16235_v10 = vunpack.i.h.bf16 %v13640_v11  ;;  %v8725_v37 = vunpack.i.h.bf16 %v13601_v17 }
 0x721   : > { %5635 = vrot.lane.b32.xlu2 %v13614_v43, %s9009_s30  ;;  %5769 = vmatpush.msrb.mxu1 %v5692_v0  ;;  %v5494_v45 = vsel %vm1082_vm8, %v16233_v36, %v8734_v47  ;;  %v15831_v0 = vunpack.i.h.bf16 %v13622_v35 }
 0x725   : > { %v13648_v25 = vpop.permute.xlu2 %8717 }
 0x726   : > { %v8719_v18 = vunpack.i.l.bf16 %v13648_v25  ;;  %8842 = vrot.lane.b32.xlu0 %v8841_v28, %s9005_s26  ;;  %v15830_v12 = vunpack.i.h.bf16 %v13648_v25 }
 0x728   : > { %v5444_v58 = vsel %vm958_vm9, %v16232_v41, %v8719_v18  ;;  %8802 = vrot.lane.b32.xlu1 %v8796_v9, %s9008_s29 }
 0x729   : > { %8832 = vrot.lane.b32.xlu2 %v8841_v28, %s9010_s12  ;;  %v5680_v38 = vsel %vm1529_vm11, %v5444_v58, %v5494_v45  ;;  %v5595_v58 = vsel %vm16234_vm14, %v8729_v20, %v15831_v0  ;;  %v5445_v45 = vsel %vm958_vm9, %v8719_v18, %v15830_v12  ;;  %v8724_v20 = vunpack.i.l.bf16 %v13601_v17 }
 0x72a   : > { %5770 = vmatpush.msrb.mxu1 %v5680_v38  ;;  %v5693_v38 = vsel %vm1529_vm11, %v5545_v14, %v5595_v58  ;;  %v15832_v18 = vunpack.i.h.bf16 %v13677_v8  ;;  %v8744_v14 = vunpack.i.l.bf16 %v13677_v8 }
 0x72d   : > { %v5624_v41 = vpop.permute.xlu2 %5623 }
 0x72e   : > { %v5645_v36 = vsel %vm16222_vm4, %v5622_v6, %v5624_v41  ;;  %v5495_v6 = vsel %vm1082_vm8, %v8734_v47, %v16235_v10  ;;  %v5345_v47 = vsel %vm710_vm2, %v8724_v20, %v8725_v37  ;;  %vm16246_vm4 = vmmov %vm16234_vm14 }
 0x72f   : > { %7781 = vmatpush.msk.msrb.mxu2 %vm1529_vm11, %v5645_v36  ;;  %v5681_v36 = vsel %vm1529_vm11, %v5445_v45, %v5495_v6  ;;  %v16237_v45 = vunpack.i.h.bf16 %v13577_v5  ;;  %v16238_v6 = vunpack.i.h.bf16 %v13567_v44  ;;  %vm16247_vm14 = vmmov %vm16244_vm0 }
 0x730   : > { %8812 = vrot.lane.b32.xlu1 %v8796_v9, %s9003_s24  ;;  %v16236_v9 = vunpack.i.h.bf16 %v13503_v49 }
 0x731   : > { %5789 = vmatpush.msrb.mxu2 %v5693_v38 }
 0x732   : > { %v5344_v38 = vsel %vm710_vm2, %v16236_v9, %v8724_v20 }
 0x733   : > { %5790 = vmatpush.msrb.mxu2 %v5681_v36  ;;  %v5294_v36 = vsel %vm586_vm1, %v16238_v6, %v8744_v14 }
 0x734   : > { %v5656_v5 = vsel %vm1529_vm11, %v13342_v4, %v5294_v36 }
 0x735   : > { %v8738_v58 = vpop.permute.xlu2 %8737 }
 0x736   : > { %v8740_v12 = vunpack.i.h.bf16 %v8738_v58  ;;  %v8739_v0 = vunpack.i.l.bf16 %v8738_v58  ;;  %v5295_v58 = vsel %vm586_vm1, %v8744_v14, %v15832_v18 }
 0x737   : > { %v5657_v44 = vsel %vm1529_vm11, %v13445_v54, %v5295_v58  ;;  %v13724_v54 = vld [vmem:[%s15611_s5] sm:$0xf] }
 0x738   : > { %v5394_v10 = vsel %vm834_vm5, %v16237_v45, %v8739_v0  ;;  %v5395_v17 = vsel %vm834_vm5, %v8739_v0, %v8740_v12  ;;  %8817 = vrot.lane.b32.xlu1 %v8826_v46, %s9007_s28  ;;  %7778 = vmatmul.msk.f32.vlgmr.msrb.gmra.mxu0 %vm3252_vm15, %v13724_v54 }
 0x739   : > { %v5668_v49 = vsel %vm1529_vm11, %v5344_v38, %v5394_v10  ;;  %v5669_v20 = vsel %vm1529_vm11, %v5345_v47, %v5395_v17 }
 0x73a   : > { %5771 = vmatpush.msrb.mxu1 %v5668_v49  ;;  %5791 = vmatpush.msrb.mxu2 %v5669_v20 }
 0x73c   : > { %5772 = vmatpush.msrb.mxu1 %v5656_v5  ;;  %5792 = vmatpush.msrb.mxu2 %v5657_v44 }
 0x73d   : > { %v13710_v0 = vpop.permute.xlu2 %8757  ;;  %7782 = vmatmul.msk.f32.vlgmr.msrb.gmra.mxu2 %vm3252_vm15, %v13724_v54  ;;  %7780 = vmatmul.msk.f32.vlgmr.msrb.gmra.mxu1 %vm3252_vm15, %v13724_v54 }
 0x73e   : > { %v8759_v17 = vunpack.i.l.bf16 %v13710_v0 }
 0x740   : > { %8837 = vrot.lane.b32.xlu1 %v8841_v28, %s9008_s29 }
 0x745   : > { %v5628_v9 = vpop.permute.xlu2 %5627 }
 0x748   : > { %8847 = vrot.lane.b32.xlu1 %v8841_v28, %s9003_s24 }
 0x74d   : > { %v13736_v47 = vpop.permute.xlu2 %8762 }
 0x74e   : > { %v16249_v13 = vunpack.i.h.bf16 %v13736_v47 }
 0x750   : > { %v5223_v46 = vpop.permute.xlu0 %5222 }
 0x751   : > { %v13715_v14 = vsel %vm16239_vm6, %v13606_v52, %v5223_v46  ;;  %vm16250_vm6 = vmmov %vm16246_vm4 }
 0x752   : > { %5637 = vrot.lane.b32.xlu0 %v13715_v14, %s9009_s30  ;;  %v5264_v4 = vrot.slane %v13715_v14, 4 }
 0x754   : > { %5287 = vrot.lane.b32.xlu1 %v5264_v4, %s9003_s24 }
 0x755   : > { %v13740_v10 = vpop.permute.xlu2 %8792 }
 0x758   : > { %v5626_v52 = vpop.permute.xlu0 %5625 }
 0x759   : > { %v5646_v28 = vsel %vm16240_vm7, %v5624_v41, %v5626_v52  ;;  %v5647_v38 = vsel %vm16241_vm13, %v5626_v52, %v5628_v9  ;;  %v5346_v41 = vsel %vm710_vm2, %v8725_v37, %v8759_v17  ;;  %vm16256_vm7 = vmmov %vm16242_vm3 }
 0x75a   : > { %7783 = vmatpush.msk.msrb.mxu3 %vm1529_vm11, %v5646_v28  ;;  %7785 = vmatpush.msk.msra.mxu0 %vm1529_vm11, %v5647_v38  ;;  %vm16257_vm13 = vmmov %vm16242_vm3 }
 0x75d   : > { %v13749_v20 = vpop.permute.xlu2 %5631 }
 0x760   : > { %v13738_v45 = vpop.permute.xlu0 %8752 }
 0x765   : > { %v13787_v55 = vpop.permute.xlu2 %8797 }
 0x768   : > { %v13743_v6 = vpop.permute.xlu0 %8772 }
 0x769   : > { %v8774_v36 = vunpack.i.l.bf16 %v13743_v6 }
 0x76b   : > { %v5396_v58 = vsel %vm834_vm5, %v8740_v12, %v8774_v36  ;;  %v8764_v12 = vunpack.i.l.bf16 %v13736_v47 }
 0x76c   : > { %v5670_v49 = vsel %vm1529_vm11, %v5346_v41, %v5396_v58 }
 0x76d   : > { %v5597_v16 = vsel %vm16250_vm6, %v8764_v12, %v16249_v13  ;;  %vm16267_vm6 = vmmov %vm16256_vm7 }
 0x770   : > { %v5630_v5 = vpop.permute.xlu0 %5629 }
 0x771   : > { %v5648_v44 = vsel %vm16242_vm3, %v5628_v9, %v5630_v5  ;;  %v5649_v52 = vsel %vm16243_vm10, %v5630_v5, %v13749_v20  ;;  %vm16259_vm3 = vmmov %vm16246_vm4 }
 0x772   : > { %v5225_v28 = vpop.permute.xlu1 %5224  ;;  %7787 = vmatpush.msk.msra.mxu1 %vm1529_vm11, %v5648_v44  ;;  %7789 = vmatpush.msk.msra.mxu2 %vm1529_vm11, %v5649_v52  ;;  %v16245_v44 = vunpack.i.h.bf16 %v13622_v35  ;;  %vm16261_vm10 = vmmov %vm16259_vm3 }
 0x773   : > { %v13757_v38 = vsel %vm16244_vm0, %v5223_v46, %v5225_v28  ;;  %v13776_v18 = vsel %vm16247_vm14, %v5225_v28, 0.0  ;;  %v8754_v28 = vunpack.i.l.bf16 %v13738_v45  ;;  %v13820_v51 = vpop.permute.xlu2 %8827  ;;  %vm16264_vm0 = vmmov %vm16259_vm3 }
 0x774   : > { %v8861_v37 = vpack.i.bf16 %v13757_v38, %v13715_v14  ;;  %v5596_v52 = vsel %vm16246_vm4, %v16245_v44, %v8764_v12  ;;  %v5265_v13 = vrot.slane %v13757_v38, 4  ;;  %vm16265_vm4 = vmmov %vm16264_vm0 }
 0x775   : > { %vm16266_vm14 = vmmov %vm16256_vm7 }
 0x776   : > { %8862 = vrot.lane.b32.xlu2 %v8861_v37, %s9004_s25  ;;  %8857 = vrot.lane.b32.xlu0 %v8861_v37, %s9006_s27 }
 0x777   : > { %8852 = vrot.lane.b32.xlu1 %v8861_v37, %s9007_s28  ;;  %v16248_v37 = vunpack.i.h.bf16 %v13616_v26 }
 0x778   : > { %v13766_v41 = vpop.permute.xlu0 %8787 }
 0x77a   : > { %v13768_v58 = vpop.permute.xlu1 %8747 }
 0x77b   : > { %v15841_v46 = vunpack.i.h.bf16 %v13768_v58  ;;  %v8749_v5 = vunpack.i.l.bf16 %v13768_v58 }
 0x77d   : > { %v5546_v31 = vsel %vm1206_vm12, %v16248_v37, %v8749_v5  ;;  %v5547_v9 = vsel %vm1206_vm12, %v8749_v5, %v15841_v46  ;;  %v16253_v5 = vunpack.i.h.bf16 %v13738_v45 }
 0x77e   : > { %5639 = vrot.lane.b32.xlu2 %v13757_v38, %s9009_s30  ;;  %5641 = vrot.lane.b32.xlu0 %v13776_v18, %s9009_s30  ;;  %v5694_v26 = vsel %vm1529_vm11, %v5546_v31, %v5596_v52  ;;  %v5695_v35 = vsel %vm1529_vm11, %v5547_v9, %v5597_v16  ;;  %v8760_v9 = vunpack.i.h.bf16 %v13710_v0  ;;  %v8866_v52 = vpack.i.bf16 %v5265_v13, %v5264_v4 }
 0x77f   : > { %5541 = vrot.lane.b32.xlu1 %v13776_v18, %s9007_s28  ;;  %5809 = vmatpush.msrb.mxu3 %v5694_v26  ;;  %v16251_v26 = vunpack.i.h.bf16 %v13648_v25  ;;  %v5447_v61 = vsel %vm958_vm9, %v8754_v28, %v16253_v5  ;;  %v16254_v4 = vunpack.i.h.bf16 %v13743_v6 }
 0x780   : > { %5829 = vmatpush.msra.mxu0 %v5695_v35  ;;  %v13805_v16 = vpop.permute.xlu0 %8807  ;;  %v16252_v35 = vunpack.i.h.bf16 %v13640_v11 }
 0x781   : > { %v5446_v46 = vsel %vm958_vm9, %v16251_v26, %v8754_v28  ;;  %v5397_v26 = vsel %vm834_vm5, %v8774_v36, %v16254_v4  ;;  %v5347_v28 = vsel %vm710_vm2, %v8759_v17, %v8760_v9  ;;  %v5266_v36 = vrot.slane %v13776_v18, 4 }
 0x782   : > { %v13801_v44 = vpop.permute.xlu1 %8767  ;;  %v5671_v5 = vsel %vm1529_vm11, %v5347_v28, %v5397_v26 }
 0x783   : > { %v8770_v37 = vunpack.i.h.bf16 %v13801_v44  ;;  %v8769_v31 = vunpack.i.l.bf16 %v13801_v44 }
 0x785   : > { %v5496_v12 = vsel %vm1082_vm8, %v16252_v35, %v8769_v31  ;;  %v5497_v2 = vsel %vm1082_vm8, %v8769_v31, %v8770_v37 }
 0x786   : > { %5441 = vrot.lane.b32.xlu0 %v13776_v18, %s9006_s27  ;;  %8867 = vrot.lane.b32.xlu2 %v8866_v52, %s9010_s12  ;;  %v5682_v25 = vsel %vm1529_vm11, %v5446_v46, %v5496_v12  ;;  %v5683_v11 = vsel %vm1529_vm11, %v5447_v61, %v5497_v2  ;;  %v16255_v12 = vunpack.i.h.bf16 %v13677_v8  ;;  %v8799_v8 = vunpack.i.l.bf16 %v13787_v55 }
 0x787   : > { %8872 = vrot.lane.b32.xlu1 %v8866_v52, %s9008_s29  ;;  %5810 = vmatpush.msrb.mxu3 %v5682_v25 }
 0x788   : > { %5830 = vmatpush.msra.mxu0 %v5683_v11  ;;  %v5634_v46 = vpop.permute.xlu0 %5633  ;;  %v13854_v11 = vpop.permute.xlu2 %5635 }
 0x789   : > { %5811 = vmatpush.msrb.mxu3 %v5670_v49  ;;  %v5650_v4 = vsel %vm16256_vm7, %v13749_v20, %v5634_v46  ;;  %v16258_v20 = vunpack.i.h.bf16 %v13736_v47  ;;  %vm16268_vm7 = vmmov %vm16264_vm0 }
 0x78a   : > { %5831 = vmatpush.msra.mxu0 %v5671_v5  ;;  %v13835_v31 = vpop.permute.xlu1 %8777 }
 0x78b   : > { %v8780_v61 = vunpack.i.h.bf16 %v13835_v31  ;;  %v8779_v2 = vunpack.i.l.bf16 %v13835_v31  ;;  %v5598_v5 = vsel %vm16259_vm3, %v16258_v20, %v8799_v8  ;;  %v16262_v20 = vunpack.i.h.bf16 %v13738_v45  ;;  %vm16270_vm3 = vmmov %vm16267_vm6 }
 0x78d   : > { %v5296_v35 = vsel %vm586_vm1, %v16255_v12, %v8779_v2  ;;  %v5297_v17 = vsel %vm586_vm1, %v8779_v2, %v8780_v61  ;;  %v8881_v2 = vpack.i.bf16 %v5266_v36, %v5265_v13  ;;  %v16260_v12 = vunpack.i.h.bf16 %v13768_v58 }
 0x78e   : > { %8877 = vrot.lane.b32.xlu0 %v8866_v52, %s9005_s26  ;;  %5591 = vrot.lane.b32.xlu2 %v5266_v36, %s9010_s12  ;;  %v5658_v49 = vsel %vm1529_vm11, %v13441_v33, %v5296_v35  ;;  %v5659_v25 = vsel %vm1529_vm11, %v13497_v1, %v5297_v17  ;;  %v8800_v52 = vunpack.i.h.bf16 %v13787_v55  ;;  %v5651_v33 = vsel %vm16257_vm13, %v5634_v46, %v13854_v11  ;;  %vm16269_vm13 = vmmov %vm16264_vm0 }
 0x78f   : > { %5491 = vrot.lane.b32.xlu1 %v5266_v36, %s9008_s29  ;;  %5812 = vmatpush.msrb.mxu3 %v5658_v49  ;;  %v8790_v58 = vunpack.i.h.bf16 %v13766_v41  ;;  %v8789_v13 = vunpack.i.l.bf16 %v13766_v41 }
 0x790   : > { %5832 = vmatpush.msra.mxu0 %v5659_v25  ;;  %7784 = vmatmul.msk.f32.vlgmr.msrb.gmra.mxu3 %vm3252_vm15, %v13724_v54  ;;  %v5599_v17 = vsel %vm16261_vm10, %v8799_v8, %v8800_v52  ;;  %v8810_v25 = vunpack.i.h.bf16 %v13805_v16  ;;  %v8809_v8 = vunpack.i.l.bf16 %v13805_v16  ;;  %vm16271_vm10 = vmmov %vm16264_vm0 }
 0x791   : > { %7786 = vmatmul.msk.f32.vlgmr.msra.gmra.mxu0 %vm3252_vm15, %v13724_v54  ;;  %7791 = vmatpush.msk.msra.mxu3 %vm1529_vm11, %v5650_v4  ;;  %v8794_v4 = vunpack.i.l.bf16 %v13740_v10 }
 0x792   : > { %7793 = vmatpush.msk.msrb.mxu0 %vm1529_vm11, %v5651_v33  ;;  %v8783_v1 = vpop.permute.xlu1 %8782  ;;  %v5399_v45 = vsel %vm834_vm5, %v8809_v8, %v8810_v25 }
 0x793   : > { %v8785_v26 = vunpack.i.h.bf16 %v8783_v1  ;;  %v8784_v28 = vunpack.i.l.bf16 %v8783_v1  ;;  %v5348_v44 = vsel %vm710_vm2, %v8760_v9, %v8794_v4 }
 0x795   : > { %v5548_v35 = vsel %vm1206_vm12, %v16260_v12, %v8784_v28  ;;  %v5549_v46 = vsel %vm1206_vm12, %v8784_v28, %v8785_v26  ;;  %v5704_v28 = vld [vmem:[%s15612_s6] sm:$0xf] }
 0x796   : > { %5391 = vrot.lane.b32.xlu0 %v5266_v36, %s9005_s26  ;;  %5341 = vrot.lane.b32.xlu2 %v13776_v18, %s9004_s25  ;;  %v5696_v47 = vsel %vm1529_vm11, %v5548_v35, %v5598_v5  ;;  %v5697_v49 = vsel %vm1529_vm11, %v5549_v46, %v5599_v17  ;;  %v8795_v18 = vunpack.i.h.bf16 %v13740_v10  ;;  %v5448_v5 = vsel %vm958_vm9, %v16262_v20, %v8789_v13  ;;  %v13928_v20 = vpop.permute.xlu2 %8832 }
 0x797   : > { %8882 = vrot.lane.b32.xlu1 %v8881_v2, %s9003_s24  ;;  %5849 = vmatpush.msra.mxu1 %v5696_v47  ;;  %v5449_v2 = vsel %vm958_vm9, %v8789_v13, %v8790_v58  ;;  %v16263_v46 = vunpack.i.h.bf16 %v13743_v6  ;;  %v8835_v31 = vunpack.i.h.bf16 %v13928_v20 }
 0x798   : > { %5869 = vmatpush.msra.mxu2 %v5697_v49  ;;  %v5349_v6 = vsel %vm710_vm2, %v8794_v4, %v8795_v18 }
 0x799   : > { %v5398_v17 = vsel %vm834_vm5, %v16263_v46, %v8809_v8  ;;  %v5673_v13 = vsel %vm1529_vm11, %v5349_v6, %v5399_v45 }
 0x79a   : > { %v13887_v36 = vpop.permute.xlu1 %8802 }
 0x79b   : > { %v8805_v33 = vunpack.i.h.bf16 %v13887_v36  ;;  %v8804_v1 = vunpack.i.l.bf16 %v13887_v36 }
 0x79d   : > { %v5498_v12 = vsel %vm1082_vm8, %v8770_v37, %v8804_v1  ;;  %v5499_v35 = vsel %vm1082_vm8, %v8804_v1, %v8805_v33  ;;  %v5672_v37 = vsel %vm1529_vm11, %v5348_v44, %v5398_v17 }
 0x79e   : > { %5707 = vperm.xlu2 %8255, %v5704_v28   ;;  %v5684_v47 = vsel %vm1529_vm11, %v5448_v5, %v5498_v12  ;;  %v5685_v49 = vsel %vm1529_vm11, %v5449_v2, %v5499_v35  ;;  %v13922_v28 = vpop.permute.xlu0 %8822 }
 0x79f   : > { %5850 = vmatpush.msra.mxu1 %v5684_v47  ;;  %5870 = vmatpush.msra.mxu2 %v5685_v49  ;;  %v8825_v55 = vunpack.i.h.bf16 %v13922_v28 }
 0x7a1   : > { %5851 = vmatpush.msra.mxu1 %v5672_v37  ;;  %5871 = vmatpush.msra.mxu2 %v5673_v13  ;;  %v8830_v37 = vunpack.i.h.bf16 %v13820_v51  ;;  %v8829_v13 = vunpack.i.l.bf16 %v13820_v51 }
 0x7a2   : > { %v8813_v8 = vpop.permute.xlu1 %8812 }
 0x7a3   : > { %v8815_v36 = vunpack.i.h.bf16 %v8813_v8  ;;  %v8814_v1 = vunpack.i.l.bf16 %v8813_v8  ;;  %v5351_v16 = vsel %vm710_vm2, %v8829_v13, %v8830_v37 }
 0x7a5   : > { %v5298_v0 = vsel %vm586_vm1, %v8780_v61, %v8814_v1  ;;  %v5299_v9 = vsel %vm586_vm1, %v8814_v1, %v8815_v36  ;;  %v8834_v61 = vunpack.i.l.bf16 %v13928_v20 }
 0x7a6   : > { %v5660_v4 = vsel %vm1529_vm11, %v13492_v39, %v5298_v0  ;;  %v5661_v5 = vsel %vm1529_vm11, %v13550_v23, %v5299_v9  ;;  %v13954_v45 = vpop.permute.xlu0 %8842 }
 0x7a7   : > { %5852 = vmatpush.msra.mxu1 %v5660_v4  ;;  %5872 = vmatpush.msra.mxu2 %v5661_v5  ;;  %v5600_v35 = vsel %vm16264_vm0, %v8800_v52, %v8834_v61  ;;  %v5601_v17 = vsel %vm16265_vm4, %v8834_v61, %v8835_v31  ;;  %v8824_v52 = vunpack.i.l.bf16 %v13922_v28  ;;  %v8844_v44 = vunpack.i.l.bf16 %v13954_v45 }
 0x7a8   : > { %7788 = vmatmul.msk.f32.vlgmr.msra.gmra.mxu1 %vm3252_vm15, %v13724_v54  ;;  %7790 = vmatmul.msk.f32.vlgmr.msra.gmra.mxu2 %vm3252_vm15, %v13724_v54 }
 0x7a9   : > { %v5450_v0 = vsel %vm958_vm9, %v8790_v58, %v8824_v52  ;;  %v5451_v9 = vsel %vm958_vm9, %v8824_v52, %v8825_v55  ;;  %v5400_v61 = vsel %vm834_vm5, %v8810_v25, %v8844_v44 }
 0x7aa   : > { %v13940_v2 = vpop.permute.xlu1 %8817 }
 0x7ab   : > { %v8820_v12 = vunpack.i.h.bf16 %v13940_v2  ;;  %v8819_v39 = vunpack.i.l.bf16 %v13940_v2 }
 0x7ad   : > { %v5550_v23 = vsel %vm1206_vm12, %v8785_v26, %v8819_v39  ;;  %v5551_v46 = vsel %vm1206_vm12, %v8819_v39, %v8820_v12  ;;  %v8845_v26 = vunpack.i.h.bf16 %v13954_v45 }
 0x7ae   : > { %v5698_v47 = vsel %vm1529_vm11, %v5550_v23, %v5600_v35  ;;  %v5699_v49 = vsel %vm1529_vm11, %v5551_v46, %v5601_v17 }
 0x7af   : > { %5889 = vmatpush.msra.mxu3 %v5698_v47  ;;  %5909 = vmatpush.msrb.mxu0 %v5699_v49  ;;  %v5401_v41 = vsel %vm834_vm5, %v8844_v44, %v8845_v26 }
 0x7b0   : > { %v5675_v23 = vsel %vm1529_vm11, %v5351_v16, %v5401_v41 }
 0x7b2   : > { %v13962_v6 = vpop.permute.xlu1 %8837 }
 0x7b3   : > { %v8840_v8 = vunpack.i.h.bf16 %v13962_v6  ;;  %v8839_v1 = vunpack.i.l.bf16 %v13962_v6 }
 0x7b5   : > { %v5500_v4 = vsel %vm1082_vm8, %v8805_v33, %v8839_v1  ;;  %v5501_v5 = vsel %vm1082_vm8, %v8839_v1, %v8840_v8  ;;  %v5350_v33 = vsel %vm710_vm2, %v8795_v18, %v8829_v13 }
 0x7b6   : > { %v5686_v58 = vsel %vm1529_vm11, %v5450_v0, %v5500_v4  ;;  %v5687_v39 = vsel %vm1529_vm11, %v5451_v9, %v5501_v5  ;;  %v5674_v25 = vsel %vm1529_vm11, %v5350_v33, %v5400_v61 }
 0x7b7   : > { %5890 = vmatpush.msra.mxu3 %v5686_v58  ;;  %5910 = vmatpush.msrb.mxu0 %v5687_v39 }
 0x7b9   : > { %5891 = vmatpush.msra.mxu3 %v5674_v25  ;;  %5911 = vmatpush.msrb.mxu0 %v5675_v23 }
 0x7ba   : > { %v13994_v35 = vpop.permute.xlu1 %8847 }
 0x7bb   : > { %v8850_v46 = vunpack.i.h.bf16 %v13994_v35  ;;  %v8849_v17 = vunpack.i.l.bf16 %v13994_v35 }
 0x7bd   : > { %v5300_v10 = vsel %vm586_vm1, %v8815_v36, %v8849_v17  ;;  %v5301_v18 = vsel %vm586_vm1, %v8849_v17, %v8850_v46 }
 0x7be   : > { %v5662_v47 = vsel %vm1529_vm11, %v13545_v56, %v5300_v10  ;;  %v5663_v49 = vsel %vm1529_vm11, %v13610_v50, %v5301_v18 }
 0x7bf   : > { %5892 = vmatpush.msra.mxu3 %v5662_v47  ;;  %5912 = vmatpush.msrb.mxu0 %v5663_v49  ;;  %v5754_v47 = vpop.f32.mrf.mxu0 }
 0x7c0   : > { %7792 = vmatmul.msk.f32.vlgmr.msra.gmra.mxu3 %vm3252_vm15, %v13724_v54  ;;  %7794 = vmatmul.msk.f32.vlgmr.msrb.gmra.mxu0 %vm3252_vm15, %v13724_v54 }
 0x7c1   : > { %6013 = vmatpush.msra.mxu0 %v16200_v42 }
 0x7c3   : > { %6014 = vmatpush.msra.mxu0 %v16103_v22 }
 0x7c4   : > { %v5638_v36 = vpop.permute.xlu0 %5637 }
 0x7c5   : > { %6015 = vmatpush.msra.mxu0 %v16095_v24  ;;  %v5652_v56 = vsel %vm16266_vm14, %v13854_v11, %v5638_v36 }
 0x7c6   : > { %7795 = vmatpush.msk.msrb.mxu1 %vm1529_vm11, %v5652_v56  ;;  %v14034_v13 = vpop.permute.xlu1 %5287 }
 0x7c7   : > { %6016 = vmatpush.msra.mxu0 %v16090_v27 }
 0x7c9   : > { %6017 = vmatpush.msra.mxu0 %v16107_v29 }
 0x7cb   : > { %6018 = vmatpush.msra.mxu0 %v12431_v53 }
 0x7cd   : > { %6019 = vmatpush.msra.mxu0 %v12481_v3 }
 0x7cf   : > { %6020 = vmatpush.msra.mxu0 %v12502_v63 }
 0x7d0   : > { %v14021_v50 = vpop.permute.xlu2 %8862 }
 0x7d1   : > { %6021 = vmatpush.msra.mxu0 %v12522_v15  ;;  %v8865_v28 = vunpack.i.h.bf16 %v14021_v50 }
 0x7d3   : > { %6022 = vmatpush.msra.mxu0 %v12542_v19 }
 0x7d5   : > { %6023 = vmatpush.msra.mxu0 %v12561_v32 }
 0x7d7   : > { %6024 = vmatpush.msra.mxu0 %v12582_v62 }
 0x7d8   : > { %v5640_v11 = vpop.permute.xlu2 %5639 }
 0x7d9   : > { %v5653_v52 = vsel %vm16267_vm6, %v5638_v36, %v5640_v11  ;;  %6025 = vmatpush.msra.mxu0 %v16192_v60 }
 0x7da   : > { %7797 = vmatpush.msk.msrb.mxu2 %vm1529_vm11, %v5653_v52 }
 0x7db   : > { %6026 = vmatpush.msra.mxu0 %v16209_v34 }
 0x7dd   : > { %6027 = vmatpush.msra.mxu0 %v16212_v7 }
 0x7df   : > { %6028 = vmatpush.msra.mxu0 %v16214_v30 }
 0x7e0   : > { %v8868_v44 = vpop.permute.xlu2 %8867 }
 0x7e1   : > { %6094 = vmatpush.msrb.mxu0 %v16200_v42  ;;  %v8870_v1 = vunpack.i.h.bf16 %v8868_v44  ;;  %v8869_v0 = vunpack.i.l.bf16 %v8868_v44 }
 0x7e3   : > { %6095 = vmatpush.msrb.mxu0 %v16103_v22  ;;  %v5602_v39 = vsel %vm16268_vm7, %v8835_v31, %v8869_v0  ;;  %v5603_v16 = vsel %vm16269_vm13, %v8869_v0, %v8870_v1 }
 0x7e5   : > { %6096 = vmatpush.msrb.mxu0 %v16095_v24 }
 0x7e7   : > { %6097 = vmatpush.msrb.mxu0 %v16090_v27 }
 0x7e8   : > { %v5592_v9 = vpop.permute.xlu2 %5591  ;;  %v14040_v4 = vpop.permute.xlu0 %8857 }
 0x7e9   : > { %6098 = vmatpush.msrb.mxu0 %v16107_v29  ;;  %v8853_v5 = vpop.permute.xlu1 %8852  ;;  %v8860_v49 = vunpack.i.h.bf16 %v14040_v4  ;;  %v8859_v36 = vunpack.i.l.bf16 %v14040_v4 }
 0x7ea   : > { %v8855_v61 = vunpack.i.h.bf16 %v8853_v5  ;;  %v8854_v41 = vunpack.i.l.bf16 %v8853_v5  ;;  %v5794_v5 = vpop.f32.mrf.mxu2 }
 0x7eb   : > { %6099 = vmatpush.msrb.mxu0 %v12431_v53 }
 0x7ec   : > { %v5552_v58 = vsel %vm1206_vm12, %v8820_v12, %v8854_v41  ;;  %v5553_v33 = vsel %vm1206_vm12, %v8854_v41, %v8855_v61  ;;  %v5604_v12 = vsel %vm16271_vm10, %v8870_v1, %v5592_v9  ;;  %v5453_v41 = vsel %vm958_vm9, %v8859_v36, %v8860_v49 }
 0x7ed   : > { %6100 = vmatpush.msrb.mxu0 %v12481_v3  ;;  %v5700_v25 = vsel %vm1529_vm11, %v5552_v58, %v5602_v39  ;;  %v5701_v23 = vsel %vm1529_vm11, %v5553_v33, %v5603_v16 }
 0x7ee   : > { %5929 = vmatpush.msrb.mxu1 %v5700_v25  ;;  %5949 = vmatpush.msrb.mxu2 %v5701_v23  ;;  %v5302_v25 = vsel %vm586_vm1, %v8850_v46, %v14034_v13 }
 0x7ef   : > { %6101 = vmatpush.msrb.mxu0 %v12502_v63 }
 0x7f0   : > { %v14055_v17 = vpop.permute.xlu2 %5341  ;;  %v5642_v2 = vpop.permute.xlu0 %5641 }
 0x7f1   : > { %6102 = vmatpush.msrb.mxu0 %v12522_v15  ;;  %v5542_v20 = vpop.permute.xlu1 %5541  ;;  %v5654_v31 = vsel %vm16270_vm3, %v5640_v11, %v5642_v2 }
 0x7f2   : > { %v5554_v10 = vsel %vm1206_vm12, %v8855_v61, %v5542_v20  ;;  %7799 = vmatpush.msk.msrb.mxu3 %vm1529_vm11, %v5654_v31  ;;  %v5452_v61 = vsel %vm958_vm9, %v8825_v55, %v8859_v36  ;;  %v8864_v55 = vunpack.i.l.bf16 %v14021_v50 }
 0x7f3   : > { %6103 = vmatpush.msrb.mxu0 %v12542_v19  ;;  %v5702_v18 = vsel %vm1529_vm11, %v5554_v10, %v5604_v12 }
 0x7f4   : > { %5969 = vmatpush.msrb.mxu3 %v5702_v18  ;;  %v5352_v12 = vsel %vm710_vm2, %v8830_v37, %v8864_v55  ;;  %v5353_v10 = vsel %vm710_vm2, %v8864_v55, %v8865_v28  ;;  %v5664_v37 = vsel %vm1529_vm11, %v13614_v43, %v5302_v25  ;;  %v16285_v25 = vld [vmem:[#allocation5_spill] sm:$0xff] }
 0x7f5   : > { %6104 = vmatpush.msrb.mxu0 %v12561_v32 }
 0x7f7   : > { %6105 = vmatpush.msrb.mxu0 %v12582_v62 }
 0x7f8   : > { %v14068_v56 = vpop.permute.xlu2 %5707  ;;  %v5442_v11 = vpop.permute.xlu0 %5441 }
 0x7f9   : > { %6106 = vmatpush.msrb.mxu0 %v16192_v60  ;;  %v8873_v52 = vpop.permute.xlu1 %8872  ;;  %v5755_v44 = vadd.f32 %v5754_v47, %v14068_v56  ;;  %v5795_v6 = vadd.f32 %v5794_v5, %v14068_v56  ;;  %v5454_v50 = vsel %vm958_vm9, %v8860_v49, %v5442_v11 }
 0x7fa   : > { %v8875_v1 = vunpack.i.h.bf16 %v8873_v52  ;;  %v8874_v0 = vunpack.i.l.bf16 %v8873_v52 }
 0x7fb   : > { %vm5977_vm0 = vcmp.ge.f32.partialorder %v5755_v44, 0.0  ;;  %v5989_v9 = vmul.f32 0.01, %v5755_v44  ;;  %6107 = vmatpush.msrb.mxu0 %v16209_v34  ;;  %v5991_v18 = vmul.f32 0.01, %v5795_v6  ;;  %vm5979_vm4 = vcmp.ge.f32.partialorder %v5795_v6, 0.0 }
 0x7fc   : > { %v5502_v4 = vsel %vm1082_vm8, %v8840_v8, %v8874_v0  ;;  %v5503_v58 = vsel %vm1082_vm8, %v8874_v0, %v8875_v1 }
 0x7fd   : > { %v14081_v39 = vsel %vm5977_vm0, %v5755_v44, %v5989_v9  ;;  %6108 = vmatpush.msrb.mxu0 %v16212_v7  ;;  %v5688_v33 = vsel %vm1529_vm11, %v5452_v61, %v5502_v4  ;;  %v5689_v16 = vsel %vm1529_vm11, %v5453_v41, %v5503_v58  ;;  %v14113_v36 = vsel %vm5979_vm4, %v5795_v6, %v5991_v18  ;;  %v16276_v61 = vld [vmem:[#allocation3_spill] sm:$0xff]  ;;  %v16277_v4 = vld [vmem:[#allocation42_spill] sm:$0xff]  ;;  %v16283_v6 = vld [vmem:[#allocation48_spill] sm:$0xff] }
 0x7fe   : > { %5930 = vmatpush.msrb.mxu1 %v5688_v33  ;;  %5950 = vmatpush.msrb.mxu2 %v5689_v16  ;;  %16272 = vst [vmem:[#allocation39_spill] sm:$0xff] %v14113_v36  ;;  %v16279_v58 = vld [vmem:[#allocation6_spill] sm:$0xff]  ;;  %v16281_v16 = vld [vmem:[#allocation12_spill] sm:$0xff] }
 0x7ff   : > { %6109 = vmatpush.msrb.mxu0 %v16214_v30  ;;  %v16280_v33 = vld [vmem:[#allocation46_spill] sm:$0xff] }
 0x800   : > { %6029 = vmatmul.f32.vlgmr.msra.gmra.mxu0 %v14081_v39  ;;  %v8878_v8 = vpop.permute.xlu0 %8877  ;;  %v16292_v18 = vld [vmem:[#allocation54_spill] sm:$0xff] }
 0x801   : > { %6175 = vmatpush.msra.mxu0 %v16200_v42  ;;  %v5492_v23 = vpop.permute.xlu1 %5491  ;;  %v8880_v2 = vunpack.i.h.bf16 %v8878_v8  ;;  %v8879_v20 = vunpack.i.l.bf16 %v8878_v8  ;;  %v16284_v8 = vld [vmem:[#allocation23_spill] sm:$0xff] }
 0x802   : > { %v5504_v31 = vsel %vm1082_vm8, %v8875_v1, %v5492_v23  ;;  %v16286_v23 = vld [vmem:[#allocation50_spill] sm:$0xff] }
 0x803   : > { %6176 = vmatpush.msra.mxu0 %v16103_v22  ;;  %v5690_v35 = vsel %vm1529_vm11, %v5454_v50, %v5504_v31  ;;  %v5402_v46 = vsel %vm834_vm5, %v8845_v26, %v8879_v20  ;;  %v5403_v47 = vsel %vm834_vm5, %v8879_v20, %v8880_v2  ;;  %v5354_v26 = vsel %vm710_vm2, %v8865_v28, %v14055_v17  ;;  %v16282_v28 = vld [vmem:[#allocation17_spill] sm:$0xff]  ;;  %v16289_v31 = vld [vmem:[#allocation52_spill] sm:$0xff] }
 0x804   : > { %5970 = vmatpush.msrb.mxu3 %v5690_v35  ;;  %v5676_v49 = vsel %vm1529_vm11, %v5352_v12, %v5402_v46  ;;  %v5677_v51 = vsel %vm1529_vm11, %v5353_v10, %v5403_v47  ;;  %v16288_v20 = vld [vmem:[#allocation13_spill] sm:$0xff]  ;;  %v16290_v12 = vld [vmem:[#allocation11_spill] sm:$0xff]  ;;  %v5774_v35 = vpop.f32.mrf.mxu1  ;;  %v16293_v46 = vld [vmem:[#allocation18_spill] sm:$0xff] }
 0x805   : > { %6177 = vmatpush.msra.mxu0 %v16095_v24  ;;  %5931 = vmatpush.msrb.mxu1 %v5676_v49  ;;  %v16291_v10 = vld [vmem:[#allocation15_spill] sm:$0xff] }
 0x806   : > { %5951 = vmatpush.msrb.mxu2 %v5677_v51  ;;  %v16294_v47 = vld [vmem:[#allocation19_spill] sm:$0xff]  ;;  %v16296_v51 = vld [vmem:[#allocation56_spill] sm:$0xff] }
 0x807   : > { %6178 = vmatpush.msra.mxu0 %v16090_v27  ;;  %5932 = vmatpush.msrb.mxu1 %v5664_v37  ;;  %v16297_v37 = vld [vmem:[#allocation2_spill] sm:$0xff] }
 0x808   : > { %6110 = vmatmul.f32.vlgmr.msrb.gmra.mxu0 %v14113_v36  ;;  %v5392_v45 = vpop.permute.xlu0 %5391  ;;  %7796 = vmatmul.msk.f32.vlgmr.msrb.gmra.mxu1 %vm3252_vm15, %v13724_v54  ;;  %v16311_v36 = vld [vmem:[#allocation35_spill] sm:$0xff] }
 0x809   : > { %6179 = vmatpush.msra.mxu0 %v16107_v29  ;;  %v8883_v11 = vpop.permute.xlu1 %8882  ;;  %v5404_v52 = vsel %vm834_vm5, %v8880_v2, %v5392_v45  ;;  %6033 = vmatpush.msra.mxu1 %v16082_v59  ;;  %v16287_v2 = vld [vmem:[#allocation4_spill] sm:$0xff]  ;;  %v5775_v45 = vadd.f32 %v5774_v35, %v14068_v56 }
 0x80a   : > { %v8885_v43 = vunpack.i.h.bf16 %v8883_v11  ;;  %v8884_v44 = vunpack.i.l.bf16 %v8883_v11  ;;  %v5678_v1 = vsel %vm1529_vm11, %v5354_v26, %v5404_v52  ;;  %v16298_v26 = vld [vmem:[#allocation8_spill] sm:$0xff]  ;;  %v16299_v11 = vld [vmem:[#allocation58_spill] sm:$0xff] }
 0x80b   : > { %6180 = vmatpush.msra.mxu0 %v12431_v53  ;;  %6034 = vmatpush.msra.mxu1 %v16113_v48  ;;  %v16300_v52 = vld [vmem:[#allocation16_spill] sm:$0xff]  ;;  %vm5978_vm6 = vcmp.ge.f32.partialorder %v5775_v45, 0.0 }
 0x80c   : > { %5971 = vmatpush.msrb.mxu3 %v5678_v1  ;;  %v5303_v0 = vsel %vm586_vm1, %v14034_v13, %v8884_v44  ;;  %v5304_v17 = vsel %vm586_vm1, %v8884_v44, %v8885_v43  ;;  %v16273_v13 = vld [vmem:[#allocation14_spill] sm:$0xff]  ;;  %v16301_v43 = vld [vmem:[#allocation9_spill] sm:$0xff]  ;;  %v16302_v44 = vld [vmem:[#allocation60_spill] sm:$0xff] }
 0x80d   : > { %6181 = vmatpush.msra.mxu0 %v12481_v3  ;;  %6035 = vmatpush.msra.mxu1 %v16089_v57  ;;  %v5665_v9 = vsel %vm1529_vm11, %v13715_v14, %v5303_v0  ;;  %v5666_v5 = vsel %vm1529_vm11, %v13757_v38, %v5304_v17  ;;  %v16274_v14 = vld [vmem:[#allocation38_spill] sm:$0xff]  ;;  %v16275_v38 = vld [vmem:[#allocation7_spill] sm:$0xff]  ;;  %v5990_v0 = vmul.f32 0.01, %v5775_v45  ;;  %v16304_v17 = vld [vmem:[#allocation20_spill] sm:$0xff] }
 0x80e   : > { %5952 = vmatpush.msrb.mxu2 %v5665_v9  ;;  %5972 = vmatpush.msrb.mxu3 %v5666_v5  ;;  %v5834_v41 = vpop.f32.mrf.mxu0  ;;  %v16303_v1 = vld [vmem:[#allocation10_spill] sm:$0xff]  ;;  %v16306_v5 = vld [vmem:[#allocation27_spill] sm:$0xff] }
 0x80f   : > { %6182 = vmatpush.msra.mxu0 %v12502_v63  ;;  %7798 = vmatmul.msk.f32.vlgmr.msrb.gmra.mxu2 %vm3252_vm15, %v13724_v54  ;;  %v5835_v55 = vadd.f32 %v5834_v41, %v14068_v56  ;;  %v16305_v9 = vld [vmem:[#allocation62_spill] sm:$0xff]  ;;  %v16307_v41 = vld [vmem:[#allocation28_spill] sm:$0xff]  ;;  %v6002_v35 = vsel %vm5978_vm6, %v5775_v45, %v5990_v0  ;;  %v16314_v45 = vld [vmem:[#allocation41_spill] sm:$0xff] }
 0x810   : > { %7800 = vmatmul.msk.f32.vlgmr.msrb.gmra.mxu3 %vm3252_vm15, %v13724_v54  ;;  %6036 = vmatpush.msra.mxu1 %v16091_v40  ;;  %v16278_v54 = vld [vmem:[#allocation21_spill] sm:$0xff]  ;;  %v16315_v0 = vld [vmem:[#allocation43_spill] sm:$0xff] }
 0x811   : > { %6053 = vmatpush.msra.mxu2 %v11939_v21  ;;  %6073 = vmatpush.msra.mxu3 %v16273_v13  ;;  %v5993_v50 = vmul.f32 0.01, %v5835_v55  ;;  %vm5981_vm14 = vcmp.ge.f32.partialorder %v5835_v55, 0.0 }
 0x812   : > { %6183 = vmatpush.msra.mxu0 %v12522_v15  ;;  %6037 = vmatpush.msra.mxu1 %v16274_v14 }
 0x813   : > { %6054 = vmatpush.msra.mxu2 %v16275_v38  ;;  %6074 = vmatpush.msra.mxu3 %v16276_v61  ;;  %v14173_v49 = vsel %vm5981_vm14, %v5835_v55, %v5993_v50  ;;  %v16308_v55 = vld [vmem:[#allocation64_spill] sm:$0xff]  ;;  %v16309_v50 = vld [vmem:[#allocation31_spill] sm:$0xff] }
 0x814   : > { %6184 = vmatpush.msra.mxu0 %v12542_v19  ;;  %6038 = vmatpush.msra.mxu1 %v16277_v4  ;;  %16295 = vst [vmem:[#allocation30_spill] sm:$0xff] %v14173_v49 }
 0x815   : > { %6055 = vmatpush.msra.mxu2 %v16278_v54  ;;  %6075 = vmatpush.msra.mxu3 %v16279_v58 }
 0x816   : > { %6185 = vmatpush.msra.mxu0 %v12561_v32  ;;  %6039 = vmatpush.msra.mxu1 %v16280_v33 }
 0x817   : > { %6056 = vmatpush.msra.mxu2 %v16281_v16  ;;  %6076 = vmatpush.msra.mxu3 %v16282_v28 }
 0x818   : > { %6186 = vmatpush.msra.mxu0 %v12582_v62  ;;  %6040 = vmatpush.msra.mxu1 %v16283_v6 }
 0x819   : > { %6057 = vmatpush.msra.mxu2 %v16284_v8  ;;  %6077 = vmatpush.msra.mxu3 %v16285_v25 }
 0x81a   : > { %6187 = vmatpush.msra.mxu0 %v16192_v60  ;;  %6041 = vmatpush.msra.mxu1 %v16286_v23 }
 0x81b   : > { %6058 = vmatpush.msra.mxu2 %v16287_v2  ;;  %6078 = vmatpush.msra.mxu3 %v16288_v20 }
 0x81c   : > { %6188 = vmatpush.msra.mxu0 %v16209_v34  ;;  %6042 = vmatpush.msra.mxu1 %v16289_v31 }
 0x81d   : > { %6059 = vmatpush.msra.mxu2 %v16290_v12  ;;  %6079 = vmatpush.msra.mxu3 %v16291_v10 }
 0x81e   : > { %6189 = vmatpush.msra.mxu0 %v16212_v7  ;;  %6043 = vmatpush.msra.mxu1 %v16292_v18 }
 0x81f   : > { %6060 = vmatpush.msra.mxu2 %v16293_v46  ;;  %6080 = vmatpush.msra.mxu3 %v16294_v47 }
 0x820   : > { %6190 = vmatpush.msra.mxu0 %v16214_v30  ;;  %6044 = vmatpush.msra.mxu1 %v16296_v51 }
 0x821   : > { %6191 = vmatmul.f32.vlgmr.msra.gmra.mxu0 %v14173_v49  ;;  %6061 = vmatpush.msra.mxu2 %v16297_v37  ;;  %v16310_v49 = vld [vmem:[#allocation32_spill] sm:$0xff] }
 0x822   : > { %6256 = vmatpush.msrb.mxu0 %v16200_v42  ;;  %6081 = vmatpush.msra.mxu3 %v16298_v26 }
 0x823   : > { %6045 = vmatpush.msra.mxu1 %v16299_v11  ;;  %6062 = vmatpush.msra.mxu2 %v16300_v52 }
 0x824   : > { %6257 = vmatpush.msrb.mxu0 %v16103_v22  ;;  %6082 = vmatpush.msra.mxu3 %v16301_v43 }
 0x825   : > { %6046 = vmatpush.msra.mxu1 %v16302_v44  ;;  %6063 = vmatpush.msra.mxu2 %v16303_v1 }
 0x826   : > { %6258 = vmatpush.msrb.mxu0 %v16095_v24  ;;  %6083 = vmatpush.msra.mxu3 %v16304_v17 }
 0x827   : > { %6047 = vmatpush.msra.mxu1 %v16305_v9  ;;  %6064 = vmatpush.msra.mxu2 %v16306_v5  ;;  %v16312_v5 = vld [vmem:[#allocation36_spill] sm:$0xff] }
 0x828   : > { %6259 = vmatpush.msrb.mxu0 %v16090_v27  ;;  %6084 = vmatpush.msra.mxu3 %v16307_v41  ;;  %v16313_v27 = vld [vmem:[#allocation40_spill] sm:$0xff] }
 0x829   : > { %6048 = vmatpush.msra.mxu1 %v16308_v55  ;;  %6065 = vmatpush.msra.mxu2 %v16309_v50 }
 0x82a   : > { %6260 = vmatpush.msrb.mxu0 %v16107_v29  ;;  %6085 = vmatpush.msra.mxu3 %v16310_v49 }
 0x82b   : > { %6049 = vmatmul.f32.vlgmr.msra.gmra.mxu1 %v6002_v35  ;;  %6066 = vmatpush.msra.mxu2 %v16311_v36  ;;  %v16316_v36 = vld [vmem:[#allocation44_spill] sm:$0xff] }
 0x82c   : > { %6114 = vmatpush.msrb.mxu1 %v16082_v59  ;;  %6261 = vmatpush.msrb.mxu0 %v12431_v53 }
 0x82d   : > { %6086 = vmatpush.msra.mxu3 %v16312_v5  ;;  %6067 = vmatpush.msra.mxu2 %v16313_v27 }
 0x82e   : > { %6115 = vmatpush.msrb.mxu1 %v16113_v48  ;;  %6262 = vmatpush.msrb.mxu0 %v12481_v3 }
 0x82f   : > { %6087 = vmatpush.msra.mxu3 %v16314_v45  ;;  %6068 = vmatpush.msra.mxu2 %v16315_v0 }
 0x830   : > { %6116 = vmatpush.msrb.mxu1 %v16089_v57  ;;  %6263 = vmatpush.msrb.mxu0 %v12502_v63 }
 0x831   : > { %6088 = vmatpush.msra.mxu3 %v16316_v36  ;;  %6069 = vmatmul.f32.vlgmr.msra.gmra.mxu2 %v14081_v39  ;;  %v5874_v39 = vpop.f32.mrf.mxu2 }
 0x832   : > { %6089 = vmatmul.f32.vlgmr.msra.gmra.mxu3 %v6002_v35  ;;  %6117 = vmatpush.msrb.mxu1 %v16091_v40  ;;  %v5875_v35 = vadd.f32 %v5874_v39, %v14068_v56  ;;  %v5814_v39 = vpop.f32.mrf.mxu3 }
 0x833   : > { %6134 = vmatpush.msrb.mxu2 %v11939_v21  ;;  %6154 = vmatpush.msrb.mxu3 %v16273_v13 }
 0x834   : > { %6264 = vmatpush.msrb.mxu0 %v12522_v15  ;;  %6118 = vmatpush.msrb.mxu1 %v16274_v14  ;;  %vm5983_vm7 = vcmp.ge.f32.partialorder %v5875_v35, 0.0 }
 0x835   : > { %6135 = vmatpush.msrb.mxu2 %v16275_v38  ;;  %6155 = vmatpush.msrb.mxu3 %v16276_v61 }
 0x836   : > { %6265 = vmatpush.msrb.mxu0 %v12542_v19  ;;  %6119 = vmatpush.msrb.mxu1 %v16277_v4 }
 0x837   : > { %6136 = vmatpush.msrb.mxu2 %v16278_v54  ;;  %6156 = vmatpush.msrb.mxu3 %v16279_v58 }
 0x838   : > { %6266 = vmatpush.msrb.mxu0 %v12561_v32  ;;  %6120 = vmatpush.msrb.mxu1 %v16280_v33 }
 0x839   : > { %6137 = vmatpush.msrb.mxu2 %v16281_v16  ;;  %6157 = vmatpush.msrb.mxu3 %v16282_v28  ;;  %v5995_v16 = vmul.f32 0.01, %v5875_v35 }
 0x83a   : > { %6267 = vmatpush.msrb.mxu0 %v12582_v62  ;;  %6121 = vmatpush.msrb.mxu1 %v16283_v6 }
 0x83b   : > { %6138 = vmatpush.msrb.mxu2 %v16284_v8  ;;  %6158 = vmatpush.msrb.mxu3 %v16285_v25 }
 0x83c   : > { %6268 = vmatpush.msrb.mxu0 %v16192_v60  ;;  %6122 = vmatpush.msrb.mxu1 %v16286_v23 }
 0x83d   : > { %6139 = vmatpush.msrb.mxu2 %v16287_v2  ;;  %6159 = vmatpush.msrb.mxu3 %v16288_v20  ;;  %v14243_v20 = vsel %vm5983_vm7, %v5875_v35, %v5995_v16  ;;  %v16318_v35 = vld [vmem:[#allocation27_spill] sm:$0xff]  ;;  %vm16334_vm7 = vcmask 31744  }
 0x83e   : > { %6269 = vmatpush.msrb.mxu0 %v16209_v34  ;;  %6123 = vmatpush.msrb.mxu1 %v16289_v31  ;;  %16317 = vst [vmem:[#allocation34_spill] sm:$0xff] %v14243_v20 }
 0x83f   : > { %6140 = vmatpush.msrb.mxu2 %v16290_v12  ;;  %6160 = vmatpush.msrb.mxu3 %v16291_v10  ;;  %v5815_v10 = vadd.f32 %v5814_v39, %v14068_v56  ;;  %v16319_v39 = vld [vmem:[#allocation33_spill] sm:$0xff] }
 0x840   : > { %6270 = vmatpush.msrb.mxu0 %v16212_v7  ;;  %6124 = vmatpush.msrb.mxu1 %v16292_v18 }
 0x841   : > { %6141 = vmatpush.msrb.mxu2 %v16293_v46  ;;  %6161 = vmatpush.msrb.mxu3 %v16294_v47  ;;  %v5992_v16 = vmul.f32 0.01, %v5815_v10  ;;  %vm5980_vm13 = vcmp.ge.f32.partialorder %v5815_v10, 0.0 }
 0x842   : > { %6271 = vmatpush.msrb.mxu0 %v16214_v30  ;;  %6125 = vmatpush.msrb.mxu1 %v16296_v51 }
 0x843   : > { %6272 = vmatmul.f32.vlgmr.msrb.gmra.mxu0 %v14243_v20  ;;  %6142 = vmatpush.msrb.mxu2 %v16297_v37  ;;  %v6004_v20 = vsel %vm5980_vm13, %v5815_v10, %v5992_v16  ;;  %v16321_v10 = vld [vmem:[#allocation39_spill] sm:$0xff]  ;;  %v5914_v16 = vpop.f32.mrf.mxu0  ;;  %vm16335_vm13 = vmmov %vm16334_vm7 }
 0x844   : > { %6337 = vmatpush.msra.mxu0 %v16200_v42  ;;  %6162 = vmatpush.msrb.mxu3 %v16298_v26 }
 0x845   : > { %6126 = vmatpush.msrb.mxu1 %v16299_v11  ;;  %6143 = vmatpush.msrb.mxu2 %v16300_v52 }
 0x846   : > { %6338 = vmatpush.msra.mxu0 %v16103_v22  ;;  %6163 = vmatpush.msrb.mxu3 %v16301_v43 }
 0x847   : > { %6127 = vmatpush.msrb.mxu1 %v16302_v44  ;;  %6144 = vmatpush.msrb.mxu2 %v16303_v1 }
 0x848   : > { %6339 = vmatpush.msra.mxu0 %v16095_v24  ;;  %6164 = vmatpush.msrb.mxu3 %v16304_v17  ;;  %v16320_v24 = vld [vmem:[#allocation35_spill] sm:$0xff] }
 0x849   : > { %6128 = vmatpush.msrb.mxu1 %v16305_v9  ;;  %6145 = vmatpush.msrb.mxu2 %v16318_v35 }
 0x84a   : > { %6340 = vmatpush.msra.mxu0 %v16319_v39  ;;  %6165 = vmatpush.msrb.mxu3 %v16307_v41 }
 0x84b   : > { %6129 = vmatpush.msrb.mxu1 %v16308_v55  ;;  %6146 = vmatpush.msrb.mxu2 %v16309_v50 }
 0x84c   : > { %6341 = vmatpush.msra.mxu0 %v16107_v29  ;;  %6166 = vmatpush.msrb.mxu3 %v16310_v49 }
 0x84d   : > { %6130 = vmatmul.f32.vlgmr.msrb.gmra.mxu1 %v6004_v20  ;;  %6147 = vmatpush.msrb.mxu2 %v16320_v24 }
 0x84e   : > { %6195 = vmatpush.msra.mxu1 %v16082_v59  ;;  %6342 = vmatpush.msra.mxu0 %v12431_v53 }
 0x84f   : > { %6167 = vmatpush.msrb.mxu3 %v16312_v5  ;;  %6148 = vmatpush.msrb.mxu2 %v16313_v27 }
 0x850   : > { %6196 = vmatpush.msra.mxu1 %v16113_v48  ;;  %6343 = vmatpush.msra.mxu0 %v12481_v3 }
 0x851   : > { %6168 = vmatpush.msrb.mxu3 %v16314_v45  ;;  %6149 = vmatpush.msrb.mxu2 %v16315_v0 }
 0x852   : > { %6197 = vmatpush.msra.mxu1 %v16089_v57  ;;  %6344 = vmatpush.msra.mxu0 %v12502_v63 }
 0x853   : > { %6169 = vmatpush.msrb.mxu3 %v16316_v36  ;;  %6150 = vmatmul.f32.vlgmr.msrb.gmra.mxu2 %v16321_v10  ;;  %v5915_v10 = vadd.f32 %v5914_v16, %v14068_v56  ;;  %v5854_v16 = vpop.f32.mrf.mxu1 }
 0x854   : > { %6170 = vmatmul.f32.vlgmr.msrb.gmra.mxu3 %v6004_v20  ;;  %6198 = vmatpush.msra.mxu1 %v16091_v40  ;;  %v16322_v20 = vld [vmem:[#allocation12_spill] sm:$0xff] }
 0x855   : > { %6215 = vmatpush.msra.mxu2 %v11939_v21  ;;  %6235 = vmatpush.msra.mxu3 %v16273_v13  ;;  %vm5985_vm3 = vcmp.ge.f32.partialorder %v5915_v10, 0.0 }
 0x856   : > { %6345 = vmatpush.msra.mxu0 %v12522_v15  ;;  %6199 = vmatpush.msra.mxu1 %v16274_v14 }
 0x857   : > { %6216 = vmatpush.msra.mxu2 %v16275_v38  ;;  %6236 = vmatpush.msra.mxu3 %v16276_v61 }
 0x858   : > { %6346 = vmatpush.msra.mxu0 %v12542_v19  ;;  %6200 = vmatpush.msra.mxu1 %v16277_v4  ;;  %v5997_v19 = vmul.f32 0.01, %v5915_v10 }
 0x859   : > { %6217 = vmatpush.msra.mxu2 %v16278_v54  ;;  %6237 = vmatpush.msra.mxu3 %v16279_v58 }
 0x85a   : > { %6347 = vmatpush.msra.mxu0 %v12561_v32  ;;  %6201 = vmatpush.msra.mxu1 %v16280_v33  ;;  %v16323_v32 = vld [vmem:[#allocation13_spill] sm:$0xff] }
 0x85b   : > { %6218 = vmatpush.msra.mxu2 %v16322_v20  ;;  %6238 = vmatpush.msra.mxu3 %v16282_v28 }
 0x85c   : > { %6348 = vmatpush.msra.mxu0 %v12582_v62  ;;  %6202 = vmatpush.msra.mxu1 %v16283_v6  ;;  %v16324_v62 = vld [vmem:[#allocation15_spill] sm:$0xff] }
 0x85d   : > { %6219 = vmatpush.msra.mxu2 %v16284_v8  ;;  %6239 = vmatpush.msra.mxu3 %v16285_v25 }
 0x85e   : > { %6349 = vmatpush.msra.mxu0 %v16192_v60  ;;  %6203 = vmatpush.msra.mxu1 %v16286_v23  ;;  %v5855_v60 = vadd.f32 %v5854_v16, %v14068_v56  ;;  %v16328_v16 = vld [vmem:[#allocation53_spill] sm:$0xff] }
 0x85f   : > { %6220 = vmatpush.msra.mxu2 %v16287_v2  ;;  %6240 = vmatpush.msra.mxu3 %v16323_v32  ;;  %v14314_v32 = vsel %vm5985_vm3, %v5915_v10, %v5997_v19  ;;  %v16325_v19 = vld [vmem:[#allocation29_spill] sm:$0xff]  ;;  %vm16336_vm3 = vmmov %vm16334_vm7 }
 0x860   : > { %6350 = vmatpush.msra.mxu0 %v16209_v34  ;;  %6204 = vmatpush.msra.mxu1 %v16289_v31  ;;  %vm5982_vm10 = vcmp.ge.f32.partialorder %v5855_v60, 0.0 }
 0x861   : > { %6221 = vmatpush.msra.mxu2 %v16290_v12  ;;  %6241 = vmatpush.msra.mxu3 %v16324_v62 }
 0x862   : > { %6351 = vmatpush.msra.mxu0 %v16212_v7  ;;  %6205 = vmatpush.msra.mxu1 %v16292_v18  ;;  %v5994_v7 = vmul.f32 0.01, %v5855_v60 }
 0x863   : > { %6222 = vmatpush.msra.mxu2 %v16293_v46  ;;  %6242 = vmatpush.msra.mxu3 %v16294_v47 }
 0x864   : > { %6352 = vmatpush.msra.mxu0 %v16214_v30  ;;  %6206 = vmatpush.msra.mxu1 %v16296_v51  ;;  %v6006_v10 = vsel %vm5982_vm10, %v5855_v60, %v5994_v7  ;;  %v16326_v7 = vld [vmem:[#allocation30_spill] sm:$0xff]  ;;  %v16327_v60 = vld [vmem:[#allocation51_spill] sm:$0xff]  ;;  %vm16337_vm10 = vmmov %vm16336_vm3 }
 0x865   : > { %6353 = vmatmul.f32.vlgmr.msra.gmra.mxu0 %v14314_v32  ;;  %6223 = vmatpush.msra.mxu2 %v16297_v37 }
 0x866   : > { %6243 = vmatpush.msra.mxu3 %v16298_v26  ;;  %6207 = vmatpush.msra.mxu1 %v16299_v11 }
 0x867   : > { %6224 = vmatpush.msra.mxu2 %v16300_v52  ;;  %6418 = vmatpush.msrb.mxu0 %v16200_v42 }
 0x868   : > { %6244 = vmatpush.msra.mxu3 %v16301_v43  ;;  %6208 = vmatpush.msra.mxu1 %v16302_v44 }
 0x869   : > { %6225 = vmatpush.msra.mxu2 %v16303_v1  ;;  %6419 = vmatpush.msrb.mxu0 %v16103_v22 }
 0x86a   : > { %6245 = vmatpush.msra.mxu3 %v16304_v17  ;;  %6209 = vmatpush.msra.mxu1 %v16305_v9 }
 0x86b   : > { %6226 = vmatpush.msra.mxu2 %v16318_v35  ;;  %6420 = vmatpush.msrb.mxu0 %v16325_v19 }
 0x86c   : > { %6246 = vmatpush.msra.mxu3 %v16307_v41  ;;  %6210 = vmatpush.msra.mxu1 %v16308_v55 }
 0x86d   : > { %6227 = vmatpush.msra.mxu2 %v16309_v50  ;;  %6211 = vmatmul.f32.vlgmr.msra.gmra.mxu1 %v6006_v10 }
 0x86e   : > { %6247 = vmatpush.msra.mxu3 %v16310_v49  ;;  %6276 = vmatpush.msrb.mxu1 %v16082_v59 }
 0x86f   : > { %6228 = vmatpush.msra.mxu2 %v16320_v24  ;;  %6421 = vmatpush.msrb.mxu0 %v16319_v39 }
 0x870   : > { %6248 = vmatpush.msra.mxu3 %v16312_v5  ;;  %6277 = vmatpush.msrb.mxu1 %v16113_v48 }
 0x871   : > { %6229 = vmatpush.msra.mxu2 %v16313_v27  ;;  %6422 = vmatpush.msrb.mxu0 %v16107_v29 }
 0x872   : > { %6249 = vmatpush.msra.mxu3 %v16314_v45  ;;  %6278 = vmatpush.msrb.mxu1 %v16089_v57 }
 0x873   : > { %6230 = vmatpush.msra.mxu2 %v16315_v0  ;;  %6423 = vmatpush.msrb.mxu0 %v12431_v53 }
 0x874   : > { %6250 = vmatpush.msra.mxu3 %v16316_v36  ;;  %6231 = vmatmul.f32.vlgmr.msra.gmra.mxu2 %v16326_v7  ;;  %v16330_v7 = vld [vmem:[#allocation55_spill] sm:$0xff] }
 0x875   : > { %6251 = vmatmul.f32.vlgmr.msra.gmra.mxu3 %v6006_v10  ;;  %6279 = vmatpush.msrb.mxu1 %v16091_v40  ;;  %v16329_v10 = vld [vmem:[#allocation13_spill] sm:$0xff] }
 0x876   : > { %6296 = vmatpush.msrb.mxu2 %v11939_v21  ;;  %6316 = vmatpush.msrb.mxu3 %v16273_v13 }
 0x877   : > { %6280 = vmatpush.msrb.mxu1 %v16274_v14  ;;  %6424 = vmatpush.msrb.mxu0 %v12481_v3 }
 0x878   : > { %6297 = vmatpush.msrb.mxu2 %v16275_v38  ;;  %6317 = vmatpush.msrb.mxu3 %v16276_v61 }
 0x879   : > { %6281 = vmatpush.msrb.mxu1 %v16277_v4  ;;  %6425 = vmatpush.msrb.mxu0 %v12502_v63 }
 0x87a   : > { %6298 = vmatpush.msrb.mxu2 %v16278_v54  ;;  %6318 = vmatpush.msrb.mxu3 %v16279_v58 }
 0x87b   : > { %6282 = vmatpush.msrb.mxu1 %v16280_v33  ;;  %6426 = vmatpush.msrb.mxu0 %v12522_v15  ;;  %v16331_v15 = vld [vmem:[#allocation57_spill] sm:$0xff] }
 0x87c   : > { %6299 = vmatpush.msrb.mxu2 %v16322_v20  ;;  %6319 = vmatpush.msrb.mxu3 %v16282_v28 }
 0x87d   : > { %6283 = vmatpush.msrb.mxu1 %v16283_v6  ;;  %6427 = vmatpush.msrb.mxu0 %v16327_v60  ;;  %v5894_v60 = vpop.f32.mrf.mxu3 }
 0x87e   : > { %6300 = vmatpush.msrb.mxu2 %v16284_v8  ;;  %6320 = vmatpush.msrb.mxu3 %v16285_v25 }
 0x87f   : > { %6284 = vmatpush.msrb.mxu1 %v16286_v23  ;;  %6428 = vmatpush.msrb.mxu0 %v16328_v16  ;;  %v5895_v16 = vadd.f32 %v5894_v60, %v14068_v56 }
 0x880   : > { %6301 = vmatpush.msrb.mxu2 %v16287_v2  ;;  %6321 = vmatpush.msrb.mxu3 %v16329_v10 }
 0x881   : > { %6285 = vmatpush.msrb.mxu1 %v16289_v31  ;;  %6429 = vmatpush.msrb.mxu0 %v16330_v7  ;;  %v16332_v7 = vld [vmem:[#allocation61_spill] sm:$0xff]  ;;  %vm5984_vm0 = vcmp.ge.f32.partialorder %v5895_v16, 0.0 }
 0x882   : > { %6302 = vmatpush.msrb.mxu2 %v16290_v12  ;;  %6322 = vmatpush.msrb.mxu3 %v16324_v62 }
 0x883   : > { %6286 = vmatpush.msrb.mxu1 %v16292_v18  ;;  %6430 = vmatpush.msrb.mxu0 %v16331_v15  ;;  %v5996_v15 = vmul.f32 0.01, %v5895_v16 }
 0x884   : > { %6303 = vmatpush.msrb.mxu2 %v16293_v46  ;;  %6323 = vmatpush.msrb.mxu3 %v16294_v47 }
 0x885   : > { %6287 = vmatpush.msrb.mxu1 %v16296_v51  ;;  %6431 = vmatpush.msrb.mxu0 %v16209_v34  ;;  %v6008_v60 = vsel %vm5984_vm0, %v5895_v16, %v5996_v15  ;;  %v16333_v16 = vld [vmem:[#allocation34_spill] sm:$0xff]  ;;  %vm16338_vm0 = vmmov %vm16336_vm3 }
 0x886   : > { %6304 = vmatpush.msrb.mxu2 %v16297_v37  ;;  %6324 = vmatpush.msrb.mxu3 %v16298_v26 }
 0x887   : > { %6288 = vmatpush.msrb.mxu1 %v16299_v11  ;;  %6432 = vmatpush.msrb.mxu0 %v16332_v7 }
 0x888   : > { %6305 = vmatpush.msrb.mxu2 %v16300_v52  ;;  %6325 = vmatpush.msrb.mxu3 %v16301_v43 }
 0x889   : > { %6289 = vmatpush.msrb.mxu1 %v16302_v44  ;;  %6433 = vmatpush.msrb.mxu0 %v16214_v30 }
 0x88a   : > { %6306 = vmatpush.msrb.mxu2 %v16303_v1  ;;  %6326 = vmatpush.msrb.mxu3 %v16304_v17 }
 0x88b   : > { %6290 = vmatpush.msrb.mxu1 %v16305_v9 }
 0x88c   : > { %6307 = vmatpush.msrb.mxu2 %v16318_v35  ;;  %6327 = vmatpush.msrb.mxu3 %v16307_v41 }
 0x88d   : > { %6291 = vmatpush.msrb.mxu1 %v16308_v55 }
 0x88e   : > { %6308 = vmatpush.msrb.mxu2 %v16309_v50  ;;  %6328 = vmatpush.msrb.mxu3 %v16310_v49 }
 0x88f   : > { %6292 = vmatmul.f32.vlgmr.msrb.gmra.mxu1 %v6008_v60 }
 0x890   : > { %6357 = vmatpush.msra.mxu1 %v16082_v59  ;;  %6309 = vmatpush.msrb.mxu2 %v16320_v24 }
 0x891   : > { %6329 = vmatpush.msrb.mxu3 %v16312_v5 }
 0x892   : > { %6358 = vmatpush.msra.mxu1 %v16113_v48  ;;  %6310 = vmatpush.msrb.mxu2 %v16313_v27  ;;  %v5954_v30 = vpop.f32.mrf.mxu2 }
 0x893   : > { %6330 = vmatpush.msrb.mxu3 %v16314_v45  ;;  %v5955_v15 = vadd.f32 %v5954_v30, %v14068_v56  ;;  %v5934_v30 = vpop.f32.mrf.mxu1 }
 0x894   : > { %6359 = vmatpush.msra.mxu1 %v16089_v57  ;;  %6311 = vmatpush.msrb.mxu2 %v16315_v0 }
 0x895   : > { %6331 = vmatpush.msrb.mxu3 %v16316_v36  ;;  %6312 = vmatmul.f32.vlgmr.msrb.gmra.mxu2 %v16333_v16  ;;  %vm5987_vm4 = vcmp.ge.f32.partialorder %v5955_v15, 0.0  ;;  %v5999_v7 = vmul.f32 0.01, %v5955_v15 }
 0x896   : > { %6332 = vmatmul.f32.vlgmr.msrb.gmra.mxu3 %v6008_v60  ;;  %6360 = vmatpush.msra.mxu1 %v16091_v40 }
 0x897   : > { %6377 = vmatpush.msra.mxu2 %v11939_v21  ;;  %6397 = vmatpush.msra.mxu3 %v16273_v13  ;;  %v14413_v34 = vsel %vm5987_vm4, %v5955_v15, %v5999_v7  ;;  %v5935_v7 = vadd.f32 %v5934_v30, %v14068_v56  ;;  %v5974_v15 = vpop.f32.mrf.mxu3  ;;  %vm16339_vm4 = vmmov %vm16338_vm0 }
 0x898   : > { %6361 = vmatpush.msra.mxu1 %v16274_v14  ;;  %6434 = vmatmul.f32.vlgmr.msrb.gmra.mxu0 %v14413_v34 }
 0x899   : > { %6378 = vmatpush.msra.mxu2 %v16275_v38  ;;  %6398 = vmatpush.msra.mxu3 %v16276_v61  ;;  %v5998_v60 = vmul.f32 0.01, %v5935_v7  ;;  %vm5986_vm14 = vcmp.ge.f32.partialorder %v5935_v7, 0.0 }
 0x89a   : > { %6362 = vmatpush.msra.mxu1 %v16277_v4 }
 0x89b   : > { %6379 = vmatpush.msra.mxu2 %v16278_v54  ;;  %6399 = vmatpush.msra.mxu3 %v16279_v58  ;;  %v6010_v16 = vsel %vm5986_vm14, %v5935_v7, %v5998_v60  ;;  %v6030_v7 = vpop.f32.mrf.mxu0  ;;  %vm16340_vm14 = vcmask 982016  }
 0x89c   : > { %6363 = vmatpush.msra.mxu1 %v16280_v33 }
 0x89d   : > { %6380 = vmatpush.msra.mxu2 %v16322_v20  ;;  %6400 = vmatpush.msra.mxu3 %v16282_v28 }
 0x89e   : > { %6364 = vmatpush.msra.mxu1 %v16283_v6 }
 0x89f   : > { %6381 = vmatpush.msra.mxu2 %v16284_v8  ;;  %6401 = vmatpush.msra.mxu3 %v16285_v25 }
 0x8a0   : > { %6365 = vmatpush.msra.mxu1 %v16286_v23 }
 0x8a1   : > { %6382 = vmatpush.msra.mxu2 %v16287_v2  ;;  %6402 = vmatpush.msra.mxu3 %v16329_v10 }
 0x8a2   : > { %6366 = vmatpush.msra.mxu1 %v16289_v31 }
 0x8a3   : > { %6383 = vmatpush.msra.mxu2 %v16290_v12  ;;  %6403 = vmatpush.msra.mxu3 %v16324_v62 }
 0x8a4   : > { %6367 = vmatpush.msra.mxu1 %v16292_v18 }
 0x8a5   : > { %6384 = vmatpush.msra.mxu2 %v16293_v46  ;;  %6404 = vmatpush.msra.mxu3 %v16294_v47 }
 0x8a6   : > { %6368 = vmatpush.msra.mxu1 %v16296_v51 }
 0x8a7   : > { %6385 = vmatpush.msra.mxu2 %v16297_v37  ;;  %6405 = vmatpush.msra.mxu3 %v16298_v26 }
 0x8a8   : > { %6369 = vmatpush.msra.mxu1 %v16299_v11  ;;  %v6050_v30 = vpop.f32.mrf.mxu1 }
 0x8a9   : > { %6386 = vmatpush.msra.mxu2 %v16300_v52  ;;  %6406 = vmatpush.msra.mxu3 %v16301_v43  ;;  %v6051_v3 = vadd.f32 %v6050_v30, %v6030_v7 }
 0x8aa   : > { %6370 = vmatpush.msra.mxu1 %v16302_v44 }
 0x8ab   : > { %6387 = vmatpush.msra.mxu2 %v16303_v1  ;;  %6407 = vmatpush.msra.mxu3 %v16304_v17 }
 0x8ac   : > { %6371 = vmatpush.msra.mxu1 %v16305_v9 }
 0x8ad   : > { %6388 = vmatpush.msra.mxu2 %v16318_v35  ;;  %6408 = vmatpush.msra.mxu3 %v16307_v41 }
 0x8ae   : > { %6372 = vmatpush.msra.mxu1 %v16308_v55 }
 0x8af   : > { %6389 = vmatpush.msra.mxu2 %v16309_v50  ;;  %6409 = vmatpush.msra.mxu3 %v16310_v49 }
 0x8b0   : > { %6373 = vmatmul.f32.vlgmr.msra.gmra.mxu1 %v6010_v16 }
 0x8b1   : > { %6438 = vmatpush.msrb.mxu1 %v16082_v59  ;;  %6390 = vmatpush.msra.mxu2 %v16320_v24 }
 0x8b2   : > { %6410 = vmatpush.msra.mxu3 %v16312_v5 }
 0x8b3   : > { %6439 = vmatpush.msrb.mxu1 %v16113_v48  ;;  %6391 = vmatpush.msra.mxu2 %v16313_v27 }
 0x8b4   : > { %6411 = vmatpush.msra.mxu3 %v16314_v45  ;;  %v6070_v63 = vpop.f32.mrf.mxu2 }
 0x8b5   : > { %6440 = vmatpush.msrb.mxu1 %v16089_v57  ;;  %6392 = vmatpush.msra.mxu2 %v16315_v0  ;;  %v6090_v60 = vpop.f32.mrf.mxu3 }
 0x8b6   : > { %6412 = vmatpush.msra.mxu3 %v16316_v36  ;;  %6393 = vmatmul.f32.vlgmr.msra.gmra.mxu2 %v14314_v32  ;;  %v6091_v59 = vadd.f32 %v6090_v60, %v6070_v63 }
 0x8b7   : > { %6413 = vmatmul.f32.vlgmr.msra.gmra.mxu3 %v6010_v16  ;;  %6441 = vmatpush.msrb.mxu1 %v16091_v40 }
 0x8b8   : > { %6458 = vmatpush.msrb.mxu2 %v11939_v21  ;;  %6478 = vmatpush.msrb.mxu3 %v16273_v13  ;;  %v6093_v48 = vmax.f32 %v6051_v3, %v6091_v59  ;;  %v5975_v3 = vadd.f32 %v5974_v15, %v14068_v56  ;;  %v6111_v56 = vpop.f32.mrf.mxu0 }
 0x8b9   : > { %6442 = vmatpush.msrb.mxu1 %v16274_v14 }
 0x8ba   : > { %6459 = vmatpush.msrb.mxu2 %v16275_v38  ;;  %6479 = vmatpush.msrb.mxu3 %v16276_v61  ;;  %v6000_v63 = vmul.f32 0.01, %v5975_v3  ;;  %vm5988_vm6 = vcmp.ge.f32.partialorder %v5975_v3, 0.0 }
 0x8bb   : > { %6443 = vmatpush.msrb.mxu1 %v16277_v4  ;;  %6505 = vrot.lane.b32.xlu0 %v6093_v48, %s9002_s23 }
 0x8bc   : > { %6460 = vmatpush.msrb.mxu2 %v16278_v54  ;;  %6480 = vmatpush.msrb.mxu3 %v16279_v58  ;;  %v6012_v32 = vsel %vm5988_vm6, %v5975_v3, %v6000_v63  ;;  %vm16341_vm6 = vmmov %vm16338_vm0 }
 0x8bd   : > { %6444 = vmatpush.msrb.mxu1 %v16280_v33 }
 0x8be   : > { %6461 = vmatpush.msrb.mxu2 %v16322_v20  ;;  %6481 = vmatpush.msrb.mxu3 %v16282_v28 }
 0x8bf   : > { %6445 = vmatpush.msrb.mxu1 %v16283_v6 }
 0x8c0   : > { %6462 = vmatpush.msrb.mxu2 %v16284_v8  ;;  %6482 = vmatpush.msrb.mxu3 %v16285_v25  ;;  %v6192_v63 = vpop.f32.mrf.mxu0  ;;  %v16375_v25 = vld [vmem:[#allocation61_spill] sm:$0xff] }
 0x8c1   : > { %6446 = vmatpush.msrb.mxu1 %v16286_v23 }
 0x8c2   : > { %6463 = vmatpush.msrb.mxu2 %v16287_v2  ;;  %6483 = vmatpush.msrb.mxu3 %v16329_v10 }
 0x8c3   : > { %6447 = vmatpush.msrb.mxu1 %v16289_v31 }
 0x8c4   : > { %6464 = vmatpush.msrb.mxu2 %v16290_v12  ;;  %6484 = vmatpush.msrb.mxu3 %v16324_v62 }
 0x8c5   : > { %6448 = vmatpush.msrb.mxu1 %v16292_v18 }
 0x8c6   : > { %6465 = vmatpush.msrb.mxu2 %v16293_v46  ;;  %6485 = vmatpush.msrb.mxu3 %v16294_v47 }
 0x8c7   : > { %6449 = vmatpush.msrb.mxu1 %v16296_v51 }
 0x8c8   : > { %6466 = vmatpush.msrb.mxu2 %v16297_v37  ;;  %6486 = vmatpush.msrb.mxu3 %v16298_v26 }
 0x8c9   : > { %6450 = vmatpush.msrb.mxu1 %v16299_v11 }
 0x8ca   : > { %6467 = vmatpush.msrb.mxu2 %v16300_v52  ;;  %6487 = vmatpush.msrb.mxu3 %v16301_v43  ;;  %v6131_v59 = vpop.f32.mrf.mxu1 }
 0x8cb   : > { %6451 = vmatpush.msrb.mxu1 %v16302_v44  ;;  %v6132_v16 = vadd.f32 %v6131_v59, %v6111_v56 }
 0x8cc   : > { %6468 = vmatpush.msrb.mxu2 %v16303_v1  ;;  %6488 = vmatpush.msrb.mxu3 %v16304_v17 }
 0x8cd   : > { %6452 = vmatpush.msrb.mxu1 %v16305_v9 }
 0x8ce   : > { %6469 = vmatpush.msrb.mxu2 %v16318_v35  ;;  %6489 = vmatpush.msrb.mxu3 %v16307_v41 }
 0x8cf   : > { %6453 = vmatpush.msrb.mxu1 %v16308_v55 }
 0x8d0   : > { %6470 = vmatpush.msrb.mxu2 %v16309_v50  ;;  %6490 = vmatpush.msrb.mxu3 %v16310_v49  ;;  %v6273_v49 = vpop.f32.mrf.mxu0 }
 0x8d1   : > { %6454 = vmatmul.f32.vlgmr.msrb.gmra.mxu1 %v6012_v32 }
 0x8d2   : > { %6471 = vmatpush.msrb.mxu2 %v16320_v24  ;;  %6491 = vmatpush.msrb.mxu3 %v16312_v5 }
 0x8d4   : > { %6472 = vmatpush.msrb.mxu2 %v16313_v27  ;;  %6492 = vmatpush.msrb.mxu3 %v16314_v45 }
 0x8d6   : > { %6473 = vmatpush.msrb.mxu2 %v16315_v0  ;;  %6493 = vmatpush.msrb.mxu3 %v16316_v36  ;;  %v6151_v48 = vpop.f32.mrf.mxu2 }
 0x8d7   : > { %6474 = vmatmul.f32.vlgmr.msrb.gmra.mxu2 %v14413_v34  ;;  %6494 = vmatmul.f32.vlgmr.msrb.gmra.mxu3 %v6012_v32  ;;  %v6171_v15 = vpop.f32.mrf.mxu3 }
 0x8d8   : > { %v6172_v30 = vadd.f32 %v6171_v15, %v6151_v48 }
 0x8da   : > { %v6174_v7 = vmax.f32 %v6132_v16, %v6172_v30 }
 0x8dc   : > { %6507 = vrot.lane.b32.xlu1 %v6174_v7, %s9002_s23 }
 0x8ea   : > { %v6212_v60 = vpop.f32.mrf.mxu1 }
 0x8eb   : > { %v6213_v27 = vadd.f32 %v6212_v60, %v6192_v63 }
 0x8f7   : > { %v6232_v3 = vpop.f32.mrf.mxu2 }
 0x8f8   : > { %v6252_v45 = vpop.f32.mrf.mxu3 }
 0x8f9   : > { %v6253_v5 = vadd.f32 %v6252_v45, %v6232_v3 }
 0x8fb   : > { %v6255_v0 = vmax.f32 %v6213_v27, %v6253_v5  ;;  %v6354_v5 = vpop.f32.mrf.mxu0 }
 0x8fd   : > { %6509 = vrot.lane.b32.xlu2 %v6255_v0, %s9002_s23 }
 0x90c   : > { %v6293_v36 = vpop.f32.mrf.mxu1 }
 0x90d   : > { %v6294_v32 = vadd.f32 %v6293_v36, %v6273_v49 }
 0x915   : > { %v6435_v63 = vpop.f32.mrf.mxu0 }
 0x918   : > { %v6313_v24 = vpop.f32.mrf.mxu2 }
 0x919   : > { %v6333_v34 = vpop.f32.mrf.mxu3 }
 0x91a   : > { %v6334_v50 = vadd.f32 %v6333_v34, %v6313_v24 }
 0x91c   : > { %v6336_v59 = vmax.f32 %v6294_v32, %v6334_v50 }
 0x91e   : > { %6511 = vrot.lane.b32.xlu0 %v6336_v59, %s9002_s23 }
 0x92d   : > { %v6506_v48 = vpop.permute.xlu0 %6505  ;;  %v6374_v45 = vpop.f32.mrf.mxu1 }
 0x92e   : > { %v14515_v56 = vsel %vm16334_vm7, 0.0, %v6506_v48  ;;  %v6375_v15 = vadd.f32 %v6374_v45, %v6354_v5  ;;  %vm16342_vm7 = vcmask 990208  }
 0x92f   : > { %6722 = vrot.lane.b32.xlu0 %v14515_v56, %s9009_s30  ;;  %v6533_v7 = vrot.slane %v14515_v56, 4 }
 0x939   : > { %v6394_v27 = vpop.f32.mrf.mxu2 }
 0x93a   : > { %v6414_v0 = vpop.f32.mrf.mxu3 }
 0x93b   : > { %v6415_v16 = vadd.f32 %v6414_v0, %v6394_v27 }
 0x93d   : > { %v6417_v30 = vmax.f32 %v6375_v15, %v6415_v16 }
 0x93f   : > { %6513 = vrot.lane.b32.xlu1 %v6417_v30, %s9002_s23 }
 0x94e   : > { %v6508_v24 = vpop.permute.xlu1 %6507  ;;  %v6455_v60 = vpop.f32.mrf.mxu1 }
 0x94f   : > { %v14521_v36 = vsel %vm16335_vm13, %v6506_v48, %v6508_v24  ;;  %v6456_v59 = vadd.f32 %v6455_v60, %v6435_v63  ;;  %vm16343_vm13 = vmmov %vm16340_vm14 }
 0x950   : > { %6724 = vrot.lane.b32.xlu1 %v14521_v36, %s9009_s30  ;;  %v8886_v49 = vpack.i.bf16 %v14521_v36, %v14515_v56  ;;  %v6534_v50 = vrot.slane %v14521_v36, 4 }
 0x952   : > { %8887 = vrot.lane.b32.xlu0 %v8886_v49, %s9007_s28  ;;  %v8906_v3 = vpack.i.bf16 %v6534_v50, %v6533_v7 }
 0x957   : > { %v6510_v27 = vpop.permute.xlu2 %6509 }
 0x958   : > { %8892 = vrot.lane.b32.xlu1 %v8886_v49, %s9006_s27  ;;  %v14538_v5 = vsel %vm16336_vm3, %v6508_v24, %v6510_v27  ;;  %vm16344_vm3 = vmmov %vm16343_vm13 }
 0x959   : > { %v6535_v24 = vrot.slane %v14538_v5, 4 }
 0x95a   : > { %v6475_v34 = vpop.f32.mrf.mxu2  ;;  %v6495_v32 = vpop.f32.mrf.mxu3  ;;  %8907 = vrot.lane.b32.xlu0 %v8906_v3, %s9008_s29 }
 0x95b   : > { %v6496_v48 = vadd.f32 %v6495_v32, %v6475_v34 }
 0x95d   : > { %v6498_v45 = vmax.f32 %v6456_v59, %v6496_v48 }
 0x95f   : > { %6515 = vrot.lane.b32.xlu2 %v6498_v45, %s9002_s23 }
 0x960   : > { %8912 = vrot.lane.b32.xlu1 %v8906_v3, %s9005_s26 }
 0x962   : > { %8917 = vrot.lane.b32.xlu0 %v8906_v3, %s9003_s24 }
 0x967   : > { %8897 = vrot.lane.b32.xlu2 %v8886_v49, %s9004_s25 }
 0x96f   : > { %8902 = vrot.lane.b32.xlu2 %v8906_v3, %s9010_s12 }
 0x977   : > { %6726 = vrot.lane.b32.xlu2 %v14538_v5, %s9009_s30 }
 0x990   : > { %v6512_v0 = vpop.permute.xlu0 %6511 }
 0x991   : > { %v14543_v15 = vsel %vm16337_vm10, %v6510_v27, %v6512_v0  ;;  %vm16347_vm10 = vmmov %vm16342_vm7 }
 0x992   : > { %v8931_v16 = vpack.i.bf16 %v14543_v15, %v14538_v5  ;;  %v6536_v30 = vrot.slane %v14543_v15, 4 }
 0x994   : > { %8932 = vrot.lane.b32.xlu0 %v8931_v16, %s9004_s25  ;;  %8927 = vrot.lane.b32.xlu2 %v8931_v16, %s9006_s27  ;;  %v8936_v49 = vpack.i.bf16 %v6536_v30, %v6535_v24 }
 0x995   : > { %8922 = vrot.lane.b32.xlu1 %v8931_v16, %s9007_s28 }
 0x99c   : > { %6728 = vrot.lane.b32.xlu2 %v14543_v15, %s9009_s30  ;;  %8937 = vrot.lane.b32.xlu0 %v8936_v49, %s9010_s12 }
 0x99d   : > { %8942 = vrot.lane.b32.xlu1 %v8936_v49, %s9008_s29 }
 0x9a1   : > { %v6723_v32 = vpop.permute.xlu0 %6722 }
 0x9a4   : > { %8947 = vrot.lane.b32.xlu2 %v8936_v49, %s9005_s26 }
 0x9a5   : > { %8952 = vrot.lane.b32.xlu1 %v8936_v49, %s9003_s24 }
 0x9b1   : > { %v6514_v50 = vpop.permute.xlu1 %6513 }
 0x9b2   : > { %v14559_v7 = vsel %vm16338_vm0, %v6512_v0, %v6514_v50  ;;  %vm16350_vm0 = vmmov %vm16342_vm7 }
 0x9b3   : > { %6730 = vrot.lane.b32.xlu0 %v14559_v7, %s9009_s30  ;;  %v6537_v60 = vrot.slane %v14559_v7, 4 }
 0x9b5   : > { %6548 = vrot.lane.b32.xlu1 %v6537_v60, %s9003_s24 }
 0x9b9   : > { %v6516_v3 = vpop.permute.xlu2 %6515 }
 0x9ba   : > { %v14566_v63 = vsel %vm16339_vm4, %v6514_v50, %v6516_v3  ;;  %v6530_v50 = vsel %vm16341_vm6, %v6516_v3, 0.0  ;;  %vm16358_vm4 = vmmov %vm16344_vm3 }
 0x9bb   : > { %6600 = vrot.lane.b32.xlu0 %v6537_v60, %s9005_s26  ;;  %v8966_v34 = vpack.i.bf16 %v14566_v63, %v14559_v7  ;;  %v6538_v59 = vrot.slane %v14566_v63, 4  ;;  %vm16366_vm6 = vmmov %vm16350_vm0 }
 0x9bd   : > { %8967 = vrot.lane.b32.xlu2 %v8966_v34, %s9004_s25  ;;  %8957 = vrot.lane.b32.xlu1 %v8966_v34, %s9007_s28  ;;  %v8971_v27 = vpack.i.bf16 %v6538_v59, %v6537_v60 }
 0x9c1   : > { %v14574_v48 = vpop.permute.xlu2 %8897 }
 0x9c2   : > { %v6725_v45 = vpop.permute.xlu1 %6724  ;;  %v8900_v43 = vunpack.i.h.bf16 %v14574_v48  ;;  %v8899_v52 = vunpack.i.l.bf16 %v14574_v48 }
 0x9c3   : > { %8962 = vrot.lane.b32.xlu0 %v8966_v34, %s9006_s27  ;;  %v6736_v0 = vsel %vm16340_vm14, %v6723_v32, %v6725_v45  ;;  %vm16359_vm14 = vmmov %vm16344_vm3 }
 0x9c4   : > { %7801 = vmatpush.msk.msra.mxu0 %vm1529_vm11, %v6736_v0  ;;  %v14579_v16 = vpop.permute.xlu0 %8887  ;;  %v6580_v48 = vsel %vm710_vm2, %v8899_v52, %v8900_v43  ;;  %v6767_v52 = vld [vmem:[%s15614_s8] sm:$0xf] }
 0x9c5   : > { %8972 = vrot.lane.b32.xlu2 %v8971_v27, %s9010_s12  ;;  %8977 = vrot.lane.b32.xlu1 %v8971_v27, %s9008_s29  ;;  %v15883_v30 = vunpack.i.h.bf16 %v14579_v16  ;;  %v8889_v24 = vunpack.i.l.bf16 %v14579_v16 }
 0x9c7   : > { %v6684_v32 = vsel %vm1206_vm12, %v8889_v24, %v15883_v30 }
 0x9c9   : > { %v14585_v49 = vpop.permute.xlu2 %8902 }
 0x9ca   : > { %v15886_v60 = vunpack.i.h.bf16 %v14585_v49  ;;  %v8904_v34 = vunpack.i.l.bf16 %v14585_v49  ;;  %v14593_v0 = vpop.permute.xlu1 %8892  ;;  %v16346_v62 = vunpack.i.h.bf16 %v14585_v49 }
 0x9cb   : > { %6734 = vrot.lane.b32.xlu0 %v6530_v50, %s9009_s30  ;;  %v15890_v27 = vunpack.i.h.bf16 %v14593_v0  ;;  %v8894_v41 = vunpack.i.l.bf16 %v14593_v0 }
 0x9cc   : > { %v6710_v3 = vsel %vm16342_vm7, %v8904_v34, %v15886_v60  ;;  %v14601_v35 = vpop.permute.xlu0 %8907  ;;  %vm16367_vm7 = vmmov %vm16350_vm0 }
 0x9cd   : > { %6732 = vrot.lane.b32.xlu2 %v14566_v63, %s9009_s30  ;;  %6682 = vrot.lane.b32.xlu1 %v6530_v50, %s9007_s28  ;;  %v6760_v24 = vsel %vm1529_vm11, %v6684_v32, %v6710_v3  ;;  %v15892_v30 = vunpack.i.h.bf16 %v14601_v35  ;;  %v8909_v17 = vunpack.i.l.bf16 %v14601_v35  ;;  %v6632_v1 = vsel %vm958_vm9, %v8894_v41, %v15890_v27 }
 0x9ce   : > { %6800 = vmatpush.msra.mxu0 %v6760_v24  ;;  %v6539_v41 = vrot.slane %v6530_v50, 4 }
 0x9cf   : > { %v6658_v34 = vsel %vm1082_vm8, %v8909_v17, %v15892_v30 }
 0x9d0   : > { %v6754_v60 = vsel %vm1529_vm11, %v6632_v1, %v6658_v34  ;;  %v14636_v34 = vld [vmem:[%s15613_s7] sm:$0xf]  ;;  %v8981_v30 = vpack.i.bf16 %v6539_v41, %v6538_v59 }
 0x9d1   : > { %v6727_v32 = vpop.permute.xlu2 %6726  ;;  %6801 = vmatpush.msra.mxu0 %v6754_v60 }
 0x9d2   : > { %v6737_v3 = vsel %vm16343_vm13, %v6725_v45, %v6727_v32  ;;  %v8913_v26 = vpop.permute.xlu1 %8912  ;;  %vm16378_vm13 = vmmov %vm16344_vm3 }
 0x9d3   : > { %7803 = vmatpush.msk.msra.mxu1 %vm1529_vm11, %v6737_v3  ;;  %6630 = vrot.lane.b32.xlu0 %v6530_v50, %s9006_s27  ;;  %v8915_v24 = vunpack.i.h.bf16 %v8913_v26  ;;  %v8914_v27 = vunpack.i.l.bf16 %v8913_v26  ;;  %s379_s27 = scalar_lea.vmem %s15617_s11, %s16409_s18 }
 0x9d4   : > { %v14621_v37 = vpop.permute.xlu0 %8917 }
 0x9d5   : > { %6708 = vrot.lane.b32.xlu2 %v6539_v41, %s9010_s12  ;;  %6656 = vrot.lane.b32.xlu1 %v6539_v41, %s9008_s29  ;;  %v15893_v1 = vunpack.i.h.bf16 %v14621_v37  ;;  %v8919_v17 = vunpack.i.l.bf16 %v14621_v37  ;;  %v6606_v45 = vsel %vm834_vm5, %v8914_v27, %v8915_v24 }
 0x9d6   : > { %v6748_v60 = vsel %vm1529_vm11, %v6580_v48, %v6606_v45 }
 0x9d7   : > { %6802 = vmatpush.msra.mxu0 %v6748_v60  ;;  %v6554_v26 = vsel %vm586_vm1, %v8919_v17, %v15893_v1 }
 0x9d8   : > { %v6742_v3 = vsel %vm1529_vm11, %v14515_v56, %v6554_v26 }
 0x9d9   : > { %6803 = vmatpush.msra.mxu0 %v6742_v3 }
 0x9da   : > { %7802 = vmatmul.msk.f32.vlgmr.msra.gmra.mxu0 %vm3252_vm15, %v14636_v34 }
 0x9db   : > { %8982 = vrot.lane.b32.xlu0 %v8981_v30, %s9005_s26 }
 0x9dd   : > { %6578 = vrot.lane.b32.xlu2 %v6530_v50, %s9004_s25  ;;  %8987 = vrot.lane.b32.xlu1 %v8981_v30, %s9003_s24 }
 0x9e5   : > { %6770 = vperm.xlu2 %8255, %v6767_v52   ;;  %v16345_v52 = vunpack.i.h.bf16 %v14579_v16  ;;  %v16351_v16 = vunpack.i.h.bf16 %v14601_v35 }
 0x9ee   : > { %v14648_v27 = vpop.permute.xlu2 %8927 }
 0x9ef   : > { %v8929_v1 = vunpack.i.l.bf16 %v14648_v27 }
 0x9f6   : > { %v14650_v17 = vpop.permute.xlu2 %6728 }
 0x9f7   : > { %v6738_v56 = vsel %vm16344_vm3, %v6727_v32, %v14650_v17  ;;  %vm16379_vm3 = vmmov %vm16350_vm0 }
 0x9f8   : > { %7805 = vmatpush.msk.msra.mxu2 %vm1529_vm11, %v6738_v56 }
 0x9fe   : > { %v14655_v59 = vpop.permute.xlu2 %8947 }
 0x9ff   : > { %v8949_v50 = vunpack.i.l.bf16 %v14655_v59  ;;  %v16371_v2 = vunpack.i.h.bf16 %v14655_v59 }
 0xa01   : > { %v6607_v60 = vsel %vm834_vm5, %v8915_v24, %v8949_v50 }
 0xa06   : > { %v14658_v41 = vpop.permute.xlu0 %8932 }
 0xa07   : > { %v14660_v30 = vpop.permute.xlu1 %8922  ;;  %v8934_v48 = vunpack.i.l.bf16 %v14658_v41 }
 0xa08   : > { %v8924_v3 = vunpack.i.l.bf16 %v14660_v30  ;;  %v16348_v12 = vunpack.i.h.bf16 %v14660_v30 }
 0xa09   : > { %v6581_v45 = vsel %vm710_vm2, %v8900_v43, %v8934_v48 }
 0xa0a   : > { %v6749_v26 = vsel %vm1529_vm11, %v6581_v45, %v6607_v60  ;;  %v6685_v55 = vsel %vm1206_vm12, %v16345_v52, %v8924_v3  ;;  %v6686_v43 = vsel %vm1206_vm12, %v8924_v3, %v16348_v12  ;;  %v16353_v12 = vunpack.i.h.bf16 %v14593_v0 }
 0xa0c   : > { %v6633_v3 = vsel %vm958_vm9, %v16353_v12, %v8929_v1 }
 0xa0e   : > { %v14669_v56 = vpop.permute.xlu0 %8937 }
 0xa0f   : > { %v14673_v46 = vpop.permute.xlu1 %8942  ;;  %v8939_v24 = vunpack.i.l.bf16 %v14669_v56  ;;  %v16349_v9 = vunpack.i.h.bf16 %v14669_v56 }
 0xa10   : > { %v8944_v32 = vunpack.i.l.bf16 %v14673_v46  ;;  %v16352_v49 = vunpack.i.h.bf16 %v14673_v46 }
 0xa11   : > { %v6711_v47 = vsel %vm16347_vm10, %v16346_v62, %v8939_v24  ;;  %v6712_v45 = vsel %vm16350_vm0, %v8939_v24, %v16349_v9  ;;  %v16354_v9 = vunpack.i.h.bf16 %v14648_v27 }
 0xa12   : > { %v6761_v60 = vsel %vm1529_vm11, %v6685_v55, %v6711_v47  ;;  %v6762_v10 = vsel %vm1529_vm11, %v6686_v43, %v6712_v45  ;;  %v6659_v52 = vsel %vm1082_vm8, %v16351_v16, %v8944_v32  ;;  %v6660_v62 = vsel %vm1082_vm8, %v8944_v32, %v16352_v49 }
 0xa13   : > { %6820 = vmatpush.msra.mxu1 %v6761_v60  ;;  %6840 = vmatpush.msra.mxu2 %v6762_v10  ;;  %v6634_v47 = vsel %vm958_vm9, %v8929_v1, %v16354_v9  ;;  %v16355_v55 = vunpack.i.h.bf16 %v14658_v41  ;;  %v6755_v43 = vsel %vm1529_vm11, %v6633_v3, %v6659_v52  ;;  %v16356_v10 = vunpack.i.h.bf16 %v14655_v59  ;;  %v16360_v9 = vld [vmem:[#allocation45_spill] sm:$0xff] }
 0xa14   : > { %v6756_v24 = vsel %vm1529_vm11, %v6634_v47, %v6660_v62  ;;  %v16357_v16 = vunpack.i.h.bf16 %v14621_v37  ;;  %v16361_v47 = vld [vmem:[#allocation47_spill] sm:$0xff] }
 0xa15   : > { %v6582_v35 = vsel %vm710_vm2, %v8934_v48, %v16355_v55  ;;  %6821 = vmatpush.msra.mxu1 %v6755_v43  ;;  %6841 = vmatpush.msra.mxu2 %v6756_v24  ;;  %v6608_v0 = vsel %vm834_vm5, %v8949_v50, %v16356_v10  ;;  %v16362_v43 = vld [vmem:[#allocation49_spill] sm:$0xff] }
 0xa16   : > { %v6750_v32 = vsel %vm1529_vm11, %v6582_v35, %v6608_v0 }
 0xa17   : > { %v14715_v45 = vpop.permute.xlu2 %8967  ;;  %v14717_v60 = vpop.permute.xlu1 %8952  ;;  %6822 = vmatpush.msra.mxu1 %v6749_v26  ;;  %6842 = vmatpush.msra.mxu2 %v6750_v32  ;;  %v16363_v32 = vld [vmem:[#allocation51_spill] sm:$0xff] }
 0xa18   : > { %v8955_v1 = vunpack.i.h.bf16 %v14717_v60  ;;  %v8954_v48 = vunpack.i.l.bf16 %v14717_v60  ;;  %v16364_v60 = vunpack.i.h.bf16 %v14660_v30  ;;  %v16369_v30 = vld [vmem:[#allocation55_spill] sm:$0xff] }
 0xa1a   : > { %v6555_v52 = vsel %vm586_vm1, %v16357_v16, %v8954_v48  ;;  %v6556_v49 = vsel %vm586_vm1, %v8954_v48, %v8955_v1  ;;  %v16365_v16 = vunpack.i.h.bf16 %v14669_v56 }
 0xa1b   : > { %v6743_v50 = vsel %vm1529_vm11, %v14521_v36, %v6555_v52  ;;  %v6744_v62 = vsel %vm1529_vm11, %v14538_v5, %v6556_v49 }
 0xa1c   : > { %6823 = vmatpush.msra.mxu1 %v6743_v50  ;;  %6843 = vmatpush.msra.mxu2 %v6744_v62  ;;  %v16368_v62 = vld [vmem:[#allocation53_spill] sm:$0xff] }
 0xa1d   : > { %7804 = vmatmul.msk.f32.vlgmr.msra.gmra.mxu1 %vm3252_vm15, %v14636_v34  ;;  %7806 = vmatmul.msk.f32.vlgmr.msra.gmra.mxu2 %vm3252_vm15, %v14636_v34 }
 0xa1e   : > { %6926 = vmatpush.msrb.mxu2 %v16200_v42 }
 0xa1f   : > { %v14734_v37 = vpop.permute.xlu2 %8972 }
 0xa20   : > { %6927 = vmatpush.msrb.mxu2 %v16103_v22  ;;  %v8974_v35 = vunpack.i.l.bf16 %v14734_v37 }
 0xa22   : > { %6928 = vmatpush.msrb.mxu2 %v16325_v19  ;;  %v6713_v52 = vsel %vm16366_vm6, %v16365_v16, %v8974_v35 }
 0xa24   : > { %6929 = vmatpush.msrb.mxu2 %v16319_v39 }
 0xa25   : > { %v6731_v36 = vpop.permute.xlu0 %6730 }
 0xa26   : > { %v6739_v5 = vsel %vm16358_vm4, %v14650_v17, %v6731_v36  ;;  %6930 = vmatpush.msrb.mxu2 %v16107_v29  ;;  %v8975_v17 = vunpack.i.h.bf16 %v14734_v37 }
 0xa27   : > { %v6733_v26 = vpop.permute.xlu2 %6732  ;;  %v14742_v12 = vpop.permute.xlu1 %6548  ;;  %7807 = vmatpush.msk.msra.mxu3 %vm1529_vm11, %v6739_v5 }
 0xa28   : > { %v6740_v3 = vsel %vm16359_vm14, %v6731_v36, %v6733_v26  ;;  %6931 = vmatpush.msrb.mxu2 %v12431_v53  ;;  %v6714_v50 = vsel %vm16367_vm7, %v8974_v35, %v8975_v17 }
 0xa29   : > { %7809 = vmatpush.msk.msrb.mxu0 %vm1529_vm11, %v6740_v3 }
 0xa2a   : > { %6932 = vmatpush.msrb.mxu2 %v16360_v9 }
 0xa2c   : > { %6933 = vmatpush.msrb.mxu2 %v16361_v47 }
 0xa2d   : > { %v14750_v55 = vpop.permute.xlu0 %6600 }
 0xa2e   : > { %6934 = vmatpush.msrb.mxu2 %v16362_v43 }
 0xa2f   : > { %v8958_v24 = vpop.permute.xlu1 %8957 }
 0xa30   : > { %v8960_v10 = vunpack.i.h.bf16 %v8958_v24  ;;  %v8959_v0 = vunpack.i.l.bf16 %v8958_v24  ;;  %6935 = vmatpush.msrb.mxu2 %v16363_v32 }
 0xa32   : > { %v6687_v48 = vsel %vm1206_vm12, %v16364_v60, %v8959_v0  ;;  %v6688_v49 = vsel %vm1206_vm12, %v8959_v0, %v8960_v10  ;;  %6936 = vmatpush.msrb.mxu2 %v16368_v62  ;;  %v16370_v60 = vld [vmem:[#allocation57_spill] sm:$0xff]  ;;  %v8969_v0 = vunpack.i.l.bf16 %v14715_v45 }
 0xa33   : > { %v6763_v37 = vsel %vm1529_vm11, %v6687_v48, %v6713_v52  ;;  %v6764_v36 = vsel %vm1529_vm11, %v6688_v49, %v6714_v50  ;;  %v6609_v48 = vsel %vm834_vm5, %v16371_v2, %v14750_v55  ;;  %v16372_v52 = vld [vmem:[#allocation59_spill] sm:$0xff]  ;;  %v16373_v49 = vunpack.i.h.bf16 %v14648_v27 }
 0xa34   : > { %6860 = vmatpush.msra.mxu3 %v6763_v37  ;;  %6880 = vmatpush.msrb.mxu0 %v6764_v36  ;;  %v16374_v37 = vunpack.i.h.bf16 %v14673_v46  ;;  %v6557_v2 = vsel %vm586_vm1, %v8955_v1, %v14742_v12  ;;  %v16376_v27 = vunpack.i.h.bf16 %v14658_v41 }
 0xa35   : > { %v8963_v5 = vpop.permute.xlu0 %8962  ;;  %6937 = vmatpush.msrb.mxu2 %v16369_v30  ;;  %v6745_v1 = vsel %vm1529_vm11, %v14543_v15, %v6557_v2  ;;  %v8970_v2 = vunpack.i.h.bf16 %v14715_v45 }
 0xa36   : > { %v8965_v3 = vunpack.i.h.bf16 %v8963_v5  ;;  %v8964_v24 = vunpack.i.l.bf16 %v8963_v5  ;;  %v6583_v46 = vsel %vm710_vm2, %v16376_v27, %v8969_v0 }
 0xa37   : > { %v8978_v56 = vpop.permute.xlu1 %8977  ;;  %6938 = vmatpush.msrb.mxu2 %v16370_v60 }
 0xa38   : > { %v8980_v16 = vunpack.i.h.bf16 %v8978_v56  ;;  %v8979_v35 = vunpack.i.l.bf16 %v8978_v56  ;;  %v6635_v50 = vsel %vm958_vm9, %v16373_v49, %v8964_v24  ;;  %v6636_v5 = vsel %vm958_vm9, %v8964_v24, %v8965_v3  ;;  %v6709_v49 = vpop.permute.xlu2 %6708 }
 0xa39   : > { %6939 = vmatpush.msrb.mxu2 %v16372_v52  ;;  %v6751_v24 = vsel %vm1529_vm11, %v6583_v46, %v6609_v48  ;;  %v6715_v41 = vsel %vm16379_vm3, %v8975_v17, %v6709_v49  ;;  %v16380_v48 = vld [vmem:[#allocation24_spill] sm:$0xff] }
 0xa3a   : > { %v6661_v36 = vsel %vm1082_vm8, %v16374_v37, %v8979_v35  ;;  %v6662_v44 = vsel %vm1082_vm8, %v8979_v35, %v8980_v16  ;;  %v16377_v35 = vld [vmem:[#allocation63_spill] sm:$0xff] }
 0xa3b   : > { %v6757_v56 = vsel %vm1529_vm11, %v6635_v50, %v6661_v36  ;;  %v6758_v59 = vsel %vm1529_vm11, %v6636_v5, %v6662_v44  ;;  %6940 = vmatpush.msrb.mxu2 %v16375_v25  ;;  %v16381_v5 = vld [vmem:[#allocation26_spill] sm:$0xff] }
 0xa3c   : > { %6861 = vmatpush.msra.mxu3 %v6757_v56  ;;  %6881 = vmatpush.msrb.mxu0 %v6758_v59 }
 0xa3d   : > { %v6735_v37 = vpop.permute.xlu0 %6734  ;;  %6941 = vmatpush.msrb.mxu2 %v16377_v35 }
 0xa3e   : > { %v6741_v50 = vsel %vm16378_vm13, %v6733_v26, %v6735_v37  ;;  %6862 = vmatpush.msra.mxu3 %v6751_v24  ;;  %v6584_v24 = vsel %vm710_vm2, %v8969_v0, %v8970_v2 }
 0xa3f   : > { %7007 = vmatpush.msra.mxu2 %v16200_v42  ;;  %v6683_v44 = vpop.permute.xlu1 %6682  ;;  %7811 = vmatpush.msk.msrb.mxu1 %vm1529_vm11, %v6741_v50 }
 0xa40   : > { %v6689_v36 = vsel %vm1206_vm12, %v8960_v10, %v6683_v44  ;;  %6863 = vmatpush.msra.mxu3 %v6745_v1  ;;  %v6579_v27 = vpop.permute.xlu2 %6578  ;;  %vm7626_vm12 = vcmask 516096  }
 0xa41   : > { %7008 = vmatpush.msra.mxu2 %v16103_v22  ;;  %7808 = vmatmul.msk.f32.vlgmr.msra.gmra.mxu3 %vm3252_vm15, %v14636_v34  ;;  %v6765_v26 = vsel %vm1529_vm11, %v6689_v36, %v6715_v41  ;;  %v6585_v49 = vsel %vm710_vm2, %v8970_v2, %v6579_v27  ;;  %v16385_v2 = vld [vmem:[#allocation13_spill] sm:$0xff]  ;;  %v16386_v27 = vld [vmem:[#allocation62_spill] sm:$0xff] }
 0xa42   : > { %6900 = vmatpush.msrb.mxu1 %v6765_v26  ;;  %6946 = vmatpush.msrb.mxu3 %v16380_v48 }
 0xa43   : > { %7009 = vmatpush.msra.mxu2 %v16325_v19 }
 0xa44   : > { %6947 = vmatpush.msrb.mxu3 %v16381_v5 }
 0xa45   : > { %v6631_v15 = vpop.permute.xlu0 %6630  ;;  %7010 = vmatpush.msra.mxu2 %v16319_v39 }
 0xa46   : > { %6948 = vmatpush.msrb.mxu3 %v16089_v57  ;;  %v6637_v10 = vsel %vm958_vm9, %v8965_v3, %v6631_v15 }
 0xa47   : > { %v6657_v17 = vpop.permute.xlu1 %6656  ;;  %7011 = vmatpush.msra.mxu2 %v16107_v29 }
 0xa48   : > { %v6663_v56 = vsel %vm1082_vm8, %v8980_v16, %v6657_v17  ;;  %6949 = vmatpush.msrb.mxu3 %v16091_v40 }
 0xa49   : > { %v6759_v59 = vsel %vm1529_vm11, %v6637_v10, %v6663_v56  ;;  %7012 = vmatpush.msra.mxu2 %v12431_v53  ;;  %v16382_v10 = vld [vmem:[#allocation5_spill] sm:$0xff]  ;;  %v16383_v56 = vld [vmem:[#allocation60_spill] sm:$0xff] }
 0xa4a   : > { %6901 = vmatpush.msrb.mxu1 %v6759_v59  ;;  %6950 = vmatpush.msrb.mxu3 %v16274_v14  ;;  %v16384_v59 = vld [vmem:[#allocation4_spill] sm:$0xff] }
 0xa4b   : > { %7013 = vmatpush.msra.mxu2 %v16360_v9 }
 0xa4c   : > { %6951 = vmatpush.msrb.mxu3 %v16277_v4 }
 0xa4d   : > { %v8983_v46 = vpop.permute.xlu0 %8982  ;;  %7014 = vmatpush.msra.mxu2 %v16361_v47 }
 0xa4e   : > { %v8985_v3 = vunpack.i.h.bf16 %v8983_v46  ;;  %v8984_v16 = vunpack.i.l.bf16 %v8983_v46  ;;  %6952 = vmatpush.msrb.mxu3 %v16280_v33  ;;  %v16387_v46 = vld [vmem:[#allocation11_spill] sm:$0xff] }
 0xa4f   : > { %v8988_v37 = vpop.permute.xlu1 %8987  ;;  %7015 = vmatpush.msra.mxu2 %v16362_v43 }
 0xa50   : > { %v8990_v45 = vunpack.i.h.bf16 %v8988_v37  ;;  %v8989_v50 = vunpack.i.l.bf16 %v8988_v37  ;;  %v6610_v44 = vsel %vm834_vm5, %v14750_v55, %v8984_v16  ;;  %v6611_v1 = vsel %vm834_vm5, %v8984_v16, %v8985_v3  ;;  %6953 = vmatpush.msrb.mxu3 %v16283_v6  ;;  %v16388_v3 = vld [vmem:[#allocation15_spill] sm:$0xff]  ;;  %v16389_v16 = vld [vmem:[#allocation64_spill] sm:$0xff] }
 0xa51   : > { %v6752_v41 = vsel %vm1529_vm11, %v6584_v24, %v6610_v44  ;;  %v6753_v36 = vsel %vm1529_vm11, %v6585_v49, %v6611_v1  ;;  %7016 = vmatpush.msra.mxu2 %v16363_v32  ;;  %v16390_v49 = vld [vmem:[#allocation18_spill] sm:$0xff]  ;;  %v16391_v37 = vld [vmem:[#allocation19_spill] sm:$0xff]  ;;  %v16395_v44 = vld [vmem:[#allocation9_spill] sm:$0xff] }
 0xa52   : > { %6882 = vmatpush.msrb.mxu0 %v6752_v41  ;;  %6902 = vmatpush.msrb.mxu1 %v6753_v36  ;;  %v6558_v0 = vsel %vm586_vm1, %v14742_v12, %v8989_v50  ;;  %v6559_v26 = vsel %vm586_vm1, %v8989_v50, %v8990_v45  ;;  %v16392_v24 = vld [vmem:[#allocation2_spill] sm:$0xff]  ;;  %v16393_v45 = vld [vmem:[#allocation8_spill] sm:$0xff] }
 0xa53   : > { %v6746_v55 = vsel %vm1529_vm11, %v14559_v7, %v6558_v0  ;;  %v6747_v15 = vsel %vm1529_vm11, %v14566_v63, %v6559_v26  ;;  %6954 = vmatpush.msrb.mxu3 %v16286_v23  ;;  %7017 = vmatpush.msra.mxu2 %v16368_v62  ;;  %v14846_v7 = vpop.permute.xlu2 %6770  ;;  %v16394_v50 = vld [vmem:[#allocation16_spill] sm:$0xff]  ;;  %v16405_v26 = vld [vmem:[#allocation41_spill] sm:$0xff] }
 0xa54   : > { %6883 = vmatpush.msrb.mxu0 %v6746_v55  ;;  %6903 = vmatpush.msrb.mxu1 %v6747_v15  ;;  %v16397_v1 = vld [vmem:[#allocation20_spill] sm:$0xff] }
 0xa55   : > { %7810 = vmatmul.msk.f32.vlgmr.msrb.gmra.mxu0 %vm3252_vm15, %v14636_v34  ;;  %7812 = vmatmul.msk.f32.vlgmr.msrb.gmra.mxu1 %vm3252_vm15, %v14636_v34  ;;  %v16399_v41 = vld [vmem:[#allocation28_spill] sm:$0xff] }
 0xa56   : > { %6966 = vmatpush.msra.mxu0 %v11939_v21  ;;  %6986 = vmatpush.msra.mxu1 %v16273_v13  ;;  %v16401_v36 = vld [vmem:[#allocation32_spill] sm:$0xff] }
 0xa57   : > { %v6805_v12 = vpop.f32.mrf.mxu0  ;;  %6955 = vmatpush.msrb.mxu3 %v16289_v31  ;;  %7018 = vmatpush.msra.mxu2 %v16369_v30  ;;  %v16403_v0 = vld [vmem:[#allocation36_spill] sm:$0xff] }
 0xa58   : > { %6967 = vmatpush.msra.mxu0 %v16275_v38  ;;  %v6806_v63 = vadd.f32 %v6805_v12, %v14846_v7  ;;  %6987 = vmatpush.msra.mxu1 %v16276_v61  ;;  %v16407_v55 = vld [vmem:[#allocation44_spill] sm:$0xff]  ;;  %v7246_v12 = vld [vmem:[%s15615_s9 + $0x268] sm:$0xff] }
 0xa59   : > { %6956 = vmatpush.msrb.mxu3 %v16292_v18  ;;  %7019 = vmatpush.msra.mxu2 %v16370_v60  ;;  %v7227_v15 = vld [vmem:[%s15615_s9 + $0x1d0] sm:$0xff] }
 0xa5a   : > { %6968 = vmatpush.msra.mxu0 %v16278_v54  ;;  %vm6908_vm1 = vcmp.ge.f32.partialorder %v6806_v63, 0.0  ;;  %v6914_v34 = vmul.f32 0.01, %v6806_v63  ;;  %6988 = vmatpush.msra.mxu1 %v16279_v58 }
 0xa5b   : > { %6957 = vmatpush.msrb.mxu3 %v16296_v51  ;;  %7020 = vmatpush.msra.mxu2 %v16372_v52 }
 0xa5c   : > { %6969 = vmatpush.msra.mxu0 %v16322_v20  ;;  %v6920_v17 = vsel %vm6908_vm1, %v6806_v63, %v6914_v34  ;;  %6989 = vmatpush.msra.mxu1 %v16282_v28  ;;  %v7226_v63 = vld [vmem:[%s15615_s9 + $0x1c8] sm:$0xff] }
 0xa5d   : > { %6942 = vmatmul.f32.vlgmr.msrb.gmra.mxu2 %v6920_v17  ;;  %6958 = vmatpush.msrb.mxu3 %v16299_v11  ;;  %v7178_v34 = vld [vmem:[%s15615_s9 + $0x48] sm:$0xff] }
 0xa5e   : > { %6970 = vmatpush.msra.mxu0 %v16284_v8  ;;  %6990 = vmatpush.msra.mxu1 %v16382_v10 }
 0xa5f   : > { %6959 = vmatpush.msrb.mxu3 %v16383_v56  ;;  %7021 = vmatpush.msra.mxu2 %v16375_v25 }
 0xa60   : > { %6971 = vmatpush.msra.mxu0 %v16384_v59  ;;  %6991 = vmatpush.msra.mxu1 %v16385_v2 }
 0xa61   : > { %6960 = vmatpush.msrb.mxu3 %v16386_v27  ;;  %7022 = vmatpush.msra.mxu2 %v16377_v35 }
 0xa62   : > { %6972 = vmatpush.msra.mxu0 %v16387_v46  ;;  %6992 = vmatpush.msra.mxu1 %v16388_v3 }
 0xa63   : > { %6961 = vmatpush.msrb.mxu3 %v16389_v16  ;;  %7088 = vmatpush.msrb.mxu2 %v16200_v42  ;;  %v16396_v42 = vld [vmem:[#allocation10_spill] sm:$0xff] }
 0xa64   : > { %6973 = vmatpush.msra.mxu0 %v16390_v49  ;;  %6993 = vmatpush.msra.mxu1 %v16391_v37 }
 0xa65   : > { %7027 = vmatpush.msra.mxu3 %v16380_v48  ;;  %7089 = vmatpush.msrb.mxu2 %v16103_v22  ;;  %v16398_v22 = vld [vmem:[#allocation27_spill] sm:$0xff] }
 0xa66   : > { %6974 = vmatpush.msra.mxu0 %v16392_v24  ;;  %6994 = vmatpush.msra.mxu1 %v16393_v45 }
 0xa67   : > { %7028 = vmatpush.msra.mxu3 %v16381_v5  ;;  %7090 = vmatpush.msrb.mxu2 %v16325_v19  ;;  %v16400_v19 = vld [vmem:[#allocation31_spill] sm:$0xff] }
 0xa68   : > { %6975 = vmatpush.msra.mxu0 %v16394_v50  ;;  %6995 = vmatpush.msra.mxu1 %v16395_v44 }
 0xa69   : > { %7029 = vmatpush.msra.mxu3 %v16089_v57  ;;  %7091 = vmatpush.msrb.mxu2 %v16319_v39  ;;  %v16402_v39 = vld [vmem:[#allocation35_spill] sm:$0xff] }
 0xa6a   : > { %6976 = vmatpush.msra.mxu0 %v16396_v42  ;;  %6996 = vmatpush.msra.mxu1 %v16397_v1 }
 0xa6b   : > { %7030 = vmatpush.msra.mxu3 %v16091_v40  ;;  %7092 = vmatpush.msrb.mxu2 %v16107_v29  ;;  %v16404_v29 = vld [vmem:[#allocation40_spill] sm:$0xff] }
 0xa6c   : > { %6977 = vmatpush.msra.mxu0 %v16398_v22  ;;  %6997 = vmatpush.msra.mxu1 %v16399_v41 }
 0xa6d   : > { %7031 = vmatpush.msra.mxu3 %v16274_v14  ;;  %7093 = vmatpush.msrb.mxu2 %v12431_v53  ;;  %v16406_v53 = vld [vmem:[#allocation43_spill] sm:$0xff] }
 0xa6e   : > { %6978 = vmatpush.msra.mxu0 %v16400_v19  ;;  %6998 = vmatpush.msra.mxu1 %v16401_v36 }
 0xa6f   : > { %7032 = vmatpush.msra.mxu3 %v16277_v4  ;;  %7094 = vmatpush.msrb.mxu2 %v16360_v9 }
 0xa70   : > { %6979 = vmatpush.msra.mxu0 %v16402_v39  ;;  %6999 = vmatpush.msra.mxu1 %v16403_v0 }
 0xa71   : > { %7033 = vmatpush.msra.mxu3 %v16280_v33  ;;  %7095 = vmatpush.msrb.mxu2 %v16361_v47 }
 0xa72   : > { %6980 = vmatpush.msra.mxu0 %v16404_v29  ;;  %7000 = vmatpush.msra.mxu1 %v16405_v26 }
 0xa73   : > { %7034 = vmatpush.msra.mxu3 %v16283_v6  ;;  %7096 = vmatpush.msrb.mxu2 %v16362_v43 }
 0xa74   : > { %6981 = vmatpush.msra.mxu0 %v16406_v53  ;;  %7001 = vmatpush.msra.mxu1 %v16407_v55 }
 0xa75   : > { %6982 = vmatmul.f32.vlgmr.msra.gmra.mxu0 %v6920_v17  ;;  %7035 = vmatpush.msra.mxu3 %v16286_v23  ;;  %v7245_v17 = vld [vmem:[%s15615_s9 + $0x260] sm:$0xff] }
 0xa76   : > { %7067 = vmatpush.msrb.mxu1 %v16273_v13  ;;  %7047 = vmatpush.msrb.mxu0 %v11939_v21 }
 0xa77   : > { %7097 = vmatpush.msrb.mxu2 %v16363_v32  ;;  %7036 = vmatpush.msra.mxu3 %v16289_v31 }
 0xa78   : > { %7068 = vmatpush.msrb.mxu1 %v16276_v61  ;;  %7048 = vmatpush.msrb.mxu0 %v16275_v38 }
 0xa79   : > { %7098 = vmatpush.msrb.mxu2 %v16368_v62  ;;  %7037 = vmatpush.msra.mxu3 %v16292_v18 }
 0xa7a   : > { %7069 = vmatpush.msrb.mxu1 %v16279_v58  ;;  %7049 = vmatpush.msrb.mxu0 %v16278_v54 }
 0xa7b   : > { %7099 = vmatpush.msrb.mxu2 %v16369_v30  ;;  %7038 = vmatpush.msra.mxu3 %v16296_v51  ;;  %v7229_v30 = vld [vmem:[%s15615_s9 + $0x1e0] sm:$0xff] }
 0xa7c   : > { %7070 = vmatpush.msrb.mxu1 %v16282_v28  ;;  %7050 = vmatpush.msrb.mxu0 %v16322_v20 }
 0xa7d   : > { %7100 = vmatpush.msrb.mxu2 %v16370_v60  ;;  %7039 = vmatpush.msra.mxu3 %v16299_v11  ;;  %v7181_v60 = vld [vmem:[%s15615_s9 + $0x60] sm:$0xff] }
 0xa7e   : > { %7071 = vmatpush.msrb.mxu1 %v16382_v10  ;;  %7051 = vmatpush.msrb.mxu0 %v16284_v8 }
 0xa7f   : > { %7101 = vmatpush.msrb.mxu2 %v16372_v52  ;;  %7040 = vmatpush.msra.mxu3 %v16383_v56  ;;  %v7228_v52 = vld [vmem:[%s15615_s9 + $0x1d8] sm:$0xff] }
 0xa80   : > { %7072 = vmatpush.msrb.mxu1 %v16385_v2  ;;  %7052 = vmatpush.msrb.mxu0 %v16384_v59 }
 0xa81   : > { %7102 = vmatpush.msrb.mxu2 %v16375_v25  ;;  %7041 = vmatpush.msra.mxu3 %v16386_v27 }
 0xa82   : > { %7073 = vmatpush.msrb.mxu1 %v16388_v3  ;;  %7053 = vmatpush.msrb.mxu0 %v16387_v46 }
 0xa83   : > { %7103 = vmatpush.msrb.mxu2 %v16377_v35  ;;  %7042 = vmatpush.msra.mxu3 %v16389_v16  ;;  %v7180_v35 = vld [vmem:[%s15615_s9 + $0x58] sm:$0xff] }
 0xa84   : > { %7074 = vmatpush.msrb.mxu1 %v16391_v37  ;;  %7054 = vmatpush.msrb.mxu0 %v16390_v49 }
 0xa86   : > { %7075 = vmatpush.msrb.mxu1 %v16393_v45  ;;  %7055 = vmatpush.msrb.mxu0 %v16392_v24 }
 0xa88   : > { %7076 = vmatpush.msrb.mxu1 %v16395_v44  ;;  %7056 = vmatpush.msrb.mxu0 %v16394_v50 }
 0xa8a   : > { %7077 = vmatpush.msrb.mxu1 %v16397_v1  ;;  %7057 = vmatpush.msrb.mxu0 %v16396_v42 }
 0xa8c   : > { %7078 = vmatpush.msrb.mxu1 %v16399_v41  ;;  %7058 = vmatpush.msrb.mxu0 %v16398_v22 }
 0xa8e   : > { %7079 = vmatpush.msrb.mxu1 %v16401_v36  ;;  %7059 = vmatpush.msrb.mxu0 %v16400_v19 }
 0xa90   : > { %7080 = vmatpush.msrb.mxu1 %v16403_v0  ;;  %7060 = vmatpush.msrb.mxu0 %v16402_v39 }
 0xa92   : > { %7081 = vmatpush.msrb.mxu1 %v16405_v26  ;;  %7061 = vmatpush.msrb.mxu0 %v16404_v29 }
 0xa94   : > { %7082 = vmatpush.msrb.mxu1 %v16407_v55  ;;  %7062 = vmatpush.msrb.mxu0 %v16406_v53 }
 0xa96   : > { %7128 = vmatpush.msra.mxu0 %v11939_v21 }
 0xa98   : > { %7129 = vmatpush.msra.mxu0 %v16275_v38 }
 0xa9a   : > { %7130 = vmatpush.msra.mxu0 %v16278_v54  ;;  %v6825_v25 = vpop.f32.mrf.mxu1 }
 0xa9b   : > { %v6826_v9 = vadd.f32 %v6825_v25, %v14846_v7  ;;  %v7263_v25 = vld [vmem:[%s15615_s9 + $0x2f0] sm:$0xff] }
 0xa9c   : > { %7131 = vmatpush.msra.mxu0 %v16322_v20 }
 0xa9d   : > { %vm6909_vm2 = vcmp.ge.f32.partialorder %v6826_v9, 0.0  ;;  %v6915_v47 = vmul.f32 0.01, %v6826_v9 }
 0xa9e   : > { %7132 = vmatpush.msra.mxu0 %v16284_v8 }
 0xa9f   : > { %v6921_v43 = vsel %vm6909_vm2, %v6826_v9, %v6915_v47  ;;  %v7199_v9 = vld [vmem:[%s15615_s9 + $0xf0] sm:$0xff] }
 0xaa0   : > { %7133 = vmatpush.msra.mxu0 %v16384_v59  ;;  %v6845_v32 = vpop.f32.mrf.mxu2  ;;  %6962 = vmatmul.f32.vlgmr.msrb.gmra.mxu3 %v6921_v43  ;;  %v7224_v59 = vld [vmem:[%s15615_s9 + $0x1b8] sm:$0xff]  ;;  %v7424_v47 = vld [vmem:[%s15615_s9 + $0x3f0] sm:$0xff] }
 0xaa1   : > { %7002 = vmatmul.f32.vlgmr.msra.gmra.mxu1 %v6921_v43  ;;  %v6846_v21 = vadd.f32 %v6845_v32, %v14846_v7  ;;  %7108 = vmatpush.msrb.mxu3 %v16380_v48  ;;  %v7248_v48 = vld [vmem:[%s15615_s9 + $0x278] sm:$0xff]  ;;  %v7239_v43 = vld [vmem:[%s15615_s9 + $0x230] sm:$0xff]  ;;  %v7262_v32 = vld [vmem:[%s15615_s9 + $0x2e8] sm:$0xff] }
 0xaa2   : > { %7148 = vmatpush.msra.mxu1 %v16273_v13  ;;  %7134 = vmatpush.msra.mxu0 %v16387_v46  ;;  %v7175_v46 = vld [vmem:[%s15615_s9 + $0x30] sm:$0xff] }
 0xaa3   : > { %vm6910_vm5 = vcmp.ge.f32.partialorder %v6846_v21, 0.0  ;;  %v6916_v38 = vmul.f32 0.01, %v6846_v21  ;;  %7109 = vmatpush.msrb.mxu3 %v16381_v5  ;;  %v7247_v5 = vld [vmem:[%s15615_s9 + $0x270] sm:$0xff] }
 0xaa4   : > { %7149 = vmatpush.msra.mxu1 %v16276_v61  ;;  %7135 = vmatpush.msra.mxu0 %v16390_v49  ;;  %v7221_v49 = vld [vmem:[%s15615_s9 + $0x1a0] sm:$0xff] }
 0xaa5   : > { %v6922_v54 = vsel %vm6910_vm5, %v6846_v21, %v6916_v38  ;;  %7110 = vmatpush.msrb.mxu3 %v16089_v57  ;;  %v7198_v21 = vld [vmem:[%s15615_s9 + $0xe8] sm:$0xff] }
 0xaa6   : > { %7150 = vmatpush.msra.mxu1 %v16279_v58  ;;  %7023 = vmatmul.f32.vlgmr.msra.gmra.mxu2 %v6922_v54  ;;  %v7232_v58 = vld [vmem:[%s15615_s9 + $0x1f8] sm:$0xff]  ;;  %v7423_v38 = vld [vmem:[%s15615_s9 + $0x3e8] sm:$0xff] }
 0xaa7   : > { %7063 = vmatmul.f32.vlgmr.msrb.gmra.mxu0 %v6922_v54  ;;  %7111 = vmatpush.msrb.mxu3 %v16091_v40  ;;  %v7238_v54 = vld [vmem:[%s15615_s9 + $0x228] sm:$0xff] }
 0xaa8   : > { %7151 = vmatpush.msra.mxu1 %v16282_v28  ;;  %7136 = vmatpush.msra.mxu0 %v16392_v24  ;;  %v7231_v28 = vld [vmem:[%s15615_s9 + $0x1f0] sm:$0xff]  ;;  %v7220_v24 = vld [vmem:[%s15615_s9 + $0x198] sm:$0xff] }
 0xaa9   : > { %7112 = vmatpush.msrb.mxu3 %v16274_v14  ;;  %7274 = vmatpush.msra.mxu2 %v7232_v58  ;;  %v7421_v58 = vld [vmem:[%s15615_s9 + $0x3d8] sm:$0xff] }
 0xaaa   : > { %7152 = vmatpush.msra.mxu1 %v16382_v10  ;;  %7137 = vmatpush.msra.mxu0 %v16394_v50  ;;  %v7225_v10 = vld [vmem:[%s15615_s9 + $0x1c0] sm:$0xff]  ;;  %v7244_v50 = vld [vmem:[%s15615_s9 + $0x258] sm:$0xff] }
 0xaab   : > { %7113 = vmatpush.msrb.mxu3 %v16277_v4  ;;  %7275 = vmatpush.msra.mxu2 %v7231_v28  ;;  %v7259_v28 = vld [vmem:[%s15615_s9 + $0x2d0] sm:$0xff] }
 0xaac   : > { %7153 = vmatpush.msra.mxu1 %v16385_v2  ;;  %7138 = vmatpush.msra.mxu0 %v16396_v42  ;;  %v7176_v2 = vld [vmem:[%s15615_s9 + $0x38] sm:$0xff]  ;;  %v7171_v42 = vld [vmem:[%s15615_s9 + $0x10] sm:$0xff] }
 0xaad   : > { %7114 = vmatpush.msrb.mxu3 %v16280_v33  ;;  %v7184_v33 = vld [vmem:[%s15615_s9 + $0x78] sm:$0xff] }
 0xaae   : > { %7154 = vmatpush.msra.mxu1 %v16388_v3  ;;  %7139 = vmatpush.msra.mxu0 %v16398_v22  ;;  %v7222_v3 = vld [vmem:[%s15615_s9 + $0x1a8] sm:$0xff] }
 0xaaf   : > { %7115 = vmatpush.msrb.mxu3 %v16283_v6  ;;  %v7218_v22 = vld [vmem:[%s15615_s9 + $0x188] sm:$0xff] }
 0xab0   : > { %7155 = vmatpush.msra.mxu1 %v16391_v37  ;;  %7140 = vmatpush.msra.mxu0 %v16400_v19  ;;  %v7173_v37 = vld [vmem:[%s15615_s9 + $0x20] sm:$0xff]  ;;  %v7242_v19 = vld [vmem:[%s15615_s9 + $0x248] sm:$0xff] }
 0xab1   : > { %7116 = vmatpush.msrb.mxu3 %v16286_v23  ;;  %v7183_v23 = vld [vmem:[%s15615_s9 + $0x70] sm:$0xff] }
 0xab2   : > { %7156 = vmatpush.msra.mxu1 %v16393_v45  ;;  %7141 = vmatpush.msra.mxu0 %v16402_v39  ;;  %v7172_v45 = vld [vmem:[%s15615_s9 + $0x18] sm:$0xff]  ;;  %v7169_v39 = vld [vmem:[%s15615_s9] sm:$0xff] }
 0xab3   : > { %7117 = vmatpush.msrb.mxu3 %v16289_v31  ;;  %v7230_v31 = vld [vmem:[%s15615_s9 + $0x1e8] sm:$0xff] }
 0xab4   : > { %7157 = vmatpush.msra.mxu1 %v16395_v44  ;;  %7142 = vmatpush.msra.mxu0 %v16404_v29  ;;  %v7219_v44 = vld [vmem:[%s15615_s9 + $0x190] sm:$0xff]  ;;  %v7264_v29 = vld [vmem:[%s15615_s9 + $0x2f8] sm:$0xff] }
 0xab5   : > { %7118 = vmatpush.msrb.mxu3 %v16292_v18  ;;  %v7182_v18 = vld [vmem:[%s15615_s9 + $0x68] sm:$0xff]  ;;  %7276 = vmatpush.msra.mxu2 %v7230_v31 }
 0xab6   : > { %7158 = vmatpush.msra.mxu1 %v16397_v1  ;;  %7143 = vmatpush.msra.mxu0 %v16406_v53  ;;  %v7243_v1 = vld [vmem:[%s15615_s9 + $0x250] sm:$0xff]  ;;  %v7425_v53 = vld [vmem:[%s15615_s9 + $0x3f8] sm:$0xff]  ;;  %v7258_v31 = vld [vmem:[%s15615_s9 + $0x2c8] sm:$0xff] }
 0xab7   : > { %7119 = vmatpush.msrb.mxu3 %v16296_v51  ;;  %7277 = vmatpush.msra.mxu2 %v7229_v30  ;;  %v7418_v30 = vld [vmem:[%s15615_s9 + $0x3c0] sm:$0xff] }
 0xab8   : > { %7159 = vmatpush.msra.mxu1 %v16399_v41  ;;  %v7170_v41 = vld [vmem:[%s15615_s9 + $0x8] sm:$0xff]  ;;  %7314 = vmatpush.msrb.mxu0 %v7264_v29 }
 0xab9   : > { %7120 = vmatpush.msrb.mxu3 %v16299_v11  ;;  %7278 = vmatpush.msra.mxu2 %v7228_v52  ;;  %v7256_v52 = vld [vmem:[%s15615_s9 + $0x2b8] sm:$0xff] }
 0xaba   : > { %7160 = vmatpush.msra.mxu1 %v16401_v36  ;;  %v7217_v36 = vld [vmem:[%s15615_s9 + $0x180] sm:$0xff]  ;;  %7315 = vmatpush.msrb.mxu0 %v7263_v25 }
 0xabb   : > { %7121 = vmatpush.msrb.mxu3 %v16383_v56  ;;  %7279 = vmatpush.msra.mxu2 %v7227_v15  ;;  %v7177_v56 = vld [vmem:[%s15615_s9 + $0x40] sm:$0xff]  ;;  %v7255_v15 = vld [vmem:[%s15615_s9 + $0x2b0] sm:$0xff] }
 0xabc   : > { %7161 = vmatpush.msra.mxu1 %v16403_v0  ;;  %v7241_v0 = vld [vmem:[%s15615_s9 + $0x240] sm:$0xff]  ;;  %7316 = vmatpush.msrb.mxu0 %v7262_v32 }
 0xabd   : > { %7122 = vmatpush.msrb.mxu3 %v16386_v27  ;;  %7280 = vmatpush.msra.mxu2 %v7226_v63  ;;  %v7223_v27 = vld [vmem:[%s15615_s9 + $0x1b0] sm:$0xff] }
 0xabe   : > { %7162 = vmatpush.msra.mxu1 %v16405_v26  ;;  %v7200_v26 = vld [vmem:[%s15615_s9 + $0xf8] sm:$0xff]  ;;  %v7215_v63 = vld [vmem:[%s15615_s9 + $0x170] sm:$0xff] }
 0xabf   : > { %7123 = vmatpush.msrb.mxu3 %v16389_v16  ;;  %7281 = vmatpush.msra.mxu2 %v7225_v10  ;;  %v7174_v16 = vld [vmem:[%s15615_s9 + $0x28] sm:$0xff] }
 0xac0   : > { %7163 = vmatpush.msra.mxu1 %v16407_v55  ;;  %v7240_v55 = vld [vmem:[%s15615_s9 + $0x238] sm:$0xff]  ;;  %v7415_v10 = vld [vmem:[%s15615_s9 + $0x3a8] sm:$0xff] }
 0xac1   : > { %7282 = vmatpush.msra.mxu2 %v7224_v59  ;;  %v7253_v59 = vld [vmem:[%s15615_s9 + $0x2a0] sm:$0xff] }
 0xac3   : > { %7283 = vmatpush.msra.mxu2 %v7223_v27  ;;  %v7414_v27 = vld [vmem:[%s15615_s9 + $0x3a0] sm:$0xff] }
 0xac4   : > { %v6865_v40 = vpop.f32.mrf.mxu3 }
 0xac5   : > { %v6866_v57 = vadd.f32 %v6865_v40, %v14846_v7  ;;  %7284 = vmatpush.msra.mxu2 %v7222_v3  ;;  %v7261_v40 = vld [vmem:[%s15615_s9 + $0x2e0] sm:$0xff]  ;;  %v7252_v3 = vld [vmem:[%s15615_s9 + $0x298] sm:$0xff] }
 0xac6   : > { %7317 = vmatpush.msrb.mxu0 %v7261_v40  ;;  %v7408_v40 = vld [vmem:[%s15615_s9 + $0x370] sm:$0xff] }
 0xac7   : > { %vm6911_vm8 = vcmp.ge.f32.partialorder %v6866_v57, 0.0  ;;  %v6917_v13 = vmul.f32 0.01, %v6866_v57  ;;  %7285 = vmatpush.msra.mxu2 %v7221_v49  ;;  %v7413_v49 = vld [vmem:[%s15615_s9 + $0x398] sm:$0xff] }
 0xac9   : > { %v6923_v14 = vsel %vm6911_vm8, %v6866_v57, %v6917_v13  ;;  %7286 = vmatpush.msra.mxu2 %v7220_v24  ;;  %v7197_v57 = vld [vmem:[%s15615_s9 + $0xe0] sm:$0xff]  ;;  %v7251_v24 = vld [vmem:[%s15615_s9 + $0x290] sm:$0xff] }
 0xaca   : > { %7043 = vmatmul.f32.vlgmr.msra.gmra.mxu3 %v6923_v14  ;;  %7083 = vmatmul.f32.vlgmr.msrb.gmra.mxu1 %v6923_v14  ;;  %v7422_v13 = vld [vmem:[%s15615_s9 + $0x3e0] sm:$0xff] }
 0xacb   : > { %7334 = vmatpush.msrb.mxu1 %v7184_v33  ;;  %7294 = vmatpush.msra.mxu3 %v7248_v48  ;;  %v7237_v14 = vld [vmem:[%s15615_s9 + $0x220] sm:$0xff]  ;;  %v7236_v33 = vld [vmem:[%s15615_s9 + $0x218] sm:$0xff] }
 0xacc   : > { %7287 = vmatpush.msra.mxu2 %v7219_v44  ;;  %v7417_v48 = vld [vmem:[%s15615_s9 + $0x3b8] sm:$0xff]  ;;  %v7412_v44 = vld [vmem:[%s15615_s9 + $0x390] sm:$0xff] }
 0xacd   : > { %7335 = vmatpush.msrb.mxu1 %v7183_v23  ;;  %7295 = vmatpush.msra.mxu3 %v7247_v5  ;;  %v7235_v23 = vld [vmem:[%s15615_s9 + $0x210] sm:$0xff]  ;;  %v7216_v5 = vld [vmem:[%s15615_s9 + $0x178] sm:$0xff] }
 0xace   : > { %7288 = vmatpush.msra.mxu2 %v7218_v22  ;;  %v7250_v22 = vld [vmem:[%s15615_s9 + $0x288] sm:$0xff] }
 0xacf   : > { %7336 = vmatpush.msrb.mxu1 %v7182_v18  ;;  %7296 = vmatpush.msra.mxu3 %v7246_v12  ;;  %v7194_v18 = vld [vmem:[%s15615_s9 + $0xc8] sm:$0xff]  ;;  %v7416_v12 = vld [vmem:[%s15615_s9 + $0x3b0] sm:$0xff] }
 0xad0   : > { %7289 = vmatpush.msra.mxu2 %v7217_v36  ;;  %v7186_v36 = vld [vmem:[%s15615_s9 + $0x88] sm:$0xff] }
 0xad1   : > { %7337 = vmatpush.msrb.mxu1 %v7181_v60  ;;  %7297 = vmatpush.msra.mxu3 %v7245_v17  ;;  %v7233_v60 = vld [vmem:[%s15615_s9 + $0x200] sm:$0xff]  ;;  %v7190_v17 = vld [vmem:[%s15615_s9 + $0xa8] sm:$0xff] }
 0xad2   : > { %v6885_v61 = vpop.f32.mrf.mxu0  ;;  %v6905_v4 = vpop.f32.mrf.mxu1 }
 0xad3   : > { %v6886_v6 = vadd.f32 %v6885_v61, %v14846_v7  ;;  %v6906_v8 = vadd.f32 %v6905_v4, %v14846_v7  ;;  %v7179_v7 = vld [vmem:[%s15615_s9 + $0x50] sm:$0xff]  ;;  %7338 = vmatpush.msrb.mxu1 %v7180_v35  ;;  %7298 = vmatpush.msra.mxu3 %v7244_v50  ;;  %v7260_v61 = vld [vmem:[%s15615_s9 + $0x2d8] sm:$0xff] }
 0xad4   : > { %v7196_v4 = vld [vmem:[%s15615_s9 + $0xd8] sm:$0xff]  ;;  %7318 = vmatpush.msrb.mxu0 %v7260_v61  ;;  %v7187_v50 = vld [vmem:[%s15615_s9 + $0x90] sm:$0xff]  ;;  %v7407_v61 = vld [vmem:[%s15615_s9 + $0x368] sm:$0xff] }
 0xad5   : > { %vm6912_vm9 = vcmp.ge.f32.partialorder %v6886_v6, 0.0  ;;  %v6918_v51 = vmul.f32 0.01, %v6886_v6  ;;  %vm6913_vm11 = vcmp.ge.f32.partialorder %v6906_v8, 0.0  ;;  %v6919_v11 = vmul.f32 0.01, %v6906_v8  ;;  %7339 = vmatpush.msrb.mxu1 %v7179_v7  ;;  %7299 = vmatpush.msra.mxu3 %v7243_v1 }
 0xad6   : > { %7319 = vmatpush.msrb.mxu0 %v7259_v28  ;;  %v7192_v35 = vld [vmem:[%s15615_s9 + $0xb8] sm:$0xff]  ;;  %v7191_v7 = vld [vmem:[%s15615_s9 + $0xb0] sm:$0xff]  ;;  %v7406_v28 = vld [vmem:[%s15615_s9 + $0x360] sm:$0xff] }
 0xad7   : > { %v6924_v20 = vsel %vm6912_vm9, %v6886_v6, %v6918_v51  ;;  %v6925_v62 = vsel %vm6913_vm11, %v6906_v8, %v6919_v11  ;;  %7340 = vmatpush.msrb.mxu1 %v7178_v34  ;;  %7300 = vmatpush.msra.mxu3 %v7242_v19  ;;  %v7195_v6 = vld [vmem:[%s15615_s9 + $0xd0] sm:$0xff]  ;;  %v7419_v51 = vld [vmem:[%s15615_s9 + $0x3c8] sm:$0xff] }
 0xad8   : > { %7104 = vmatmul.f32.vlgmr.msrb.gmra.mxu2 %v6924_v20  ;;  %7124 = vmatmul.f32.vlgmr.msrb.gmra.mxu3 %v6925_v62  ;;  %v7420_v8 = vld [vmem:[%s15615_s9 + $0x3d0] sm:$0xff]  ;;  %v7234_v11 = vld [vmem:[%s15615_s9 + $0x208] sm:$0xff] }
 0xad9   : > { %7144 = vmatmul.f32.vlgmr.msra.gmra.mxu0 %v6924_v20  ;;  %7164 = vmatmul.f32.vlgmr.msra.gmra.mxu1 %v6925_v62  ;;  %v7257_v20 = vld [vmem:[%s15615_s9 + $0x2c0] sm:$0xff]  ;;  %v7254_v34 = vld [vmem:[%s15615_s9 + $0x2a8] sm:$0xff]  ;;  %v7211_v1 = vld [vmem:[%s15615_s9 + $0x150] sm:$0xff] }
 0xada   : > { %7341 = vmatpush.msrb.mxu1 %v7177_v56  ;;  %7301 = vmatpush.msra.mxu3 %v7241_v0  ;;  %v7193_v62 = vld [vmem:[%s15615_s9 + $0xc0] sm:$0xff]  ;;  %v7214_v56 = vld [vmem:[%s15615_s9 + $0x168] sm:$0xff] }
 0xadb   : > { %7354 = vmatpush.msrb.mxu2 %v7200_v26  ;;  %7320 = vmatpush.msrb.mxu0 %v7258_v31  ;;  %v7210_v26 = vld [vmem:[%s15615_s9 + $0x148] sm:$0xff]  ;;  %v7405_v31 = vld [vmem:[%s15615_s9 + $0x358] sm:$0xff] }
 0xadc   : > { %7342 = vmatpush.msrb.mxu1 %v7176_v2  ;;  %7302 = vmatpush.msra.mxu3 %v7240_v55  ;;  %v7189_v2 = vld [vmem:[%s15615_s9 + $0xa0] sm:$0xff] }
 0xadd   : > { %7355 = vmatpush.msrb.mxu2 %v7199_v9  ;;  %7321 = vmatpush.msrb.mxu0 %v7257_v20  ;;  %v7185_v55 = vld [vmem:[%s15615_s9 + $0x80] sm:$0xff]  ;;  %v7404_v20 = vld [vmem:[%s15615_s9 + $0x350] sm:$0xff] }
 0xade   : > { %7343 = vmatpush.msrb.mxu1 %v7175_v46  ;;  %7303 = vmatpush.msra.mxu3 %v7239_v43  ;;  %v7213_v46 = vld [vmem:[%s15615_s9 + $0x160] sm:$0xff]  ;;  %v7409_v43 = vld [vmem:[%s15615_s9 + $0x378] sm:$0xff] }
 0xadf   : > { %7356 = vmatpush.msrb.mxu2 %v7198_v21  ;;  %7322 = vmatpush.msrb.mxu0 %v7256_v52  ;;  %v7410_v9 = vld [vmem:[%s15615_s9 + $0x380] sm:$0xff]  ;;  %v7441_v21 = vld [vmem:[%s15615_s9 + $0x478] sm:$0xff]  ;;  %v7403_v52 = vld [vmem:[%s15615_s9 + $0x348] sm:$0xff] }
 0xae0   : > { %7344 = vmatpush.msrb.mxu1 %v7174_v16  ;;  %7304 = vmatpush.msra.mxu3 %v7238_v54  ;;  %v7188_v16 = vld [vmem:[%s15615_s9 + $0x98] sm:$0xff] }
 0xae1   : > { %7357 = vmatpush.msrb.mxu2 %v7197_v57  ;;  %7323 = vmatpush.msrb.mxu0 %v7255_v15  ;;  %v7208_v54 = vld [vmem:[%s15615_s9 + $0x138] sm:$0xff]  ;;  %v7440_v57 = vld [vmem:[%s15615_s9 + $0x470] sm:$0xff]  ;;  %v7402_v15 = vld [vmem:[%s15615_s9 + $0x340] sm:$0xff] }
 0xae2   : > { %7345 = vmatpush.msrb.mxu1 %v7173_v37  ;;  %7305 = vmatpush.msra.mxu3 %v7237_v14  ;;  %v7212_v37 = vld [vmem:[%s15615_s9 + $0x158] sm:$0xff]  ;;  %v7207_v14 = vld [vmem:[%s15615_s9 + $0x130] sm:$0xff] }
 0xae3   : > { %7358 = vmatpush.msrb.mxu2 %v7196_v4  ;;  %7324 = vmatpush.msrb.mxu0 %v7254_v34  ;;  %v7439_v4 = vld [vmem:[%s15615_s9 + $0x468] sm:$0xff]  ;;  %v7401_v34 = vld [vmem:[%s15615_s9 + $0x338] sm:$0xff] }
 0xae4   : > { %7346 = vmatpush.msrb.mxu1 %v7172_v45  ;;  %7306 = vmatpush.msra.mxu3 %v7236_v33  ;;  %v7206_v33 = vld [vmem:[%s15615_s9 + $0x128] sm:$0xff] }
 0xae5   : > { %7359 = vmatpush.msrb.mxu2 %v7195_v6  ;;  %7325 = vmatpush.msrb.mxu0 %v7253_v59  ;;  %v7438_v6 = vld [vmem:[%s15615_s9 + $0x460] sm:$0xff]  ;;  %v7432_v59 = vld [vmem:[%s15615_s9 + $0x430] sm:$0xff] }
 0xae6   : > { %7347 = vmatpush.msrb.mxu1 %v7171_v42  ;;  %7307 = vmatpush.msra.mxu3 %v7235_v23  ;;  %v6943_v42 = vpop.f32.mrf.mxu2  ;;  %v7205_v23 = vld [vmem:[%s15615_s9 + $0x120] sm:$0xff] }
 0xae7   : > { %7360 = vmatpush.msrb.mxu2 %v7194_v18  ;;  %7326 = vmatpush.msrb.mxu0 %v7252_v3  ;;  %v7437_v18 = vld [vmem:[%s15615_s9 + $0x458] sm:$0xff]  ;;  %v7546_v3 = vld [vmem:[%s15615_s9 + $0x5a8] sm:$0xff] }
 0xae8   : > { %7348 = vmatpush.msrb.mxu1 %v7170_v41  ;;  %7308 = vmatpush.msra.mxu3 %v7234_v11  ;;  %v7204_v11 = vld [vmem:[%s15615_s9 + $0x118] sm:$0xff] }
 0xae9   : > { %7361 = vmatpush.msrb.mxu2 %v7193_v62  ;;  %7327 = vmatpush.msrb.mxu0 %v7251_v24  ;;  %v7436_v62 = vld [vmem:[%s15615_s9 + $0x450] sm:$0xff]  ;;  %v7397_v24 = vld [vmem:[%s15615_s9 + $0x318] sm:$0xff] }
 0xaea   : > { %7349 = vmatpush.msrb.mxu1 %v7169_v39  ;;  %7309 = vmatpush.msra.mxu3 %v7233_v60  ;;  %v7411_v39 = vld [vmem:[%s15615_s9 + $0x388] sm:$0xff]  ;;  %v7203_v60 = vld [vmem:[%s15615_s9 + $0x110] sm:$0xff] }
 0xaeb   : > { %7362 = vmatpush.msrb.mxu2 %v7192_v35  ;;  %7328 = vmatpush.msrb.mxu0 %v7250_v22  ;;  %v7435_v35 = vld [vmem:[%s15615_s9 + $0x448] sm:$0xff] }
 0xaec   : > { %7468 = vmatpush.msra.mxu1 %v7425_v53  ;;  %7374 = vmatpush.msrb.mxu3 %v7216_v5  ;;  %v7249_v53 = vld [vmem:[%s15615_s9 + $0x280] sm:$0xff]  ;;  %v7202_v5 = vld [vmem:[%s15615_s9 + $0x108] sm:$0xff] }
 0xaed   : > { %7363 = vmatpush.msrb.mxu2 %v7191_v7  ;;  %7329 = vmatpush.msrb.mxu0 %v7249_v53  ;;  %v7434_v7 = vld [vmem:[%s15615_s9 + $0x440] sm:$0xff]  ;;  %v7395_v22 = vld [vmem:[%s15615_s9 + $0x308] sm:$0xff] }
 0xaee   : > { %7469 = vmatpush.msra.mxu1 %v7424_v47  ;;  %7375 = vmatpush.msrb.mxu3 %v7215_v63  ;;  %v7209_v47 = vld [vmem:[%s15615_s9 + $0x140] sm:$0xff] }
 0xaef   : > { %7364 = vmatpush.msrb.mxu2 %v7190_v17  ;;  %7448 = vmatpush.msra.mxu0 %v7409_v43  ;;  %v7201_v63 = vld [vmem:[%s15615_s9 + $0x100] sm:$0xff]  ;;  %v7433_v17 = vld [vmem:[%s15615_s9 + $0x438] sm:$0xff] }
 0xaf0   : > { %7470 = vmatpush.msra.mxu1 %v7423_v38  ;;  %7376 = vmatpush.msrb.mxu3 %v7214_v56  ;;  %v7556_v38 = vld [vmem:[%s15615_s9 + $0x5f8] sm:$0xff]  ;;  %v7400_v56 = vld [vmem:[%s15615_s9 + $0x330] sm:$0xff] }
 0xaf1   : > { %7365 = vmatpush.msrb.mxu2 %v7189_v2  ;;  %7449 = vmatpush.msra.mxu0 %v7408_v40  ;;  %v7547_v2 = vld [vmem:[%s15615_s9 + $0x5b0] sm:$0xff]  ;;  %v7522_v40 = vld [vmem:[%s15615_s9 + $0x4e8] sm:$0xff] }
 0xaf2   : > { %7471 = vmatpush.msra.mxu1 %v7422_v13  ;;  %7377 = vmatpush.msrb.mxu3 %v7213_v46  ;;  %v6983_v41 = vpop.f32.mrf.mxu0  ;;  %v7555_v13 = vld [vmem:[%s15615_s9 + $0x5f0] sm:$0xff]  ;;  %v7431_v46 = vld [vmem:[%s15615_s9 + $0x428] sm:$0xff] }
 0xaf3   : > { %7366 = vmatpush.msrb.mxu2 %v7188_v16  ;;  %7450 = vmatpush.msra.mxu0 %v7407_v61  ;;  %v7398_v16 = vld [vmem:[%s15615_s9 + $0x320] sm:$0xff]  ;;  %v7520_v61 = vld [vmem:[%s15615_s9 + $0x4d8] sm:$0xff] }
 0xaf4   : > { %7472 = vmatpush.msra.mxu1 %v7421_v58  ;;  %7378 = vmatpush.msrb.mxu3 %v7212_v37  ;;  %v7554_v58 = vld [vmem:[%s15615_s9 + $0x5e8] sm:$0xff]  ;;  %v7545_v37 = vld [vmem:[%s15615_s9 + $0x5a0] sm:$0xff] }
 0xaf5   : > { %7367 = vmatpush.msrb.mxu2 %v7187_v50  ;;  %7451 = vmatpush.msra.mxu0 %v7406_v28  ;;  %v7544_v50 = vld [vmem:[%s15615_s9 + $0x598] sm:$0xff] }
 0xaf6   : > { %7473 = vmatpush.msra.mxu1 %v7420_v8  ;;  %7379 = vmatpush.msrb.mxu3 %v7211_v1  ;;  %v7553_v8 = vld [vmem:[%s15615_s9 + $0x5e0] sm:$0xff]  ;;  %v7543_v1 = vld [vmem:[%s15615_s9 + $0x590] sm:$0xff] }
 0xaf7   : > { %7368 = vmatpush.msrb.mxu2 %v7186_v36  ;;  %7452 = vmatpush.msra.mxu0 %v7405_v31  ;;  %v7394_v36 = vld [vmem:[%s15615_s9 + $0x300] sm:$0xff] }
 0xaf8   : > { %7474 = vmatpush.msra.mxu1 %v7419_v51  ;;  %7380 = vmatpush.msrb.mxu3 %v7210_v26  ;;  %v7552_v51 = vld [vmem:[%s15615_s9 + $0x5d8] sm:$0xff] }
 0xaf9   : > { %7369 = vmatpush.msrb.mxu2 %v7185_v55  ;;  %7453 = vmatpush.msra.mxu0 %v7404_v20  ;;  %v7540_v20 = vld [vmem:[%s15615_s9 + $0x578] sm:$0xff] }
 0xafa   : > { %7475 = vmatpush.msra.mxu1 %v7418_v30  ;;  %7381 = vmatpush.msrb.mxu3 %v7209_v47  ;;  %v7551_v30 = vld [vmem:[%s15615_s9 + $0x5d0] sm:$0xff] }
 0xafb   : > { %7454 = vmatpush.msra.mxu0 %v7403_v52  ;;  %v7538_v52 = vld [vmem:[%s15615_s9 + $0x568] sm:$0xff] }
 0xafc   : > { %7476 = vmatpush.msra.mxu1 %v7417_v48  ;;  %7382 = vmatpush.msrb.mxu3 %v7208_v54  ;;  %v7550_v48 = vld [vmem:[%s15615_s9 + $0x5c8] sm:$0xff]  ;;  %v7523_v54 = vld [vmem:[%s15615_s9 + $0x4f0] sm:$0xff] }
 0xafd   : > { %7455 = vmatpush.msra.mxu0 %v7402_v15  ;;  %v7513_v15 = vld [vmem:[%s15615_s9 + $0x4a0] sm:$0xff] }
 0xafe   : > { %7477 = vmatpush.msra.mxu1 %v7416_v12  ;;  %7383 = vmatpush.msrb.mxu3 %v7207_v14  ;;  %v7549_v12 = vld [vmem:[%s15615_s9 + $0x5c0] sm:$0xff] }
 0xaff   : > { %7456 = vmatpush.msra.mxu0 %v7401_v34  ;;  %v7511_v34 = vld [vmem:[%s15615_s9 + $0x490] sm:$0xff] }
 0xb00   : > { %7478 = vmatpush.msra.mxu1 %v7415_v10  ;;  %7384 = vmatpush.msrb.mxu3 %v7206_v33  ;;  %v7548_v10 = vld [vmem:[%s15615_s9 + $0x5b8] sm:$0xff] }
 0xb01   : > { %7457 = vmatpush.msra.mxu0 %v7400_v56  ;;  %v7533_v56 = vld [vmem:[%s15615_s9 + $0x540] sm:$0xff] }
 0xb02   : > { %7479 = vmatpush.msra.mxu1 %v7414_v27  ;;  %7385 = vmatpush.msrb.mxu3 %v7205_v23  ;;  %v7399_v27 = vld [vmem:[%s15615_s9 + $0x328] sm:$0xff] }
 0xb03   : > { %7458 = vmatpush.msra.mxu0 %v7399_v27  ;;  %v7518_v23 = vld [vmem:[%s15615_s9 + $0x4c8] sm:$0xff] }
 0xb04   : > { %7480 = vmatpush.msra.mxu1 %v7413_v49  ;;  %7386 = vmatpush.msrb.mxu3 %v7204_v11  ;;  %v7430_v49 = vld [vmem:[%s15615_s9 + $0x420] sm:$0xff] }
 0xb05   : > { %7459 = vmatpush.msra.mxu0 %v7398_v16  ;;  %v7517_v11 = vld [vmem:[%s15615_s9 + $0x4c0] sm:$0xff] }
 0xb06   : > { %7481 = vmatpush.msra.mxu1 %v7412_v44  ;;  %7387 = vmatpush.msrb.mxu3 %v7203_v60  ;;  %v7396_v44 = vld [vmem:[%s15615_s9 + $0x310] sm:$0xff]  ;;  %v7529_v16 = vld [vmem:[%s15615_s9 + $0x520] sm:$0xff] }
 0xb07   : > { %7460 = vmatpush.msra.mxu0 %v7397_v24  ;;  %v7515_v60 = vld [vmem:[%s15615_s9 + $0x4b0] sm:$0xff]  ;;  %v7525_v24 = vld [vmem:[%s15615_s9 + $0x500] sm:$0xff] }
 0xb08   : > { %7482 = vmatpush.msra.mxu1 %v7411_v39  ;;  %7388 = vmatpush.msrb.mxu3 %v7202_v5  ;;  %v7426_v39 = vld [vmem:[%s15615_s9 + $0x400] sm:$0xff] }
 0xb09   : > { %7461 = vmatpush.msra.mxu0 %v7396_v44 }
 0xb0a   : > { %7483 = vmatpush.msra.mxu1 %v7410_v9  ;;  %7389 = vmatpush.msrb.mxu3 %v7201_v63  ;;  %v7535_v63 = vld [vmem:[%s15615_s9 + $0x550] sm:$0xff] }
 0xb0b   : > { %7462 = vmatpush.msra.mxu0 %v7395_v22 }
 0xb0d   : > { %7463 = vmatpush.msra.mxu0 %v7394_v36 }
 0xb1e   : > { %v7003_v45 = vpop.f32.mrf.mxu1 }
 0xb1f   : > { %v7004_v0 = vadd.f32 %v7003_v45, %v6983_v41  ;;  %v7429_v45 = vld [vmem:[%s15615_s9 + $0x418] sm:$0xff]  ;;  %v7427_v41 = vld [vmem:[%s15615_s9 + $0x408] sm:$0xff] }
 0xb23   : > { %v6963_v19 = vpop.f32.mrf.mxu3 }
 0xb24   : > { %v6964_v29 = vadd.f32 %v6963_v19, %v6943_v42  ;;  %v7428_v42 = vld [vmem:[%s15615_s9 + $0x410] sm:$0xff]  ;;  %v7542_v19 = vld [vmem:[%s15615_s9 + $0x588] sm:$0xff]  ;;  %v7064_v26 = vpop.f32.mrf.mxu0 }
 0xb26   : > { %v15314_v25 = vmax.f32 %v6964_v29, %v7004_v0  ;;  %v7541_v0 = vld [vmem:[%s15615_s9 + $0x580] sm:$0xff] }
 0xb28   : > { %v7268_v32 = vrot.slane %v15314_v25, 1  ;;  %7350 = vmatmul.f32.vlgmr.msrb.gmra.mxu1 %v15314_v25  ;;  %v7442_v5 = vrot.slane %v15314_v25, 2  ;;  %v7557_v27 = vrot.slane %v15314_v25, 3  ;;  %v7528_v25 = vld [vmem:[%s15615_s9 + $0x518] sm:$0xff] }
 0xb29   : > { %7603 = vmatpush.msrb.mxu1 %v7556_v38  ;;  %v7024_v53 = vpop.f32.mrf.mxu2  ;;  %v7524_v38 = vld [vmem:[%s15615_s9 + $0x4f8] sm:$0xff] }
 0xb2a   : > { %7290 = vmatmul.f32.vlgmr.msra.gmra.mxu2 %v7268_v32 }
 0xb2b   : > { %7488 = vmatpush.msra.mxu2 %v7441_v21  ;;  %7604 = vmatpush.msrb.mxu1 %v7555_v13 }
 0xb2d   : > { %7489 = vmatpush.msra.mxu2 %v7440_v57  ;;  %7605 = vmatpush.msrb.mxu1 %v7554_v58  ;;  %v7521_v57 = vld [vmem:[%s15615_s9 + $0x4e0] sm:$0xff] }
 0xb2f   : > { %7490 = vmatpush.msra.mxu2 %v7439_v4  ;;  %7606 = vmatpush.msrb.mxu1 %v7553_v8 }
 0xb31   : > { %7491 = vmatpush.msra.mxu2 %v7438_v6  ;;  %7607 = vmatpush.msrb.mxu1 %v7552_v51  ;;  %v7519_v6 = vld [vmem:[%s15615_s9 + $0x4d0] sm:$0xff] }
 0xb33   : > { %7492 = vmatpush.msra.mxu2 %v7437_v18  ;;  %7608 = vmatpush.msrb.mxu1 %v7551_v30  ;;  %v7539_v30 = vld [vmem:[%s15615_s9 + $0x570] sm:$0xff] }
 0xb35   : > { %7493 = vmatpush.msra.mxu2 %v7436_v62  ;;  %7609 = vmatpush.msrb.mxu1 %v7550_v48  ;;  %v7516_v62 = vld [vmem:[%s15615_s9 + $0x4b8] sm:$0xff]  ;;  %v7537_v48 = vld [vmem:[%s15615_s9 + $0x560] sm:$0xff] }
 0xb37   : > { %7494 = vmatpush.msra.mxu2 %v7435_v35  ;;  %7610 = vmatpush.msrb.mxu1 %v7549_v12  ;;  %v7514_v35 = vld [vmem:[%s15615_s9 + $0x4a8] sm:$0xff]  ;;  %v7512_v12 = vld [vmem:[%s15615_s9 + $0x498] sm:$0xff] }
 0xb39   : > { %7495 = vmatpush.msra.mxu2 %v7434_v7  ;;  %7611 = vmatpush.msrb.mxu1 %v7548_v10  ;;  %v7536_v7 = vld [vmem:[%s15615_s9 + $0x558] sm:$0xff]  ;;  %v7510_v10 = vld [vmem:[%s15615_s9 + $0x488] sm:$0xff] }
 0xb3b   : > { %7496 = vmatpush.msra.mxu2 %v7433_v17  ;;  %7612 = vmatpush.msrb.mxu1 %v7547_v2  ;;  %v7534_v17 = vld [vmem:[%s15615_s9 + $0x548] sm:$0xff]  ;;  %v7532_v2 = vld [vmem:[%s15615_s9 + $0x538] sm:$0xff] }
 0xb3d   : > { %7497 = vmatpush.msra.mxu2 %v7432_v59  ;;  %7613 = vmatpush.msrb.mxu1 %v7546_v3  ;;  %v7509_v59 = vld [vmem:[%s15615_s9 + $0x480] sm:$0xff]  ;;  %v7530_v3 = vld [vmem:[%s15615_s9 + $0x528] sm:$0xff] }
 0xb3f   : > { %7498 = vmatpush.msra.mxu2 %v7431_v46  ;;  %7614 = vmatpush.msrb.mxu1 %v7545_v37  ;;  %v7531_v46 = vld [vmem:[%s15615_s9 + $0x530] sm:$0xff]  ;;  %v7526_v37 = vld [vmem:[%s15615_s9 + $0x508] sm:$0xff] }
 0xb41   : > { %7499 = vmatpush.msra.mxu2 %v7430_v49  ;;  %7615 = vmatpush.msrb.mxu1 %v7544_v50  ;;  %v7527_v49 = vld [vmem:[%s15615_s9 + $0x510] sm:$0xff] }
 0xb43   : > { %7500 = vmatpush.msra.mxu2 %v7429_v45  ;;  %7616 = vmatpush.msrb.mxu1 %v7543_v1 }
 0xb45   : > { %7501 = vmatpush.msra.mxu2 %v7428_v42  ;;  %7617 = vmatpush.msrb.mxu1 %v7542_v19 }
 0xb47   : > { %7502 = vmatpush.msra.mxu2 %v7427_v41  ;;  %7618 = vmatpush.msrb.mxu1 %v7541_v0  ;;  %v7084_v29 = vpop.f32.mrf.mxu1 }
 0xb48   : > { %v7085_v9 = vadd.f32 %v7084_v29, %v7064_v26 }
 0xb49   : > { %7503 = vmatpush.msra.mxu2 %v7426_v39 }
 0xb4d   : > { %v7044_v55 = vpop.f32.mrf.mxu3 }
 0xb4e   : > { %v7045_v47 = vadd.f32 %v7044_v55, %v7024_v53 }
 0xb50   : > { %v15492_v43 = vmax.f32 %v7045_v47, %v7085_v9 }
 0xb52   : > { %v7269_v32 = vrot.slane %v15492_v43, 1  ;;  %v7443_v21 = vrot.slane %v15492_v43, 2  ;;  %7370 = vmatmul.f32.vlgmr.msrb.gmra.mxu2 %v15492_v43  ;;  %v7558_v45 = vrot.slane %v15492_v43, 3 }
 0xb54   : > { %7310 = vmatmul.f32.vlgmr.msra.gmra.mxu3 %v7269_v32  ;;  %7484 = vmatmul.f32.vlgmr.msra.gmra.mxu1 %v7443_v21 }
 0xb55   : > { %7563 = vmatpush.msra.mxu3 %v7524_v38 }
 0xb56   : > { %v7145_v13 = vpop.f32.mrf.mxu0  ;;  %v7165_v14 = vpop.f32.mrf.mxu1 }
 0xb57   : > { %7564 = vmatpush.msra.mxu3 %v7523_v54  ;;  %v7166_v33 = vadd.f32 %v7165_v14, %v7145_v13 }
 0xb59   : > { %7565 = vmatpush.msra.mxu3 %v7522_v40 }
 0xb5b   : > { %7566 = vmatpush.msra.mxu3 %v7521_v57  ;;  %v7105_v4 = vpop.f32.mrf.mxu2  ;;  %v7125_v58 = vpop.f32.mrf.mxu3  ;;  %v7624_v57 = vld [vmem:[%s15616_s10] sm:$0x1] }
 0xb5c   : > { %v7126_v28 = vadd.f32 %v7125_v58, %v7105_v4 }
 0xb5d   : > { %7567 = vmatpush.msra.mxu3 %v7520_v61 }
 0xb5e   : > { %v7168_v8 = vmax.f32 %v7126_v28, %v7166_v33 }
 0xb5f   : > { %7568 = vmatpush.msra.mxu3 %v7519_v6 }
 0xb60   : > { %v7270_v31 = vrot.slane %v7168_v8, 1  ;;  %v7444_v18 = vrot.slane %v7168_v8, 2  ;;  %v7559_v51 = vrot.slane %v7168_v8, 3  ;;  %7390 = vmatmul.f32.vlgmr.msrb.gmra.mxu3 %v7168_v8 }
 0xb61   : > { %7569 = vmatpush.msra.mxu3 %v7518_v23 }
 0xb62   : > { %7330 = vmatmul.f32.vlgmr.msrb.gmra.mxu0 %v7270_v31  ;;  %7504 = vmatmul.f32.vlgmr.msra.gmra.mxu2 %v7444_v18 }
 0xb63   : > { %7570 = vmatpush.msra.mxu3 %v7517_v11  ;;  %7583 = vmatpush.msrb.mxu0 %v7540_v20 }
 0xb64   : > { %7619 = vmatmul.f32.vlgmr.msrb.gmra.mxu1 %v7559_v51 }
 0xb65   : > { %7571 = vmatpush.msra.mxu3 %v7516_v62  ;;  %7584 = vmatpush.msrb.mxu0 %v7539_v30 }
 0xb67   : > { %7572 = vmatpush.msra.mxu3 %v7515_v60  ;;  %7585 = vmatpush.msrb.mxu0 %v7538_v52 }
 0xb69   : > { %7573 = vmatpush.msra.mxu3 %v7514_v35  ;;  %7586 = vmatpush.msrb.mxu0 %v7537_v48 }
 0xb6a   : > { %7464 = vmatmul.f32.vlgmr.msra.gmra.mxu0 %v7442_v5 }
 0xb6b   : > { %7574 = vmatpush.msra.mxu3 %v7513_v15  ;;  %7587 = vmatpush.msrb.mxu0 %v7536_v7 }
 0xb6d   : > { %7575 = vmatpush.msra.mxu3 %v7512_v12  ;;  %7588 = vmatpush.msrb.mxu0 %v7535_v63 }
 0xb6f   : > { %7576 = vmatpush.msra.mxu3 %v7511_v34  ;;  %7589 = vmatpush.msrb.mxu0 %v7534_v17 }
 0xb71   : > { %7577 = vmatpush.msra.mxu3 %v7510_v10  ;;  %7590 = vmatpush.msrb.mxu0 %v7533_v56 }
 0xb73   : > { %7578 = vmatpush.msra.mxu3 %v7509_v59  ;;  %7591 = vmatpush.msrb.mxu0 %v7532_v2 }
 0xb74   : > { %7579 = vmatmul.f32.vlgmr.msra.gmra.mxu3 %v7557_v27 }
 0xb75   : > { %7592 = vmatpush.msrb.mxu0 %v7531_v46 }
 0xb77   : > { %7593 = vmatpush.msrb.mxu0 %v7530_v3 }
 0xb79   : > { %7594 = vmatpush.msrb.mxu0 %v7529_v16 }
 0xb7b   : > { %7595 = vmatpush.msrb.mxu0 %v7528_v25 }
 0xb7d   : > { %7596 = vmatpush.msrb.mxu0 %v7527_v49 }
 0xb7f   : > { %7597 = vmatpush.msrb.mxu0 %v7526_v37 }
 0xb81   : > { %7598 = vmatpush.msrb.mxu0 %v7525_v24 }
 0xb82   : > { %7599 = vmatmul.f32.vlgmr.msrb.gmra.mxu0 %v7558_v45 }
 0xba5   : > { %v7351_v1 = vpop.f32.mrf.mxu1 }
 0xbad   : > { %v7291_v50 = vpop.f32.mrf.mxu2 }
 0xbd1   : > { %v7485_v29 = vpop.f32.mrf.mxu1 }
 0xbd5   : > { %v7371_v19 = vpop.f32.mrf.mxu2 }
 0xbd7   : > { %v7311_v42 = vpop.f32.mrf.mxu3 }
 0xbd8   : > { %v7312_v22 = vadd.f32 %v7311_v42, %v7291_v50 }
 0xbdf   : > { %v7331_v44 = vpop.f32.mrf.mxu0 }
 0xbe0   : > { %v7332_v41 = vadd.f32 %v7331_v44, %v7312_v22 }
 0xbe1   : > { %v7620_v38 = vpop.f32.mrf.mxu1 }
 0xbe2   : > { %v7352_v0 = vadd.f32 %v7351_v1, %v7332_v41 }
 0xbe3   : > { %v7391_v36 = vpop.f32.mrf.mxu3 }
 0xbe4   : > { %v7372_v53 = vadd.f32 %v7371_v19, %v7352_v0 }
 0xbe5   : > { %v7505_v55 = vpop.f32.mrf.mxu2 }
 0xbe6   : > { %v7392_v32 = vadd.f32 %v7391_v36, %v7372_v53 }
 0xbe7   : > { %v7465_v39 = vpop.f32.mrf.mxu0 }
 0xbe8   : > { %v7486_v26 = vadd.f32 %v7485_v29, %v7465_v39 }
 0xbea   : > { %v7506_v9 = vadd.f32 %v7505_v55, %v7486_v26 }
 0xbec   : > { %v7508_v54 = vadd.f32 %v7506_v9, %v7392_v32 }
 0xbf7   : > { %v7580_v47 = vpop.f32.mrf.mxu3 }
 0xbff   : > { %v7600_v43 = vpop.f32.mrf.mxu0 }
 0xc00   : > { %v7601_v21 = vadd.f32 %v7600_v43, %v7580_v47 }
 0xc02   : > { %v7621_v40 = vadd.f32 %v7620_v38, %v7601_v21 }
 0xc04   : > { %v7623_v13 = vadd.f32 %v7621_v40, %v7508_v54 }
 0xc06   : > { %v7625_v14 = vadd.f32 %v7624_v57, %v7623_v13 }
 0xc08   : > { %7627 = vst.msk [vmem:[%s379_s27] sm:$0x1] %vm7626_vm12, %v7625_v14 }
 0xc09 PF: > { %s21_s17 = sadd.s32 1, %s9000_s17  }
 0xc0a   : > { %p18_p4 = scmp.ge.s32.totalorder %s21_s17, 4  }
 0xc0c   :  { %20 = sbr.rel (!%p18_p4) target bundleno = 1 (0x1), region = 94 }

</bundles_post_ra>
